<compile_context>
chip_gen: v7x
topology: tpu7x:2x2x1
jax: 0.10.0
libtpu: 0.0.40
codegen_flags: <defaults>
</compile_context>

<pallas_src>
import functools

import jax
import jax.numpy as jnp
from jax.experimental import pallas as pl
from jax.experimental.pallas import tpu as pltpu


# ----------------------------------------------------------------------------
# helpers
# ----------------------------------------------------------------------------
def _round_up(n, m):
    return ((n + m - 1) // m) * m


def _pick_time_block(T, cap=16):
    """Time steps per grid block.  If T <= cap use a single block; otherwise
    pick tt in [8..cap] minimizing zero padding of the time axis, so prime /
    awkward T never degrades to tt=1 (per-grid-step overhead amortized)."""
    if T <= cap:
        return T
    best_tt, best_tp = cap, _round_up(T, cap)
    for c in range(8, cap + 1):
        tp = _round_up(T, c)
        if tp < best_tp or (tp == best_tp and c > best_tt):
            best_tt, best_tp = c, tp
    return best_tt


def _pad_gate_cols(w, H, Hp):
    """(..., 4H) -> (..., 4Hp): zero-pad each [i|f|g|o] gate block from H to Hp."""
    if Hp == H:
        return w
    pad = [(0, 0)] * (w.ndim - 1) + [(0, Hp - H)]
    parts = [jnp.pad(w[..., k * H:(k + 1) * H], pad) for k in range(4)]
    return jnp.concatenate(parts, axis=-1)


def _expand_bidir_rows(w, H, Hp):
    """(2H, G) -> (2Hp, G): rows [0:H]->[0:H], rows [H:2H]->[Hp:Hp+H], rest 0.

    Layers > 0 consume the padded (Tp, Bp, 2*Hp) activation of the previous
    bidirectional layer (fwd half in cols [0:Hp], bwd half in [Hp:2Hp])."""
    G = w.shape[1]
    out = jnp.zeros((2 * Hp, G), w.dtype)
    out = out.at[0:H].set(w[0:H])
    out = out.at[Hp:Hp + H].set(w[H:2 * H])
    return out


# ----------------------------------------------------------------------------
# Pallas kernel: ONE bidirectional LSTM layer, both directions interleaved.
# Grid = (time-block,), sequential carry in VMEM scratch.
# Per block: one bf16 MXU matmul per direction produces all pre-gates of the
# block (off the serial chain); the unrolled recurrence then only does the
# (Bp, Hp) @ (Hp, 4Hp) h @ W_hh matmuls + gate math on two independent chains.
# ----------------------------------------------------------------------------
def _bilstm_kernel(xf_ref, xb_ref, wih_ref, whh_ref, b_ref,
                   outf_ref, outb_ref, hN_ref, cN_ref,
                   pre_sc, h_sc, c_sc,
                   *, tt, hp, dp, bp, t_real, t_pad):
    tb = pl.program_id(0)
    nb = pl.num_programs(0)

    @pl.when(tb == 0)
    def _init():
        h_sc[...] = jnp.zeros_like(h_sc)
        c_sc[...] = jnp.zeros_like(c_sc)
        hN_ref[...] = jnp.zeros_like(hN_ref)
        cN_ref[...] = jnp.zeros_like(cN_ref)

    # ---- block-level input projection (fused; off the serial critical path) --
    wih_f = wih_ref[0]                    # (Dp, 4Hp) bf16, VMEM-resident
    wih_b = wih_ref[1]
    bias_f = b_ref[0]                     # (1, 4Hp) f32
    bias_b = b_ref[1]
    xf = xf_ref[...].reshape(tt * bp, dp)     # (tt*Bp, Dp) bf16
    xb = xb_ref[...].reshape(tt * bp, dp)
    pre_sc[0] = jnp.dot(xf, wih_f, preferred_element_type=jnp.float32) + bias_f
    pre_sc[1] = jnp.dot(xb, wih_b, preferred_element_type=jnp.float32) + bias_b

    w_hh_f = whh_ref[0]                   # (Hp, 4Hp) bf16
    w_hh_b = whh_ref[1]

    # carries (persist across time blocks via VMEM scratch); kept in f32
    hf = h_sc[0]
    cf = c_sc[0]
    hb = h_sc[1]
    cb = c_sc[1]

    def gate_step(pre, h, c, w_hh):
        gates = pre + jnp.dot(h.astype(jnp.bfloat16), w_hh,
                              preferred_element_type=jnp.float32)
        i = jax.nn.sigmoid(gates[:, 0 * hp:1 * hp])
        f = jax.nn.sigmoid(gates[:, 1 * hp:2 * hp])
        g = jnp.tanh(gates[:, 2 * hp:3 * hp])
        o = jax.nn.sigmoid(gates[:, 3 * hp:4 * hp])
        c = f * c + i * g
        h = o * jnp.tanh(c)
        return h, c

    # Fully unrolled: static VMEM offsets for all pre/out accesses; the two
    # direction chains are independent so the scheduler interleaves them.
    for s in range(tt):
        # Backward chain must start from zero state at its first REAL step
        # (real time t_real-1 == global step t_pad - t_real); padded trailing
        # time steps processed before it are discarded by this reset.
        if t_pad > t_real and s == (t_pad - t_real) % tt:
            keep = tb != (t_pad - t_real) // tt
            hb = jnp.where(keep, hb, jnp.zeros_like(hb))
            cb = jnp.where(keep, cb, jnp.zeros_like(cb))

        hf, cf = gate_step(pre_sc[0, s * bp:(s + 1) * bp, :], hf, cf, w_hh_f)
        hb, cb = gate_step(pre_sc[1, (tt - 1 - s) * bp:(tt - s) * bp, :],
                           hb, cb, w_hh_b)

        outf_ref[s] = hf.astype(outf_ref.dtype)
        outb_ref[tt - 1 - s] = hb.astype(outb_ref.dtype)

        # forward final state: captured at the true last REAL step (T-1)
        if s == (t_real - 1) % tt:
            @pl.when(tb == (t_real - 1) // tt)
            def _capture_fwd():
                hN_ref[0] = hf
                cN_ref[0] = cf
        # backward final state: after it processes real time 0 (last grid step)
        if s == tt - 1:
            @pl.when(tb == nb - 1)
            def _capture_bwd():
                hN_ref[1] = hb
                cN_ref[1] = cb

    h_sc[0] = hf
    h_sc[1] = hb
    c_sc[0] = cf
    c_sc[1] = cb


def _bilstm_pallas(act, w_ih, w_hh, b, *, tt, t_real, out_dtype):
    """act: (Tp, Bp, Dp) bf16 (time-major, padded).
       w_ih: (2, Dp, 4Hp) bf16, w_hh: (2, Hp, 4Hp) bf16, b: (2, 1, 4Hp) f32.

    Returns out_f:(Tp,Bp,Hp), out_b:(Tp,Bp,Hp) (both in natural time order),
            h_n:(2,Bp,Hp) f32, c_n:(2,Bp,Hp) f32.
    """
    Tp, Bp, Dp = act.shape
    G4 = w_ih.shape[-1]
    Hp = G4 // 4
    nb = Tp // tt
    assert nb * tt == Tp

    kernel = functools.partial(_bilstm_kernel, tt=tt, hp=Hp, dp=Dp, bp=Bp,
                               t_real=t_real, t_pad=Tp)

    out_isz = jnp.dtype(out_dtype).itemsize
    # VMEM accounting (double-buffered blocks + weights + scratch) with headroom.
    est = (2 * 2 * tt * Bp * Dp * 2       # x fwd/bwd blocks, bf16, x2 buffers
           + 2 * 2 * Dp * G4 * 2          # W_ih (both dirs), bf16
           + 2 * 2 * Hp * G4 * 2          # W_hh (both dirs), bf16
           + 2 * 2 * G4 * 4               # bias
           + 2 * 2 * tt * Bp * Hp * out_isz   # out_f/out_b blocks x2 buffers
           + 2 * 2 * 2 * Bp * Hp * 4      # hN/cN blocks
           + 2 * tt * Bp * G4 * 4         # pre-gate scratch (both dirs), f32
           + 2 * 2 * Bp * Hp * 4)         # h/c carries
    vmem_limit = int(min(56 * 1024 * 1024, max(32 * 1024 * 1024, 2 * est)))

    grid_spec = pltpu.PrefetchScalarGridSpec(
        num_scalar_prefetch=0,
        grid=(nb,),
        in_specs=[
            # same activation array passed twice: forward-order and reversed
            # time blocks (no materialized reversed copy)
            pl.BlockSpec((tt, Bp, Dp), lambda tb: (tb, 0, 0)),
            pl.BlockSpec((tt, Bp, Dp), lambda tb: (nb - 1 - tb, 0, 0)),
            pl.BlockSpec((2, Dp, G4), lambda tb: (0, 0, 0)),   # W_ih resident
            pl.BlockSpec((2, Hp, G4), lambda tb: (0, 0, 0)),   # W_hh resident
            pl.BlockSpec((2, 1, G4), lambda tb: (0, 0, 0)),    # bias resident
        ],
        out_specs=[
            pl.BlockSpec((tt, Bp, Hp), lambda tb: (tb, 0, 0)),          # fwd out
            pl.BlockSpec((tt, Bp, Hp), lambda tb: (nb - 1 - tb, 0, 0)),  # bwd out
            pl.BlockSpec((2, Bp, Hp), lambda tb: (0, 0, 0)),            # final h
            pl.BlockSpec((2, Bp, Hp), lambda tb: (0, 0, 0)),            # final c
        ],
        scratch_shapes=[
            pltpu.VMEM((2, tt * Bp, G4), jnp.float32),   # block pre-gates
            pltpu.VMEM((2, Bp, Hp), jnp.float32),        # h carries (fwd, bwd)
            pltpu.VMEM((2, Bp, Hp), jnp.float32),        # c carries (fwd, bwd)
        ],
    )
    out_shape = (
        jax.ShapeDtypeStruct((Tp, Bp, Hp), out_dtype),
        jax.ShapeDtypeStruct((Tp, Bp, Hp), out_dtype),
        jax.ShapeDtypeStruct((2, Bp, Hp), jnp.float32),
        jax.ShapeDtypeStruct((2, Bp, Hp), jnp.float32),
    )
    return pl.pallas_call(
        kernel,
        out_shape=out_shape,
        grid_spec=grid_spec,
        compiler_params=pltpu.CompilerParams(
            dimension_semantics=("arbitrary",),       # serial time carry
            vmem_limit_bytes=vmem_limit),
    )(act, act, w_ih, w_hh, b)


# ----------------------------------------------------------------------------
# Parameter construction (mirrors nn.Embedding / nn.LSTM) + kernel-layout prep
# ----------------------------------------------------------------------------
def init_encoder_params(key, cat_feat, cat_mapping, embed_dim_mapping,
                        input_dim, hidden_dim, n_layers):
    params = {"emb": {}, "lstm": []}
    keys = jax.random.split(key, 1 + n_layers * 2)

    ek = jax.random.split(keys[0], len(cat_feat))
    for i, f in enumerate(cat_feat):
        vocab = len(cat_mapping[f])
        dim = embed_dim_mapping[f]
        params["emb"][f] = jax.random.normal(ek[i], (vocab, dim), jnp.float32)

    lstm_in = input_dim + sum(embed_dim_mapping.values()) - len(cat_mapping)
    H = hidden_dim
    bound = 1.0 / jnp.sqrt(jnp.float32(H))

    def make_dir(k, d_in):
        k1, k2, k3, k4 = jax.random.split(k, 4)
        w_ih = jax.random.uniform(k1, (d_in, 4 * H), jnp.float32, -bound, bound)
        w_hh = jax.random.uniform(k2, (H, 4 * H), jnp.float32, -bound, bound)
        b_ih = jax.random.uniform(k3, (4 * H,), jnp.float32, -bound, bound)
        b_hh = jax.random.uniform(k4, (4 * H,), jnp.float32, -bound, bound)
        return (w_ih, w_hh, (b_ih + b_hh).reshape(1, 4 * H))

    d_in = lstm_in
    for l in range(n_layers):
        fwd = make_dir(keys[1 + 2 * l], d_in)
        bwd = make_dir(keys[2 + 2 * l], d_in)
        params["lstm"].append({"fwd": fwd, "bwd": bwd})
        d_in = 2 * H
    return params


def prepare_params(raw, hidden_dim):
    """Pad to lane-aligned gates / padded hidden / padded input rows, cast bf16."""
    H = hidden_dim
    Hp = _round_up(H, 128)
    layers = []
    for li, layer in enumerate(raw["lstm"]):
        wih_d, whh_d, b_d = [], [], []
        for name in ("fwd", "bwd"):
            w_ih, w_hh, b = layer[name]
            w_ih = _pad_gate_cols(w_ih, H, Hp)                    # (D_in, 4Hp)
            if li == 0:
                Dp = _round_up(w_ih.shape[0], 128)
                w_ih = jnp.pad(w_ih, ((0, Dp - w_ih.shape[0]), (0, 0)))
            else:
                w_ih = _expand_bidir_rows(w_ih, H, Hp)            # (2Hp, 4Hp)
            w_hh = jnp.pad(_pad_gate_cols(w_hh, H, Hp), ((0, Hp - H), (0, 0)))
            b = _pad_gate_cols(b, H, Hp)                          # (1, 4Hp)
            wih_d.append(w_ih.astype(jnp.bfloat16))
            whh_d.append(w_hh.astype(jnp.bfloat16))
            b_d.append(b)
        layers.append({
            "w_ih": jnp.stack(wih_d, 0),    # (2, Dp, 4Hp)  bf16
            "w_hh": jnp.stack(whh_d, 0),    # (2, Hp, 4Hp)  bf16
            "b": jnp.stack(b_d, 0),         # (2, 1, 4Hp)   f32
        })
    return {"emb": raw["emb"], "layers": layers}


# ----------------------------------------------------------------------------
# Encoder forward (eval-mode semantics of the PyTorch module)
# ----------------------------------------------------------------------------
def encoder_forward(prepared, x, cat_x, *, cat_feat, H):
    # Embedding lookups + concatenation (glue; plain XLA gather).
    x_embed = [jnp.take(prepared["emb"][f], cat_x[:, :, i], axis=0)
               for i, f in enumerate(cat_feat)]
    x = jnp.concatenate([x] + x_embed, axis=2)              # (B, T, D)
    B, T, D = x.shape
    Bp = _round_up(B, 16)                                   # bf16 MXU tile rows
    tt = _pick_time_block(T)
    Tp = _round_up(T, tt)
    Dp0 = _round_up(D, 128)
    Hp = _round_up(H, 128)

    # one transpose in; activations stay time-major + padded + bf16 across layers
    act = jnp.transpose(x, (1, 0, 2))
    act = jnp.pad(act, ((0, Tp - T), (0, Bp - B), (0, Dp0 - D))).astype(jnp.bfloat16)

    h_list, c_list = [], []
    n = len(prepared["layers"])
    out_f = out_b = None
    for li, lp in enumerate(prepared["layers"]):
        # TODO(synk): nn.LSTM inter-layer dropout (p=drop_prob) is train-only; eval-mode here.
        out_dtype = jnp.float32 if li == n - 1 else jnp.bfloat16
        out_f, out_b, h_n, c_n = _bilstm_pallas(
            act, lp["w_ih"], lp["w_hh"], lp["b"],
            tt=tt, t_real=T, out_dtype=out_dtype)
        h_list += [h_n[0, :B, :H], h_n[1, :B, :H]]
        c_list += [c_n[0, :B, :H], c_n[1, :B, :H]]
        if li < n - 1:
            act = jnp.concatenate([out_f, out_b], axis=-1)  # (Tp, Bp, 2Hp) bf16
        del Hp  # unused beyond here within loop scope clarity
        Hp = _round_up(H, 128)

    rnn_out = jnp.concatenate([out_f[:T, :B, :H], out_b[:T, :B, :H]], axis=-1)
    rnn_out = jnp.transpose(rnn_out, (1, 0, 2)).astype(jnp.float32)   # (B, T, 2H)
    return rnn_out, (jnp.stack(h_list, 0), jnp.stack(c_list, 0))


# ----------------------------------------------------------------------------
# Pure-JAX reference (f32, unpadded) for a correctness sanity check
# ----------------------------------------------------------------------------
def _lstm_ref(x_tbd, w_ih, w_hh, b):
    H = w_hh.shape[0]
    B = x_tbd.shape[1]

    def step(carry, x_t):
        h, c = carry
        gates = x_t @ w_ih + h @ w_hh + b
        i = jax.nn.sigmoid(gates[:, 0 * H:1 * H])
        f = jax.nn.sigmoid(gates[:, 1 * H:2 * H])
        g = jnp.tanh(gates[:, 2 * H:3 * H])
        o = jax.nn.sigmoid(gates[:, 3 * H:4 * H])
        c = f * c + i * g
        h = o * jnp.tanh(c)
        return (h, c), h

    init = (jnp.zeros((B, H), jnp.float32), jnp.zeros((B, H), jnp.float32))
    (h, c), out = jax.lax.scan(step, init, x_tbd)
    return out, h, c


def encoder_forward_ref(raw, x, cat_x, cat_feat):
    x_embed = [jnp.take(raw["emb"][f], cat_x[:, :, i], axis=0)
               for i, f in enumerate(cat_feat)]
    x = jnp.concatenate([x] + x_embed, axis=2)
    out = jnp.transpose(x, (1, 0, 2))
    h_list, c_list = [], []
    for layer in raw["lstm"]:
        of, hf, cf = _lstm_ref(out, *layer["fwd"])
        ob, hb, cb = _lstm_ref(out[::-1], *layer["bwd"])
        ob = ob[::-1]
        out = jnp.concatenate([of, ob], axis=-1)
        h_list += [hf, hb]
        c_list += [cf, cb]
    return jnp.transpose(out, (1, 0, 2)), (jnp.stack(h_list, 0), jnp.stack(c_list, 0))


if __name__ == "__main__":
    # Small, module-consistent shapes.
    B, T = 2, 8
    cat_feat = ["f1", "f2"]
    cat_mapping = {"f1": list(range(5)), "f2": list(range(7))}
    embed_dim_mapping = {"f1": 3, "f2": 4}
    input_dim = 12          # continuous dim = 12 - 2 = 10
    hidden_dim = 16
    n_layers = 2

    cont_dim = input_dim - len(cat_mapping)

    key = jax.random.PRNGKey(0)
    kp, kx, kc = jax.random.split(key, 3)

    raw_params = init_encoder_params(kp, cat_feat, cat_mapping, embed_dim_mapping,
                                     input_dim, hidden_dim, n_layers)
    prepared = prepare_params(raw_params, hidden_dim)

    x = jax.random.normal(kx, (B, T, cont_dim), jnp.float32)
    cat_x = jnp.stack(
        [jax.random.randint(jax.random.fold_in(kc, i), (B, T), 0,
                            len(cat_mapping[f]))
         for i, f in enumerate(cat_feat)], axis=2).astype(jnp.int32)

    fwd = jax.jit(functools.partial(encoder_forward, cat_feat=tuple(cat_feat),
                                    H=hidden_dim))
    rnn_out, (h_n, c_n) = fwd(prepared, x, cat_x)
    jax.block_until_ready((rnn_out, h_n, c_n))

    assert rnn_out.shape == (B, T, 2 * hidden_dim)
    assert h_n.shape == (n_layers * 2, B, hidden_dim)
    assert c_n.shape == (n_layers * 2, B, hidden_dim)

    # Numerical sanity check vs. f32 reference (bf16 matmuls -> loose atol).
    ref_out, (ref_h, ref_c) = encoder_forward_ref(raw_params, x, cat_x, cat_feat)
    assert jnp.allclose(rnn_out, ref_out, atol=1e-1)
    assert jnp.allclose(h_n, ref_h, atol=1e-1)
    assert jnp.allclose(c_n, ref_c, atol=1e-1)

    print("KERNEL_OK")
</pallas_src>

<mosaic_0001>
module attributes {stable_mosaic.version = 11 : i64} {
  func.func @_bilstm_kernel(%arg0: i32, %arg1: memref<8x16x128xbf16, #tpu.memory_space<vmem>>, %arg2: memref<8x16x128xbf16, #tpu.memory_space<vmem>>, %arg3: memref<2x128x512xbf16, #tpu.memory_space<vmem>>, %arg4: memref<2x128x512xbf16, #tpu.memory_space<vmem>>, %arg5: memref<2x1x512xf32, #tpu.memory_space<vmem>>, %arg6: memref<8x16x128xbf16, #tpu.memory_space<vmem>>, %arg7: memref<8x16x128xbf16, #tpu.memory_space<vmem>>, %arg8: memref<2x16x128xf32, #tpu.memory_space<vmem>>, %arg9: memref<2x16x128xf32, #tpu.memory_space<vmem>>, %arg10: memref<2x128x512xf32, #tpu.memory_space<vmem>>, %arg11: memref<2x16x128xf32, #tpu.memory_space<vmem>>, %arg12: memref<2x16x128xf32, #tpu.memory_space<vmem>>) attributes {dimension_semantics = [#tpu.dimension_semantics<arbitrary>], iteration_bounds = array<i64: 1>, scalar_prefetch = 0 : i64, scratch_operands = 3 : i64, tpu.core_type = #tpu.core_type<tc>, window_params = [{transform_indices = @transform_0, window_bounds = array<i64: 8, 16, 128>}, {transform_indices = @transform_1, window_bounds = array<i64: 8, 16, 128>}, {pipeline_mode = #tpu.pipeline_mode<synchronous>, transform_indices = @transform_2, window_bounds = array<i64: 2, 128, 512>}, {pipeline_mode = #tpu.pipeline_mode<synchronous>, transform_indices = @transform_3, window_bounds = array<i64: 2, 128, 512>}, {pipeline_mode = #tpu.pipeline_mode<synchronous>, transform_indices = @transform_4, window_bounds = array<i64: 2, 1, 512>}, {transform_indices = @transform_5, window_bounds = array<i64: 8, 16, 128>}, {transform_indices = @transform_6, window_bounds = array<i64: 8, 16, 128>}, {pipeline_mode = #tpu.pipeline_mode<synchronous>, transform_indices = @transform_7, window_bounds = array<i64: 2, 16, 128>}, {pipeline_mode = #tpu.pipeline_mode<synchronous>, transform_indices = @transform_8, window_bounds = array<i64: 2, 16, 128>}]} {
    %c0_i32 = arith.constant 0 : i32
    %0 = arith.cmpi eq, %arg0, %c0_i32 : i32
    %1 = arith.extui %0 : i1 to i32
    %c0_i32_0 = arith.constant 0 : i32
    %2 = arith.cmpi ne, %1, %c0_i32_0 : i32
    scf.if %2 {
      %cst_205 = arith.constant 0.000000e+00 : f32
      %601 = vector.broadcast %cst_205 : f32 to vector<2x16x128xf32>
      %c0_206 = arith.constant 0 : index
      %c0_207 = arith.constant 0 : index
      %c0_208 = arith.constant 0 : index
      %602 = vector.load %arg11[%c0_206, %c0_207, %c0_208] : memref<2x16x128xf32, #tpu.memory_space<vmem>>, vector<2x16x128xf32>
      tpu.vector_store %arg11[%c0_206, %c0_207, %c0_208], %601 {strides = array<i32>} : memref<2x16x128xf32, #tpu.memory_space<vmem>>, vector<2x16x128xf32>,
      %cst_209 = arith.constant 0.000000e+00 : f32
      %603 = vector.broadcast %cst_209 : f32 to vector<2x16x128xf32>
      %c0_210 = arith.constant 0 : index
      %c0_211 = arith.constant 0 : index
      %c0_212 = arith.constant 0 : index
      %604 = vector.load %arg12[%c0_210, %c0_211, %c0_212] : memref<2x16x128xf32, #tpu.memory_space<vmem>>, vector<2x16x128xf32>
      tpu.vector_store %arg12[%c0_210, %c0_211, %c0_212], %603 {strides = array<i32>} : memref<2x16x128xf32, #tpu.memory_space<vmem>>, vector<2x16x128xf32>,
      %cst_213 = arith.constant 0.000000e+00 : f32
      %605 = vector.broadcast %cst_213 : f32 to vector<2x16x128xf32>
      %c0_214 = arith.constant 0 : index
      %c0_215 = arith.constant 0 : index
      %c0_216 = arith.constant 0 : index
      %606 = vector.load %arg8[%c0_214, %c0_215, %c0_216] : memref<2x16x128xf32, #tpu.memory_space<vmem>>, vector<2x16x128xf32>
      tpu.vector_store %arg8[%c0_214, %c0_215, %c0_216], %605 {strides = array<i32>} : memref<2x16x128xf32, #tpu.memory_space<vmem>>, vector<2x16x128xf32>,
      %cst_217 = arith.constant 0.000000e+00 : f32
      %607 = vector.broadcast %cst_217 : f32 to vector<2x16x128xf32>
      %c0_218 = arith.constant 0 : index
      %c0_219 = arith.constant 0 : index
      %c0_220 = arith.constant 0 : index
      %608 = vector.load %arg9[%c0_218, %c0_219, %c0_220] : memref<2x16x128xf32, #tpu.memory_space<vmem>>, vector<2x16x128xf32>
      tpu.vector_store %arg9[%c0_218, %c0_219, %c0_220], %607 {strides = array<i32>} : memref<2x16x128xf32, #tpu.memory_space<vmem>>, vector<2x16x128xf32>,
    } else {
    }
    %c0 = arith.constant 0 : index
    %c0_1 = arith.constant 0 : index
    %c0_2 = arith.constant 0 : index
    %3 = vector.load %arg3[%c0, %c0_1, %c0_2] : memref<2x128x512xbf16, #tpu.memory_space<vmem>>, vector<1x128x512xbf16>
    %4 = vector.shape_cast %3 : vector<1x128x512xbf16> to vector<128x512xbf16>
    %c1 = arith.constant 1 : index
    %c0_3 = arith.constant 0 : index
    %c0_4 = arith.constant 0 : index
    %5 = vector.load %arg3[%c1, %c0_3, %c0_4] : memref<2x128x512xbf16, #tpu.memory_space<vmem>>, vector<1x128x512xbf16>
    %6 = vector.shape_cast %5 : vector<1x128x512xbf16> to vector<128x512xbf16>
    %c0_5 = arith.constant 0 : index
    %c0_6 = arith.constant 0 : index
    %c0_7 = arith.constant 0 : index
    %7 = vector.load %arg5[%c0_5, %c0_6, %c0_7] : memref<2x1x512xf32, #tpu.memory_space<vmem>>, vector<1x1x512xf32>
    %8 = vector.shape_cast %7 : vector<1x1x512xf32> to vector<1x512xf32>
    %c1_8 = arith.constant 1 : index
    %c0_9 = arith.constant 0 : index
    %c0_10 = arith.constant 0 : index
    %9 = vector.load %arg5[%c1_8, %c0_9, %c0_10] : memref<2x1x512xf32, #tpu.memory_space<vmem>>, vector<1x1x512xf32>
    %10 = vector.shape_cast %9 : vector<1x1x512xf32> to vector<1x512xf32>
    %c0_11 = arith.constant 0 : index
    %c0_12 = arith.constant 0 : index
    %c0_13 = arith.constant 0 : index
    %11 = vector.load %arg1[%c0_11, %c0_12, %c0_13] : memref<8x16x128xbf16, #tpu.memory_space<vmem>>, vector<8x16x128xbf16>
    %12 = vector.shape_cast %11 : vector<8x16x128xbf16> to vector<128x128xbf16>
    %c0_14 = arith.constant 0 : index
    %c0_15 = arith.constant 0 : index
    %c0_16 = arith.constant 0 : index
    %13 = vector.load %arg2[%c0_14, %c0_15, %c0_16] : memref<8x16x128xbf16, #tpu.memory_space<vmem>>, vector<8x16x128xbf16>
    %14 = vector.shape_cast %13 : vector<8x16x128xbf16> to vector<128x128xbf16>
    %cst = arith.constant dense<0.000000e+00> : vector<128x512xf32>
    %15 = tpu.matmul %12, %4, %cst {dimension_numbers = #tpu.dot_dimension_numbers<[1], [0], [0], [1], [0, 0, 1, 1], [], []>} : vector<128x128xbf16>, vector<128x512xbf16>, vector<128x512xf32> -> vector<128x512xf32>
    %16 = vector.broadcast %8 : vector<1x512xf32> to vector<128x512xf32>
    %17 = arith.addf %15, %16 : vector<128x512xf32>
    %c0_17 = arith.constant 0 : index
    %c0_18 = arith.constant 0 : index
    %c0_19 = arith.constant 0 : index
    %18 = vector.load %arg10[%c0_17, %c0_18, %c0_19] : memref<2x128x512xf32, #tpu.memory_space<vmem>>, vector<1x128x512xf32>
    %19 = vector.shape_cast %18 : vector<1x128x512xf32> to vector<128x512xf32>
    %20 = vector.shape_cast %17 : vector<128x512xf32> to vector<1x128x512xf32>
    tpu.vector_store %arg10[%c0_17, %c0_18, %c0_19], %20 {strides = array<i32>} : memref<2x128x512xf32, #tpu.memory_space<vmem>>, vector<1x128x512xf32>,
    %cst_20 = arith.constant dense<0.000000e+00> : vector<128x512xf32>
    %21 = tpu.matmul %14, %6, %cst_20 {dimension_numbers = #tpu.dot_dimension_numbers<[1], [0], [0], [1], [0, 0, 1, 1], [], []>} : vector<128x128xbf16>, vector<128x512xbf16>, vector<128x512xf32> -> vector<128x512xf32>
    %22 = vector.broadcast %10 : vector<1x512xf32> to vector<128x512xf32>
    %23 = arith.addf %21, %22 : vector<128x512xf32>
    %c1_21 = arith.constant 1 : index
    %c0_22 = arith.constant 0 : index
    %c0_23 = arith.constant 0 : index
    %24 = vector.load %arg10[%c1_21, %c0_22, %c0_23] : memref<2x128x512xf32, #tpu.memory_space<vmem>>, vector<1x128x512xf32>
    %25 = vector.shape_cast %24 : vector<1x128x512xf32> to vector<128x512xf32>
    %26 = vector.shape_cast %23 : vector<128x512xf32> to vector<1x128x512xf32>
    tpu.vector_store %arg10[%c1_21, %c0_22, %c0_23], %26 {strides = array<i32>} : memref<2x128x512xf32, #tpu.memory_space<vmem>>, vector<1x128x512xf32>,
    %c0_24 = arith.constant 0 : index
    %c0_25 = arith.constant 0 : index
    %c0_26 = arith.constant 0 : index
    %27 = vector.load %arg4[%c0_24, %c0_25, %c0_26] : memref<2x128x512xbf16, #tpu.memory_space<vmem>>, vector<1x128x512xbf16>
    %28 = vector.shape_cast %27 : vector<1x128x512xbf16> to vector<128x512xbf16>
    %c1_27 = arith.constant 1 : index
    %c0_28 = arith.constant 0 : index
    %c0_29 = arith.constant 0 : index
    %29 = vector.load %arg4[%c1_27, %c0_28, %c0_29] : memref<2x128x512xbf16, #tpu.memory_space<vmem>>, vector<1x128x512xbf16>
    %30 = vector.shape_cast %29 : vector<1x128x512xbf16> to vector<128x512xbf16>
    %c0_30 = arith.constant 0 : index
    %c0_31 = arith.constant 0 : index
    %c0_32 = arith.constant 0 : index
    %31 = vector.load %arg11[%c0_30, %c0_31, %c0_32] : memref<2x16x128xf32, #tpu.memory_space<vmem>>, vector<1x16x128xf32>
    %32 = vector.shape_cast %31 : vector<1x16x128xf32> to vector<16x128xf32>
    %c0_33 = arith.constant 0 : index
    %c0_34 = arith.constant 0 : index
    %c0_35 = arith.constant 0 : index
    %33 = vector.load %arg12[%c0_33, %c0_34, %c0_35] : memref<2x16x128xf32, #tpu.memory_space<vmem>>, vector<1x16x128xf32>
    %34 = vector.shape_cast %33 : vector<1x16x128xf32> to vector<16x128xf32>
    %c1_36 = arith.constant 1 : index
    %c0_37 = arith.constant 0 : index
    %c0_38 = arith.constant 0 : index
    %35 = vector.load %arg11[%c1_36, %c0_37, %c0_38] : memref<2x16x128xf32, #tpu.memory_space<vmem>>, vector<1x16x128xf32>
    %36 = vector.shape_cast %35 : vector<1x16x128xf32> to vector<16x128xf32>
    %c1_39 = arith.constant 1 : index
    %c0_40 = arith.constant 0 : index
    %c0_41 = arith.constant 0 : index
    %37 = vector.load %arg12[%c1_39, %c0_40, %c0_41] : memref<2x16x128xf32, #tpu.memory_space<vmem>>, vector<1x16x128xf32>
    %38 = vector.shape_cast %37 : vector<1x16x128xf32> to vector<16x128xf32>
    %c0_42 = arith.constant 0 : index
    %c0_43 = arith.constant 0 : index
    %c0_44 = arith.constant 0 : index
    %39 = vector.load %arg10[%c0_42, %c0_43, %c0_44] : memref<2x128x512xf32, #tpu.memory_space<vmem>>, vector<1x16x512xf32>
    %40 = vector.shape_cast %39 : vector<1x16x512xf32> to vector<16x512xf32>
    %41 = arith.truncf %32 : vector<16x128xf32> to vector<16x128xbf16>
    %cst_45 = arith.constant dense<0.000000e+00> : vector<16x512xf32>
    %42 = tpu.matmul %41, %28, %cst_45 {dimension_numbers = #tpu.dot_dimension_numbers<[1], [0], [0], [1], [0, 0, 1, 1], [], []>} : vector<16x128xbf16>, vector<128x512xbf16>, vector<16x512xf32> -> vector<16x512xf32>
    %43 = arith.addf %40, %42 : vector<16x512xf32>
    %44 = vector.extract_strided_slice %43 {offsets = [0, 0], sizes = [16, 128], strides = [1, 1]} : vector<16x512xf32> to vector<16x128xf32>
    %45 = arith.negf %44 : vector<16x128xf32>
    %46 = math.exp %45 : vector<16x128xf32>
    %cst_46 = arith.constant 1.000000e+00 : f32
    %47 = vector.broadcast %cst_46 : f32 to vector<16x128xf32>
    %48 = arith.addf %47, %46 : vector<16x128xf32>
    %49 = arith.divf %47, %48 : vector<16x128xf32>
    %50 = vector.extract_strided_slice %43 {offsets = [0, 128], sizes = [16, 128], strides = [1, 1]} : vector<16x512xf32> to vector<16x128xf32>
    %51 = arith.negf %50 : vector<16x128xf32>
    %52 = math.exp %51 : vector<16x128xf32>
    %cst_47 = arith.constant 1.000000e+00 : f32
    %53 = vector.broadcast %cst_47 : f32 to vector<16x128xf32>
    %54 = arith.addf %53, %52 : vector<16x128xf32>
    %55 = arith.divf %53, %54 : vector<16x128xf32>
    %56 = vector.extract_strided_slice %43 {offsets = [0, 256], sizes = [16, 128], strides = [1, 1]} : vector<16x512xf32> to vector<16x128xf32>
    %57 = math.tanh %56 : vector<16x128xf32>
    %58 = vector.extract_strided_slice %43 {offsets = [0, 384], sizes = [16, 128], strides = [1, 1]} : vector<16x512xf32> to vector<16x128xf32>
    %59 = arith.negf %58 : vector<16x128xf32>
    %60 = math.exp %59 : vector<16x128xf32>
    %cst_48 = arith.constant 1.000000e+00 : f32
    %61 = vector.broadcast %cst_48 : f32 to vector<16x128xf32>
    %62 = arith.addf %61, %60 : vector<16x128xf32>
    %63 = arith.divf %61, %62 : vector<16x128xf32>
    %64 = arith.mulf %55, %34 : vector<16x128xf32>
    %65 = arith.mulf %49, %57 : vector<16x128xf32>
    %66 = arith.addf %64, %65 : vector<16x128xf32>
    %67 = math.tanh %66 : vector<16x128xf32>
    %68 = arith.mulf %63, %67 : vector<16x128xf32>
    %c1_49 = arith.constant 1 : index
    %c112 = arith.constant 112 : index
    %c0_50 = arith.constant 0 : index
    %69 = vector.load %arg10[%c1_49, %c112, %c0_50] : memref<2x128x512xf32, #tpu.memory_space<vmem>>, vector<1x16x512xf32>
    %70 = vector.shape_cast %69 : vector<1x16x512xf32> to vector<16x512xf32>
    %71 = arith.truncf %36 : vector<16x128xf32> to vector<16x128xbf16>
    %cst_51 = arith.constant dense<0.000000e+00> : vector<16x512xf32>
    %72 = tpu.matmul %71, %30, %cst_51 {dimension_numbers = #tpu.dot_dimension_numbers<[1], [0], [0], [1], [0, 0, 1, 1], [], []>} : vector<16x128xbf16>, vector<128x512xbf16>, vector<16x512xf32> -> vector<16x512xf32>
    %73 = arith.addf %70, %72 : vector<16x512xf32>
    %74 = vector.extract_strided_slice %73 {offsets = [0, 0], sizes = [16, 128], strides = [1, 1]} : vector<16x512xf32> to vector<16x128xf32>
    %75 = arith.negf %74 : vector<16x128xf32>
    %76 = math.exp %75 : vector<16x128xf32>
    %cst_52 = arith.constant 1.000000e+00 : f32
    %77 = vector.broadcast %cst_52 : f32 to vector<16x128xf32>
    %78 = arith.addf %77, %76 : vector<16x128xf32>
    %79 = arith.divf %77, %78 : vector<16x128xf32>
    %80 = vector.extract_strided_slice %73 {offsets = [0, 128], sizes = [16, 128], strides = [1, 1]} : vector<16x512xf32> to vector<16x128xf32>
    %81 = arith.negf %80 : vector<16x128xf32>
    %82 = math.exp %81 : vector<16x128xf32>
    %cst_53 = arith.constant 1.000000e+00 : f32
    %83 = vector.broadcast %cst_53 : f32 to vector<16x128xf32>
    %84 = arith.addf %83, %82 : vector<16x128xf32>
    %85 = arith.divf %83, %84 : vector<16x128xf32>
    %86 = vector.extract_strided_slice %73 {offsets = [0, 256], sizes = [16, 128], strides = [1, 1]} : vector<16x512xf32> to vector<16x128xf32>
    %87 = math.tanh %86 : vector<16x128xf32>
    %88 = vector.extract_strided_slice %73 {offsets = [0, 384], sizes = [16, 128], strides = [1, 1]} : vector<16x512xf32> to vector<16x128xf32>
    %89 = arith.negf %88 : vector<16x128xf32>
    %90 = math.exp %89 : vector<16x128xf32>
    %cst_54 = arith.constant 1.000000e+00 : f32
    %91 = vector.broadcast %cst_54 : f32 to vector<16x128xf32>
    %92 = arith.addf %91, %90 : vector<16x128xf32>
    %93 = arith.divf %91, %92 : vector<16x128xf32>
    %94 = arith.mulf %85, %38 : vector<16x128xf32>
    %95 = arith.mulf %79, %87 : vector<16x128xf32>
    %96 = arith.addf %94, %95 : vector<16x128xf32>
    %97 = math.tanh %96 : vector<16x128xf32>
    %98 = arith.mulf %93, %97 : vector<16x128xf32>
    %99 = arith.truncf %68 : vector<16x128xf32> to vector<16x128xbf16>
    %c0_55 = arith.constant 0 : index
    %c0_56 = arith.constant 0 : index
    %c0_57 = arith.constant 0 : index
    %100 = vector.load %arg6[%c0_55, %c0_56, %c0_57] : memref<8x16x128xbf16, #tpu.memory_space<vmem>>, vector<1x16x128xbf16>
    %101 = vector.shape_cast %100 : vector<1x16x128xbf16> to vector<16x128xbf16>
    %102 = vector.shape_cast %99 : vector<16x128xbf16> to vector<1x16x128xbf16>
    tpu.vector_store %arg6[%c0_55, %c0_56, %c0_57], %102 {strides = array<i32>} : memref<8x16x128xbf16, #tpu.memory_space<vmem>>, vector<1x16x128xbf16>,
    %103 = arith.truncf %98 : vector<16x128xf32> to vector<16x128xbf16>
    %c7 = arith.constant 7 : index
    %c0_58 = arith.constant 0 : index
    %c0_59 = arith.constant 0 : index
    %104 = vector.load %arg7[%c7, %c0_58, %c0_59] : memref<8x16x128xbf16, #tpu.memory_space<vmem>>, vector<1x16x128xbf16>
    %105 = vector.shape_cast %104 : vector<1x16x128xbf16> to vector<16x128xbf16>
    %106 = vector.shape_cast %103 : vector<16x128xbf16> to vector<1x16x128xbf16>
    tpu.vector_store %arg7[%c7, %c0_58, %c0_59], %106 {strides = array<i32>} : memref<8x16x128xbf16, #tpu.memory_space<vmem>>, vector<1x16x128xbf16>,
    %c0_60 = arith.constant 0 : index
    %c16 = arith.constant 16 : index
    %c0_61 = arith.constant 0 : index
    %107 = vector.load %arg10[%c0_60, %c16, %c0_61] : memref<2x128x512xf32, #tpu.memory_space<vmem>>, vector<1x16x512xf32>
    %108 = vector.shape_cast %107 : vector<1x16x512xf32> to vector<16x512xf32>
    %109 = arith.truncf %68 : vector<16x128xf32> to vector<16x128xbf16>
    %cst_62 = arith.constant dense<0.000000e+00> : vector<16x512xf32>
    %110 = tpu.matmul %109, %28, %cst_62 {dimension_numbers = #tpu.dot_dimension_numbers<[1], [0], [0], [1], [0, 0, 1, 1], [], []>} : vector<16x128xbf16>, vector<128x512xbf16>, vector<16x512xf32> -> vector<16x512xf32>
    %111 = arith.addf %108, %110 : vector<16x512xf32>
    %112 = vector.extract_strided_slice %111 {offsets = [0, 0], sizes = [16, 128], strides = [1, 1]} : vector<16x512xf32> to vector<16x128xf32>
    %113 = arith.negf %112 : vector<16x128xf32>
    %114 = math.exp %113 : vector<16x128xf32>
    %cst_63 = arith.constant 1.000000e+00 : f32
    %115 = vector.broadcast %cst_63 : f32 to vector<16x128xf32>
    %116 = arith.addf %115, %114 : vector<16x128xf32>
    %117 = arith.divf %115, %116 : vector<16x128xf32>
    %118 = vector.extract_strided_slice %111 {offsets = [0, 128], sizes = [16, 128], strides = [1, 1]} : vector<16x512xf32> to vector<16x128xf32>
    %119 = arith.negf %118 : vector<16x128xf32>
    %120 = math.exp %119 : vector<16x128xf32>
    %cst_64 = arith.constant 1.000000e+00 : f32
    %121 = vector.broadcast %cst_64 : f32 to vector<16x128xf32>
    %122 = arith.addf %121, %120 : vector<16x128xf32>
    %123 = arith.divf %121, %122 : vector<16x128xf32>
    %124 = vector.extract_strided_slice %111 {offsets = [0, 256], sizes = [16, 128], strides = [1, 1]} : vector<16x512xf32> to vector<16x128xf32>
    %125 = math.tanh %124 : vector<16x128xf32>
    %126 = vector.extract_strided_slice %111 {offsets = [0, 384], sizes = [16, 128], strides = [1, 1]} : vector<16x512xf32> to vector<16x128xf32>
    %127 = arith.negf %126 : vector<16x128xf32>
    %128 = math.exp %127 : vector<16x128xf32>
    %cst_65 = arith.constant 1.000000e+00 : f32
    %129 = vector.broadcast %cst_65 : f32 to vector<16x128xf32>
    %130 = arith.addf %129, %128 : vector<16x128xf32>
    %131 = arith.divf %129, %130 : vector<16x128xf32>
    %132 = arith.mulf %123, %66 : vector<16x128xf32>
    %133 = arith.mulf %117, %125 : vector<16x128xf32>
    %134 = arith.addf %132, %133 : vector<16x128xf32>
    %135 = math.tanh %134 : vector<16x128xf32>
    %136 = arith.mulf %131, %135 : vector<16x128xf32>
    %c1_66 = arith.constant 1 : index
    %c96 = arith.constant 96 : index
    %c0_67 = arith.constant 0 : index
    %137 = vector.load %arg10[%c1_66, %c96, %c0_67] : memref<2x128x512xf32, #tpu.memory_space<vmem>>, vector<1x16x512xf32>
    %138 = vector.shape_cast %137 : vector<1x16x512xf32> to vector<16x512xf32>
    %139 = arith.truncf %98 : vector<16x128xf32> to vector<16x128xbf16>
    %cst_68 = arith.constant dense<0.000000e+00> : vector<16x512xf32>
    %140 = tpu.matmul %139, %30, %cst_68 {dimension_numbers = #tpu.dot_dimension_numbers<[1], [0], [0], [1], [0, 0, 1, 1], [], []>} : vector<16x128xbf16>, vector<128x512xbf16>, vector<16x512xf32> -> vector<16x512xf32>
    %141 = arith.addf %138, %140 : vector<16x512xf32>
    %142 = vector.extract_strided_slice %141 {offsets = [0, 0], sizes = [16, 128], strides = [1, 1]} : vector<16x512xf32> to vector<16x128xf32>
    %143 = arith.negf %142 : vector<16x128xf32>
    %144 = math.exp %143 : vector<16x128xf32>
    %cst_69 = arith.constant 1.000000e+00 : f32
    %145 = vector.broadcast %cst_69 : f32 to vector<16x128xf32>
    %146 = arith.addf %145, %144 : vector<16x128xf32>
    %147 = arith.divf %145, %146 : vector<16x128xf32>
    %148 = vector.extract_strided_slice %141 {offsets = [0, 128], sizes = [16, 128], strides = [1, 1]} : vector<16x512xf32> to vector<16x128xf32>
    %149 = arith.negf %148 : vector<16x128xf32>
    %150 = math.exp %149 : vector<16x128xf32>
    %cst_70 = arith.constant 1.000000e+00 : f32
    %151 = vector.broadcast %cst_70 : f32 to vector<16x128xf32>
    %152 = arith.addf %151, %150 : vector<16x128xf32>
    %153 = arith.divf %151, %152 : vector<16x128xf32>
    %154 = vector.extract_strided_slice %141 {offsets = [0, 256], sizes = [16, 128], strides = [1, 1]} : vector<16x512xf32> to vector<16x128xf32>
    %155 = math.tanh %154 : vector<16x128xf32>
    %156 = vector.extract_strided_slice %141 {offsets = [0, 384], sizes = [16, 128], strides = [1, 1]} : vector<16x512xf32> to vector<16x128xf32>
    %157 = arith.negf %156 : vector<16x128xf32>
    %158 = math.exp %157 : vector<16x128xf32>
    %cst_71 = arith.constant 1.000000e+00 : f32
    %159 = vector.broadcast %cst_71 : f32 to vector<16x128xf32>
    %160 = arith.addf %159, %158 : vector<16x128xf32>
    %161 = arith.divf %159, %160 : vector<16x128xf32>
    %162 = arith.mulf %153, %96 : vector<16x128xf32>
    %163 = arith.mulf %147, %155 : vector<16x128xf32>
    %164 = arith.addf %162, %163 : vector<16x128xf32>
    %165 = math.tanh %164 : vector<16x128xf32>
    %166 = arith.mulf %161, %165 : vector<16x128xf32>
    %167 = arith.truncf %136 : vector<16x128xf32> to vector<16x128xbf16>
    %c1_72 = arith.constant 1 : index
    %c0_73 = arith.constant 0 : index
    %c0_74 = arith.constant 0 : index
    %168 = vector.load %arg6[%c1_72, %c0_73, %c0_74] : memref<8x16x128xbf16, #tpu.memory_space<vmem>>, vector<1x16x128xbf16>
    %169 = vector.shape_cast %168 : vector<1x16x128xbf16> to vector<16x128xbf16>
    %170 = vector.shape_cast %167 : vector<16x128xbf16> to vector<1x16x128xbf16>
    tpu.vector_store %arg6[%c1_72, %c0_73, %c0_74], %170 {strides = array<i32>} : memref<8x16x128xbf16, #tpu.memory_space<vmem>>, vector<1x16x128xbf16>,
    %171 = arith.truncf %166 : vector<16x128xf32> to vector<16x128xbf16>
    %c6 = arith.constant 6 : index
    %c0_75 = arith.constant 0 : index
    %c0_76 = arith.constant 0 : index
    %172 = vector.load %arg7[%c6, %c0_75, %c0_76] : memref<8x16x128xbf16, #tpu.memory_space<vmem>>, vector<1x16x128xbf16>
    %173 = vector.shape_cast %172 : vector<1x16x128xbf16> to vector<16x128xbf16>
    %174 = vector.shape_cast %171 : vector<16x128xbf16> to vector<1x16x128xbf16>
    tpu.vector_store %arg7[%c6, %c0_75, %c0_76], %174 {strides = array<i32>} : memref<8x16x128xbf16, #tpu.memory_space<vmem>>, vector<1x16x128xbf16>,
    %c0_77 = arith.constant 0 : index
    %c32 = arith.constant 32 : index
    %c0_78 = arith.constant 0 : index
    %175 = vector.load %arg10[%c0_77, %c32, %c0_78] : memref<2x128x512xf32, #tpu.memory_space<vmem>>, vector<1x16x512xf32>
    %176 = vector.shape_cast %175 : vector<1x16x512xf32> to vector<16x512xf32>
    %177 = arith.truncf %136 : vector<16x128xf32> to vector<16x128xbf16>
    %cst_79 = arith.constant dense<0.000000e+00> : vector<16x512xf32>
    %178 = tpu.matmul %177, %28, %cst_79 {dimension_numbers = #tpu.dot_dimension_numbers<[1], [0], [0], [1], [0, 0, 1, 1], [], []>} : vector<16x128xbf16>, vector<128x512xbf16>, vector<16x512xf32> -> vector<16x512xf32>
    %179 = arith.addf %176, %178 : vector<16x512xf32>
    %180 = vector.extract_strided_slice %179 {offsets = [0, 0], sizes = [16, 128], strides = [1, 1]} : vector<16x512xf32> to vector<16x128xf32>
    %181 = arith.negf %180 : vector<16x128xf32>
    %182 = math.exp %181 : vector<16x128xf32>
    %cst_80 = arith.constant 1.000000e+00 : f32
    %183 = vector.broadcast %cst_80 : f32 to vector<16x128xf32>
    %184 = arith.addf %183, %182 : vector<16x128xf32>
    %185 = arith.divf %183, %184 : vector<16x128xf32>
    %186 = vector.extract_strided_slice %179 {offsets = [0, 128], sizes = [16, 128], strides = [1, 1]} : vector<16x512xf32> to vector<16x128xf32>
    %187 = arith.negf %186 : vector<16x128xf32>
    %188 = math.exp %187 : vector<16x128xf32>
    %cst_81 = arith.constant 1.000000e+00 : f32
    %189 = vector.broadcast %cst_81 : f32 to vector<16x128xf32>
    %190 = arith.addf %189, %188 : vector<16x128xf32>
    %191 = arith.divf %189, %190 : vector<16x128xf32>
    %192 = vector.extract_strided_slice %179 {offsets = [0, 256], sizes = [16, 128], strides = [1, 1]} : vector<16x512xf32> to vector<16x128xf32>
    %193 = math.tanh %192 : vector<16x128xf32>
    %194 = vector.extract_strided_slice %179 {offsets = [0, 384], sizes = [16, 128], strides = [1, 1]} : vector<16x512xf32> to vector<16x128xf32>
    %195 = arith.negf %194 : vector<16x128xf32>
    %196 = math.exp %195 : vector<16x128xf32>
    %cst_82 = arith.constant 1.000000e+00 : f32
    %197 = vector.broadcast %cst_82 : f32 to vector<16x128xf32>
    %198 = arith.addf %197, %196 : vector<16x128xf32>
    %199 = arith.divf %197, %198 : vector<16x128xf32>
    %200 = arith.mulf %191, %134 : vector<16x128xf32>
    %201 = arith.mulf %185, %193 : vector<16x128xf32>
    %202 = arith.addf %200, %201 : vector<16x128xf32>
    %203 = math.tanh %202 : vector<16x128xf32>
    %204 = arith.mulf %199, %203 : vector<16x128xf32>
    %c1_83 = arith.constant 1 : index
    %c80 = arith.constant 80 : index
    %c0_84 = arith.constant 0 : index
    %205 = vector.load %arg10[%c1_83, %c80, %c0_84] : memref<2x128x512xf32, #tpu.memory_space<vmem>>, vector<1x16x512xf32>
    %206 = vector.shape_cast %205 : vector<1x16x512xf32> to vector<16x512xf32>
    %207 = arith.truncf %166 : vector<16x128xf32> to vector<16x128xbf16>
    %cst_85 = arith.constant dense<0.000000e+00> : vector<16x512xf32>
    %208 = tpu.matmul %207, %30, %cst_85 {dimension_numbers = #tpu.dot_dimension_numbers<[1], [0], [0], [1], [0, 0, 1, 1], [], []>} : vector<16x128xbf16>, vector<128x512xbf16>, vector<16x512xf32> -> vector<16x512xf32>
    %209 = arith.addf %206, %208 : vector<16x512xf32>
    %210 = vector.extract_strided_slice %209 {offsets = [0, 0], sizes = [16, 128], strides = [1, 1]} : vector<16x512xf32> to vector<16x128xf32>
    %211 = arith.negf %210 : vector<16x128xf32>
    %212 = math.exp %211 : vector<16x128xf32>
    %cst_86 = arith.constant 1.000000e+00 : f32
    %213 = vector.broadcast %cst_86 : f32 to vector<16x128xf32>
    %214 = arith.addf %213, %212 : vector<16x128xf32>
    %215 = arith.divf %213, %214 : vector<16x128xf32>
    %216 = vector.extract_strided_slice %209 {offsets = [0, 128], sizes = [16, 128], strides = [1, 1]} : vector<16x512xf32> to vector<16x128xf32>
    %217 = arith.negf %216 : vector<16x128xf32>
    %218 = math.exp %217 : vector<16x128xf32>
    %cst_87 = arith.constant 1.000000e+00 : f32
    %219 = vector.broadcast %cst_87 : f32 to vector<16x128xf32>
    %220 = arith.addf %219, %218 : vector<16x128xf32>
    %221 = arith.divf %219, %220 : vector<16x128xf32>
    %222 = vector.extract_strided_slice %209 {offsets = [0, 256], sizes = [16, 128], strides = [1, 1]} : vector<16x512xf32> to vector<16x128xf32>
    %223 = math.tanh %222 : vector<16x128xf32>
    %224 = vector.extract_strided_slice %209 {offsets = [0, 384], sizes = [16, 128], strides = [1, 1]} : vector<16x512xf32> to vector<16x128xf32>
    %225 = arith.negf %224 : vector<16x128xf32>
    %226 = math.exp %225 : vector<16x128xf32>
    %cst_88 = arith.constant 1.000000e+00 : f32
    %227 = vector.broadcast %cst_88 : f32 to vector<16x128xf32>
    %228 = arith.addf %227, %226 : vector<16x128xf32>
    %229 = arith.divf %227, %228 : vector<16x128xf32>
    %230 = arith.mulf %221, %164 : vector<16x128xf32>
    %231 = arith.mulf %215, %223 : vector<16x128xf32>
    %232 = arith.addf %230, %231 : vector<16x128xf32>
    %233 = math.tanh %232 : vector<16x128xf32>
    %234 = arith.mulf %229, %233 : vector<16x128xf32>
    %235 = arith.truncf %204 : vector<16x128xf32> to vector<16x128xbf16>
    %c2 = arith.constant 2 : index
    %c0_89 = arith.constant 0 : index
    %c0_90 = arith.constant 0 : index
    %236 = vector.load %arg6[%c2, %c0_89, %c0_90] : memref<8x16x128xbf16, #tpu.memory_space<vmem>>, vector<1x16x128xbf16>
    %237 = vector.shape_cast %236 : vector<1x16x128xbf16> to vector<16x128xbf16>
    %238 = vector.shape_cast %235 : vector<16x128xbf16> to vector<1x16x128xbf16>
    tpu.vector_store %arg6[%c2, %c0_89, %c0_90], %238 {strides = array<i32>} : memref<8x16x128xbf16, #tpu.memory_space<vmem>>, vector<1x16x128xbf16>,
    %239 = arith.truncf %234 : vector<16x128xf32> to vector<16x128xbf16>
    %c5 = arith.constant 5 : index
    %c0_91 = arith.constant 0 : index
    %c0_92 = arith.constant 0 : index
    %240 = vector.load %arg7[%c5, %c0_91, %c0_92] : memref<8x16x128xbf16, #tpu.memory_space<vmem>>, vector<1x16x128xbf16>
    %241 = vector.shape_cast %240 : vector<1x16x128xbf16> to vector<16x128xbf16>
    %242 = vector.shape_cast %239 : vector<16x128xbf16> to vector<1x16x128xbf16>
    tpu.vector_store %arg7[%c5, %c0_91, %c0_92], %242 {strides = array<i32>} : memref<8x16x128xbf16, #tpu.memory_space<vmem>>, vector<1x16x128xbf16>,
    %c0_93 = arith.constant 0 : index
    %c48 = arith.constant 48 : index
    %c0_94 = arith.constant 0 : index
    %243 = vector.load %arg10[%c0_93, %c48, %c0_94] : memref<2x128x512xf32, #tpu.memory_space<vmem>>, vector<1x16x512xf32>
    %244 = vector.shape_cast %243 : vector<1x16x512xf32> to vector<16x512xf32>
    %245 = arith.truncf %204 : vector<16x128xf32> to vector<16x128xbf16>
    %cst_95 = arith.constant dense<0.000000e+00> : vector<16x512xf32>
    %246 = tpu.matmul %245, %28, %cst_95 {dimension_numbers = #tpu.dot_dimension_numbers<[1], [0], [0], [1], [0, 0, 1, 1], [], []>} : vector<16x128xbf16>, vector<128x512xbf16>, vector<16x512xf32> -> vector<16x512xf32>
    %247 = arith.addf %244, %246 : vector<16x512xf32>
    %248 = vector.extract_strided_slice %247 {offsets = [0, 0], sizes = [16, 128], strides = [1, 1]} : vector<16x512xf32> to vector<16x128xf32>
    %249 = arith.negf %248 : vector<16x128xf32>
    %250 = math.exp %249 : vector<16x128xf32>
    %cst_96 = arith.constant 1.000000e+00 : f32
    %251 = vector.broadcast %cst_96 : f32 to vector<16x128xf32>
    %252 = arith.addf %251, %250 : vector<16x128xf32>
    %253 = arith.divf %251, %252 : vector<16x128xf32>
    %254 = vector.extract_strided_slice %247 {offsets = [0, 128], sizes = [16, 128], strides = [1, 1]} : vector<16x512xf32> to vector<16x128xf32>
    %255 = arith.negf %254 : vector<16x128xf32>
    %256 = math.exp %255 : vector<16x128xf32>
    %cst_97 = arith.constant 1.000000e+00 : f32
    %257 = vector.broadcast %cst_97 : f32 to vector<16x128xf32>
    %258 = arith.addf %257, %256 : vector<16x128xf32>
    %259 = arith.divf %257, %258 : vector<16x128xf32>
    %260 = vector.extract_strided_slice %247 {offsets = [0, 256], sizes = [16, 128], strides = [1, 1]} : vector<16x512xf32> to vector<16x128xf32>
    %261 = math.tanh %260 : vector<16x128xf32>
    %262 = vector.extract_strided_slice %247 {offsets = [0, 384], sizes = [16, 128], strides = [1, 1]} : vector<16x512xf32> to vector<16x128xf32>
    %263 = arith.negf %262 : vector<16x128xf32>
    %264 = math.exp %263 : vector<16x128xf32>
    %cst_98 = arith.constant 1.000000e+00 : f32
    %265 = vector.broadcast %cst_98 : f32 to vector<16x128xf32>
    %266 = arith.addf %265, %264 : vector<16x128xf32>
    %267 = arith.divf %265, %266 : vector<16x128xf32>
    %268 = arith.mulf %259, %202 : vector<16x128xf32>
    %269 = arith.mulf %253, %261 : vector<16x128xf32>
    %270 = arith.addf %268, %269 : vector<16x128xf32>
    %271 = math.tanh %270 : vector<16x128xf32>
    %272 = arith.mulf %267, %271 : vector<16x128xf32>
    %c1_99 = arith.constant 1 : index
    %c64 = arith.constant 64 : index
    %c0_100 = arith.constant 0 : index
    %273 = vector.load %arg10[%c1_99, %c64, %c0_100] : memref<2x128x512xf32, #tpu.memory_space<vmem>>, vector<1x16x512xf32>
    %274 = vector.shape_cast %273 : vector<1x16x512xf32> to vector<16x512xf32>
    %275 = arith.truncf %234 : vector<16x128xf32> to vector<16x128xbf16>
    %cst_101 = arith.constant dense<0.000000e+00> : vector<16x512xf32>
    %276 = tpu.matmul %275, %30, %cst_101 {dimension_numbers = #tpu.dot_dimension_numbers<[1], [0], [0], [1], [0, 0, 1, 1], [], []>} : vector<16x128xbf16>, vector<128x512xbf16>, vector<16x512xf32> -> vector<16x512xf32>
    %277 = arith.addf %274, %276 : vector<16x512xf32>
    %278 = vector.extract_strided_slice %277 {offsets = [0, 0], sizes = [16, 128], strides = [1, 1]} : vector<16x512xf32> to vector<16x128xf32>
    %279 = arith.negf %278 : vector<16x128xf32>
    %280 = math.exp %279 : vector<16x128xf32>
    %cst_102 = arith.constant 1.000000e+00 : f32
    %281 = vector.broadcast %cst_102 : f32 to vector<16x128xf32>
    %282 = arith.addf %281, %280 : vector<16x128xf32>
    %283 = arith.divf %281, %282 : vector<16x128xf32>
    %284 = vector.extract_strided_slice %277 {offsets = [0, 128], sizes = [16, 128], strides = [1, 1]} : vector<16x512xf32> to vector<16x128xf32>
    %285 = arith.negf %284 : vector<16x128xf32>
    %286 = math.exp %285 : vector<16x128xf32>
    %cst_103 = arith.constant 1.000000e+00 : f32
    %287 = vector.broadcast %cst_103 : f32 to vector<16x128xf32>
    %288 = arith.addf %287, %286 : vector<16x128xf32>
    %289 = arith.divf %287, %288 : vector<16x128xf32>
    %290 = vector.extract_strided_slice %277 {offsets = [0, 256], sizes = [16, 128], strides = [1, 1]} : vector<16x512xf32> to vector<16x128xf32>
    %291 = math.tanh %290 : vector<16x128xf32>
    %292 = vector.extract_strided_slice %277 {offsets = [0, 384], sizes = [16, 128], strides = [1, 1]} : vector<16x512xf32> to vector<16x128xf32>
    %293 = arith.negf %292 : vector<16x128xf32>
    %294 = math.exp %293 : vector<16x128xf32>
    %cst_104 = arith.constant 1.000000e+00 : f32
    %295 = vector.broadcast %cst_104 : f32 to vector<16x128xf32>
    %296 = arith.addf %295, %294 : vector<16x128xf32>
    %297 = arith.divf %295, %296 : vector<16x128xf32>
    %298 = arith.mulf %289, %232 : vector<16x128xf32>
    %299 = arith.mulf %283, %291 : vector<16x128xf32>
    %300 = arith.addf %298, %299 : vector<16x128xf32>
    %301 = math.tanh %300 : vector<16x128xf32>
    %302 = arith.mulf %297, %301 : vector<16x128xf32>
    %303 = arith.truncf %272 : vector<16x128xf32> to vector<16x128xbf16>
    %c3 = arith.constant 3 : index
    %c0_105 = arith.constant 0 : index
    %c0_106 = arith.constant 0 : index
    %304 = vector.load %arg6[%c3, %c0_105, %c0_106] : memref<8x16x128xbf16, #tpu.memory_space<vmem>>, vector<1x16x128xbf16>
    %305 = vector.shape_cast %304 : vector<1x16x128xbf16> to vector<16x128xbf16>
    %306 = vector.shape_cast %303 : vector<16x128xbf16> to vector<1x16x128xbf16>
    tpu.vector_store %arg6[%c3, %c0_105, %c0_106], %306 {strides = array<i32>} : memref<8x16x128xbf16, #tpu.memory_space<vmem>>, vector<1x16x128xbf16>,
    %307 = arith.truncf %302 : vector<16x128xf32> to vector<16x128xbf16>
    %c4 = arith.constant 4 : index
    %c0_107 = arith.constant 0 : index
    %c0_108 = arith.constant 0 : index
    %308 = vector.load %arg7[%c4, %c0_107, %c0_108] : memref<8x16x128xbf16, #tpu.memory_space<vmem>>, vector<1x16x128xbf16>
    %309 = vector.shape_cast %308 : vector<1x16x128xbf16> to vector<16x128xbf16>
    %310 = vector.shape_cast %307 : vector<16x128xbf16> to vector<1x16x128xbf16>
    tpu.vector_store %arg7[%c4, %c0_107, %c0_108], %310 {strides = array<i32>} : memref<8x16x128xbf16, #tpu.memory_space<vmem>>, vector<1x16x128xbf16>,
    %c0_109 = arith.constant 0 : index
    %c64_110 = arith.constant 64 : index
    %c0_111 = arith.constant 0 : index
    %311 = vector.load %arg10[%c0_109, %c64_110, %c0_111] : memref<2x128x512xf32, #tpu.memory_space<vmem>>, vector<1x16x512xf32>
    %312 = vector.shape_cast %311 : vector<1x16x512xf32> to vector<16x512xf32>
    %313 = arith.truncf %272 : vector<16x128xf32> to vector<16x128xbf16>
    %cst_112 = arith.constant dense<0.000000e+00> : vector<16x512xf32>
    %314 = tpu.matmul %313, %28, %cst_112 {dimension_numbers = #tpu.dot_dimension_numbers<[1], [0], [0], [1], [0, 0, 1, 1], [], []>} : vector<16x128xbf16>, vector<128x512xbf16>, vector<16x512xf32> -> vector<16x512xf32>
    %315 = arith.addf %312, %314 : vector<16x512xf32>
    %316 = vector.extract_strided_slice %315 {offsets = [0, 0], sizes = [16, 128], strides = [1, 1]} : vector<16x512xf32> to vector<16x128xf32>
    %317 = arith.negf %316 : vector<16x128xf32>
    %318 = math.exp %317 : vector<16x128xf32>
    %cst_113 = arith.constant 1.000000e+00 : f32
    %319 = vector.broadcast %cst_113 : f32 to vector<16x128xf32>
    %320 = arith.addf %319, %318 : vector<16x128xf32>
    %321 = arith.divf %319, %320 : vector<16x128xf32>
    %322 = vector.extract_strided_slice %315 {offsets = [0, 128], sizes = [16, 128], strides = [1, 1]} : vector<16x512xf32> to vector<16x128xf32>
    %323 = arith.negf %322 : vector<16x128xf32>
    %324 = math.exp %323 : vector<16x128xf32>
    %cst_114 = arith.constant 1.000000e+00 : f32
    %325 = vector.broadcast %cst_114 : f32 to vector<16x128xf32>
    %326 = arith.addf %325, %324 : vector<16x128xf32>
    %327 = arith.divf %325, %326 : vector<16x128xf32>
    %328 = vector.extract_strided_slice %315 {offsets = [0, 256], sizes = [16, 128], strides = [1, 1]} : vector<16x512xf32> to vector<16x128xf32>
    %329 = math.tanh %328 : vector<16x128xf32>
    %330 = vector.extract_strided_slice %315 {offsets = [0, 384], sizes = [16, 128], strides = [1, 1]} : vector<16x512xf32> to vector<16x128xf32>
    %331 = arith.negf %330 : vector<16x128xf32>
    %332 = math.exp %331 : vector<16x128xf32>
    %cst_115 = arith.constant 1.000000e+00 : f32
    %333 = vector.broadcast %cst_115 : f32 to vector<16x128xf32>
    %334 = arith.addf %333, %332 : vector<16x128xf32>
    %335 = arith.divf %333, %334 : vector<16x128xf32>
    %336 = arith.mulf %327, %270 : vector<16x128xf32>
    %337 = arith.mulf %321, %329 : vector<16x128xf32>
    %338 = arith.addf %336, %337 : vector<16x128xf32>
    %339 = math.tanh %338 : vector<16x128xf32>
    %340 = arith.mulf %335, %339 : vector<16x128xf32>
    %c1_116 = arith.constant 1 : index
    %c48_117 = arith.constant 48 : index
    %c0_118 = arith.constant 0 : index
    %341 = vector.load %arg10[%c1_116, %c48_117, %c0_118] : memref<2x128x512xf32, #tpu.memory_space<vmem>>, vector<1x16x512xf32>
    %342 = vector.shape_cast %341 : vector<1x16x512xf32> to vector<16x512xf32>
    %343 = arith.truncf %302 : vector<16x128xf32> to vector<16x128xbf16>
    %cst_119 = arith.constant dense<0.000000e+00> : vector<16x512xf32>
    %344 = tpu.matmul %343, %30, %cst_119 {dimension_numbers = #tpu.dot_dimension_numbers<[1], [0], [0], [1], [0, 0, 1, 1], [], []>} : vector<16x128xbf16>, vector<128x512xbf16>, vector<16x512xf32> -> vector<16x512xf32>
    %345 = arith.addf %342, %344 : vector<16x512xf32>
    %346 = vector.extract_strided_slice %345 {offsets = [0, 0], sizes = [16, 128], strides = [1, 1]} : vector<16x512xf32> to vector<16x128xf32>
    %347 = arith.negf %346 : vector<16x128xf32>
    %348 = math.exp %347 : vector<16x128xf32>
    %cst_120 = arith.constant 1.000000e+00 : f32
    %349 = vector.broadcast %cst_120 : f32 to vector<16x128xf32>
    %350 = arith.addf %349, %348 : vector<16x128xf32>
    %351 = arith.divf %349, %350 : vector<16x128xf32>
    %352 = vector.extract_strided_slice %345 {offsets = [0, 128], sizes = [16, 128], strides = [1, 1]} : vector<16x512xf32> to vector<16x128xf32>
    %353 = arith.negf %352 : vector<16x128xf32>
    %354 = math.exp %353 : vector<16x128xf32>
    %cst_121 = arith.constant 1.000000e+00 : f32
    %355 = vector.broadcast %cst_121 : f32 to vector<16x128xf32>
    %356 = arith.addf %355, %354 : vector<16x128xf32>
    %357 = arith.divf %355, %356 : vector<16x128xf32>
    %358 = vector.extract_strided_slice %345 {offsets = [0, 256], sizes = [16, 128], strides = [1, 1]} : vector<16x512xf32> to vector<16x128xf32>
    %359 = math.tanh %358 : vector<16x128xf32>
    %360 = vector.extract_strided_slice %345 {offsets = [0, 384], sizes = [16, 128], strides = [1, 1]} : vector<16x512xf32> to vector<16x128xf32>
    %361 = arith.negf %360 : vector<16x128xf32>
    %362 = math.exp %361 : vector<16x128xf32>
    %cst_122 = arith.constant 1.000000e+00 : f32
    %363 = vector.broadcast %cst_122 : f32 to vector<16x128xf32>
    %364 = arith.addf %363, %362 : vector<16x128xf32>
    %365 = arith.divf %363, %364 : vector<16x128xf32>
    %366 = arith.mulf %357, %300 : vector<16x128xf32>
    %367 = arith.mulf %351, %359 : vector<16x128xf32>
    %368 = arith.addf %366, %367 : vector<16x128xf32>
    %369 = math.tanh %368 : vector<16x128xf32>
    %370 = arith.mulf %365, %369 : vector<16x128xf32>
    %371 = arith.truncf %340 : vector<16x128xf32> to vector<16x128xbf16>
    %c4_123 = arith.constant 4 : index
    %c0_124 = arith.constant 0 : index
    %c0_125 = arith.constant 0 : index
    %372 = vector.load %arg6[%c4_123, %c0_124, %c0_125] : memref<8x16x128xbf16, #tpu.memory_space<vmem>>, vector<1x16x128xbf16>
    %373 = vector.shape_cast %372 : vector<1x16x128xbf16> to vector<16x128xbf16>
    %374 = vector.shape_cast %371 : vector<16x128xbf16> to vector<1x16x128xbf16>
    tpu.vector_store %arg6[%c4_123, %c0_124, %c0_125], %374 {strides = array<i32>} : memref<8x16x128xbf16, #tpu.memory_space<vmem>>, vector<1x16x128xbf16>,
    %375 = arith.truncf %370 : vector<16x128xf32> to vector<16x128xbf16>
    %c3_126 = arith.constant 3 : index
    %c0_127 = arith.constant 0 : index
    %c0_128 = arith.constant 0 : index
    %376 = vector.load %arg7[%c3_126, %c0_127, %c0_128] : memref<8x16x128xbf16, #tpu.memory_space<vmem>>, vector<1x16x128xbf16>
    %377 = vector.shape_cast %376 : vector<1x16x128xbf16> to vector<16x128xbf16>
    %378 = vector.shape_cast %375 : vector<16x128xbf16> to vector<1x16x128xbf16>
    tpu.vector_store %arg7[%c3_126, %c0_127, %c0_128], %378 {strides = array<i32>} : memref<8x16x128xbf16, #tpu.memory_space<vmem>>, vector<1x16x128xbf16>,
    %c0_129 = arith.constant 0 : index
    %c80_130 = arith.constant 80 : index
    %c0_131 = arith.constant 0 : index
    %379 = vector.load %arg10[%c0_129, %c80_130, %c0_131] : memref<2x128x512xf32, #tpu.memory_space<vmem>>, vector<1x16x512xf32>
    %380 = vector.shape_cast %379 : vector<1x16x512xf32> to vector<16x512xf32>
    %381 = arith.truncf %340 : vector<16x128xf32> to vector<16x128xbf16>
    %cst_132 = arith.constant dense<0.000000e+00> : vector<16x512xf32>
    %382 = tpu.matmul %381, %28, %cst_132 {dimension_numbers = #tpu.dot_dimension_numbers<[1], [0], [0], [1], [0, 0, 1, 1], [], []>} : vector<16x128xbf16>, vector<128x512xbf16>, vector<16x512xf32> -> vector<16x512xf32>
    %383 = arith.addf %380, %382 : vector<16x512xf32>
    %384 = vector.extract_strided_slice %383 {offsets = [0, 0], sizes = [16, 128], strides = [1, 1]} : vector<16x512xf32> to vector<16x128xf32>
    %385 = arith.negf %384 : vector<16x128xf32>
    %386 = math.exp %385 : vector<16x128xf32>
    %cst_133 = arith.constant 1.000000e+00 : f32
    %387 = vector.broadcast %cst_133 : f32 to vector<16x128xf32>
    %388 = arith.addf %387, %386 : vector<16x128xf32>
    %389 = arith.divf %387, %388 : vector<16x128xf32>
    %390 = vector.extract_strided_slice %383 {offsets = [0, 128], sizes = [16, 128], strides = [1, 1]} : vector<16x512xf32> to vector<16x128xf32>
    %391 = arith.negf %390 : vector<16x128xf32>
    %392 = math.exp %391 : vector<16x128xf32>
    %cst_134 = arith.constant 1.000000e+00 : f32
    %393 = vector.broadcast %cst_134 : f32 to vector<16x128xf32>
    %394 = arith.addf %393, %392 : vector<16x128xf32>
    %395 = arith.divf %393, %394 : vector<16x128xf32>
    %396 = vector.extract_strided_slice %383 {offsets = [0, 256], sizes = [16, 128], strides = [1, 1]} : vector<16x512xf32> to vector<16x128xf32>
    %397 = math.tanh %396 : vector<16x128xf32>
    %398 = vector.extract_strided_slice %383 {offsets = [0, 384], sizes = [16, 128], strides = [1, 1]} : vector<16x512xf32> to vector<16x128xf32>
    %399 = arith.negf %398 : vector<16x128xf32>
    %400 = math.exp %399 : vector<16x128xf32>
    %cst_135 = arith.constant 1.000000e+00 : f32
    %401 = vector.broadcast %cst_135 : f32 to vector<16x128xf32>
    %402 = arith.addf %401, %400 : vector<16x128xf32>
    %403 = arith.divf %401, %402 : vector<16x128xf32>
    %404 = arith.mulf %395, %338 : vector<16x128xf32>
    %405 = arith.mulf %389, %397 : vector<16x128xf32>
    %406 = arith.addf %404, %405 : vector<16x128xf32>
    %407 = math.tanh %406 : vector<16x128xf32>
    %408 = arith.mulf %403, %407 : vector<16x128xf32>
    %c1_136 = arith.constant 1 : index
    %c32_137 = arith.constant 32 : index
    %c0_138 = arith.constant 0 : index
    %409 = vector.load %arg10[%c1_136, %c32_137, %c0_138] : memref<2x128x512xf32, #tpu.memory_space<vmem>>, vector<1x16x512xf32>
    %410 = vector.shape_cast %409 : vector<1x16x512xf32> to vector<16x512xf32>
    %411 = arith.truncf %370 : vector<16x128xf32> to vector<16x128xbf16>
    %cst_139 = arith.constant dense<0.000000e+00> : vector<16x512xf32>
    %412 = tpu.matmul %411, %30, %cst_139 {dimension_numbers = #tpu.dot_dimension_numbers<[1], [0], [0], [1], [0, 0, 1, 1], [], []>} : vector<16x128xbf16>, vector<128x512xbf16>, vector<16x512xf32> -> vector<16x512xf32>
    %413 = arith.addf %410, %412 : vector<16x512xf32>
    %414 = vector.extract_strided_slice %413 {offsets = [0, 0], sizes = [16, 128], strides = [1, 1]} : vector<16x512xf32> to vector<16x128xf32>
    %415 = arith.negf %414 : vector<16x128xf32>
    %416 = math.exp %415 : vector<16x128xf32>
    %cst_140 = arith.constant 1.000000e+00 : f32
    %417 = vector.broadcast %cst_140 : f32 to vector<16x128xf32>
    %418 = arith.addf %417, %416 : vector<16x128xf32>
    %419 = arith.divf %417, %418 : vector<16x128xf32>
    %420 = vector.extract_strided_slice %413 {offsets = [0, 128], sizes = [16, 128], strides = [1, 1]} : vector<16x512xf32> to vector<16x128xf32>
    %421 = arith.negf %420 : vector<16x128xf32>
    %422 = math.exp %421 : vector<16x128xf32>
    %cst_141 = arith.constant 1.000000e+00 : f32
    %423 = vector.broadcast %cst_141 : f32 to vector<16x128xf32>
    %424 = arith.addf %423, %422 : vector<16x128xf32>
    %425 = arith.divf %423, %424 : vector<16x128xf32>
    %426 = vector.extract_strided_slice %413 {offsets = [0, 256], sizes = [16, 128], strides = [1, 1]} : vector<16x512xf32> to vector<16x128xf32>
    %427 = math.tanh %426 : vector<16x128xf32>
    %428 = vector.extract_strided_slice %413 {offsets = [0, 384], sizes = [16, 128], strides = [1, 1]} : vector<16x512xf32> to vector<16x128xf32>
    %429 = arith.negf %428 : vector<16x128xf32>
    %430 = math.exp %429 : vector<16x128xf32>
    %cst_142 = arith.constant 1.000000e+00 : f32
    %431 = vector.broadcast %cst_142 : f32 to vector<16x128xf32>
    %432 = arith.addf %431, %430 : vector<16x128xf32>
    %433 = arith.divf %431, %432 : vector<16x128xf32>
    %434 = arith.mulf %425, %368 : vector<16x128xf32>
    %435 = arith.mulf %419, %427 : vector<16x128xf32>
    %436 = arith.addf %434, %435 : vector<16x128xf32>
    %437 = math.tanh %436 : vector<16x128xf32>
    %438 = arith.mulf %433, %437 : vector<16x128xf32>
    %439 = arith.truncf %408 : vector<16x128xf32> to vector<16x128xbf16>
    %c5_143 = arith.constant 5 : index
    %c0_144 = arith.constant 0 : index
    %c0_145 = arith.constant 0 : index
    %440 = vector.load %arg6[%c5_143, %c0_144, %c0_145] : memref<8x16x128xbf16, #tpu.memory_space<vmem>>, vector<1x16x128xbf16>
    %441 = vector.shape_cast %440 : vector<1x16x128xbf16> to vector<16x128xbf16>
    %442 = vector.shape_cast %439 : vector<16x128xbf16> to vector<1x16x128xbf16>
    tpu.vector_store %arg6[%c5_143, %c0_144, %c0_145], %442 {strides = array<i32>} : memref<8x16x128xbf16, #tpu.memory_space<vmem>>, vector<1x16x128xbf16>,
    %443 = arith.truncf %438 : vector<16x128xf32> to vector<16x128xbf16>
    %c2_146 = arith.constant 2 : index
    %c0_147 = arith.constant 0 : index
    %c0_148 = arith.constant 0 : index
    %444 = vector.load %arg7[%c2_146, %c0_147, %c0_148] : memref<8x16x128xbf16, #tpu.memory_space<vmem>>, vector<1x16x128xbf16>
    %445 = vector.shape_cast %444 : vector<1x16x128xbf16> to vector<16x128xbf16>
    %446 = vector.shape_cast %443 : vector<16x128xbf16> to vector<1x16x128xbf16>
    tpu.vector_store %arg7[%c2_146, %c0_147, %c0_148], %446 {strides = array<i32>} : memref<8x16x128xbf16, #tpu.memory_space<vmem>>, vector<1x16x128xbf16>,
    %c0_149 = arith.constant 0 : index
    %c96_150 = arith.constant 96 : index
    %c0_151 = arith.constant 0 : index
    %447 = vector.load %arg10[%c0_149, %c96_150, %c0_151] : memref<2x128x512xf32, #tpu.memory_space<vmem>>, vector<1x16x512xf32>
    %448 = vector.shape_cast %447 : vector<1x16x512xf32> to vector<16x512xf32>
    %449 = arith.truncf %408 : vector<16x128xf32> to vector<16x128xbf16>
    %cst_152 = arith.constant dense<0.000000e+00> : vector<16x512xf32>
    %450 = tpu.matmul %449, %28, %cst_152 {dimension_numbers = #tpu.dot_dimension_numbers<[1], [0], [0], [1], [0, 0, 1, 1], [], []>} : vector<16x128xbf16>, vector<128x512xbf16>, vector<16x512xf32> -> vector<16x512xf32>
    %451 = arith.addf %448, %450 : vector<16x512xf32>
    %452 = vector.extract_strided_slice %451 {offsets = [0, 0], sizes = [16, 128], strides = [1, 1]} : vector<16x512xf32> to vector<16x128xf32>
    %453 = arith.negf %452 : vector<16x128xf32>
    %454 = math.exp %453 : vector<16x128xf32>
    %cst_153 = arith.constant 1.000000e+00 : f32
    %455 = vector.broadcast %cst_153 : f32 to vector<16x128xf32>
    %456 = arith.addf %455, %454 : vector<16x128xf32>
    %457 = arith.divf %455, %456 : vector<16x128xf32>
    %458 = vector.extract_strided_slice %451 {offsets = [0, 128], sizes = [16, 128], strides = [1, 1]} : vector<16x512xf32> to vector<16x128xf32>
    %459 = arith.negf %458 : vector<16x128xf32>
    %460 = math.exp %459 : vector<16x128xf32>
    %cst_154 = arith.constant 1.000000e+00 : f32
    %461 = vector.broadcast %cst_154 : f32 to vector<16x128xf32>
    %462 = arith.addf %461, %460 : vector<16x128xf32>
    %463 = arith.divf %461, %462 : vector<16x128xf32>
    %464 = vector.extract_strided_slice %451 {offsets = [0, 256], sizes = [16, 128], strides = [1, 1]} : vector<16x512xf32> to vector<16x128xf32>
    %465 = math.tanh %464 : vector<16x128xf32>
    %466 = vector.extract_strided_slice %451 {offsets = [0, 384], sizes = [16, 128], strides = [1, 1]} : vector<16x512xf32> to vector<16x128xf32>
    %467 = arith.negf %466 : vector<16x128xf32>
    %468 = math.exp %467 : vector<16x128xf32>
    %cst_155 = arith.constant 1.000000e+00 : f32
    %469 = vector.broadcast %cst_155 : f32 to vector<16x128xf32>
    %470 = arith.addf %469, %468 : vector<16x128xf32>
    %471 = arith.divf %469, %470 : vector<16x128xf32>
    %472 = arith.mulf %463, %406 : vector<16x128xf32>
    %473 = arith.mulf %457, %465 : vector<16x128xf32>
    %474 = arith.addf %472, %473 : vector<16x128xf32>
    %475 = math.tanh %474 : vector<16x128xf32>
    %476 = arith.mulf %471, %475 : vector<16x128xf32>
    %c1_156 = arith.constant 1 : index
    %c16_157 = arith.constant 16 : index
    %c0_158 = arith.constant 0 : index
    %477 = vector.load %arg10[%c1_156, %c16_157, %c0_158] : memref<2x128x512xf32, #tpu.memory_space<vmem>>, vector<1x16x512xf32>
    %478 = vector.shape_cast %477 : vector<1x16x512xf32> to vector<16x512xf32>
    %479 = arith.truncf %438 : vector<16x128xf32> to vector<16x128xbf16>
    %cst_159 = arith.constant dense<0.000000e+00> : vector<16x512xf32>
    %480 = tpu.matmul %479, %30, %cst_159 {dimension_numbers = #tpu.dot_dimension_numbers<[1], [0], [0], [1], [0, 0, 1, 1], [], []>} : vector<16x128xbf16>, vector<128x512xbf16>, vector<16x512xf32> -> vector<16x512xf32>
    %481 = arith.addf %478, %480 : vector<16x512xf32>
    %482 = vector.extract_strided_slice %481 {offsets = [0, 0], sizes = [16, 128], strides = [1, 1]} : vector<16x512xf32> to vector<16x128xf32>
    %483 = arith.negf %482 : vector<16x128xf32>
    %484 = math.exp %483 : vector<16x128xf32>
    %cst_160 = arith.constant 1.000000e+00 : f32
    %485 = vector.broadcast %cst_160 : f32 to vector<16x128xf32>
    %486 = arith.addf %485, %484 : vector<16x128xf32>
    %487 = arith.divf %485, %486 : vector<16x128xf32>
    %488 = vector.extract_strided_slice %481 {offsets = [0, 128], sizes = [16, 128], strides = [1, 1]} : vector<16x512xf32> to vector<16x128xf32>
    %489 = arith.negf %488 : vector<16x128xf32>
    %490 = math.exp %489 : vector<16x128xf32>
    %cst_161 = arith.constant 1.000000e+00 : f32
    %491 = vector.broadcast %cst_161 : f32 to vector<16x128xf32>
    %492 = arith.addf %491, %490 : vector<16x128xf32>
    %493 = arith.divf %491, %492 : vector<16x128xf32>
    %494 = vector.extract_strided_slice %481 {offsets = [0, 256], sizes = [16, 128], strides = [1, 1]} : vector<16x512xf32> to vector<16x128xf32>
    %495 = math.tanh %494 : vector<16x128xf32>
    %496 = vector.extract_strided_slice %481 {offsets = [0, 384], sizes = [16, 128], strides = [1, 1]} : vector<16x512xf32> to vector<16x128xf32>
    %497 = arith.negf %496 : vector<16x128xf32>
    %498 = math.exp %497 : vector<16x128xf32>
    %cst_162 = arith.constant 1.000000e+00 : f32
    %499 = vector.broadcast %cst_162 : f32 to vector<16x128xf32>
    %500 = arith.addf %499, %498 : vector<16x128xf32>
    %501 = arith.divf %499, %500 : vector<16x128xf32>
    %502 = arith.mulf %493, %436 : vector<16x128xf32>
    %503 = arith.mulf %487, %495 : vector<16x128xf32>
    %504 = arith.addf %502, %503 : vector<16x128xf32>
    %505 = math.tanh %504 : vector<16x128xf32>
    %506 = arith.mulf %501, %505 : vector<16x128xf32>
    %507 = arith.truncf %476 : vector<16x128xf32> to vector<16x128xbf16>
    %c6_163 = arith.constant 6 : index
    %c0_164 = arith.constant 0 : index
    %c0_165 = arith.constant 0 : index
    %508 = vector.load %arg6[%c6_163, %c0_164, %c0_165] : memref<8x16x128xbf16, #tpu.memory_space<vmem>>, vector<1x16x128xbf16>
    %509 = vector.shape_cast %508 : vector<1x16x128xbf16> to vector<16x128xbf16>
    %510 = vector.shape_cast %507 : vector<16x128xbf16> to vector<1x16x128xbf16>
    tpu.vector_store %arg6[%c6_163, %c0_164, %c0_165], %510 {strides = array<i32>} : memref<8x16x128xbf16, #tpu.memory_space<vmem>>, vector<1x16x128xbf16>,
    %511 = arith.truncf %506 : vector<16x128xf32> to vector<16x128xbf16>
    %c1_166 = arith.constant 1 : index
    %c0_167 = arith.constant 0 : index
    %c0_168 = arith.constant 0 : index
    %512 = vector.load %arg7[%c1_166, %c0_167, %c0_168] : memref<8x16x128xbf16, #tpu.memory_space<vmem>>, vector<1x16x128xbf16>
    %513 = vector.shape_cast %512 : vector<1x16x128xbf16> to vector<16x128xbf16>
    %514 = vector.shape_cast %511 : vector<16x128xbf16> to vector<1x16x128xbf16>
    tpu.vector_store %arg7[%c1_166, %c0_167, %c0_168], %514 {strides = array<i32>} : memref<8x16x128xbf16, #tpu.memory_space<vmem>>, vector<1x16x128xbf16>,
    %c0_169 = arith.constant 0 : index
    %c112_170 = arith.constant 112 : index
    %c0_171 = arith.constant 0 : index
    %515 = vector.load %arg10[%c0_169, %c112_170, %c0_171] : memref<2x128x512xf32, #tpu.memory_space<vmem>>, vector<1x16x512xf32>
    %516 = vector.shape_cast %515 : vector<1x16x512xf32> to vector<16x512xf32>
    %517 = arith.truncf %476 : vector<16x128xf32> to vector<16x128xbf16>
    %cst_172 = arith.constant dense<0.000000e+00> : vector<16x512xf32>
    %518 = tpu.matmul %517, %28, %cst_172 {dimension_numbers = #tpu.dot_dimension_numbers<[1], [0], [0], [1], [0, 0, 1, 1], [], []>} : vector<16x128xbf16>, vector<128x512xbf16>, vector<16x512xf32> -> vector<16x512xf32>
    %519 = arith.addf %516, %518 : vector<16x512xf32>
    %520 = vector.extract_strided_slice %519 {offsets = [0, 0], sizes = [16, 128], strides = [1, 1]} : vector<16x512xf32> to vector<16x128xf32>
    %521 = arith.negf %520 : vector<16x128xf32>
    %522 = math.exp %521 : vector<16x128xf32>
    %cst_173 = arith.constant 1.000000e+00 : f32
    %523 = vector.broadcast %cst_173 : f32 to vector<16x128xf32>
    %524 = arith.addf %523, %522 : vector<16x128xf32>
    %525 = arith.divf %523, %524 : vector<16x128xf32>
    %526 = vector.extract_strided_slice %519 {offsets = [0, 128], sizes = [16, 128], strides = [1, 1]} : vector<16x512xf32> to vector<16x128xf32>
    %527 = arith.negf %526 : vector<16x128xf32>
    %528 = math.exp %527 : vector<16x128xf32>
    %cst_174 = arith.constant 1.000000e+00 : f32
    %529 = vector.broadcast %cst_174 : f32 to vector<16x128xf32>
    %530 = arith.addf %529, %528 : vector<16x128xf32>
    %531 = arith.divf %529, %530 : vector<16x128xf32>
    %532 = vector.extract_strided_slice %519 {offsets = [0, 256], sizes = [16, 128], strides = [1, 1]} : vector<16x512xf32> to vector<16x128xf32>
    %533 = math.tanh %532 : vector<16x128xf32>
    %534 = vector.extract_strided_slice %519 {offsets = [0, 384], sizes = [16, 128], strides = [1, 1]} : vector<16x512xf32> to vector<16x128xf32>
    %535 = arith.negf %534 : vector<16x128xf32>
    %536 = math.exp %535 : vector<16x128xf32>
    %cst_175 = arith.constant 1.000000e+00 : f32
    %537 = vector.broadcast %cst_175 : f32 to vector<16x128xf32>
    %538 = arith.addf %537, %536 : vector<16x128xf32>
    %539 = arith.divf %537, %538 : vector<16x128xf32>
    %540 = arith.mulf %531, %474 : vector<16x128xf32>
    %541 = arith.mulf %525, %533 : vector<16x128xf32>
    %542 = arith.addf %540, %541 : vector<16x128xf32>
    %543 = math.tanh %542 : vector<16x128xf32>
    %544 = arith.mulf %539, %543 : vector<16x128xf32>
    %c1_176 = arith.constant 1 : index
    %c0_177 = arith.constant 0 : index
    %c0_178 = arith.constant 0 : index
    %545 = vector.load %arg10[%c1_176, %c0_177, %c0_178] : memref<2x128x512xf32, #tpu.memory_space<vmem>>, vector<1x16x512xf32>
    %546 = vector.shape_cast %545 : vector<1x16x512xf32> to vector<16x512xf32>
    %547 = arith.truncf %506 : vector<16x128xf32> to vector<16x128xbf16>
    %cst_179 = arith.constant dense<0.000000e+00> : vector<16x512xf32>
    %548 = tpu.matmul %547, %30, %cst_179 {dimension_numbers = #tpu.dot_dimension_numbers<[1], [0], [0], [1], [0, 0, 1, 1], [], []>} : vector<16x128xbf16>, vector<128x512xbf16>, vector<16x512xf32> -> vector<16x512xf32>
    %549 = arith.addf %546, %548 : vector<16x512xf32>
    %550 = vector.extract_strided_slice %549 {offsets = [0, 0], sizes = [16, 128], strides = [1, 1]} : vector<16x512xf32> to vector<16x128xf32>
    %551 = arith.negf %550 : vector<16x128xf32>
    %552 = math.exp %551 : vector<16x128xf32>
    %cst_180 = arith.constant 1.000000e+00 : f32
    %553 = vector.broadcast %cst_180 : f32 to vector<16x128xf32>
    %554 = arith.addf %553, %552 : vector<16x128xf32>
    %555 = arith.divf %553, %554 : vector<16x128xf32>
    %556 = vector.extract_strided_slice %549 {offsets = [0, 128], sizes = [16, 128], strides = [1, 1]} : vector<16x512xf32> to vector<16x128xf32>
    %557 = arith.negf %556 : vector<16x128xf32>
    %558 = math.exp %557 : vector<16x128xf32>
    %cst_181 = arith.constant 1.000000e+00 : f32
    %559 = vector.broadcast %cst_181 : f32 to vector<16x128xf32>
    %560 = arith.addf %559, %558 : vector<16x128xf32>
    %561 = arith.divf %559, %560 : vector<16x128xf32>
    %562 = vector.extract_strided_slice %549 {offsets = [0, 256], sizes = [16, 128], strides = [1, 1]} : vector<16x512xf32> to vector<16x128xf32>
    %563 = math.tanh %562 : vector<16x128xf32>
    %564 = vector.extract_strided_slice %549 {offsets = [0, 384], sizes = [16, 128], strides = [1, 1]} : vector<16x512xf32> to vector<16x128xf32>
    %565 = arith.negf %564 : vector<16x128xf32>
    %566 = math.exp %565 : vector<16x128xf32>
    %cst_182 = arith.constant 1.000000e+00 : f32
    %567 = vector.broadcast %cst_182 : f32 to vector<16x128xf32>
    %568 = arith.addf %567, %566 : vector<16x128xf32>
    %569 = arith.divf %567, %568 : vector<16x128xf32>
    %570 = arith.mulf %561, %504 : vector<16x128xf32>
    %571 = arith.mulf %555, %563 : vector<16x128xf32>
    %572 = arith.addf %570, %571 : vector<16x128xf32>
    %573 = math.tanh %572 : vector<16x128xf32>
    %574 = arith.mulf %569, %573 : vector<16x128xf32>
    %575 = arith.truncf %544 : vector<16x128xf32> to vector<16x128xbf16>
    %c7_183 = arith.constant 7 : index
    %c0_184 = arith.constant 0 : index
    %c0_185 = arith.constant 0 : index
    %576 = vector.load %arg6[%c7_183, %c0_184, %c0_185] : memref<8x16x128xbf16, #tpu.memory_space<vmem>>, vector<1x16x128xbf16>
    %577 = vector.shape_cast %576 : vector<1x16x128xbf16> to vector<16x128xbf16>
    %578 = vector.shape_cast %575 : vector<16x128xbf16> to vector<1x16x128xbf16>
    tpu.vector_store %arg6[%c7_183, %c0_184, %c0_185], %578 {strides = array<i32>} : memref<8x16x128xbf16, #tpu.memory_space<vmem>>, vector<1x16x128xbf16>,
    %579 = arith.truncf %574 : vector<16x128xf32> to vector<16x128xbf16>
    %c0_186 = arith.constant 0 : index
    %c0_187 = arith.constant 0 : index
    %c0_188 = arith.constant 0 : index
    %580 = vector.load %arg7[%c0_186, %c0_187, %c0_188] : memref<8x16x128xbf16, #tpu.memory_space<vmem>>, vector<1x16x128xbf16>
    %581 = vector.shape_cast %580 : vector<1x16x128xbf16> to vector<16x128xbf16>
    %582 = vector.shape_cast %579 : vector<16x128xbf16> to vector<1x16x128xbf16>
    tpu.vector_store %arg7[%c0_186, %c0_187, %c0_188], %582 {strides = array<i32>} : memref<8x16x128xbf16, #tpu.memory_space<vmem>>, vector<1x16x128xbf16>,
    %c0_i32_189 = arith.constant 0 : i32
    %583 = arith.cmpi eq, %arg0, %c0_i32_189 : i32
    %584 = arith.extui %583 : i1 to i32
    %c0_i32_190 = arith.constant 0 : i32
    %585 = arith.cmpi ne, %584, %c0_i32_190 : i32
    scf.if %585 {
      %c0_205 = arith.constant 0 : index
      %c0_206 = arith.constant 0 : index
      %c0_207 = arith.constant 0 : index
      %601 = vector.load %arg8[%c0_205, %c0_206, %c0_207] : memref<2x16x128xf32, #tpu.memory_space<vmem>>, vector<1x16x128xf32>
      %602 = vector.shape_cast %601 : vector<1x16x128xf32> to vector<16x128xf32>
      %603 = vector.shape_cast %544 : vector<16x128xf32> to vector<1x16x128xf32>
      tpu.vector_store %arg8[%c0_205, %c0_206, %c0_207], %603 {strides = array<i32>} : memref<2x16x128xf32, #tpu.memory_space<vmem>>, vector<1x16x128xf32>,
      %c0_208 = arith.constant 0 : index
      %c0_209 = arith.constant 0 : index
      %c0_210 = arith.constant 0 : index
      %604 = vector.load %arg9[%c0_208, %c0_209, %c0_210] : memref<2x16x128xf32, #tpu.memory_space<vmem>>, vector<1x16x128xf32>
      %605 = vector.shape_cast %604 : vector<1x16x128xf32> to vector<16x128xf32>
      %606 = vector.shape_cast %542 : vector<16x128xf32> to vector<1x16x128xf32>
      tpu.vector_store %arg9[%c0_208, %c0_209, %c0_210], %606 {strides = array<i32>} : memref<2x16x128xf32, #tpu.memory_space<vmem>>, vector<1x16x128xf32>,
    } else {
    }
    %c0_i32_191 = arith.constant 0 : i32
    %586 = arith.cmpi eq, %arg0, %c0_i32_191 : i32
    %587 = arith.extui %586 : i1 to i32
    %c0_i32_192 = arith.constant 0 : i32
    %588 = arith.cmpi ne, %587, %c0_i32_192 : i32
    scf.if %588 {
      %c1_205 = arith.constant 1 : index
      %c0_206 = arith.constant 0 : index
      %c0_207 = arith.constant 0 : index
      %601 = vector.load %arg8[%c1_205, %c0_206, %c0_207] : memref<2x16x128xf32, #tpu.memory_space<vmem>>, vector<1x16x128xf32>
      %602 = vector.shape_cast %601 : vector<1x16x128xf32> to vector<16x128xf32>
      %603 = vector.shape_cast %574 : vector<16x128xf32> to vector<1x16x128xf32>
      tpu.vector_store %arg8[%c1_205, %c0_206, %c0_207], %603 {strides = array<i32>} : memref<2x16x128xf32, #tpu.memory_space<vmem>>, vector<1x16x128xf32>,
      %c1_208 = arith.constant 1 : index
      %c0_209 = arith.constant 0 : index
      %c0_210 = arith.constant 0 : index
      %604 = vector.load %arg9[%c1_208, %c0_209, %c0_210] : memref<2x16x128xf32, #tpu.memory_space<vmem>>, vector<1x16x128xf32>
      %605 = vector.shape_cast %604 : vector<1x16x128xf32> to vector<16x128xf32>
      %606 = vector.shape_cast %572 : vector<16x128xf32> to vector<1x16x128xf32>
      tpu.vector_store %arg9[%c1_208, %c0_209, %c0_210], %606 {strides = array<i32>} : memref<2x16x128xf32, #tpu.memory_space<vmem>>, vector<1x16x128xf32>,
    } else {
    }
    %c0_193 = arith.constant 0 : index
    %c0_194 = arith.constant 0 : index
    %c0_195 = arith.constant 0 : index
    %589 = vector.load %arg11[%c0_193, %c0_194, %c0_195] : memref<2x16x128xf32, #tpu.memory_space<vmem>>, vector<1x16x128xf32>
    %590 = vector.shape_cast %589 : vector<1x16x128xf32> to vector<16x128xf32>
    %591 = vector.shape_cast %544 : vector<16x128xf32> to vector<1x16x128xf32>
    tpu.vector_store %arg11[%c0_193, %c0_194, %c0_195], %591 {strides = array<i32>} : memref<2x16x128xf32, #tpu.memory_space<vmem>>, vector<1x16x128xf32>,
    %c1_196 = arith.constant 1 : index
    %c0_197 = arith.constant 0 : index
    %c0_198 = arith.constant 0 : index
    %592 = vector.load %arg11[%c1_196, %c0_197, %c0_198] : memref<2x16x128xf32, #tpu.memory_space<vmem>>, vector<1x16x128xf32>
    %593 = vector.shape_cast %592 : vector<1x16x128xf32> to vector<16x128xf32>
    %594 = vector.shape_cast %574 : vector<16x128xf32> to vector<1x16x128xf32>
    tpu.vector_store %arg11[%c1_196, %c0_197, %c0_198], %594 {strides = array<i32>} : memref<2x16x128xf32, #tpu.memory_space<vmem>>, vector<1x16x128xf32>,
    %c0_199 = arith.constant 0 : index
    %c0_200 = arith.constant 0 : index
    %c0_201 = arith.constant 0 : index
    %595 = vector.load %arg12[%c0_199, %c0_200, %c0_201] : memref<2x16x128xf32, #tpu.memory_space<vmem>>, vector<1x16x128xf32>
    %596 = vector.shape_cast %595 : vector<1x16x128xf32> to vector<16x128xf32>
    %597 = vector.shape_cast %542 : vector<16x128xf32> to vector<1x16x128xf32>
    tpu.vector_store %arg12[%c0_199, %c0_200, %c0_201], %597 {strides = array<i32>} : memref<2x16x128xf32, #tpu.memory_space<vmem>>, vector<1x16x128xf32>,
    %c1_202 = arith.constant 1 : index
    %c0_203 = arith.constant 0 : index
    %c0_204 = arith.constant 0 : index
    %598 = vector.load %arg12[%c1_202, %c0_203, %c0_204] : memref<2x16x128xf32, #tpu.memory_space<vmem>>, vector<1x16x128xf32>
    %599 = vector.shape_cast %598 : vector<1x16x128xf32> to vector<16x128xf32>
    %600 = vector.shape_cast %572 : vector<16x128xf32> to vector<1x16x128xf32>
    tpu.vector_store %arg12[%c1_202, %c0_203, %c0_204], %600 {strides = array<i32>} : memref<2x16x128xf32, #tpu.memory_space<vmem>>, vector<1x16x128xf32>,
    return
  }
  func.func @transform_0(%arg0: i32) -> (i32, i32, i32) {
    %c0_i32 = arith.constant 0 : i32
    %c0_i32_0 = arith.constant 0 : i32
    %c0_i32_1 = arith.constant 0 : i32
    return %arg0, %c0_i32, %c0_i32_0 : i32, i32, i32
  }
  func.func @transform_1(%arg0: i32) -> (i32, i32, i32) {
    %c0_i32 = arith.constant 0 : i32
    %0 = arith.subi %c0_i32, %arg0 : i32
    %c0_i32_0 = arith.constant 0 : i32
    %c0_i32_1 = arith.constant 0 : i32
    %c0_i32_2 = arith.constant 0 : i32
    return %0, %c0_i32_0, %c0_i32_1 : i32, i32, i32
  }
  func.func @transform_2(%arg0: i32) -> (i32, i32, i32) {
    %c0_i32 = arith.constant 0 : i32
    %c0_i32_0 = arith.constant 0 : i32
    %c0_i32_1 = arith.constant 0 : i32
    %c0_i32_2 = arith.constant 0 : i32
    return %c0_i32, %c0_i32_0, %c0_i32_1 : i32, i32, i32
  }
  func.func @transform_3(%arg0: i32) -> (i32, i32, i32) {
    %c0_i32 = arith.constant 0 : i32
    %c0_i32_0 = arith.constant 0 : i32
    %c0_i32_1 = arith.constant 0 : i32
    %c0_i32_2 = arith.constant 0 : i32
    return %c0_i32, %c0_i32_0, %c0_i32_1 : i32, i32, i32
  }
  func.func @transform_4(%arg0: i32) -> (i32, i32, i32) {
    %c0_i32 = arith.constant 0 : i32
    %c0_i32_0 = arith.constant 0 : i32
    %c0_i32_1 = arith.constant 0 : i32
    %c0_i32_2 = arith.constant 0 : i32
    return %c0_i32, %c0_i32_0, %c0_i32_1 : i32, i32, i32
  }
  func.func @transform_5(%arg0: i32) -> (i32, i32, i32) {
    %c0_i32 = arith.constant 0 : i32
    %c0_i32_0 = arith.constant 0 : i32
    %c0_i32_1 = arith.constant 0 : i32
    return %arg0, %c0_i32, %c0_i32_0 : i32, i32, i32
  }
  func.func @transform_6(%arg0: i32) -> (i32, i32, i32) {
    %c0_i32 = arith.constant 0 : i32
    %0 = arith.subi %c0_i32, %arg0 : i32
    %c0_i32_0 = arith.constant 0 : i32
    %c0_i32_1 = arith.constant 0 : i32
    %c0_i32_2 = arith.constant 0 : i32
    return %0, %c0_i32_0, %c0_i32_1 : i32, i32, i32
  }
  func.func @transform_7(%arg0: i32) -> (i32, i32, i32) {
    %c0_i32 = arith.constant 0 : i32
    %c0_i32_0 = arith.constant 0 : i32
    %c0_i32_1 = arith.constant 0 : i32
    %c0_i32_2 = arith.constant 0 : i32
    return %c0_i32, %c0_i32_0, %c0_i32_1 : i32, i32, i32
  }
  func.func @transform_8(%arg0: i32) -> (i32, i32, i32) {
    %c0_i32 = arith.constant 0 : i32
    %c0_i32_0 = arith.constant 0 : i32
    %c0_i32_1 = arith.constant 0 : i32
    %c0_i32_2 = arith.constant 0 : i32
    return %c0_i32, %c0_i32_0, %c0_i32_1 : i32, i32, i32
  }
}

module attributes {stable_mosaic.version = 11 : i64} {
  func.func @_bilstm_kernel(%arg0: i32, %arg1: memref<8x16x256xbf16, #tpu.memory_space<vmem>>, %arg2: memref<8x16x256xbf16, #tpu.memory_space<vmem>>, %arg3: memref<2x256x512xbf16, #tpu.memory_space<vmem>>, %arg4: memref<2x128x512xbf16, #tpu.memory_space<vmem>>, %arg5: memref<2x1x512xf32, #tpu.memory_space<vmem>>, %arg6: memref<8x16x128xf32, #tpu.memory_space<vmem>>, %arg7: memref<8x16x128xf32, #tpu.memory_space<vmem>>, %arg8: memref<2x16x128xf32, #tpu.memory_space<vmem>>, %arg9: memref<2x16x128xf32, #tpu.memory_space<vmem>>, %arg10: memref<2x128x512xf32, #tpu.memory_space<vmem>>, %arg11: memref<2x16x128xf32, #tpu.memory_space<vmem>>, %arg12: memref<2x16x128xf32, #tpu.memory_space<vmem>>) attributes {dimension_semantics = [#tpu.dimension_semantics<arbitrary>], iteration_bounds = array<i64: 1>, scalar_prefetch = 0 : i64, scratch_operands = 3 : i64, tpu.core_type = #tpu.core_type<tc>, window_params = [{transform_indices = @transform_0, window_bounds = array<i64: 8, 16, 256>}, {transform_indices = @transform_1, window_bounds = array<i64: 8, 16, 256>}, {pipeline_mode = #tpu.pipeline_mode<synchronous>, transform_indices = @transform_2, window_bounds = array<i64: 2, 256, 512>}, {pipeline_mode = #tpu.pipeline_mode<synchronous>, transform_indices = @transform_3, window_bounds = array<i64: 2, 128, 512>}, {pipeline_mode = #tpu.pipeline_mode<synchronous>, transform_indices = @transform_4, window_bounds = array<i64: 2, 1, 512>}, {transform_indices = @transform_5, window_bounds = array<i64: 8, 16, 128>}, {transform_indices = @transform_6, window_bounds = array<i64: 8, 16, 128>}, {pipeline_mode = #tpu.pipeline_mode<synchronous>, transform_indices = @transform_7, window_bounds = array<i64: 2, 16, 128>}, {pipeline_mode = #tpu.pipeline_mode<synchronous>, transform_indices = @transform_8, window_bounds = array<i64: 2, 16, 128>}]} {
    %c0_i32 = arith.constant 0 : i32
    %0 = arith.cmpi eq, %arg0, %c0_i32 : i32
    %1 = arith.extui %0 : i1 to i32
    %c0_i32_0 = arith.constant 0 : i32
    %2 = arith.cmpi ne, %1, %c0_i32_0 : i32
    scf.if %2 {
      %cst_205 = arith.constant 0.000000e+00 : f32
      %585 = vector.broadcast %cst_205 : f32 to vector<2x16x128xf32>
      %c0_206 = arith.constant 0 : index
      %c0_207 = arith.constant 0 : index
      %c0_208 = arith.constant 0 : index
      %586 = vector.load %arg11[%c0_206, %c0_207, %c0_208] : memref<2x16x128xf32, #tpu.memory_space<vmem>>, vector<2x16x128xf32>
      tpu.vector_store %arg11[%c0_206, %c0_207, %c0_208], %585 {strides = array<i32>} : memref<2x16x128xf32, #tpu.memory_space<vmem>>, vector<2x16x128xf32>,
      %cst_209 = arith.constant 0.000000e+00 : f32
      %587 = vector.broadcast %cst_209 : f32 to vector<2x16x128xf32>
      %c0_210 = arith.constant 0 : index
      %c0_211 = arith.constant 0 : index
      %c0_212 = arith.constant 0 : index
      %588 = vector.load %arg12[%c0_210, %c0_211, %c0_212] : memref<2x16x128xf32, #tpu.memory_space<vmem>>, vector<2x16x128xf32>
      tpu.vector_store %arg12[%c0_210, %c0_211, %c0_212], %587 {strides = array<i32>} : memref<2x16x128xf32, #tpu.memory_space<vmem>>, vector<2x16x128xf32>,
      %cst_213 = arith.constant 0.000000e+00 : f32
      %589 = vector.broadcast %cst_213 : f32 to vector<2x16x128xf32>
      %c0_214 = arith.constant 0 : index
      %c0_215 = arith.constant 0 : index
      %c0_216 = arith.constant 0 : index
      %590 = vector.load %arg8[%c0_214, %c0_215, %c0_216] : memref<2x16x128xf32, #tpu.memory_space<vmem>>, vector<2x16x128xf32>
      tpu.vector_store %arg8[%c0_214, %c0_215, %c0_216], %589 {strides = array<i32>} : memref<2x16x128xf32, #tpu.memory_space<vmem>>, vector<2x16x128xf32>,
      %cst_217 = arith.constant 0.000000e+00 : f32
      %591 = vector.broadcast %cst_217 : f32 to vector<2x16x128xf32>
      %c0_218 = arith.constant 0 : index
      %c0_219 = arith.constant 0 : index
      %c0_220 = arith.constant 0 : index
      %592 = vector.load %arg9[%c0_218, %c0_219, %c0_220] : memref<2x16x128xf32, #tpu.memory_space<vmem>>, vector<2x16x128xf32>
      tpu.vector_store %arg9[%c0_218, %c0_219, %c0_220], %591 {strides = array<i32>} : memref<2x16x128xf32, #tpu.memory_space<vmem>>, vector<2x16x128xf32>,
    } else {
    }
    %c0 = arith.constant 0 : index
    %c0_1 = arith.constant 0 : index
    %c0_2 = arith.constant 0 : index
    %3 = vector.load %arg3[%c0, %c0_1, %c0_2] : memref<2x256x512xbf16, #tpu.memory_space<vmem>>, vector<1x256x512xbf16>
    %4 = vector.shape_cast %3 : vector<1x256x512xbf16> to vector<256x512xbf16>
    %c1 = arith.constant 1 : index
    %c0_3 = arith.constant 0 : index
    %c0_4 = arith.constant 0 : index
    %5 = vector.load %arg3[%c1, %c0_3, %c0_4] : memref<2x256x512xbf16, #tpu.memory_space<vmem>>, vector<1x256x512xbf16>
    %6 = vector.shape_cast %5 : vector<1x256x512xbf16> to vector<256x512xbf16>
    %c0_5 = arith.constant 0 : index
    %c0_6 = arith.constant 0 : index
    %c0_7 = arith.constant 0 : index
    %7 = vector.load %arg5[%c0_5, %c0_6, %c0_7] : memref<2x1x512xf32, #tpu.memory_space<vmem>>, vector<1x1x512xf32>
    %8 = vector.shape_cast %7 : vector<1x1x512xf32> to vector<1x512xf32>
    %c1_8 = arith.constant 1 : index
    %c0_9 = arith.constant 0 : index
    %c0_10 = arith.constant 0 : index
    %9 = vector.load %arg5[%c1_8, %c0_9, %c0_10] : memref<2x1x512xf32, #tpu.memory_space<vmem>>, vector<1x1x512xf32>
    %10 = vector.shape_cast %9 : vector<1x1x512xf32> to vector<1x512xf32>
    %c0_11 = arith.constant 0 : index
    %c0_12 = arith.constant 0 : index
    %c0_13 = arith.constant 0 : index
    %11 = vector.load %arg1[%c0_11, %c0_12, %c0_13] : memref<8x16x256xbf16, #tpu.memory_space<vmem>>, vector<8x16x256xbf16>
    %12 = vector.shape_cast %11 : vector<8x16x256xbf16> to vector<128x256xbf16>
    %c0_14 = arith.constant 0 : index
    %c0_15 = arith.constant 0 : index
    %c0_16 = arith.constant 0 : index
    %13 = vector.load %arg2[%c0_14, %c0_15, %c0_16] : memref<8x16x256xbf16, #tpu.memory_space<vmem>>, vector<8x16x256xbf16>
    %14 = vector.shape_cast %13 : vector<8x16x256xbf16> to vector<128x256xbf16>
    %cst = arith.constant dense<0.000000e+00> : vector<128x512xf32>
    %15 = tpu.matmul %12, %4, %cst {dimension_numbers = #tpu.dot_dimension_numbers<[1], [0], [0], [1], [0, 0, 1, 1], [], []>} : vector<128x256xbf16>, vector<256x512xbf16>, vector<128x512xf32> -> vector<128x512xf32>
    %16 = vector.broadcast %8 : vector<1x512xf32> to vector<128x512xf32>
    %17 = arith.addf %15, %16 : vector<128x512xf32>
    %c0_17 = arith.constant 0 : index
    %c0_18 = arith.constant 0 : index
    %c0_19 = arith.constant 0 : index
    %18 = vector.load %arg10[%c0_17, %c0_18, %c0_19] : memref<2x128x512xf32, #tpu.memory_space<vmem>>, vector<1x128x512xf32>
    %19 = vector.shape_cast %18 : vector<1x128x512xf32> to vector<128x512xf32>
    %20 = vector.shape_cast %17 : vector<128x512xf32> to vector<1x128x512xf32>
    tpu.vector_store %arg10[%c0_17, %c0_18, %c0_19], %20 {strides = array<i32>} : memref<2x128x512xf32, #tpu.memory_space<vmem>>, vector<1x128x512xf32>,
    %cst_20 = arith.constant dense<0.000000e+00> : vector<128x512xf32>
    %21 = tpu.matmul %14, %6, %cst_20 {dimension_numbers = #tpu.dot_dimension_numbers<[1], [0], [0], [1], [0, 0, 1, 1], [], []>} : vector<128x256xbf16>, vector<256x512xbf16>, vector<128x512xf32> -> vector<128x512xf32>
    %22 = vector.broadcast %10 : vector<1x512xf32> to vector<128x512xf32>
    %23 = arith.addf %21, %22 : vector<128x512xf32>
    %c1_21 = arith.constant 1 : index
    %c0_22 = arith.constant 0 : index
    %c0_23 = arith.constant 0 : index
    %24 = vector.load %arg10[%c1_21, %c0_22, %c0_23] : memref<2x128x512xf32, #tpu.memory_space<vmem>>, vector<1x128x512xf32>
    %25 = vector.shape_cast %24 : vector<1x128x512xf32> to vector<128x512xf32>
    %26 = vector.shape_cast %23 : vector<128x512xf32> to vector<1x128x512xf32>
    tpu.vector_store %arg10[%c1_21, %c0_22, %c0_23], %26 {strides = array<i32>} : memref<2x128x512xf32, #tpu.memory_space<vmem>>, vector<1x128x512xf32>,
    %c0_24 = arith.constant 0 : index
    %c0_25 = arith.constant 0 : index
    %c0_26 = arith.constant 0 : index
    %27 = vector.load %arg4[%c0_24, %c0_25, %c0_26] : memref<2x128x512xbf16, #tpu.memory_space<vmem>>, vector<1x128x512xbf16>
    %28 = vector.shape_cast %27 : vector<1x128x512xbf16> to vector<128x512xbf16>
    %c1_27 = arith.constant 1 : index
    %c0_28 = arith.constant 0 : index
    %c0_29 = arith.constant 0 : index
    %29 = vector.load %arg4[%c1_27, %c0_28, %c0_29] : memref<2x128x512xbf16, #tpu.memory_space<vmem>>, vector<1x128x512xbf16>
    %30 = vector.shape_cast %29 : vector<1x128x512xbf16> to vector<128x512xbf16>
    %c0_30 = arith.constant 0 : index
    %c0_31 = arith.constant 0 : index
    %c0_32 = arith.constant 0 : index
    %31 = vector.load %arg11[%c0_30, %c0_31, %c0_32] : memref<2x16x128xf32, #tpu.memory_space<vmem>>, vector<1x16x128xf32>
    %32 = vector.shape_cast %31 : vector<1x16x128xf32> to vector<16x128xf32>
    %c0_33 = arith.constant 0 : index
    %c0_34 = arith.constant 0 : index
    %c0_35 = arith.constant 0 : index
    %33 = vector.load %arg12[%c0_33, %c0_34, %c0_35] : memref<2x16x128xf32, #tpu.memory_space<vmem>>, vector<1x16x128xf32>
    %34 = vector.shape_cast %33 : vector<1x16x128xf32> to vector<16x128xf32>
    %c1_36 = arith.constant 1 : index
    %c0_37 = arith.constant 0 : index
    %c0_38 = arith.constant 0 : index
    %35 = vector.load %arg11[%c1_36, %c0_37, %c0_38] : memref<2x16x128xf32, #tpu.memory_space<vmem>>, vector<1x16x128xf32>
    %36 = vector.shape_cast %35 : vector<1x16x128xf32> to vector<16x128xf32>
    %c1_39 = arith.constant 1 : index
    %c0_40 = arith.constant 0 : index
    %c0_41 = arith.constant 0 : index
    %37 = vector.load %arg12[%c1_39, %c0_40, %c0_41] : memref<2x16x128xf32, #tpu.memory_space<vmem>>, vector<1x16x128xf32>
    %38 = vector.shape_cast %37 : vector<1x16x128xf32> to vector<16x128xf32>
    %c0_42 = arith.constant 0 : index
    %c0_43 = arith.constant 0 : index
    %c0_44 = arith.constant 0 : index
    %39 = vector.load %arg10[%c0_42, %c0_43, %c0_44] : memref<2x128x512xf32, #tpu.memory_space<vmem>>, vector<1x16x512xf32>
    %40 = vector.shape_cast %39 : vector<1x16x512xf32> to vector<16x512xf32>
    %41 = arith.truncf %32 : vector<16x128xf32> to vector<16x128xbf16>
    %cst_45 = arith.constant dense<0.000000e+00> : vector<16x512xf32>
    %42 = tpu.matmul %41, %28, %cst_45 {dimension_numbers = #tpu.dot_dimension_numbers<[1], [0], [0], [1], [0, 0, 1, 1], [], []>} : vector<16x128xbf16>, vector<128x512xbf16>, vector<16x512xf32> -> vector<16x512xf32>
    %43 = arith.addf %40, %42 : vector<16x512xf32>
    %44 = vector.extract_strided_slice %43 {offsets = [0, 0], sizes = [16, 128], strides = [1, 1]} : vector<16x512xf32> to vector<16x128xf32>
    %45 = arith.negf %44 : vector<16x128xf32>
    %46 = math.exp %45 : vector<16x128xf32>
    %cst_46 = arith.constant 1.000000e+00 : f32
    %47 = vector.broadcast %cst_46 : f32 to vector<16x128xf32>
    %48 = arith.addf %47, %46 : vector<16x128xf32>
    %49 = arith.divf %47, %48 : vector<16x128xf32>
    %50 = vector.extract_strided_slice %43 {offsets = [0, 128], sizes = [16, 128], strides = [1, 1]} : vector<16x512xf32> to vector<16x128xf32>
    %51 = arith.negf %50 : vector<16x128xf32>
    %52 = math.exp %51 : vector<16x128xf32>
    %cst_47 = arith.constant 1.000000e+00 : f32
    %53 = vector.broadcast %cst_47 : f32 to vector<16x128xf32>
    %54 = arith.addf %53, %52 : vector<16x128xf32>
    %55 = arith.divf %53, %54 : vector<16x128xf32>
    %56 = vector.extract_strided_slice %43 {offsets = [0, 256], sizes = [16, 128], strides = [1, 1]} : vector<16x512xf32> to vector<16x128xf32>
    %57 = math.tanh %56 : vector<16x128xf32>
    %58 = vector.extract_strided_slice %43 {offsets = [0, 384], sizes = [16, 128], strides = [1, 1]} : vector<16x512xf32> to vector<16x128xf32>
    %59 = arith.negf %58 : vector<16x128xf32>
    %60 = math.exp %59 : vector<16x128xf32>
    %cst_48 = arith.constant 1.000000e+00 : f32
    %61 = vector.broadcast %cst_48 : f32 to vector<16x128xf32>
    %62 = arith.addf %61, %60 : vector<16x128xf32>
    %63 = arith.divf %61, %62 : vector<16x128xf32>
    %64 = arith.mulf %55, %34 : vector<16x128xf32>
    %65 = arith.mulf %49, %57 : vector<16x128xf32>
    %66 = arith.addf %64, %65 : vector<16x128xf32>
    %67 = math.tanh %66 : vector<16x128xf32>
    %68 = arith.mulf %63, %67 : vector<16x128xf32>
    %c1_49 = arith.constant 1 : index
    %c112 = arith.constant 112 : index
    %c0_50 = arith.constant 0 : index
    %69 = vector.load %arg10[%c1_49, %c112, %c0_50] : memref<2x128x512xf32, #tpu.memory_space<vmem>>, vector<1x16x512xf32>
    %70 = vector.shape_cast %69 : vector<1x16x512xf32> to vector<16x512xf32>
    %71 = arith.truncf %36 : vector<16x128xf32> to vector<16x128xbf16>
    %cst_51 = arith.constant dense<0.000000e+00> : vector<16x512xf32>
    %72 = tpu.matmul %71, %30, %cst_51 {dimension_numbers = #tpu.dot_dimension_numbers<[1], [0], [0], [1], [0, 0, 1, 1], [], []>} : vector<16x128xbf16>, vector<128x512xbf16>, vector<16x512xf32> -> vector<16x512xf32>
    %73 = arith.addf %70, %72 : vector<16x512xf32>
    %74 = vector.extract_strided_slice %73 {offsets = [0, 0], sizes = [16, 128], strides = [1, 1]} : vector<16x512xf32> to vector<16x128xf32>
    %75 = arith.negf %74 : vector<16x128xf32>
    %76 = math.exp %75 : vector<16x128xf32>
    %cst_52 = arith.constant 1.000000e+00 : f32
    %77 = vector.broadcast %cst_52 : f32 to vector<16x128xf32>
    %78 = arith.addf %77, %76 : vector<16x128xf32>
    %79 = arith.divf %77, %78 : vector<16x128xf32>
    %80 = vector.extract_strided_slice %73 {offsets = [0, 128], sizes = [16, 128], strides = [1, 1]} : vector<16x512xf32> to vector<16x128xf32>
    %81 = arith.negf %80 : vector<16x128xf32>
    %82 = math.exp %81 : vector<16x128xf32>
    %cst_53 = arith.constant 1.000000e+00 : f32
    %83 = vector.broadcast %cst_53 : f32 to vector<16x128xf32>
    %84 = arith.addf %83, %82 : vector<16x128xf32>
    %85 = arith.divf %83, %84 : vector<16x128xf32>
    %86 = vector.extract_strided_slice %73 {offsets = [0, 256], sizes = [16, 128], strides = [1, 1]} : vector<16x512xf32> to vector<16x128xf32>
    %87 = math.tanh %86 : vector<16x128xf32>
    %88 = vector.extract_strided_slice %73 {offsets = [0, 384], sizes = [16, 128], strides = [1, 1]} : vector<16x512xf32> to vector<16x128xf32>
    %89 = arith.negf %88 : vector<16x128xf32>
    %90 = math.exp %89 : vector<16x128xf32>
    %cst_54 = arith.constant 1.000000e+00 : f32
    %91 = vector.broadcast %cst_54 : f32 to vector<16x128xf32>
    %92 = arith.addf %91, %90 : vector<16x128xf32>
    %93 = arith.divf %91, %92 : vector<16x128xf32>
    %94 = arith.mulf %85, %38 : vector<16x128xf32>
    %95 = arith.mulf %79, %87 : vector<16x128xf32>
    %96 = arith.addf %94, %95 : vector<16x128xf32>
    %97 = math.tanh %96 : vector<16x128xf32>
    %98 = arith.mulf %93, %97 : vector<16x128xf32>
    %c0_55 = arith.constant 0 : index
    %c0_56 = arith.constant 0 : index
    %c0_57 = arith.constant 0 : index
    %99 = vector.load %arg6[%c0_55, %c0_56, %c0_57] : memref<8x16x128xf32, #tpu.memory_space<vmem>>, vector<1x16x128xf32>
    %100 = vector.shape_cast %99 : vector<1x16x128xf32> to vector<16x128xf32>
    %101 = vector.shape_cast %68 : vector<16x128xf32> to vector<1x16x128xf32>
    tpu.vector_store %arg6[%c0_55, %c0_56, %c0_57], %101 {strides = array<i32>} : memref<8x16x128xf32, #tpu.memory_space<vmem>>, vector<1x16x128xf32>,
    %c7 = arith.constant 7 : index
    %c0_58 = arith.constant 0 : index
    %c0_59 = arith.constant 0 : index
    %102 = vector.load %arg7[%c7, %c0_58, %c0_59] : memref<8x16x128xf32, #tpu.memory_space<vmem>>, vector<1x16x128xf32>
    %103 = vector.shape_cast %102 : vector<1x16x128xf32> to vector<16x128xf32>
    %104 = vector.shape_cast %98 : vector<16x128xf32> to vector<1x16x128xf32>
    tpu.vector_store %arg7[%c7, %c0_58, %c0_59], %104 {strides = array<i32>} : memref<8x16x128xf32, #tpu.memory_space<vmem>>, vector<1x16x128xf32>,
    %c0_60 = arith.constant 0 : index
    %c16 = arith.constant 16 : index
    %c0_61 = arith.constant 0 : index
    %105 = vector.load %arg10[%c0_60, %c16, %c0_61] : memref<2x128x512xf32, #tpu.memory_space<vmem>>, vector<1x16x512xf32>
    %106 = vector.shape_cast %105 : vector<1x16x512xf32> to vector<16x512xf32>
    %107 = arith.truncf %68 : vector<16x128xf32> to vector<16x128xbf16>
    %cst_62 = arith.constant dense<0.000000e+00> : vector<16x512xf32>
    %108 = tpu.matmul %107, %28, %cst_62 {dimension_numbers = #tpu.dot_dimension_numbers<[1], [0], [0], [1], [0, 0, 1, 1], [], []>} : vector<16x128xbf16>, vector<128x512xbf16>, vector<16x512xf32> -> vector<16x512xf32>
    %109 = arith.addf %106, %108 : vector<16x512xf32>
    %110 = vector.extract_strided_slice %109 {offsets = [0, 0], sizes = [16, 128], strides = [1, 1]} : vector<16x512xf32> to vector<16x128xf32>
    %111 = arith.negf %110 : vector<16x128xf32>
    %112 = math.exp %111 : vector<16x128xf32>
    %cst_63 = arith.constant 1.000000e+00 : f32
    %113 = vector.broadcast %cst_63 : f32 to vector<16x128xf32>
    %114 = arith.addf %113, %112 : vector<16x128xf32>
    %115 = arith.divf %113, %114 : vector<16x128xf32>
    %116 = vector.extract_strided_slice %109 {offsets = [0, 128], sizes = [16, 128], strides = [1, 1]} : vector<16x512xf32> to vector<16x128xf32>
    %117 = arith.negf %116 : vector<16x128xf32>
    %118 = math.exp %117 : vector<16x128xf32>
    %cst_64 = arith.constant 1.000000e+00 : f32
    %119 = vector.broadcast %cst_64 : f32 to vector<16x128xf32>
    %120 = arith.addf %119, %118 : vector<16x128xf32>
    %121 = arith.divf %119, %120 : vector<16x128xf32>
    %122 = vector.extract_strided_slice %109 {offsets = [0, 256], sizes = [16, 128], strides = [1, 1]} : vector<16x512xf32> to vector<16x128xf32>
    %123 = math.tanh %122 : vector<16x128xf32>
    %124 = vector.extract_strided_slice %109 {offsets = [0, 384], sizes = [16, 128], strides = [1, 1]} : vector<16x512xf32> to vector<16x128xf32>
    %125 = arith.negf %124 : vector<16x128xf32>
    %126 = math.exp %125 : vector<16x128xf32>
    %cst_65 = arith.constant 1.000000e+00 : f32
    %127 = vector.broadcast %cst_65 : f32 to vector<16x128xf32>
    %128 = arith.addf %127, %126 : vector<16x128xf32>
    %129 = arith.divf %127, %128 : vector<16x128xf32>
    %130 = arith.mulf %121, %66 : vector<16x128xf32>
    %131 = arith.mulf %115, %123 : vector<16x128xf32>
    %132 = arith.addf %130, %131 : vector<16x128xf32>
    %133 = math.tanh %132 : vector<16x128xf32>
    %134 = arith.mulf %129, %133 : vector<16x128xf32>
    %c1_66 = arith.constant 1 : index
    %c96 = arith.constant 96 : index
    %c0_67 = arith.constant 0 : index
    %135 = vector.load %arg10[%c1_66, %c96, %c0_67] : memref<2x128x512xf32, #tpu.memory_space<vmem>>, vector<1x16x512xf32>
    %136 = vector.shape_cast %135 : vector<1x16x512xf32> to vector<16x512xf32>
    %137 = arith.truncf %98 : vector<16x128xf32> to vector<16x128xbf16>
    %cst_68 = arith.constant dense<0.000000e+00> : vector<16x512xf32>
    %138 = tpu.matmul %137, %30, %cst_68 {dimension_numbers = #tpu.dot_dimension_numbers<[1], [0], [0], [1], [0, 0, 1, 1], [], []>} : vector<16x128xbf16>, vector<128x512xbf16>, vector<16x512xf32> -> vector<16x512xf32>
    %139 = arith.addf %136, %138 : vector<16x512xf32>
    %140 = vector.extract_strided_slice %139 {offsets = [0, 0], sizes = [16, 128], strides = [1, 1]} : vector<16x512xf32> to vector<16x128xf32>
    %141 = arith.negf %140 : vector<16x128xf32>
    %142 = math.exp %141 : vector<16x128xf32>
    %cst_69 = arith.constant 1.000000e+00 : f32
    %143 = vector.broadcast %cst_69 : f32 to vector<16x128xf32>
    %144 = arith.addf %143, %142 : vector<16x128xf32>
    %145 = arith.divf %143, %144 : vector<16x128xf32>
    %146 = vector.extract_strided_slice %139 {offsets = [0, 128], sizes = [16, 128], strides = [1, 1]} : vector<16x512xf32> to vector<16x128xf32>
    %147 = arith.negf %146 : vector<16x128xf32>
    %148 = math.exp %147 : vector<16x128xf32>
    %cst_70 = arith.constant 1.000000e+00 : f32
    %149 = vector.broadcast %cst_70 : f32 to vector<16x128xf32>
    %150 = arith.addf %149, %148 : vector<16x128xf32>
    %151 = arith.divf %149, %150 : vector<16x128xf32>
    %152 = vector.extract_strided_slice %139 {offsets = [0, 256], sizes = [16, 128], strides = [1, 1]} : vector<16x512xf32> to vector<16x128xf32>
    %153 = math.tanh %152 : vector<16x128xf32>
    %154 = vector.extract_strided_slice %139 {offsets = [0, 384], sizes = [16, 128], strides = [1, 1]} : vector<16x512xf32> to vector<16x128xf32>
    %155 = arith.negf %154 : vector<16x128xf32>
    %156 = math.exp %155 : vector<16x128xf32>
    %cst_71 = arith.constant 1.000000e+00 : f32
    %157 = vector.broadcast %cst_71 : f32 to vector<16x128xf32>
    %158 = arith.addf %157, %156 : vector<16x128xf32>
    %159 = arith.divf %157, %158 : vector<16x128xf32>
    %160 = arith.mulf %151, %96 : vector<16x128xf32>
    %161 = arith.mulf %145, %153 : vector<16x128xf32>
    %162 = arith.addf %160, %161 : vector<16x128xf32>
    %163 = math.tanh %162 : vector<16x128xf32>
    %164 = arith.mulf %159, %163 : vector<16x128xf32>
    %c1_72 = arith.constant 1 : index
    %c0_73 = arith.constant 0 : index
    %c0_74 = arith.constant 0 : index
    %165 = vector.load %arg6[%c1_72, %c0_73, %c0_74] : memref<8x16x128xf32, #tpu.memory_space<vmem>>, vector<1x16x128xf32>
    %166 = vector.shape_cast %165 : vector<1x16x128xf32> to vector<16x128xf32>
    %167 = vector.shape_cast %134 : vector<16x128xf32> to vector<1x16x128xf32>
    tpu.vector_store %arg6[%c1_72, %c0_73, %c0_74], %167 {strides = array<i32>} : memref<8x16x128xf32, #tpu.memory_space<vmem>>, vector<1x16x128xf32>,
    %c6 = arith.constant 6 : index
    %c0_75 = arith.constant 0 : index
    %c0_76 = arith.constant 0 : index
    %168 = vector.load %arg7[%c6, %c0_75, %c0_76] : memref<8x16x128xf32, #tpu.memory_space<vmem>>, vector<1x16x128xf32>
    %169 = vector.shape_cast %168 : vector<1x16x128xf32> to vector<16x128xf32>
    %170 = vector.shape_cast %164 : vector<16x128xf32> to vector<1x16x128xf32>
    tpu.vector_store %arg7[%c6, %c0_75, %c0_76], %170 {strides = array<i32>} : memref<8x16x128xf32, #tpu.memory_space<vmem>>, vector<1x16x128xf32>,
    %c0_77 = arith.constant 0 : index
    %c32 = arith.constant 32 : index
    %c0_78 = arith.constant 0 : index
    %171 = vector.load %arg10[%c0_77, %c32, %c0_78] : memref<2x128x512xf32, #tpu.memory_space<vmem>>, vector<1x16x512xf32>
    %172 = vector.shape_cast %171 : vector<1x16x512xf32> to vector<16x512xf32>
    %173 = arith.truncf %134 : vector<16x128xf32> to vector<16x128xbf16>
    %cst_79 = arith.constant dense<0.000000e+00> : vector<16x512xf32>
    %174 = tpu.matmul %173, %28, %cst_79 {dimension_numbers = #tpu.dot_dimension_numbers<[1], [0], [0], [1], [0, 0, 1, 1], [], []>} : vector<16x128xbf16>, vector<128x512xbf16>, vector<16x512xf32> -> vector<16x512xf32>
    %175 = arith.addf %172, %174 : vector<16x512xf32>
    %176 = vector.extract_strided_slice %175 {offsets = [0, 0], sizes = [16, 128], strides = [1, 1]} : vector<16x512xf32> to vector<16x128xf32>
    %177 = arith.negf %176 : vector<16x128xf32>
    %178 = math.exp %177 : vector<16x128xf32>
    %cst_80 = arith.constant 1.000000e+00 : f32
    %179 = vector.broadcast %cst_80 : f32 to vector<16x128xf32>
    %180 = arith.addf %179, %178 : vector<16x128xf32>
    %181 = arith.divf %179, %180 : vector<16x128xf32>
    %182 = vector.extract_strided_slice %175 {offsets = [0, 128], sizes = [16, 128], strides = [1, 1]} : vector<16x512xf32> to vector<16x128xf32>
    %183 = arith.negf %182 : vector<16x128xf32>
    %184 = math.exp %183 : vector<16x128xf32>
    %cst_81 = arith.constant 1.000000e+00 : f32
    %185 = vector.broadcast %cst_81 : f32 to vector<16x128xf32>
    %186 = arith.addf %185, %184 : vector<16x128xf32>
    %187 = arith.divf %185, %186 : vector<16x128xf32>
    %188 = vector.extract_strided_slice %175 {offsets = [0, 256], sizes = [16, 128], strides = [1, 1]} : vector<16x512xf32> to vector<16x128xf32>
    %189 = math.tanh %188 : vector<16x128xf32>
    %190 = vector.extract_strided_slice %175 {offsets = [0, 384], sizes = [16, 128], strides = [1, 1]} : vector<16x512xf32> to vector<16x128xf32>
    %191 = arith.negf %190 : vector<16x128xf32>
    %192 = math.exp %191 : vector<16x128xf32>
    %cst_82 = arith.constant 1.000000e+00 : f32
    %193 = vector.broadcast %cst_82 : f32 to vector<16x128xf32>
    %194 = arith.addf %193, %192 : vector<16x128xf32>
    %195 = arith.divf %193, %194 : vector<16x128xf32>
    %196 = arith.mulf %187, %132 : vector<16x128xf32>
    %197 = arith.mulf %181, %189 : vector<16x128xf32>
    %198 = arith.addf %196, %197 : vector<16x128xf32>
    %199 = math.tanh %198 : vector<16x128xf32>
    %200 = arith.mulf %195, %199 : vector<16x128xf32>
    %c1_83 = arith.constant 1 : index
    %c80 = arith.constant 80 : index
    %c0_84 = arith.constant 0 : index
    %201 = vector.load %arg10[%c1_83, %c80, %c0_84] : memref<2x128x512xf32, #tpu.memory_space<vmem>>, vector<1x16x512xf32>
    %202 = vector.shape_cast %201 : vector<1x16x512xf32> to vector<16x512xf32>
    %203 = arith.truncf %164 : vector<16x128xf32> to vector<16x128xbf16>
    %cst_85 = arith.constant dense<0.000000e+00> : vector<16x512xf32>
    %204 = tpu.matmul %203, %30, %cst_85 {dimension_numbers = #tpu.dot_dimension_numbers<[1], [0], [0], [1], [0, 0, 1, 1], [], []>} : vector<16x128xbf16>, vector<128x512xbf16>, vector<16x512xf32> -> vector<16x512xf32>
    %205 = arith.addf %202, %204 : vector<16x512xf32>
    %206 = vector.extract_strided_slice %205 {offsets = [0, 0], sizes = [16, 128], strides = [1, 1]} : vector<16x512xf32> to vector<16x128xf32>
    %207 = arith.negf %206 : vector<16x128xf32>
    %208 = math.exp %207 : vector<16x128xf32>
    %cst_86 = arith.constant 1.000000e+00 : f32
    %209 = vector.broadcast %cst_86 : f32 to vector<16x128xf32>
    %210 = arith.addf %209, %208 : vector<16x128xf32>
    %211 = arith.divf %209, %210 : vector<16x128xf32>
    %212 = vector.extract_strided_slice %205 {offsets = [0, 128], sizes = [16, 128], strides = [1, 1]} : vector<16x512xf32> to vector<16x128xf32>
    %213 = arith.negf %212 : vector<16x128xf32>
    %214 = math.exp %213 : vector<16x128xf32>
    %cst_87 = arith.constant 1.000000e+00 : f32
    %215 = vector.broadcast %cst_87 : f32 to vector<16x128xf32>
    %216 = arith.addf %215, %214 : vector<16x128xf32>
    %217 = arith.divf %215, %216 : vector<16x128xf32>
    %218 = vector.extract_strided_slice %205 {offsets = [0, 256], sizes = [16, 128], strides = [1, 1]} : vector<16x512xf32> to vector<16x128xf32>
    %219 = math.tanh %218 : vector<16x128xf32>
    %220 = vector.extract_strided_slice %205 {offsets = [0, 384], sizes = [16, 128], strides = [1, 1]} : vector<16x512xf32> to vector<16x128xf32>
    %221 = arith.negf %220 : vector<16x128xf32>
    %222 = math.exp %221 : vector<16x128xf32>
    %cst_88 = arith.constant 1.000000e+00 : f32
    %223 = vector.broadcast %cst_88 : f32 to vector<16x128xf32>
    %224 = arith.addf %223, %222 : vector<16x128xf32>
    %225 = arith.divf %223, %224 : vector<16x128xf32>
    %226 = arith.mulf %217, %162 : vector<16x128xf32>
    %227 = arith.mulf %211, %219 : vector<16x128xf32>
    %228 = arith.addf %226, %227 : vector<16x128xf32>
    %229 = math.tanh %228 : vector<16x128xf32>
    %230 = arith.mulf %225, %229 : vector<16x128xf32>
    %c2 = arith.constant 2 : index
    %c0_89 = arith.constant 0 : index
    %c0_90 = arith.constant 0 : index
    %231 = vector.load %arg6[%c2, %c0_89, %c0_90] : memref<8x16x128xf32, #tpu.memory_space<vmem>>, vector<1x16x128xf32>
    %232 = vector.shape_cast %231 : vector<1x16x128xf32> to vector<16x128xf32>
    %233 = vector.shape_cast %200 : vector<16x128xf32> to vector<1x16x128xf32>
    tpu.vector_store %arg6[%c2, %c0_89, %c0_90], %233 {strides = array<i32>} : memref<8x16x128xf32, #tpu.memory_space<vmem>>, vector<1x16x128xf32>,
    %c5 = arith.constant 5 : index
    %c0_91 = arith.constant 0 : index
    %c0_92 = arith.constant 0 : index
    %234 = vector.load %arg7[%c5, %c0_91, %c0_92] : memref<8x16x128xf32, #tpu.memory_space<vmem>>, vector<1x16x128xf32>
    %235 = vector.shape_cast %234 : vector<1x16x128xf32> to vector<16x128xf32>
    %236 = vector.shape_cast %230 : vector<16x128xf32> to vector<1x16x128xf32>
    tpu.vector_store %arg7[%c5, %c0_91, %c0_92], %236 {strides = array<i32>} : memref<8x16x128xf32, #tpu.memory_space<vmem>>, vector<1x16x128xf32>,
    %c0_93 = arith.constant 0 : index
    %c48 = arith.constant 48 : index
    %c0_94 = arith.constant 0 : index
    %237 = vector.load %arg10[%c0_93, %c48, %c0_94] : memref<2x128x512xf32, #tpu.memory_space<vmem>>, vector<1x16x512xf32>
    %238 = vector.shape_cast %237 : vector<1x16x512xf32> to vector<16x512xf32>
    %239 = arith.truncf %200 : vector<16x128xf32> to vector<16x128xbf16>
    %cst_95 = arith.constant dense<0.000000e+00> : vector<16x512xf32>
    %240 = tpu.matmul %239, %28, %cst_95 {dimension_numbers = #tpu.dot_dimension_numbers<[1], [0], [0], [1], [0, 0, 1, 1], [], []>} : vector<16x128xbf16>, vector<128x512xbf16>, vector<16x512xf32> -> vector<16x512xf32>
    %241 = arith.addf %238, %240 : vector<16x512xf32>
    %242 = vector.extract_strided_slice %241 {offsets = [0, 0], sizes = [16, 128], strides = [1, 1]} : vector<16x512xf32> to vector<16x128xf32>
    %243 = arith.negf %242 : vector<16x128xf32>
    %244 = math.exp %243 : vector<16x128xf32>
    %cst_96 = arith.constant 1.000000e+00 : f32
    %245 = vector.broadcast %cst_96 : f32 to vector<16x128xf32>
    %246 = arith.addf %245, %244 : vector<16x128xf32>
    %247 = arith.divf %245, %246 : vector<16x128xf32>
    %248 = vector.extract_strided_slice %241 {offsets = [0, 128], sizes = [16, 128], strides = [1, 1]} : vector<16x512xf32> to vector<16x128xf32>
    %249 = arith.negf %248 : vector<16x128xf32>
    %250 = math.exp %249 : vector<16x128xf32>
    %cst_97 = arith.constant 1.000000e+00 : f32
    %251 = vector.broadcast %cst_97 : f32 to vector<16x128xf32>
    %252 = arith.addf %251, %250 : vector<16x128xf32>
    %253 = arith.divf %251, %252 : vector<16x128xf32>
    %254 = vector.extract_strided_slice %241 {offsets = [0, 256], sizes = [16, 128], strides = [1, 1]} : vector<16x512xf32> to vector<16x128xf32>
    %255 = math.tanh %254 : vector<16x128xf32>
    %256 = vector.extract_strided_slice %241 {offsets = [0, 384], sizes = [16, 128], strides = [1, 1]} : vector<16x512xf32> to vector<16x128xf32>
    %257 = arith.negf %256 : vector<16x128xf32>
    %258 = math.exp %257 : vector<16x128xf32>
    %cst_98 = arith.constant 1.000000e+00 : f32
    %259 = vector.broadcast %cst_98 : f32 to vector<16x128xf32>
    %260 = arith.addf %259, %258 : vector<16x128xf32>
    %261 = arith.divf %259, %260 : vector<16x128xf32>
    %262 = arith.mulf %253, %198 : vector<16x128xf32>
    %263 = arith.mulf %247, %255 : vector<16x128xf32>
    %264 = arith.addf %262, %263 : vector<16x128xf32>
    %265 = math.tanh %264 : vector<16x128xf32>
    %266 = arith.mulf %261, %265 : vector<16x128xf32>
    %c1_99 = arith.constant 1 : index
    %c64 = arith.constant 64 : index
    %c0_100 = arith.constant 0 : index
    %267 = vector.load %arg10[%c1_99, %c64, %c0_100] : memref<2x128x512xf32, #tpu.memory_space<vmem>>, vector<1x16x512xf32>
    %268 = vector.shape_cast %267 : vector<1x16x512xf32> to vector<16x512xf32>
    %269 = arith.truncf %230 : vector<16x128xf32> to vector<16x128xbf16>
    %cst_101 = arith.constant dense<0.000000e+00> : vector<16x512xf32>
    %270 = tpu.matmul %269, %30, %cst_101 {dimension_numbers = #tpu.dot_dimension_numbers<[1], [0], [0], [1], [0, 0, 1, 1], [], []>} : vector<16x128xbf16>, vector<128x512xbf16>, vector<16x512xf32> -> vector<16x512xf32>
    %271 = arith.addf %268, %270 : vector<16x512xf32>
    %272 = vector.extract_strided_slice %271 {offsets = [0, 0], sizes = [16, 128], strides = [1, 1]} : vector<16x512xf32> to vector<16x128xf32>
    %273 = arith.negf %272 : vector<16x128xf32>
    %274 = math.exp %273 : vector<16x128xf32>
    %cst_102 = arith.constant 1.000000e+00 : f32
    %275 = vector.broadcast %cst_102 : f32 to vector<16x128xf32>
    %276 = arith.addf %275, %274 : vector<16x128xf32>
    %277 = arith.divf %275, %276 : vector<16x128xf32>
    %278 = vector.extract_strided_slice %271 {offsets = [0, 128], sizes = [16, 128], strides = [1, 1]} : vector<16x512xf32> to vector<16x128xf32>
    %279 = arith.negf %278 : vector<16x128xf32>
    %280 = math.exp %279 : vector<16x128xf32>
    %cst_103 = arith.constant 1.000000e+00 : f32
    %281 = vector.broadcast %cst_103 : f32 to vector<16x128xf32>
    %282 = arith.addf %281, %280 : vector<16x128xf32>
    %283 = arith.divf %281, %282 : vector<16x128xf32>
    %284 = vector.extract_strided_slice %271 {offsets = [0, 256], sizes = [16, 128], strides = [1, 1]} : vector<16x512xf32> to vector<16x128xf32>
    %285 = math.tanh %284 : vector<16x128xf32>
    %286 = vector.extract_strided_slice %271 {offsets = [0, 384], sizes = [16, 128], strides = [1, 1]} : vector<16x512xf32> to vector<16x128xf32>
    %287 = arith.negf %286 : vector<16x128xf32>
    %288 = math.exp %287 : vector<16x128xf32>
    %cst_104 = arith.constant 1.000000e+00 : f32
    %289 = vector.broadcast %cst_104 : f32 to vector<16x128xf32>
    %290 = arith.addf %289, %288 : vector<16x128xf32>
    %291 = arith.divf %289, %290 : vector<16x128xf32>
    %292 = arith.mulf %283, %228 : vector<16x128xf32>
    %293 = arith.mulf %277, %285 : vector<16x128xf32>
    %294 = arith.addf %292, %293 : vector<16x128xf32>
    %295 = math.tanh %294 : vector<16x128xf32>
    %296 = arith.mulf %291, %295 : vector<16x128xf32>
    %c3 = arith.constant 3 : index
    %c0_105 = arith.constant 0 : index
    %c0_106 = arith.constant 0 : index
    %297 = vector.load %arg6[%c3, %c0_105, %c0_106] : memref<8x16x128xf32, #tpu.memory_space<vmem>>, vector<1x16x128xf32>
    %298 = vector.shape_cast %297 : vector<1x16x128xf32> to vector<16x128xf32>
    %299 = vector.shape_cast %266 : vector<16x128xf32> to vector<1x16x128xf32>
    tpu.vector_store %arg6[%c3, %c0_105, %c0_106], %299 {strides = array<i32>} : memref<8x16x128xf32, #tpu.memory_space<vmem>>, vector<1x16x128xf32>,
    %c4 = arith.constant 4 : index
    %c0_107 = arith.constant 0 : index
    %c0_108 = arith.constant 0 : index
    %300 = vector.load %arg7[%c4, %c0_107, %c0_108] : memref<8x16x128xf32, #tpu.memory_space<vmem>>, vector<1x16x128xf32>
    %301 = vector.shape_cast %300 : vector<1x16x128xf32> to vector<16x128xf32>
    %302 = vector.shape_cast %296 : vector<16x128xf32> to vector<1x16x128xf32>
    tpu.vector_store %arg7[%c4, %c0_107, %c0_108], %302 {strides = array<i32>} : memref<8x16x128xf32, #tpu.memory_space<vmem>>, vector<1x16x128xf32>,
    %c0_109 = arith.constant 0 : index
    %c64_110 = arith.constant 64 : index
    %c0_111 = arith.constant 0 : index
    %303 = vector.load %arg10[%c0_109, %c64_110, %c0_111] : memref<2x128x512xf32, #tpu.memory_space<vmem>>, vector<1x16x512xf32>
    %304 = vector.shape_cast %303 : vector<1x16x512xf32> to vector<16x512xf32>
    %305 = arith.truncf %266 : vector<16x128xf32> to vector<16x128xbf16>
    %cst_112 = arith.constant dense<0.000000e+00> : vector<16x512xf32>
    %306 = tpu.matmul %305, %28, %cst_112 {dimension_numbers = #tpu.dot_dimension_numbers<[1], [0], [0], [1], [0, 0, 1, 1], [], []>} : vector<16x128xbf16>, vector<128x512xbf16>, vector<16x512xf32> -> vector<16x512xf32>
    %307 = arith.addf %304, %306 : vector<16x512xf32>
    %308 = vector.extract_strided_slice %307 {offsets = [0, 0], sizes = [16, 128], strides = [1, 1]} : vector<16x512xf32> to vector<16x128xf32>
    %309 = arith.negf %308 : vector<16x128xf32>
    %310 = math.exp %309 : vector<16x128xf32>
    %cst_113 = arith.constant 1.000000e+00 : f32
    %311 = vector.broadcast %cst_113 : f32 to vector<16x128xf32>
    %312 = arith.addf %311, %310 : vector<16x128xf32>
    %313 = arith.divf %311, %312 : vector<16x128xf32>
    %314 = vector.extract_strided_slice %307 {offsets = [0, 128], sizes = [16, 128], strides = [1, 1]} : vector<16x512xf32> to vector<16x128xf32>
    %315 = arith.negf %314 : vector<16x128xf32>
    %316 = math.exp %315 : vector<16x128xf32>
    %cst_114 = arith.constant 1.000000e+00 : f32
    %317 = vector.broadcast %cst_114 : f32 to vector<16x128xf32>
    %318 = arith.addf %317, %316 : vector<16x128xf32>
    %319 = arith.divf %317, %318 : vector<16x128xf32>
    %320 = vector.extract_strided_slice %307 {offsets = [0, 256], sizes = [16, 128], strides = [1, 1]} : vector<16x512xf32> to vector<16x128xf32>
    %321 = math.tanh %320 : vector<16x128xf32>
    %322 = vector.extract_strided_slice %307 {offsets = [0, 384], sizes = [16, 128], strides = [1, 1]} : vector<16x512xf32> to vector<16x128xf32>
    %323 = arith.negf %322 : vector<16x128xf32>
    %324 = math.exp %323 : vector<16x128xf32>
    %cst_115 = arith.constant 1.000000e+00 : f32
    %325 = vector.broadcast %cst_115 : f32 to vector<16x128xf32>
    %326 = arith.addf %325, %324 : vector<16x128xf32>
    %327 = arith.divf %325, %326 : vector<16x128xf32>
    %328 = arith.mulf %319, %264 : vector<16x128xf32>
    %329 = arith.mulf %313, %321 : vector<16x128xf32>
    %330 = arith.addf %328, %329 : vector<16x128xf32>
    %331 = math.tanh %330 : vector<16x128xf32>
    %332 = arith.mulf %327, %331 : vector<16x128xf32>
    %c1_116 = arith.constant 1 : index
    %c48_117 = arith.constant 48 : index
    %c0_118 = arith.constant 0 : index
    %333 = vector.load %arg10[%c1_116, %c48_117, %c0_118] : memref<2x128x512xf32, #tpu.memory_space<vmem>>, vector<1x16x512xf32>
    %334 = vector.shape_cast %333 : vector<1x16x512xf32> to vector<16x512xf32>
    %335 = arith.truncf %296 : vector<16x128xf32> to vector<16x128xbf16>
    %cst_119 = arith.constant dense<0.000000e+00> : vector<16x512xf32>
    %336 = tpu.matmul %335, %30, %cst_119 {dimension_numbers = #tpu.dot_dimension_numbers<[1], [0], [0], [1], [0, 0, 1, 1], [], []>} : vector<16x128xbf16>, vector<128x512xbf16>, vector<16x512xf32> -> vector<16x512xf32>
    %337 = arith.addf %334, %336 : vector<16x512xf32>
    %338 = vector.extract_strided_slice %337 {offsets = [0, 0], sizes = [16, 128], strides = [1, 1]} : vector<16x512xf32> to vector<16x128xf32>
    %339 = arith.negf %338 : vector<16x128xf32>
    %340 = math.exp %339 : vector<16x128xf32>
    %cst_120 = arith.constant 1.000000e+00 : f32
    %341 = vector.broadcast %cst_120 : f32 to vector<16x128xf32>
    %342 = arith.addf %341, %340 : vector<16x128xf32>
    %343 = arith.divf %341, %342 : vector<16x128xf32>
    %344 = vector.extract_strided_slice %337 {offsets = [0, 128], sizes = [16, 128], strides = [1, 1]} : vector<16x512xf32> to vector<16x128xf32>
    %345 = arith.negf %344 : vector<16x128xf32>
    %346 = math.exp %345 : vector<16x128xf32>
    %cst_121 = arith.constant 1.000000e+00 : f32
    %347 = vector.broadcast %cst_121 : f32 to vector<16x128xf32>
    %348 = arith.addf %347, %346 : vector<16x128xf32>
    %349 = arith.divf %347, %348 : vector<16x128xf32>
    %350 = vector.extract_strided_slice %337 {offsets = [0, 256], sizes = [16, 128], strides = [1, 1]} : vector<16x512xf32> to vector<16x128xf32>
    %351 = math.tanh %350 : vector<16x128xf32>
    %352 = vector.extract_strided_slice %337 {offsets = [0, 384], sizes = [16, 128], strides = [1, 1]} : vector<16x512xf32> to vector<16x128xf32>
    %353 = arith.negf %352 : vector<16x128xf32>
    %354 = math.exp %353 : vector<16x128xf32>
    %cst_122 = arith.constant 1.000000e+00 : f32
    %355 = vector.broadcast %cst_122 : f32 to vector<16x128xf32>
    %356 = arith.addf %355, %354 : vector<16x128xf32>
    %357 = arith.divf %355, %356 : vector<16x128xf32>
    %358 = arith.mulf %349, %294 : vector<16x128xf32>
    %359 = arith.mulf %343, %351 : vector<16x128xf32>
    %360 = arith.addf %358, %359 : vector<16x128xf32>
    %361 = math.tanh %360 : vector<16x128xf32>
    %362 = arith.mulf %357, %361 : vector<16x128xf32>
    %c4_123 = arith.constant 4 : index
    %c0_124 = arith.constant 0 : index
    %c0_125 = arith.constant 0 : index
    %363 = vector.load %arg6[%c4_123, %c0_124, %c0_125] : memref<8x16x128xf32, #tpu.memory_space<vmem>>, vector<1x16x128xf32>
    %364 = vector.shape_cast %363 : vector<1x16x128xf32> to vector<16x128xf32>
    %365 = vector.shape_cast %332 : vector<16x128xf32> to vector<1x16x128xf32>
    tpu.vector_store %arg6[%c4_123, %c0_124, %c0_125], %365 {strides = array<i32>} : memref<8x16x128xf32, #tpu.memory_space<vmem>>, vector<1x16x128xf32>,
    %c3_126 = arith.constant 3 : index
    %c0_127 = arith.constant 0 : index
    %c0_128 = arith.constant 0 : index
    %366 = vector.load %arg7[%c3_126, %c0_127, %c0_128] : memref<8x16x128xf32, #tpu.memory_space<vmem>>, vector<1x16x128xf32>
    %367 = vector.shape_cast %366 : vector<1x16x128xf32> to vector<16x128xf32>
    %368 = vector.shape_cast %362 : vector<16x128xf32> to vector<1x16x128xf32>
    tpu.vector_store %arg7[%c3_126, %c0_127, %c0_128], %368 {strides = array<i32>} : memref<8x16x128xf32, #tpu.memory_space<vmem>>, vector<1x16x128xf32>,
    %c0_129 = arith.constant 0 : index
    %c80_130 = arith.constant 80 : index
    %c0_131 = arith.constant 0 : index
    %369 = vector.load %arg10[%c0_129, %c80_130, %c0_131] : memref<2x128x512xf32, #tpu.memory_space<vmem>>, vector<1x16x512xf32>
    %370 = vector.shape_cast %369 : vector<1x16x512xf32> to vector<16x512xf32>
    %371 = arith.truncf %332 : vector<16x128xf32> to vector<16x128xbf16>
    %cst_132 = arith.constant dense<0.000000e+00> : vector<16x512xf32>
    %372 = tpu.matmul %371, %28, %cst_132 {dimension_numbers = #tpu.dot_dimension_numbers<[1], [0], [0], [1], [0, 0, 1, 1], [], []>} : vector<16x128xbf16>, vector<128x512xbf16>, vector<16x512xf32> -> vector<16x512xf32>
    %373 = arith.addf %370, %372 : vector<16x512xf32>
    %374 = vector.extract_strided_slice %373 {offsets = [0, 0], sizes = [16, 128], strides = [1, 1]} : vector<16x512xf32> to vector<16x128xf32>
    %375 = arith.negf %374 : vector<16x128xf32>
    %376 = math.exp %375 : vector<16x128xf32>
    %cst_133 = arith.constant 1.000000e+00 : f32
    %377 = vector.broadcast %cst_133 : f32 to vector<16x128xf32>
    %378 = arith.addf %377, %376 : vector<16x128xf32>
    %379 = arith.divf %377, %378 : vector<16x128xf32>
    %380 = vector.extract_strided_slice %373 {offsets = [0, 128], sizes = [16, 128], strides = [1, 1]} : vector<16x512xf32> to vector<16x128xf32>
    %381 = arith.negf %380 : vector<16x128xf32>
    %382 = math.exp %381 : vector<16x128xf32>
    %cst_134 = arith.constant 1.000000e+00 : f32
    %383 = vector.broadcast %cst_134 : f32 to vector<16x128xf32>
    %384 = arith.addf %383, %382 : vector<16x128xf32>
    %385 = arith.divf %383, %384 : vector<16x128xf32>
    %386 = vector.extract_strided_slice %373 {offsets = [0, 256], sizes = [16, 128], strides = [1, 1]} : vector<16x512xf32> to vector<16x128xf32>
    %387 = math.tanh %386 : vector<16x128xf32>
    %388 = vector.extract_strided_slice %373 {offsets = [0, 384], sizes = [16, 128], strides = [1, 1]} : vector<16x512xf32> to vector<16x128xf32>
    %389 = arith.negf %388 : vector<16x128xf32>
    %390 = math.exp %389 : vector<16x128xf32>
    %cst_135 = arith.constant 1.000000e+00 : f32
    %391 = vector.broadcast %cst_135 : f32 to vector<16x128xf32>
    %392 = arith.addf %391, %390 : vector<16x128xf32>
    %393 = arith.divf %391, %392 : vector<16x128xf32>
    %394 = arith.mulf %385, %330 : vector<16x128xf32>
    %395 = arith.mulf %379, %387 : vector<16x128xf32>
    %396 = arith.addf %394, %395 : vector<16x128xf32>
    %397 = math.tanh %396 : vector<16x128xf32>
    %398 = arith.mulf %393, %397 : vector<16x128xf32>
    %c1_136 = arith.constant 1 : index
    %c32_137 = arith.constant 32 : index
    %c0_138 = arith.constant 0 : index
    %399 = vector.load %arg10[%c1_136, %c32_137, %c0_138] : memref<2x128x512xf32, #tpu.memory_space<vmem>>, vector<1x16x512xf32>
    %400 = vector.shape_cast %399 : vector<1x16x512xf32> to vector<16x512xf32>
    %401 = arith.truncf %362 : vector<16x128xf32> to vector<16x128xbf16>
    %cst_139 = arith.constant dense<0.000000e+00> : vector<16x512xf32>
    %402 = tpu.matmul %401, %30, %cst_139 {dimension_numbers = #tpu.dot_dimension_numbers<[1], [0], [0], [1], [0, 0, 1, 1], [], []>} : vector<16x128xbf16>, vector<128x512xbf16>, vector<16x512xf32> -> vector<16x512xf32>
    %403 = arith.addf %400, %402 : vector<16x512xf32>
    %404 = vector.extract_strided_slice %403 {offsets = [0, 0], sizes = [16, 128], strides = [1, 1]} : vector<16x512xf32> to vector<16x128xf32>
    %405 = arith.negf %404 : vector<16x128xf32>
    %406 = math.exp %405 : vector<16x128xf32>
    %cst_140 = arith.constant 1.000000e+00 : f32
    %407 = vector.broadcast %cst_140 : f32 to vector<16x128xf32>
    %408 = arith.addf %407, %406 : vector<16x128xf32>
    %409 = arith.divf %407, %408 : vector<16x128xf32>
    %410 = vector.extract_strided_slice %403 {offsets = [0, 128], sizes = [16, 128], strides = [1, 1]} : vector<16x512xf32> to vector<16x128xf32>
    %411 = arith.negf %410 : vector<16x128xf32>
    %412 = math.exp %411 : vector<16x128xf32>
    %cst_141 = arith.constant 1.000000e+00 : f32
    %413 = vector.broadcast %cst_141 : f32 to vector<16x128xf32>
    %414 = arith.addf %413, %412 : vector<16x128xf32>
    %415 = arith.divf %413, %414 : vector<16x128xf32>
    %416 = vector.extract_strided_slice %403 {offsets = [0, 256], sizes = [16, 128], strides = [1, 1]} : vector<16x512xf32> to vector<16x128xf32>
    %417 = math.tanh %416 : vector<16x128xf32>
    %418 = vector.extract_strided_slice %403 {offsets = [0, 384], sizes = [16, 128], strides = [1, 1]} : vector<16x512xf32> to vector<16x128xf32>
    %419 = arith.negf %418 : vector<16x128xf32>
    %420 = math.exp %419 : vector<16x128xf32>
    %cst_142 = arith.constant 1.000000e+00 : f32
    %421 = vector.broadcast %cst_142 : f32 to vector<16x128xf32>
    %422 = arith.addf %421, %420 : vector<16x128xf32>
    %423 = arith.divf %421, %422 : vector<16x128xf32>
    %424 = arith.mulf %415, %360 : vector<16x128xf32>
    %425 = arith.mulf %409, %417 : vector<16x128xf32>
    %426 = arith.addf %424, %425 : vector<16x128xf32>
    %427 = math.tanh %426 : vector<16x128xf32>
    %428 = arith.mulf %423, %427 : vector<16x128xf32>
    %c5_143 = arith.constant 5 : index
    %c0_144 = arith.constant 0 : index
    %c0_145 = arith.constant 0 : index
    %429 = vector.load %arg6[%c5_143, %c0_144, %c0_145] : memref<8x16x128xf32, #tpu.memory_space<vmem>>, vector<1x16x128xf32>
    %430 = vector.shape_cast %429 : vector<1x16x128xf32> to vector<16x128xf32>
    %431 = vector.shape_cast %398 : vector<16x128xf32> to vector<1x16x128xf32>
    tpu.vector_store %arg6[%c5_143, %c0_144, %c0_145], %431 {strides = array<i32>} : memref<8x16x128xf32, #tpu.memory_space<vmem>>, vector<1x16x128xf32>,
    %c2_146 = arith.constant 2 : index
    %c0_147 = arith.constant 0 : index
    %c0_148 = arith.constant 0 : index
    %432 = vector.load %arg7[%c2_146, %c0_147, %c0_148] : memref<8x16x128xf32, #tpu.memory_space<vmem>>, vector<1x16x128xf32>
    %433 = vector.shape_cast %432 : vector<1x16x128xf32> to vector<16x128xf32>
    %434 = vector.shape_cast %428 : vector<16x128xf32> to vector<1x16x128xf32>
    tpu.vector_store %arg7[%c2_146, %c0_147, %c0_148], %434 {strides = array<i32>} : memref<8x16x128xf32, #tpu.memory_space<vmem>>, vector<1x16x128xf32>,
    %c0_149 = arith.constant 0 : index
    %c96_150 = arith.constant 96 : index
    %c0_151 = arith.constant 0 : index
    %435 = vector.load %arg10[%c0_149, %c96_150, %c0_151] : memref<2x128x512xf32, #tpu.memory_space<vmem>>, vector<1x16x512xf32>
    %436 = vector.shape_cast %435 : vector<1x16x512xf32> to vector<16x512xf32>
    %437 = arith.truncf %398 : vector<16x128xf32> to vector<16x128xbf16>
    %cst_152 = arith.constant dense<0.000000e+00> : vector<16x512xf32>
    %438 = tpu.matmul %437, %28, %cst_152 {dimension_numbers = #tpu.dot_dimension_numbers<[1], [0], [0], [1], [0, 0, 1, 1], [], []>} : vector<16x128xbf16>, vector<128x512xbf16>, vector<16x512xf32> -> vector<16x512xf32>
    %439 = arith.addf %436, %438 : vector<16x512xf32>
    %440 = vector.extract_strided_slice %439 {offsets = [0, 0], sizes = [16, 128], strides = [1, 1]} : vector<16x512xf32> to vector<16x128xf32>
    %441 = arith.negf %440 : vector<16x128xf32>
    %442 = math.exp %441 : vector<16x128xf32>
    %cst_153 = arith.constant 1.000000e+00 : f32
    %443 = vector.broadcast %cst_153 : f32 to vector<16x128xf32>
    %444 = arith.addf %443, %442 : vector<16x128xf32>
    %445 = arith.divf %443, %444 : vector<16x128xf32>
    %446 = vector.extract_strided_slice %439 {offsets = [0, 128], sizes = [16, 128], strides = [1, 1]} : vector<16x512xf32> to vector<16x128xf32>
    %447 = arith.negf %446 : vector<16x128xf32>
    %448 = math.exp %447 : vector<16x128xf32>
    %cst_154 = arith.constant 1.000000e+00 : f32
    %449 = vector.broadcast %cst_154 : f32 to vector<16x128xf32>
    %450 = arith.addf %449, %448 : vector<16x128xf32>
    %451 = arith.divf %449, %450 : vector<16x128xf32>
    %452 = vector.extract_strided_slice %439 {offsets = [0, 256], sizes = [16, 128], strides = [1, 1]} : vector<16x512xf32> to vector<16x128xf32>
    %453 = math.tanh %452 : vector<16x128xf32>
    %454 = vector.extract_strided_slice %439 {offsets = [0, 384], sizes = [16, 128], strides = [1, 1]} : vector<16x512xf32> to vector<16x128xf32>
    %455 = arith.negf %454 : vector<16x128xf32>
    %456 = math.exp %455 : vector<16x128xf32>
    %cst_155 = arith.constant 1.000000e+00 : f32
    %457 = vector.broadcast %cst_155 : f32 to vector<16x128xf32>
    %458 = arith.addf %457, %456 : vector<16x128xf32>
    %459 = arith.divf %457, %458 : vector<16x128xf32>
    %460 = arith.mulf %451, %396 : vector<16x128xf32>
    %461 = arith.mulf %445, %453 : vector<16x128xf32>
    %462 = arith.addf %460, %461 : vector<16x128xf32>
    %463 = math.tanh %462 : vector<16x128xf32>
    %464 = arith.mulf %459, %463 : vector<16x128xf32>
    %c1_156 = arith.constant 1 : index
    %c16_157 = arith.constant 16 : index
    %c0_158 = arith.constant 0 : index
    %465 = vector.load %arg10[%c1_156, %c16_157, %c0_158] : memref<2x128x512xf32, #tpu.memory_space<vmem>>, vector<1x16x512xf32>
    %466 = vector.shape_cast %465 : vector<1x16x512xf32> to vector<16x512xf32>
    %467 = arith.truncf %428 : vector<16x128xf32> to vector<16x128xbf16>
    %cst_159 = arith.constant dense<0.000000e+00> : vector<16x512xf32>
    %468 = tpu.matmul %467, %30, %cst_159 {dimension_numbers = #tpu.dot_dimension_numbers<[1], [0], [0], [1], [0, 0, 1, 1], [], []>} : vector<16x128xbf16>, vector<128x512xbf16>, vector<16x512xf32> -> vector<16x512xf32>
    %469 = arith.addf %466, %468 : vector<16x512xf32>
    %470 = vector.extract_strided_slice %469 {offsets = [0, 0], sizes = [16, 128], strides = [1, 1]} : vector<16x512xf32> to vector<16x128xf32>
    %471 = arith.negf %470 : vector<16x128xf32>
    %472 = math.exp %471 : vector<16x128xf32>
    %cst_160 = arith.constant 1.000000e+00 : f32
    %473 = vector.broadcast %cst_160 : f32 to vector<16x128xf32>
    %474 = arith.addf %473, %472 : vector<16x128xf32>
    %475 = arith.divf %473, %474 : vector<16x128xf32>
    %476 = vector.extract_strided_slice %469 {offsets = [0, 128], sizes = [16, 128], strides = [1, 1]} : vector<16x512xf32> to vector<16x128xf32>
    %477 = arith.negf %476 : vector<16x128xf32>
    %478 = math.exp %477 : vector<16x128xf32>
    %cst_161 = arith.constant 1.000000e+00 : f32
    %479 = vector.broadcast %cst_161 : f32 to vector<16x128xf32>
    %480 = arith.addf %479, %478 : vector<16x128xf32>
    %481 = arith.divf %479, %480 : vector<16x128xf32>
    %482 = vector.extract_strided_slice %469 {offsets = [0, 256], sizes = [16, 128], strides = [1, 1]} : vector<16x512xf32> to vector<16x128xf32>
    %483 = math.tanh %482 : vector<16x128xf32>
    %484 = vector.extract_strided_slice %469 {offsets = [0, 384], sizes = [16, 128], strides = [1, 1]} : vector<16x512xf32> to vector<16x128xf32>
    %485 = arith.negf %484 : vector<16x128xf32>
    %486 = math.exp %485 : vector<16x128xf32>
    %cst_162 = arith.constant 1.000000e+00 : f32
    %487 = vector.broadcast %cst_162 : f32 to vector<16x128xf32>
    %488 = arith.addf %487, %486 : vector<16x128xf32>
    %489 = arith.divf %487, %488 : vector<16x128xf32>
    %490 = arith.mulf %481, %426 : vector<16x128xf32>
    %491 = arith.mulf %475, %483 : vector<16x128xf32>
    %492 = arith.addf %490, %491 : vector<16x128xf32>
    %493 = math.tanh %492 : vector<16x128xf32>
    %494 = arith.mulf %489, %493 : vector<16x128xf32>
    %c6_163 = arith.constant 6 : index
    %c0_164 = arith.constant 0 : index
    %c0_165 = arith.constant 0 : index
    %495 = vector.load %arg6[%c6_163, %c0_164, %c0_165] : memref<8x16x128xf32, #tpu.memory_space<vmem>>, vector<1x16x128xf32>
    %496 = vector.shape_cast %495 : vector<1x16x128xf32> to vector<16x128xf32>
    %497 = vector.shape_cast %464 : vector<16x128xf32> to vector<1x16x128xf32>
    tpu.vector_store %arg6[%c6_163, %c0_164, %c0_165], %497 {strides = array<i32>} : memref<8x16x128xf32, #tpu.memory_space<vmem>>, vector<1x16x128xf32>,
    %c1_166 = arith.constant 1 : index
    %c0_167 = arith.constant 0 : index
    %c0_168 = arith.constant 0 : index
    %498 = vector.load %arg7[%c1_166, %c0_167, %c0_168] : memref<8x16x128xf32, #tpu.memory_space<vmem>>, vector<1x16x128xf32>
    %499 = vector.shape_cast %498 : vector<1x16x128xf32> to vector<16x128xf32>
    %500 = vector.shape_cast %494 : vector<16x128xf32> to vector<1x16x128xf32>
    tpu.vector_store %arg7[%c1_166, %c0_167, %c0_168], %500 {strides = array<i32>} : memref<8x16x128xf32, #tpu.memory_space<vmem>>, vector<1x16x128xf32>,
    %c0_169 = arith.constant 0 : index
    %c112_170 = arith.constant 112 : index
    %c0_171 = arith.constant 0 : index
    %501 = vector.load %arg10[%c0_169, %c112_170, %c0_171] : memref<2x128x512xf32, #tpu.memory_space<vmem>>, vector<1x16x512xf32>
    %502 = vector.shape_cast %501 : vector<1x16x512xf32> to vector<16x512xf32>
    %503 = arith.truncf %464 : vector<16x128xf32> to vector<16x128xbf16>
    %cst_172 = arith.constant dense<0.000000e+00> : vector<16x512xf32>
    %504 = tpu.matmul %503, %28, %cst_172 {dimension_numbers = #tpu.dot_dimension_numbers<[1], [0], [0], [1], [0, 0, 1, 1], [], []>} : vector<16x128xbf16>, vector<128x512xbf16>, vector<16x512xf32> -> vector<16x512xf32>
    %505 = arith.addf %502, %504 : vector<16x512xf32>
    %506 = vector.extract_strided_slice %505 {offsets = [0, 0], sizes = [16, 128], strides = [1, 1]} : vector<16x512xf32> to vector<16x128xf32>
    %507 = arith.negf %506 : vector<16x128xf32>
    %508 = math.exp %507 : vector<16x128xf32>
    %cst_173 = arith.constant 1.000000e+00 : f32
    %509 = vector.broadcast %cst_173 : f32 to vector<16x128xf32>
    %510 = arith.addf %509, %508 : vector<16x128xf32>
    %511 = arith.divf %509, %510 : vector<16x128xf32>
    %512 = vector.extract_strided_slice %505 {offsets = [0, 128], sizes = [16, 128], strides = [1, 1]} : vector<16x512xf32> to vector<16x128xf32>
    %513 = arith.negf %512 : vector<16x128xf32>
    %514 = math.exp %513 : vector<16x128xf32>
    %cst_174 = arith.constant 1.000000e+00 : f32
    %515 = vector.broadcast %cst_174 : f32 to vector<16x128xf32>
    %516 = arith.addf %515, %514 : vector<16x128xf32>
    %517 = arith.divf %515, %516 : vector<16x128xf32>
    %518 = vector.extract_strided_slice %505 {offsets = [0, 256], sizes = [16, 128], strides = [1, 1]} : vector<16x512xf32> to vector<16x128xf32>
    %519 = math.tanh %518 : vector<16x128xf32>
    %520 = vector.extract_strided_slice %505 {offsets = [0, 384], sizes = [16, 128], strides = [1, 1]} : vector<16x512xf32> to vector<16x128xf32>
    %521 = arith.negf %520 : vector<16x128xf32>
    %522 = math.exp %521 : vector<16x128xf32>
    %cst_175 = arith.constant 1.000000e+00 : f32
    %523 = vector.broadcast %cst_175 : f32 to vector<16x128xf32>
    %524 = arith.addf %523, %522 : vector<16x128xf32>
    %525 = arith.divf %523, %524 : vector<16x128xf32>
    %526 = arith.mulf %517, %462 : vector<16x128xf32>
    %527 = arith.mulf %511, %519 : vector<16x128xf32>
    %528 = arith.addf %526, %527 : vector<16x128xf32>
    %529 = math.tanh %528 : vector<16x128xf32>
    %530 = arith.mulf %525, %529 : vector<16x128xf32>
    %c1_176 = arith.constant 1 : index
    %c0_177 = arith.constant 0 : index
    %c0_178 = arith.constant 0 : index
    %531 = vector.load %arg10[%c1_176, %c0_177, %c0_178] : memref<2x128x512xf32, #tpu.memory_space<vmem>>, vector<1x16x512xf32>
    %532 = vector.shape_cast %531 : vector<1x16x512xf32> to vector<16x512xf32>
    %533 = arith.truncf %494 : vector<16x128xf32> to vector<16x128xbf16>
    %cst_179 = arith.constant dense<0.000000e+00> : vector<16x512xf32>
    %534 = tpu.matmul %533, %30, %cst_179 {dimension_numbers = #tpu.dot_dimension_numbers<[1], [0], [0], [1], [0, 0, 1, 1], [], []>} : vector<16x128xbf16>, vector<128x512xbf16>, vector<16x512xf32> -> vector<16x512xf32>
    %535 = arith.addf %532, %534 : vector<16x512xf32>
    %536 = vector.extract_strided_slice %535 {offsets = [0, 0], sizes = [16, 128], strides = [1, 1]} : vector<16x512xf32> to vector<16x128xf32>
    %537 = arith.negf %536 : vector<16x128xf32>
    %538 = math.exp %537 : vector<16x128xf32>
    %cst_180 = arith.constant 1.000000e+00 : f32
    %539 = vector.broadcast %cst_180 : f32 to vector<16x128xf32>
    %540 = arith.addf %539, %538 : vector<16x128xf32>
    %541 = arith.divf %539, %540 : vector<16x128xf32>
    %542 = vector.extract_strided_slice %535 {offsets = [0, 128], sizes = [16, 128], strides = [1, 1]} : vector<16x512xf32> to vector<16x128xf32>
    %543 = arith.negf %542 : vector<16x128xf32>
    %544 = math.exp %543 : vector<16x128xf32>
    %cst_181 = arith.constant 1.000000e+00 : f32
    %545 = vector.broadcast %cst_181 : f32 to vector<16x128xf32>
    %546 = arith.addf %545, %544 : vector<16x128xf32>
    %547 = arith.divf %545, %546 : vector<16x128xf32>
    %548 = vector.extract_strided_slice %535 {offsets = [0, 256], sizes = [16, 128], strides = [1, 1]} : vector<16x512xf32> to vector<16x128xf32>
    %549 = math.tanh %548 : vector<16x128xf32>
    %550 = vector.extract_strided_slice %535 {offsets = [0, 384], sizes = [16, 128], strides = [1, 1]} : vector<16x512xf32> to vector<16x128xf32>
    %551 = arith.negf %550 : vector<16x128xf32>
    %552 = math.exp %551 : vector<16x128xf32>
    %cst_182 = arith.constant 1.000000e+00 : f32
    %553 = vector.broadcast %cst_182 : f32 to vector<16x128xf32>
    %554 = arith.addf %553, %552 : vector<16x128xf32>
    %555 = arith.divf %553, %554 : vector<16x128xf32>
    %556 = arith.mulf %547, %492 : vector<16x128xf32>
    %557 = arith.mulf %541, %549 : vector<16x128xf32>
    %558 = arith.addf %556, %557 : vector<16x128xf32>
    %559 = math.tanh %558 : vector<16x128xf32>
    %560 = arith.mulf %555, %559 : vector<16x128xf32>
    %c7_183 = arith.constant 7 : index
    %c0_184 = arith.constant 0 : index
    %c0_185 = arith.constant 0 : index
    %561 = vector.load %arg6[%c7_183, %c0_184, %c0_185] : memref<8x16x128xf32, #tpu.memory_space<vmem>>, vector<1x16x128xf32>
    %562 = vector.shape_cast %561 : vector<1x16x128xf32> to vector<16x128xf32>
    %563 = vector.shape_cast %530 : vector<16x128xf32> to vector<1x16x128xf32>
    tpu.vector_store %arg6[%c7_183, %c0_184, %c0_185], %563 {strides = array<i32>} : memref<8x16x128xf32, #tpu.memory_space<vmem>>, vector<1x16x128xf32>,
    %c0_186 = arith.constant 0 : index
    %c0_187 = arith.constant 0 : index
    %c0_188 = arith.constant 0 : index
    %564 = vector.load %arg7[%c0_186, %c0_187, %c0_188] : memref<8x16x128xf32, #tpu.memory_space<vmem>>, vector<1x16x128xf32>
    %565 = vector.shape_cast %564 : vector<1x16x128xf32> to vector<16x128xf32>
    %566 = vector.shape_cast %560 : vector<16x128xf32> to vector<1x16x128xf32>
    tpu.vector_store %arg7[%c0_186, %c0_187, %c0_188], %566 {strides = array<i32>} : memref<8x16x128xf32, #tpu.memory_space<vmem>>, vector<1x16x128xf32>,
    %c0_i32_189 = arith.constant 0 : i32
    %567 = arith.cmpi eq, %arg0, %c0_i32_189 : i32
    %568 = arith.extui %567 : i1 to i32
    %c0_i32_190 = arith.constant 0 : i32
    %569 = arith.cmpi ne, %568, %c0_i32_190 : i32
    scf.if %569 {
      %c0_205 = arith.constant 0 : index
      %c0_206 = arith.constant 0 : index
      %c0_207 = arith.constant 0 : index
      %585 = vector.load %arg8[%c0_205, %c0_206, %c0_207] : memref<2x16x128xf32, #tpu.memory_space<vmem>>, vector<1x16x128xf32>
      %586 = vector.shape_cast %585 : vector<1x16x128xf32> to vector<16x128xf32>
      %587 = vector.shape_cast %530 : vector<16x128xf32> to vector<1x16x128xf32>
      tpu.vector_store %arg8[%c0_205, %c0_206, %c0_207], %587 {strides = array<i32>} : memref<2x16x128xf32, #tpu.memory_space<vmem>>, vector<1x16x128xf32>,
      %c0_208 = arith.constant 0 : index
      %c0_209 = arith.constant 0 : index
      %c0_210 = arith.constant 0 : index
      %588 = vector.load %arg9[%c0_208, %c0_209, %c0_210] : memref<2x16x128xf32, #tpu.memory_space<vmem>>, vector<1x16x128xf32>
      %589 = vector.shape_cast %588 : vector<1x16x128xf32> to vector<16x128xf32>
      %590 = vector.shape_cast %528 : vector<16x128xf32> to vector<1x16x128xf32>
      tpu.vector_store %arg9[%c0_208, %c0_209, %c0_210], %590 {strides = array<i32>} : memref<2x16x128xf32, #tpu.memory_space<vmem>>, vector<1x16x128xf32>,
    } else {
    }
    %c0_i32_191 = arith.constant 0 : i32
    %570 = arith.cmpi eq, %arg0, %c0_i32_191 : i32
    %571 = arith.extui %570 : i1 to i32
    %c0_i32_192 = arith.constant 0 : i32
    %572 = arith.cmpi ne, %571, %c0_i32_192 : i32
    scf.if %572 {
      %c1_205 = arith.constant 1 : index
      %c0_206 = arith.constant 0 : index
      %c0_207 = arith.constant 0 : index
      %585 = vector.load %arg8[%c1_205, %c0_206, %c0_207] : memref<2x16x128xf32, #tpu.memory_space<vmem>>, vector<1x16x128xf32>
      %586 = vector.shape_cast %585 : vector<1x16x128xf32> to vector<16x128xf32>
      %587 = vector.shape_cast %560 : vector<16x128xf32> to vector<1x16x128xf32>
      tpu.vector_store %arg8[%c1_205, %c0_206, %c0_207], %587 {strides = array<i32>} : memref<2x16x128xf32, #tpu.memory_space<vmem>>, vector<1x16x128xf32>,
      %c1_208 = arith.constant 1 : index
      %c0_209 = arith.constant 0 : index
      %c0_210 = arith.constant 0 : index
      %588 = vector.load %arg9[%c1_208, %c0_209, %c0_210] : memref<2x16x128xf32, #tpu.memory_space<vmem>>, vector<1x16x128xf32>
      %589 = vector.shape_cast %588 : vector<1x16x128xf32> to vector<16x128xf32>
      %590 = vector.shape_cast %558 : vector<16x128xf32> to vector<1x16x128xf32>
      tpu.vector_store %arg9[%c1_208, %c0_209, %c0_210], %590 {strides = array<i32>} : memref<2x16x128xf32, #tpu.memory_space<vmem>>, vector<1x16x128xf32>,
    } else {
    }
    %c0_193 = arith.constant 0 : index
    %c0_194 = arith.constant 0 : index
    %c0_195 = arith.constant 0 : index
    %573 = vector.load %arg11[%c0_193, %c0_194, %c0_195] : memref<2x16x128xf32, #tpu.memory_space<vmem>>, vector<1x16x128xf32>
    %574 = vector.shape_cast %573 : vector<1x16x128xf32> to vector<16x128xf32>
    %575 = vector.shape_cast %530 : vector<16x128xf32> to vector<1x16x128xf32>
    tpu.vector_store %arg11[%c0_193, %c0_194, %c0_195], %575 {strides = array<i32>} : memref<2x16x128xf32, #tpu.memory_space<vmem>>, vector<1x16x128xf32>,
    %c1_196 = arith.constant 1 : index
    %c0_197 = arith.constant 0 : index
    %c0_198 = arith.constant 0 : index
    %576 = vector.load %arg11[%c1_196, %c0_197, %c0_198] : memref<2x16x128xf32, #tpu.memory_space<vmem>>, vector<1x16x128xf32>
    %577 = vector.shape_cast %576 : vector<1x16x128xf32> to vector<16x128xf32>
    %578 = vector.shape_cast %560 : vector<16x128xf32> to vector<1x16x128xf32>
    tpu.vector_store %arg11[%c1_196, %c0_197, %c0_198], %578 {strides = array<i32>} : memref<2x16x128xf32, #tpu.memory_space<vmem>>, vector<1x16x128xf32>,
    %c0_199 = arith.constant 0 : index
    %c0_200 = arith.constant 0 : index
    %c0_201 = arith.constant 0 : index
    %579 = vector.load %arg12[%c0_199, %c0_200, %c0_201] : memref<2x16x128xf32, #tpu.memory_space<vmem>>, vector<1x16x128xf32>
    %580 = vector.shape_cast %579 : vector<1x16x128xf32> to vector<16x128xf32>
    %581 = vector.shape_cast %528 : vector<16x128xf32> to vector<1x16x128xf32>
    tpu.vector_store %arg12[%c0_199, %c0_200, %c0_201], %581 {strides = array<i32>} : memref<2x16x128xf32, #tpu.memory_space<vmem>>, vector<1x16x128xf32>,
    %c1_202 = arith.constant 1 : index
    %c0_203 = arith.constant 0 : index
    %c0_204 = arith.constant 0 : index
    %582 = vector.load %arg12[%c1_202, %c0_203, %c0_204] : memref<2x16x128xf32, #tpu.memory_space<vmem>>, vector<1x16x128xf32>
    %583 = vector.shape_cast %582 : vector<1x16x128xf32> to vector<16x128xf32>
    %584 = vector.shape_cast %558 : vector<16x128xf32> to vector<1x16x128xf32>
    tpu.vector_store %arg12[%c1_202, %c0_203, %c0_204], %584 {strides = array<i32>} : memref<2x16x128xf32, #tpu.memory_space<vmem>>, vector<1x16x128xf32>,
    return
  }
  func.func @transform_0(%arg0: i32) -> (i32, i32, i32) {
    %c0_i32 = arith.constant 0 : i32
    %c0_i32_0 = arith.constant 0 : i32
    %c0_i32_1 = arith.constant 0 : i32
    return %arg0, %c0_i32, %c0_i32_0 : i32, i32, i32
  }
  func.func @transform_1(%arg0: i32) -> (i32, i32, i32) {
    %c0_i32 = arith.constant 0 : i32
    %0 = arith.subi %c0_i32, %arg0 : i32
    %c0_i32_0 = arith.constant 0 : i32
    %c0_i32_1 = arith.constant 0 : i32
    %c0_i32_2 = arith.constant 0 : i32
    return %0, %c0_i32_0, %c0_i32_1 : i32, i32, i32
  }
  func.func @transform_2(%arg0: i32) -> (i32, i32, i32) {
    %c0_i32 = arith.constant 0 : i32
    %c0_i32_0 = arith.constant 0 : i32
    %c0_i32_1 = arith.constant 0 : i32
    %c0_i32_2 = arith.constant 0 : i32
    return %c0_i32, %c0_i32_0, %c0_i32_1 : i32, i32, i32
  }
  func.func @transform_3(%arg0: i32) -> (i32, i32, i32) {
    %c0_i32 = arith.constant 0 : i32
    %c0_i32_0 = arith.constant 0 : i32
    %c0_i32_1 = arith.constant 0 : i32
    %c0_i32_2 = arith.constant 0 : i32
    return %c0_i32, %c0_i32_0, %c0_i32_1 : i32, i32, i32
  }
  func.func @transform_4(%arg0: i32) -> (i32, i32, i32) {
    %c0_i32 = arith.constant 0 : i32
    %c0_i32_0 = arith.constant 0 : i32
    %c0_i32_1 = arith.constant 0 : i32
    %c0_i32_2 = arith.constant 0 : i32
    return %c0_i32, %c0_i32_0, %c0_i32_1 : i32, i32, i32
  }
  func.func @transform_5(%arg0: i32) -> (i32, i32, i32) {
    %c0_i32 = arith.constant 0 : i32
    %c0_i32_0 = arith.constant 0 : i32
    %c0_i32_1 = arith.constant 0 : i32
    return %arg0, %c0_i32, %c0_i32_0 : i32, i32, i32
  }
  func.func @transform_6(%arg0: i32) -> (i32, i32, i32) {
    %c0_i32 = arith.constant 0 : i32
    %0 = arith.subi %c0_i32, %arg0 : i32
    %c0_i32_0 = arith.constant 0 : i32
    %c0_i32_1 = arith.constant 0 : i32
    %c0_i32_2 = arith.constant 0 : i32
    return %0, %c0_i32_0, %c0_i32_1 : i32, i32, i32
  }
  func.func @transform_7(%arg0: i32) -> (i32, i32, i32) {
    %c0_i32 = arith.constant 0 : i32
    %c0_i32_0 = arith.constant 0 : i32
    %c0_i32_1 = arith.constant 0 : i32
    %c0_i32_2 = arith.constant 0 : i32
    return %c0_i32, %c0_i32_0, %c0_i32_1 : i32, i32, i32
  }
  func.func @transform_8(%arg0: i32) -> (i32, i32, i32) {
    %c0_i32 = arith.constant 0 : i32
    %c0_i32_0 = arith.constant 0 : i32
    %c0_i32_1 = arith.constant 0 : i32
    %c0_i32_2 = arith.constant 0 : i32
    return %c0_i32, %c0_i32_0, %c0_i32_1 : i32, i32, i32
  }
}

</mosaic_0001>

<bundles_post_ra>
// kernel: encoder_forward.2
= control target key start
LH: loop header
LB: loop body
LE: loop exit
PB: predicated region body
PF: predicated region fallthrough
CT: control target
= control target key end

     0   :  { %14 = vsyncpa [#allocation6], 0  ;;  %s7371_s0 = inlined_call_operand.vmem [shape: bf16[8,16,128], index: 0, kind: input, shape index: {}, may-alias: {0,1}]   ;;  %s7372_s1 = inlined_call_operand.vmem [shape: bf16[8,16,128], index: 1, kind: input, shape index: {}, may-alias: {0,1}]   ;;  %s7373_s2 = inlined_call_operand.hbm [shape: bf16[2,128,512], index: 2, kind: input, shape index: {}]   ;;  %s7374_s3 = inlined_call_operand.hbm [shape: bf16[2,128,512], index: 3, kind: input, shape index: {}]   ;;  %s7375_s4 = inlined_call_operand.hbm [shape: f32[2,1,512], index: 4, kind: input, shape index: {}]   ;;  %s7376_s5 = inlined_call_operand.vmem [shape: bf16[8,16,128], index: 5, kind: output, shape index: {0}]   ;;  %s7377_s6 = inlined_call_operand.vmem [shape: bf16[8,16,128], index: 6, kind: output, shape index: {1}]   ;;  %s7378_s7 = inlined_call_operand.vmem [shape: f32[2,16,128], index: 7, kind: output, shape index: {2}]   ;;  %s7379_s8 = inlined_call_operand.vmem [shape: f32[2,16,128], index: 8, kind: output, shape index: {3}]  }
   0x1   :  { %15 = vsyncpa [#allocation8], 0  ;;  %s5920_s27 = smov [#allocation7]   ;;  %s5921_s29 = smov [#allocation5]  }
   0x2   :  { %s46_s28 = sshll.u32 %s5920_s27, 4  ;;  %s34_s30 = sshll.u32 %s5921_s29, 4  ;;  %s47_s28 = int_to_ptr.vmem [resolvable:$true] %s46_s28  ;;  %s5974_s30 = int_to_ptr.vmem [resolvable:$true] %s34_s30 }
   0x3   :  { %s5850_s11 = scalar_lea.hbm %s7374_s3, 8192 }
   0x4   :  { %p5851_p0 = scmp.ne.s32.totalorder %s7374_s3, %s5850_s11  ;;  %p5854_p1 = scmp.lt.u32.totalorder %s5850_s11, %s7374_s3 }
   0x6   :  { %p5856_p2 = pnand %p5854_p1, %p5851_p0 }
   0x8   :  { %5859 = shalt.err (!%p5856_p2)
}
   0x9   :  { %s5860_s16 = scalar_lea.vmem %s47_s28, 8192  ;;  %p5865_p4 = scmp.lt.s32.totalorder %s47_s28, %s47_s28 }
   0xa   :  { %p5861_p3 = scmp.ne.s32.totalorder %s47_s28, %s5860_s16  ;;  %p5866_p5 = scmp.lt.s32.totalorder %s5860_s16, %s5860_s16 }
   0xc   :  { %p5867_p6 = por %p5866_p5, %p5865_p4 }
   0xe   :  { %p5868_p7 = pnand %p5867_p6, %p5861_p3 }
  0x10   :  { %5871 = shalt.err (!%p5868_p7)
}
  0x11   :  { %s5922_s17 = smov 256   ;;  %s5923_s18 = smov 16  }
  0x12   :  { %52 = dma.hbm_to_vmem [thread:$0]  %s7374_s3, 8192, %s47_s28, [#allocation8], %s5922_s17, %s5922_s17, %s5923_s18  }
  0x13   :  { %s5872_s23 = scalar_lea.hbm %s7373_s2, 8192 }
  0x14   :  { %p5873_p8 = scmp.ne.s32.totalorder %s7373_s2, %s5872_s23  ;;  %p5876_p9 = scmp.lt.u32.totalorder %s5872_s23, %s7373_s2 }
  0x16   :  { %p5878_p10 = pnand %p5876_p9, %p5873_p8 }
  0x18   :  { %5881 = shalt.err (!%p5878_p10)
}
  0x19   :  { %s5882_s29 = scalar_lea.vmem %s5974_s30, 8192  ;;  %p5887_p12 = scmp.lt.s32.totalorder %s5974_s30, %s5974_s30 }
  0x1a   :  { %p5883_p11 = scmp.ne.s32.totalorder %s5974_s30, %s5882_s29  ;;  %p5888_p13 = scmp.lt.s32.totalorder %s5882_s29, %s5882_s29 }
  0x1c   :  { %p5889_p0 = por %p5888_p13, %p5887_p12 }
  0x1e   :  { %p5890_p1 = pnand %p5889_p0, %p5883_p11 }
  0x20   :  { %5893 = shalt.err (!%p5890_p1)
}
  0x21   :  { %40 = dma.hbm_to_vmem [thread:$0]  %s7373_s2, 8192, %s5974_s30, [#allocation6], %s5922_s17, %s5922_s17, %s5923_s18  }
  0x22   :  { %s5924_s9 = smov [#allocation9]   ;;  %s5894_s13 = scalar_lea.hbm %s7375_s4, 128 }
  0x23   :  { %s58_s10 = sshll.u32 %s5924_s9, 4  ;;  %p5895_p2 = scmp.ne.s32.totalorder %s7375_s4, %s5894_s13  ;;  %s59_s10 = int_to_ptr.vmem [resolvable:$true] %s58_s10 }
  0x24   :  { %p5898_p3 = scmp.lt.u32.totalorder %s5894_s13, %s7375_s4 }
  0x26   :  { %p5900_p4 = pnand %p5898_p3, %p5895_p2 }
  0x28   :  { %5903 = shalt.err (!%p5900_p4)
}
  0x29   :  { %s5904_s20 = scalar_lea.vmem %s59_s10, 128  ;;  %p5909_p6 = scmp.lt.s32.totalorder %s59_s10, %s59_s10 }
  0x2a   :  { %p5905_p5 = scmp.ne.s32.totalorder %s59_s10, %s5904_s20  ;;  %p5910_p7 = scmp.lt.s32.totalorder %s5904_s20, %s5904_s20 }
  0x2c   :  { %p5911_p8 = por %p5910_p7, %p5909_p6 }
  0x2e   :  { %p5912_p9 = pnand %p5911_p8, %p5905_p5 }
  0x30   :  { %5915 = shalt.err (!%p5912_p9)
}
  0x31   :  { %s5925_s2 = smov 64   ;;  %s5926_s30 = smov 4  }
  0x32   :  { %64 = dma.hbm_to_vmem [thread:$0]  %s7375_s4, 128, %s59_s10, [#allocation8], %s5925_s2, %s5925_s2, %s5926_s30  }
  0x33   :  { %5916 = dma.done.wait [#allocation6], 8192  }
  0x34   :  { %5917 = vsyncadd [#allocation6], 4294959104 }
  0x35   :  { %5918 = dma.done.wait [#allocation8], 8320  }
  0x36   :  { %5919 = vsyncadd [#allocation8], 4294958976  ;;  %v7380_v0 = vmov 0   ;;  %v5002_v1 = vld [vmem:[#allocation5 + $0x4] ss:$16 sps:$4 sm:$0xff]   ;;  %v5054_v43 = vld [vmem:[%s7371_s0 + $0x8] sm:$0xff]  }
  0x37   :  { %488 = vmatprep.mubr.bf16.mxu0 %v7380_v0  ;;  %601 = vmatprep.mubr.bf16.mxu1 %v7380_v0  ;;  %v5004_v2 = vld [vmem:[#allocation5 + $0xc] ss:$16 sps:$4 sm:$0xff]   ;;  %v5006_v3 = vld [vmem:[#allocation5] ss:$16 sps:$4 sm:$0xff]   ;;  %v5007_v4 = vld [vmem:[#allocation5 + $0x8] ss:$16 sps:$4 sm:$0xff]  }
  0x38   :  { %456 = vmatprep.subr.bf16.mxu0 %v5002_v1  ;;  %569 = vmatprep.subr.bf16.mxu1 %v5004_v2  ;;  %v5008_v5 = vld [vmem:[#allocation5 + $0x24] ss:$16 sps:$4 sm:$0xff]   ;;  %v5010_v6 = vld [vmem:[#allocation5 + $0x2c] ss:$16 sps:$4 sm:$0xff]   ;;  %v5012_v7 = vld [vmem:[#allocation5 + $0x20] ss:$16 sps:$4 sm:$0xff]  }
  0x39   :  { %457 = vmatpush1.bf16.msra.mxu0 %v5006_v3  ;;  %570 = vmatpush1.bf16.msra.mxu1 %v5007_v4  ;;  %v5013_v8 = vld [vmem:[#allocation5 + $0x28] ss:$16 sps:$4 sm:$0xff]   ;;  %v5014_v9 = vld [vmem:[#allocation5 + $0x44] ss:$16 sps:$4 sm:$0xff]   ;;  %v5016_v10 = vld [vmem:[#allocation5 + $0x4c] ss:$16 sps:$4 sm:$0xff]  }
  0x3a   :  { %458 = vmatprep.subr.bf16.mxu0 %v5008_v5  ;;  %571 = vmatprep.subr.bf16.mxu1 %v5010_v6  ;;  %v5018_v11 = vld [vmem:[#allocation5 + $0x40] ss:$16 sps:$4 sm:$0xff]   ;;  %v5019_v12 = vld [vmem:[#allocation5 + $0x48] ss:$16 sps:$4 sm:$0xff]   ;;  %v5020_v13 = vld [vmem:[#allocation5 + $0x64] ss:$16 sps:$4 sm:$0xff]  }
  0x3b   :  { %v5022_v14 = vld [vmem:[#allocation5 + $0x6c] ss:$16 sps:$4 sm:$0xff]   ;;  %v5024_v15 = vld [vmem:[#allocation5 + $0x60] ss:$16 sps:$4 sm:$0xff]   ;;  %v5025_v16 = vld [vmem:[#allocation5 + $0x68] ss:$16 sps:$4 sm:$0xff]  }
  0x3c   :  { %v5026_v17 = vld [vmem:[#allocation5 + $0x84] ss:$16 sps:$4 sm:$0xff]   ;;  %v5028_v18 = vld [vmem:[#allocation5 + $0x8c] ss:$16 sps:$4 sm:$0xff]   ;;  %v5030_v19 = vld [vmem:[#allocation5 + $0x80] ss:$16 sps:$4 sm:$0xff]  }
  0x3d   :  { %459 = vmatpush1.bf16.msra.mxu0 %v5012_v7  ;;  %572 = vmatpush1.bf16.msra.mxu1 %v5013_v8  ;;  %v5031_v20 = vld [vmem:[#allocation5 + $0x88] ss:$16 sps:$4 sm:$0xff]   ;;  %v5032_v21 = vld [vmem:[#allocation5 + $0xa4] ss:$16 sps:$4 sm:$0xff]   ;;  %v5034_v22 = vld [vmem:[#allocation5 + $0xac] ss:$16 sps:$4 sm:$0xff]  }
  0x3e   :  { %460 = vmatprep.subr.bf16.mxu0 %v5014_v9  ;;  %573 = vmatprep.subr.bf16.mxu1 %v5016_v10  ;;  %v5036_v23 = vld [vmem:[#allocation5 + $0xa0] ss:$16 sps:$4 sm:$0xff]   ;;  %v5037_v24 = vld [vmem:[#allocation5 + $0xa8] ss:$16 sps:$4 sm:$0xff]   ;;  %v5038_v25 = vld [vmem:[#allocation5 + $0xc4] ss:$16 sps:$4 sm:$0xff]  }
  0x3f   :  { %v5040_v26 = vld [vmem:[#allocation5 + $0xcc] ss:$16 sps:$4 sm:$0xff]   ;;  %v5042_v27 = vld [vmem:[#allocation5 + $0xc0] ss:$16 sps:$4 sm:$0xff]   ;;  %v5043_v28 = vld [vmem:[#allocation5 + $0xc8] ss:$16 sps:$4 sm:$0xff]  }
  0x40   :  { %v5044_v29 = vld [vmem:[#allocation5 + $0xe4] ss:$16 sps:$4 sm:$0xff]   ;;  %v5046_v30 = vld [vmem:[#allocation5 + $0xec] ss:$16 sps:$4 sm:$0xff]   ;;  %v5048_v31 = vld [vmem:[#allocation5 + $0xe0] ss:$16 sps:$4 sm:$0xff]  }
  0x41   :  { %461 = vmatpush1.bf16.msra.mxu0 %v5018_v11  ;;  %574 = vmatpush1.bf16.msra.mxu1 %v5019_v12  ;;  %v5049_v32 = vld [vmem:[#allocation5 + $0xe8] ss:$16 sps:$4 sm:$0xff]   ;;  %v5053_v33 = vld [vmem:[#allocation5 + $0x104] ss:$16 sps:$4 sm:$0xff]   ;;  %v5060_v34 = vld [vmem:[#allocation5 + $0x10c] ss:$16 sps:$4 sm:$0xff]  }
  0x42   :  { %462 = vmatprep.subr.bf16.mxu0 %v5020_v13  ;;  %575 = vmatprep.subr.bf16.mxu1 %v5022_v14  ;;  %v5050_v35 = vld [vmem:[%s7371_s0] sm:$0xff]   ;;  %v5058_v38 = vld [vmem:[#allocation5 + $0x108] ss:$16 sps:$4 sm:$0xff]   ;;  %v5067_v39 = vld [vmem:[#allocation5 + $0x12c] ss:$16 sps:$4 sm:$0xff]  }
  0x43   :  { %v5051_v36 = vld [vmem:[#allocation5 + $0x100] ss:$16 sps:$4 sm:$0xff]   ;;  %v5057_v37 = vld [vmem:[#allocation5 + $0x124] ss:$16 sps:$4 sm:$0xff]   ;;  %v5065_v42 = vld [vmem:[#allocation5 + $0x128] ss:$16 sps:$4 sm:$0xff]  }
  0x44   :  { %v5055_v40 = vld [vmem:[#allocation5 + $0x120] ss:$16 sps:$4 sm:$0xff]   ;;  %v5064_v41 = vld [vmem:[#allocation5 + $0x144] ss:$16 sps:$4 sm:$0xff]   ;;  %v5074_v46 = vld [vmem:[#allocation5 + $0x14c] ss:$16 sps:$4 sm:$0xff]  }
  0x45   :  { %463 = vmatpush1.bf16.msra.mxu0 %v5024_v15  ;;  %576 = vmatpush1.bf16.msra.mxu1 %v5025_v16  ;;  %v5062_v44 = vld [vmem:[#allocation5 + $0x140] ss:$16 sps:$4 sm:$0xff]   ;;  %v5071_v45 = vld [vmem:[#allocation5 + $0x164] ss:$16 sps:$4 sm:$0xff]   ;;  %v5072_v47 = vld [vmem:[#allocation5 + $0x148] ss:$16 sps:$4 sm:$0xff]  }
  0x46   :  { %464 = vmatprep.subr.bf16.mxu0 %v5026_v17  ;;  %577 = vmatprep.subr.bf16.mxu1 %v5028_v18  ;;  %v5081_v48 = vld [vmem:[#allocation5 + $0x16c] ss:$16 sps:$4 sm:$0xff]   ;;  %v5069_v49 = vld [vmem:[#allocation5 + $0x160] ss:$16 sps:$4 sm:$0xff]   ;;  %v5078_v50 = vld [vmem:[#allocation5 + $0x184] ss:$16 sps:$4 sm:$0xff]  }
  0x47   :  { %v5079_v51 = vld [vmem:[#allocation5 + $0x168] ss:$16 sps:$4 sm:$0xff]   ;;  %v5061_v52 = vld [vmem:[%s7371_s0 + $0x10] sm:$0xff]   ;;  %v5088_v54 = vld [vmem:[#allocation5 + $0x18c] ss:$16 sps:$4 sm:$0xff]  }
  0x48   :  { %v5076_v53 = vld [vmem:[#allocation5 + $0x180] ss:$16 sps:$4 sm:$0xff]   ;;  %v5085_v55 = vld [vmem:[#allocation5 + $0x1a4] ss:$16 sps:$4 sm:$0xff]   ;;  %v5086_v56 = vld [vmem:[#allocation5 + $0x188] ss:$16 sps:$4 sm:$0xff]  }
  0x49   :  { %465 = vmatpush1.bf16.msra.mxu0 %v5030_v19  ;;  %578 = vmatpush1.bf16.msra.mxu1 %v5031_v20  ;;  %v5095_v57 = vld [vmem:[#allocation5 + $0x1ac] ss:$16 sps:$4 sm:$0xff]   ;;  %v5083_v58 = vld [vmem:[#allocation5 + $0x1a0] ss:$16 sps:$4 sm:$0xff]   ;;  %v5092_v59 = vld [vmem:[#allocation5 + $0x1c4] ss:$16 sps:$4 sm:$0xff]  }
  0x4a   :  { %466 = vmatprep.subr.bf16.mxu0 %v5032_v21  ;;  %579 = vmatprep.subr.bf16.mxu1 %v5034_v22  ;;  %v5093_v60 = vld [vmem:[#allocation5 + $0x1a8] ss:$16 sps:$4 sm:$0xff]   ;;  %v5090_v62 = vld [vmem:[#allocation5 + $0x1c0] ss:$16 sps:$4 sm:$0xff]   ;;  %v5102_v63 = vld [vmem:[#allocation5 + $0x1cc] ss:$16 sps:$4 sm:$0xff]  }
  0x4b   :  { %v5068_v61 = vld [vmem:[%s7371_s0 + $0x18] sm:$0xff]   ;;  %v5099_v1 = vld [vmem:[#allocation5 + $0x1e4] ss:$16 sps:$4 sm:$0xff]   ;;  %v5097_v4 = vld [vmem:[#allocation5 + $0x1e0] ss:$16 sps:$4 sm:$0xff]  }
  0x4c   :  { %v5100_v2 = vld [vmem:[#allocation5 + $0x1c8] ss:$16 sps:$4 sm:$0xff]   ;;  %v5105_v3 = vld [vmem:[#allocation5 + $0x1ec] ss:$16 sps:$4 sm:$0xff]   ;;  %v6039_v6 = vld [vmem:[#allocation7 + $0x4] ss:$16 sps:$4 sm:$0xff]  }
  0x4d   :  { %467 = vmatpush1.bf16.msra.mxu0 %v5036_v23  ;;  %580 = vmatpush1.bf16.msra.mxu1 %v5037_v24  ;;  %v5103_v5 = vld [vmem:[#allocation5 + $0x1e8] ss:$16 sps:$4 sm:$0xff]   ;;  %v5075_v7 = vld [vmem:[%s7371_s0 + $0x20] sm:$0xff]   ;;  %v6044_v8 = vld [vmem:[#allocation7 + $0xc] ss:$16 sps:$4 sm:$0xff]  }
  0x4e   :  { %468 = vmatprep.subr.bf16.mxu0 %v5038_v25  ;;  %581 = vmatprep.subr.bf16.mxu1 %v5040_v26  ;;  %v5082_v9 = vld [vmem:[%s7371_s0 + $0x28] sm:$0xff]   ;;  %v5089_v10 = vld [vmem:[%s7371_s0 + $0x30] sm:$0xff]   ;;  %v5096_v11 = vld [vmem:[%s7371_s0 + $0x38] sm:$0xff]  }
  0x4f   :  { %v5106_v12 = vld [vmem:[%s7372_s1] sm:$0xff]   ;;  %v6072_v15 = vld [vmem:[#allocation7 + $0x8] ss:$16 sps:$4 sm:$0xff]   ;;  %v6074_v16 = vld [vmem:[#allocation7 + $0x2c] ss:$16 sps:$4 sm:$0xff]  }
  0x50   :  { %v6068_v13 = vld [vmem:[#allocation7] ss:$16 sps:$4 sm:$0xff]   ;;  %v6070_v14 = vld [vmem:[#allocation7 + $0x24] ss:$16 sps:$4 sm:$0xff]   ;;  %v6085_v19 = vld [vmem:[#allocation7 + $0x28] ss:$16 sps:$4 sm:$0xff]  }
  0x51   :  { %469 = vmatpush1.bf16.msra.mxu0 %v5042_v27  ;;  %582 = vmatpush1.bf16.msra.mxu1 %v5043_v28  ;;  %v6078_v17 = vld [vmem:[#allocation7 + $0x20] ss:$16 sps:$4 sm:$0xff]   ;;  %v6082_v18 = vld [vmem:[#allocation7 + $0x44] ss:$16 sps:$4 sm:$0xff]   ;;  %v5110_v20 = vld [vmem:[%s7372_s1 + $0x8] sm:$0xff]  }
  0x52   :  { %470 = vmatprep.subr.bf16.mxu0 %v5044_v29  ;;  %583 = vmatprep.subr.bf16.mxu1 %v5046_v30  ;;  %v6093_v21 = vld [vmem:[#allocation7 + $0x40] ss:$16 sps:$4 sm:$0xff]   ;;  %v6095_v22 = vld [vmem:[#allocation7 + $0x4c] ss:$16 sps:$4 sm:$0xff]   ;;  %v6097_v23 = vld [vmem:[#allocation7 + $0x64] ss:$16 sps:$4 sm:$0xff]  }
  0x53   :  { %7497 = vst [vmem:[#allocation12_spill] sm:$0xff] %v6093_v21  ;;  %7498 = vst [vmem:[#allocation13_spill] sm:$0xff] %v6097_v23  ;;  %v6100_v24 = vld [vmem:[#allocation7 + $0x48] ss:$16 sps:$4 sm:$0xff]   ;;  %v6102_v25 = vld [vmem:[#allocation7 + $0x6c] ss:$16 sps:$4 sm:$0xff]  }
  0x54   :  { %7499 = vst [vmem:[#allocation14_spill] sm:$0xff] %v6100_v24  ;;  %7500 = vst [vmem:[#allocation15_spill] sm:$0xff] %v6102_v25  ;;  %v6107_v26 = vld [vmem:[#allocation7 + $0x60] ss:$16 sps:$4 sm:$0xff]   ;;  %v6111_v27 = vld [vmem:[#allocation7 + $0x84] ss:$16 sps:$4 sm:$0xff]  }
  0x55   :  { %471 = vmatpush1.bf16.msra.mxu0 %v5048_v31  ;;  %584 = vmatpush1.bf16.msra.mxu1 %v5049_v32  ;;  %7501 = vst [vmem:[#allocation16_spill] sm:$0xff] %v6107_v26  ;;  %7502 = vst [vmem:[#allocation17_spill] sm:$0xff] %v6111_v27  ;;  %v6114_v28 = vld [vmem:[#allocation7 + $0x68] ss:$16 sps:$4 sm:$0xff]   ;;  %v5116_v29 = vld [vmem:[%s7372_s1 + $0x10] sm:$0xff]  }
  0x56   :  { %975 = vmatprep.subr.bf16.mxu0 %v5053_v33  ;;  %1088 = vmatprep.subr.bf16.mxu1 %v5060_v34  ;;  %7503 = vst [vmem:[#allocation18_spill] sm:$0xff] %v6114_v28  ;;  %v6121_v30 = vld [vmem:[#allocation7 + $0x80] ss:$16 sps:$4 sm:$0xff]   ;;  %v6123_v31 = vld [vmem:[#allocation7 + $0x8c] ss:$16 sps:$4 sm:$0xff]  }
  0x57   :  { %7504 = vst [vmem:[#allocation19_spill] sm:$0xff] %v6121_v30  ;;  %7505 = vst [vmem:[#allocation20_spill] sm:$0xff] %v6123_v31  ;;  %v6126_v32 = vld [vmem:[#allocation7 + $0xa4] ss:$16 sps:$4 sm:$0xff]   ;;  %v6129_v33 = vld [vmem:[#allocation7 + $0x88] ss:$16 sps:$4 sm:$0xff]  }
  0x58   :  { %489 = vmatmul.mubr.bf16.vlgmr.msra.gmra.mrb[0].mxu0 %v5050_v35  ;;  %602 = vmatmul.mubr.bf16.vlgmr.msra.gmra.mrb[0].mxu1 %v5050_v35  ;;  %7506 = vst [vmem:[#allocation21_spill] sm:$0xff] %v6126_v32  ;;  %7507 = vst [vmem:[#allocation22_spill] sm:$0xff] %v6129_v33  ;;  %v6131_v34 = vld [vmem:[#allocation7 + $0xac] ss:$16 sps:$4 sm:$0xff]   ;;  %v6136_v35 = vld [vmem:[#allocation7 + $0xa0] ss:$16 sps:$4 sm:$0xff]  }
  0x59   :  { %976 = vmatpush1.bf16.msra.mxu0 %v5051_v36  ;;  %498 = vmatprep.mubr.bf16.mxu0 %v7380_v0  ;;  %7508 = vst [vmem:[#allocation23_spill] sm:$0xff] %v6131_v34  ;;  %7509 = vst [vmem:[#allocation24_spill] sm:$0xff] %v6136_v35  ;;  %v6140_v36 = vld [vmem:[#allocation7 + $0xc4] ss:$16 sps:$4 sm:$0xff]  }
  0x5a   :  { %611 = vmatprep.mubr.bf16.mxu1 %v7380_v0  ;;  %977 = vmatprep.subr.bf16.mxu0 %v5057_v37  ;;  %7510 = vst [vmem:[#allocation25_spill] sm:$0xff] %v6140_v36  ;;  %v6143_v37 = vld [vmem:[#allocation7 + $0xa8] ss:$16 sps:$4 sm:$0xff]  }
  0x5b   :  { %1089 = vmatpush1.bf16.msra.mxu1 %v5058_v38  ;;  %7511 = vst [vmem:[#allocation26_spill] sm:$0xff] %v6143_v37  ;;  %v5123_v38 = vld [vmem:[%s7372_s1 + $0x18] sm:$0xff]  }
  0x5c   :  { %1090 = vmatprep.subr.bf16.mxu1 %v5067_v39  ;;  %v6150_v39 = vld [vmem:[#allocation7 + $0xc0] ss:$16 sps:$4 sm:$0xff]  }
  0x5d   :  { %978 = vmatpush1.bf16.msra.mxu0 %v5055_v40  ;;  %7512 = vst [vmem:[#allocation27_spill] sm:$0xff] %v6150_v39  ;;  %v6152_v40 = vld [vmem:[#allocation7 + $0xcc] ss:$16 sps:$4 sm:$0xff]  }
  0x5e   :  { %979 = vmatprep.subr.bf16.mxu0 %v5064_v41  ;;  %7513 = vst [vmem:[#allocation28_spill] sm:$0xff] %v6152_v40  ;;  %v6156_v41 = vld [vmem:[#allocation7 + $0xe4] ss:$16 sps:$4 sm:$0xff]  }
  0x5f   :  { %1091 = vmatpush1.bf16.msra.mxu1 %v5065_v42  ;;  %7514 = vst [vmem:[#allocation29_spill] sm:$0xff] %v6156_v41  ;;  %v6158_v42 = vld [vmem:[#allocation7 + $0xc8] ss:$16 sps:$4 sm:$0xff]  }
  0x60   :  { %499 = vmatmul.mubr.bf16.gmra.mrb[4].mxu0 %v5054_v43  ;;  %612 = vmatmul.mubr.bf16.gmra.mrb[4].mxu1 %v5054_v43  ;;  %7515 = vst [vmem:[#allocation30_spill] sm:$0xff] %v6158_v42  ;;  %v6160_v43 = vld [vmem:[#allocation7 + $0xec] ss:$16 sps:$4 sm:$0xff]  }
  0x61   :  { %508 = vmatprep.mubr.bf16.mxu0 %v7380_v0  ;;  %621 = vmatprep.mubr.bf16.mxu1 %v7380_v0  ;;  %7516 = vst [vmem:[#allocation31_spill] sm:$0xff] %v6160_v43 }
  0x62   :  { %980 = vmatpush1.bf16.msra.mxu0 %v5062_v44  ;;  %1092 = vmatprep.subr.bf16.mxu1 %v5074_v46  ;;  %v6166_v44 = vld [vmem:[#allocation7 + $0xe0] ss:$16 sps:$4 sm:$0xff]   ;;  %v6172_v46 = vld [vmem:[#allocation7 + $0x104] ss:$16 sps:$4 sm:$0xff]  }
  0x63   :  { %981 = vmatprep.subr.bf16.mxu0 %v5071_v45  ;;  %1093 = vmatpush1.bf16.msra.mxu1 %v5072_v47  ;;  %7517 = vst [vmem:[#allocation32_spill] sm:$0xff] %v6166_v44  ;;  %v6170_v45 = vld [vmem:[#allocation7 + $0xe8] ss:$16 sps:$4 sm:$0xff]   ;;  %7519 = vst [vmem:[#allocation34_spill] sm:$0xff] %v6172_v46  ;;  %v5130_v47 = vld [vmem:[%s7372_s1 + $0x20] sm:$0xff]  }
  0x64   :  { %1094 = vmatprep.subr.bf16.mxu1 %v5081_v48  ;;  %7518 = vst [vmem:[#allocation33_spill] sm:$0xff] %v6170_v45  ;;  %v6179_v48 = vld [vmem:[#allocation7 + $0x10c] ss:$16 sps:$4 sm:$0xff]  }
  0x65   :  { %7520 = vst [vmem:[#allocation35_spill] sm:$0xff] %v6179_v48 }
  0x66   :  { %982 = vmatpush1.bf16.msra.mxu0 %v5069_v49  ;;  %v5137_v49 = vld [vmem:[%s7372_s1 + $0x28] sm:$0xff]  }
  0x67   :  { %983 = vmatprep.subr.bf16.mxu0 %v5078_v50  ;;  %1095 = vmatpush1.bf16.msra.mxu1 %v5079_v51  ;;  %v5144_v50 = vld [vmem:[%s7372_s1 + $0x30] sm:$0xff]   ;;  %v5154_v51 = vld [vmem:[%s7372_s1 + $0x38] sm:$0xff]  }
  0x68   :  { %509 = vmatmul.mubr.bf16.gmra.mrb[8].mxu0 %v5061_v52  ;;  %622 = vmatmul.mubr.bf16.gmra.mrb[8].mxu1 %v5061_v52  ;;  %v6201_v52 = vld [vmem:[#allocation7 + $0x100] ss:$16 sps:$4 sm:$0xff]  }
  0x69   :  { %518 = vmatprep.mubr.bf16.mxu0 %v7380_v0  ;;  %631 = vmatprep.mubr.bf16.mxu1 %v7380_v0 }
  0x6a   :  { %984 = vmatpush1.bf16.msra.mxu0 %v5076_v53  ;;  %1096 = vmatprep.subr.bf16.mxu1 %v5088_v54  ;;  %v6203_v53 = vld [vmem:[#allocation7 + $0x108] ss:$16 sps:$4 sm:$0xff]   ;;  %v6205_v54 = vld [vmem:[#allocation7 + $0x124] ss:$16 sps:$4 sm:$0xff]  }
  0x6b   :  { %985 = vmatprep.subr.bf16.mxu0 %v5085_v55  ;;  %1097 = vmatpush1.bf16.msra.mxu1 %v5086_v56  ;;  %v6207_v55 = vld [vmem:[#allocation7 + $0x12c] ss:$16 sps:$4 sm:$0xff]   ;;  %v7382_v56 = vmov 0.0|0.0  }
  0x6c   :  { %1098 = vmatprep.subr.bf16.mxu1 %v5095_v57  ;;  %v6213_v57 = vld [vmem:[#allocation7 + $0x120] ss:$16 sps:$4 sm:$0xff]  }
  0x6e   :  { %986 = vmatpush1.bf16.msra.mxu0 %v5083_v58  ;;  %v6215_v58 = vld [vmem:[#allocation7 + $0x128] ss:$16 sps:$4 sm:$0xff]  }
  0x6f   :  { %987 = vmatprep.subr.bf16.mxu0 %v5092_v59  ;;  %1099 = vmatpush1.bf16.msra.mxu1 %v5093_v60  ;;  %v6219_v59 = vld [vmem:[#allocation7 + $0x144] ss:$16 sps:$4 sm:$0xff]   ;;  %v6221_v60 = vld [vmem:[#allocation7 + $0x14c] ss:$16 sps:$4 sm:$0xff]  }
  0x70   :  { %519 = vmatmul.mubr.bf16.gmra.mrb[12].mxu0 %v5068_v61  ;;  %632 = vmatmul.mubr.bf16.gmra.mrb[12].mxu1 %v5068_v61  ;;  %v6227_v61 = vld [vmem:[#allocation7 + $0x140] ss:$16 sps:$4 sm:$0xff]  }
  0x71   :  { %528 = vmatprep.mubr.bf16.mxu0 %v7380_v0  ;;  %641 = vmatprep.mubr.bf16.mxu1 %v7380_v0 }
  0x72   :  { %988 = vmatpush1.bf16.msra.mxu0 %v5090_v62  ;;  %1100 = vmatprep.subr.bf16.mxu1 %v5102_v63  ;;  %v6229_v62 = vld [vmem:[#allocation7 + $0x148] ss:$16 sps:$4 sm:$0xff]   ;;  %v6233_v63 = vld [vmem:[#allocation7 + $0x164] ss:$16 sps:$4 sm:$0xff]  }
  0x73   :  { %989 = vmatprep.subr.bf16.mxu0 %v5099_v1  ;;  %1101 = vmatpush1.bf16.msra.mxu1 %v5100_v2  ;;  %v6235_v1 = vld [vmem:[#allocation7 + $0x16c] ss:$16 sps:$4 sm:$0xff]   ;;  %v6239_v2 = vld [vmem:[#allocation7 + $0x160] ss:$16 sps:$4 sm:$0xff]  }
  0x74   :  { %1102 = vmatprep.subr.bf16.mxu1 %v5105_v3  ;;  %v6241_v3 = vld [vmem:[#allocation7 + $0x168] ss:$16 sps:$4 sm:$0xff]  }
  0x76   :  { %990 = vmatpush1.bf16.msra.mxu0 %v5097_v4  ;;  %v6245_v4 = vld [vmem:[#allocation7 + $0x184] ss:$16 sps:$4 sm:$0xff]  }
  0x77   :  { %1103 = vmatpush1.bf16.msra.mxu1 %v5103_v5  ;;  %1510 = vmatprep.subr.bf16.mxu0 %v6039_v6  ;;  %v6247_v5 = vld [vmem:[#allocation7 + $0x18c] ss:$16 sps:$4 sm:$0xff]  }
  0x78   :  { %529 = vmatmul.mubr.bf16.gmra.mrb[16].mxu0 %v5075_v7  ;;  %642 = vmatmul.mubr.bf16.gmra.mrb[16].mxu1 %v5075_v7  ;;  %v6251_v7 = vld [vmem:[#allocation7 + $0x180] ss:$16 sps:$4 sm:$0xff]  }
  0x79   :  { %538 = vmatprep.mubr.bf16.mxu0 %v7380_v0  ;;  %651 = vmatprep.mubr.bf16.mxu1 %v7380_v0 }
  0x7a   :  { %1553 = vmatprep.subr.bf16.mxu1 %v6044_v8 }
  0x80   :  { %539 = vmatmul.mubr.bf16.gmra.mrb[20].mxu0 %v5082_v9  ;;  %652 = vmatmul.mubr.bf16.gmra.mrb[20].mxu1 %v5082_v9  ;;  %v6253_v9 = vld [vmem:[#allocation7 + $0x188] ss:$16 sps:$4 sm:$0xff]  }
  0x81   :  { %548 = vmatprep.mubr.bf16.mxu0 %v7380_v0  ;;  %661 = vmatprep.mubr.bf16.mxu1 %v7380_v0 }
  0x88   :  { %549 = vmatmul.mubr.bf16.gmra.mrb[24].mxu0 %v5089_v10  ;;  %662 = vmatmul.mubr.bf16.gmra.mrb[24].mxu1 %v5089_v10  ;;  %v6257_v10 = vld [vmem:[#allocation7 + $0x1a4] ss:$16 sps:$4 sm:$0xff]  }
  0x89   :  { %558 = vmatprep.mubr.bf16.mxu0 %v7380_v0  ;;  %671 = vmatprep.mubr.bf16.mxu1 %v7380_v0 }
  0x90   :  { %559 = vmatmul.mubr.bf16.gmra.mrb[28].mxu0 %v5096_v11  ;;  %672 = vmatmul.mubr.bf16.gmra.mrb[28].mxu1 %v5096_v11  ;;  %v6259_v11 = vld [vmem:[#allocation7 + $0x1ac] ss:$16 sps:$4 sm:$0xff]  }
  0x91   :  { %1007 = vmatprep.mubr.bf16.mxu0 %v7380_v0  ;;  %1120 = vmatprep.mubr.bf16.mxu1 %v7380_v0 }
  0x98   :  { %1008 = vmatmul.mubr.bf16.vlgmr.msra.gmra.mrb[32].mxu0 %v5106_v12  ;;  %1121 = vmatmul.mubr.bf16.vlgmr.msra.gmra.mrb[32].mxu1 %v5106_v12  ;;  %v6263_v12 = vld [vmem:[#allocation7 + $0x1a0] ss:$16 sps:$4 sm:$0xff]  }
  0x99   :  { %1511 = vmatpush1.bf16.msra.mxu0 %v6068_v13  ;;  %1017 = vmatprep.mubr.bf16.mxu0 %v7380_v0 }
  0x9a   :  { %1130 = vmatprep.mubr.bf16.mxu1 %v7380_v0  ;;  %1512 = vmatprep.subr.bf16.mxu0 %v6070_v14 }
  0x9b   :  { %1554 = vmatpush1.bf16.msra.mxu1 %v6072_v15 }
  0x9c   :  { %1555 = vmatprep.subr.bf16.mxu1 %v6074_v16 }
  0x9d   :  { %1513 = vmatpush1.bf16.msra.mxu0 %v6078_v17 }
  0x9e   :  { %1514 = vmatprep.subr.bf16.mxu0 %v6082_v18 }
  0x9f   :  { %1556 = vmatpush1.bf16.msra.mxu1 %v6085_v19 }
  0xa0   :  { %1018 = vmatmul.mubr.bf16.gmra.mrb[36].mxu0 %v5110_v20  ;;  %1131 = vmatmul.mubr.bf16.gmra.mrb[36].mxu1 %v5110_v20  ;;  %v6265_v20 = vld [vmem:[#allocation7 + $0x1a8] ss:$16 sps:$4 sm:$0xff]  }
  0xa1   :  { %1027 = vmatprep.mubr.bf16.mxu0 %v7380_v0  ;;  %1140 = vmatprep.mubr.bf16.mxu1 %v7380_v0 }
  0xa2   :  { %1515 = vmatpush1.bf16.msra.mxu0 %v6093_v21  ;;  %1557 = vmatprep.subr.bf16.mxu1 %v6095_v22 }
  0xa3   :  { %1516 = vmatprep.subr.bf16.mxu0 %v6097_v23  ;;  %1558 = vmatpush1.bf16.msra.mxu1 %v6100_v24 }
  0xa4   :  { %1559 = vmatprep.subr.bf16.mxu1 %v6102_v25 }
  0xa6   :  { %1517 = vmatpush1.bf16.msra.mxu0 %v6107_v26 }
  0xa7   :  { %1518 = vmatprep.subr.bf16.mxu0 %v6111_v27  ;;  %1560 = vmatpush1.bf16.msra.mxu1 %v6114_v28 }
  0xa8   :  { %1028 = vmatmul.mubr.bf16.gmra.mrb[40].mxu0 %v5116_v29  ;;  %1141 = vmatmul.mubr.bf16.gmra.mrb[40].mxu1 %v5116_v29  ;;  %v6269_v29 = vld [vmem:[#allocation7 + $0x1c4] ss:$16 sps:$4 sm:$0xff]  }
  0xa9   :  { %1037 = vmatprep.mubr.bf16.mxu0 %v7380_v0  ;;  %1150 = vmatprep.mubr.bf16.mxu1 %v7380_v0 }
  0xaa   :  { %1519 = vmatpush1.bf16.msra.mxu0 %v6121_v30  ;;  %1561 = vmatprep.subr.bf16.mxu1 %v6123_v31 }
  0xab   :  { %1520 = vmatprep.subr.bf16.mxu0 %v6126_v32  ;;  %1562 = vmatpush1.bf16.msra.mxu1 %v6129_v33 }
  0xac   :  { %1563 = vmatprep.subr.bf16.mxu1 %v6131_v34 }
  0xae   :  { %1521 = vmatpush1.bf16.msra.mxu0 %v6136_v35 }
  0xaf   :  { %1522 = vmatprep.subr.bf16.mxu0 %v6140_v36  ;;  %1564 = vmatpush1.bf16.msra.mxu1 %v6143_v37 }
  0xb0   :  { %1038 = vmatmul.mubr.bf16.gmra.mrb[44].mxu0 %v5123_v38  ;;  %1151 = vmatmul.mubr.bf16.gmra.mrb[44].mxu1 %v5123_v38  ;;  %v6271_v38 = vld [vmem:[#allocation7 + $0x1cc] ss:$16 sps:$4 sm:$0xff]  }
  0xb1   :  { %1047 = vmatprep.mubr.bf16.mxu0 %v7380_v0  ;;  %1160 = vmatprep.mubr.bf16.mxu1 %v7380_v0  ;;  %7521 = vst [vmem:[#allocation36_spill] sm:$0xff] %v6271_v38 }
  0xb2   :  { %1523 = vmatpush1.bf16.msra.mxu0 %v6150_v39  ;;  %1565 = vmatprep.subr.bf16.mxu1 %v6152_v40 }
  0xb3   :  { %1524 = vmatprep.subr.bf16.mxu0 %v6156_v41  ;;  %1566 = vmatpush1.bf16.msra.mxu1 %v6158_v42 }
  0xb4   :  { %1567 = vmatprep.subr.bf16.mxu1 %v6160_v43 }
  0xb6   :  { %1525 = vmatpush1.bf16.msra.mxu0 %v6166_v44 }
  0xb7   :  { %1568 = vmatpush1.bf16.msra.mxu1 %v6170_v45  ;;  %1821 = vmatprep.subr.bf16.mxu0 %v6172_v46 }
  0xb8   :  { %1048 = vmatmul.mubr.bf16.gmra.mrb[48].mxu0 %v5130_v47  ;;  %1161 = vmatmul.mubr.bf16.gmra.mrb[48].mxu1 %v5130_v47  ;;  %v6275_v47 = vld [vmem:[#allocation7 + $0x1c0] ss:$16 sps:$4 sm:$0xff]  }
  0xb9   :  { %1057 = vmatprep.mubr.bf16.mxu0 %v7380_v0  ;;  %1170 = vmatprep.mubr.bf16.mxu1 %v7380_v0 }
  0xba   :  { %1864 = vmatprep.subr.bf16.mxu1 %v6179_v48 }
  0xc0   :  { %1058 = vmatmul.mubr.bf16.gmra.mrb[52].mxu0 %v5137_v49  ;;  %1171 = vmatmul.mubr.bf16.gmra.mrb[52].mxu1 %v5137_v49  ;;  %v6277_v49 = vld [vmem:[#allocation7 + $0x1c8] ss:$16 sps:$4 sm:$0xff]  }
  0xc1   :  { %1067 = vmatprep.mubr.bf16.mxu0 %v7380_v0  ;;  %1180 = vmatprep.mubr.bf16.mxu1 %v7380_v0 }
  0xc8   :  { %1068 = vmatmul.mubr.bf16.gmra.mrb[56].mxu0 %v5144_v50  ;;  %1181 = vmatmul.mubr.bf16.gmra.mrb[56].mxu1 %v5144_v50  ;;  %v6281_v50 = vld [vmem:[#allocation7 + $0x1e4] ss:$16 sps:$4 sm:$0xff]  }
  0xc9   :  { %1077 = vmatprep.mubr.bf16.mxu0 %v7380_v0  ;;  %1190 = vmatprep.mubr.bf16.mxu1 %v7380_v0 }
  0xd0   :  { %1078 = vmatmul.mubr.bf16.gmra.mrb[60].mxu0 %v5154_v51  ;;  %1191 = vmatmul.mubr.bf16.gmra.mrb[60].mxu1 %v5154_v51  ;;  %v6283_v51 = vld [vmem:[#allocation7 + $0x1ec] ss:$16 sps:$4 sm:$0xff]  }
  0xd1   :  { %1542 = vmatprep.mubr.bf16.mxu0 %v7380_v0  ;;  %1585 = vmatprep.mubr.bf16.mxu1 %v7380_v0  ;;  %7522 = vst [vmem:[#allocation37_spill] sm:$0xff] %v6283_v51 }
  0xd8   :  { %1543 = vmatmul.mubr.bf16.vlgmr.msra.gmra.mrb[0].mxu0 %v7382_v56  ;;  %1586 = vmatmul.mubr.bf16.vlgmr.msra.gmra.mrb[0].mxu1 %v7382_v56  ;;  %v6289_v56 = vld [vmem:[#allocation7 + $0x1e8] ss:$16 sps:$4 sm:$0xff]  }
  0xd9   :  { %1822 = vmatpush1.bf16.msra.mxu0 %v6201_v52  ;;  %1865 = vmatpush1.bf16.msra.mxu1 %v6203_v53 }
  0xda   :  { %1823 = vmatprep.subr.bf16.mxu0 %v6205_v54  ;;  %1866 = vmatprep.subr.bf16.mxu1 %v6207_v55 }
  0xdb   :  { %1853 = vmatprep.mubr.bf16.mxu0 %v7380_v0  ;;  %1896 = vmatprep.mubr.bf16.mxu1 %v7380_v0  ;;  %v6287_v0 = vld [vmem:[#allocation7 + $0x1e0] ss:$16 sps:$4 sm:$0xff]  }
  0xdd   :  { %1824 = vmatpush1.bf16.msra.mxu0 %v6213_v57  ;;  %1867 = vmatpush1.bf16.msra.mxu1 %v6215_v58 }
  0xde   :  { %1825 = vmatprep.subr.bf16.mxu0 %v6219_v59  ;;  %1868 = vmatprep.subr.bf16.mxu1 %v6221_v60 }
  0xe1   :  { %1826 = vmatpush1.bf16.msra.mxu0 %v6227_v61  ;;  %1869 = vmatpush1.bf16.msra.mxu1 %v6229_v62 }
  0xe2   :  { %1827 = vmatprep.subr.bf16.mxu0 %v6233_v63  ;;  %1870 = vmatprep.subr.bf16.mxu1 %v6235_v1 }
  0xe5   :  { %1828 = vmatpush1.bf16.msra.mxu0 %v6239_v2  ;;  %1871 = vmatpush1.bf16.msra.mxu1 %v6241_v3 }
  0xe6   :  { %1829 = vmatprep.subr.bf16.mxu0 %v6245_v4  ;;  %1872 = vmatprep.subr.bf16.mxu1 %v6247_v5 }
  0xe9   :  { %1830 = vmatpush1.bf16.msra.mxu0 %v6251_v7  ;;  %1873 = vmatpush1.bf16.msra.mxu1 %v6253_v9 }
  0xea   :  { %1831 = vmatprep.subr.bf16.mxu0 %v6257_v10  ;;  %1874 = vmatprep.subr.bf16.mxu1 %v6259_v11 }
  0xed   :  { %1832 = vmatpush1.bf16.msra.mxu0 %v6263_v12  ;;  %1875 = vmatpush1.bf16.msra.mxu1 %v6265_v20 }
  0xee   :  { %1833 = vmatprep.subr.bf16.mxu0 %v6269_v29  ;;  %1876 = vmatprep.subr.bf16.mxu1 %v6271_v38  ;;  %v7523_v38 = vmov 0.0|0.0  }
  0xf1   :  { %1834 = vmatpush1.bf16.msra.mxu0 %v6275_v47  ;;  %1877 = vmatpush1.bf16.msra.mxu1 %v6277_v49 }
  0xf2   :  { %1835 = vmatprep.subr.bf16.mxu0 %v6281_v50  ;;  %1878 = vmatprep.subr.bf16.mxu1 %v6283_v51  ;;  %v7524_v51 = vmov 0  }
  0xf5   :  { %1836 = vmatpush1.bf16.msra.mxu0 %v6287_v0  ;;  %1879 = vmatpush1.bf16.msra.mxu1 %v6289_v56 }
  0xf6   :  { %1992 = vmatprep.subr.bf16.mxu0 %v6039_v6  ;;  %2035 = vmatprep.subr.bf16.mxu1 %v6044_v8 }
  0xf8   :  { %1854 = vmatmul.mubr.bf16.vlgmr.msra.gmra.mrb[60].mxu0 %v7523_v38  ;;  %1897 = vmatmul.mubr.bf16.vlgmr.msra.gmra.mrb[60].mxu1 %v7523_v38  ;;  %v228_v38 = vlaneseq }
  0xf9   :  { %1993 = vmatpush1.bf16.msra.mxu0 %v6068_v13  ;;  %2036 = vmatpush1.bf16.msra.mxu1 %v6072_v15 }
  0xfa   :  { %1994 = vmatprep.subr.bf16.mxu0 %v6070_v14  ;;  %2037 = vmatprep.subr.bf16.mxu1 %v6074_v16 }
  0xfb   :  { %2024 = vmatprep.mubr.bf16.mxu0 %v7524_v51  ;;  %2067 = vmatprep.mubr.bf16.mxu1 %v7524_v51 }
  0xfd   :  { %1995 = vmatpush1.bf16.msra.mxu0 %v6078_v17  ;;  %2038 = vmatpush1.bf16.msra.mxu1 %v6085_v19 }
  0xfe   :  { %1996 = vmatprep.subr.bf16.mxu0 %v6082_v18  ;;  %2039 = vmatprep.subr.bf16.mxu1 %v6095_v22 }
 0x101   :  { %1997 = vmatpush1.bf16.msra.mxu0 %v6093_v21  ;;  %2040 = vmatpush1.bf16.msra.mxu1 %v6100_v24 }
 0x102   :  { %1998 = vmatprep.subr.bf16.mxu0 %v6097_v23  ;;  %2041 = vmatprep.subr.bf16.mxu1 %v6102_v25 }
 0x105   :  { %1999 = vmatpush1.bf16.msra.mxu0 %v6107_v26  ;;  %2042 = vmatpush1.bf16.msra.mxu1 %v6114_v28 }
 0x106   :  { %2000 = vmatprep.subr.bf16.mxu0 %v6111_v27  ;;  %2043 = vmatprep.subr.bf16.mxu1 %v6123_v31 }
 0x109   :  { %2001 = vmatpush1.bf16.msra.mxu0 %v6121_v30  ;;  %2044 = vmatpush1.bf16.msra.mxu1 %v6129_v33 }
 0x10a   :  { %2002 = vmatprep.subr.bf16.mxu0 %v6126_v32  ;;  %2045 = vmatprep.subr.bf16.mxu1 %v6131_v34 }
 0x10d   :  { %2003 = vmatpush1.bf16.msra.mxu0 %v6136_v35  ;;  %2046 = vmatpush1.bf16.msra.mxu1 %v6143_v37 }
 0x10e   :  { %2004 = vmatprep.subr.bf16.mxu0 %v6140_v36  ;;  %2047 = vmatprep.subr.bf16.mxu1 %v6152_v40  ;;  %v6333_v36 = vshrl.u32 %v228_v38, 7 }
 0x110   :  { %v230_v40 = vsub.s32 0, %v6333_v36  ;;  %v7415_v30 = vsub.s32 2, %v6333_v36 }
 0x111   :  { %2005 = vmatpush1.bf16.msra.mxu0 %v6150_v39  ;;  %2048 = vmatpush1.bf16.msra.mxu1 %v6158_v42  ;;  %v192_v39 = vld [vmem:[#allocation9] sm:$0xf]  ;;  %v234_v42 = vsub.s32 1, %v6333_v36 }
 0x112   :  { %2006 = vmatprep.subr.bf16.mxu0 %v6156_v41  ;;  %2049 = vmatprep.subr.bf16.mxu1 %v6160_v43  ;;  %v6337_v37 = vrot.slane %v192_v39, %v230_v40 }
 0x113   :  { %v6339_v41 = vrot.slane %v192_v39, %v234_v42 }
 0x114   :  { %7525 = vst [vmem:[#allocation38_spill] sm:$0xff] %v6337_v37 }
 0x115   :  { %2007 = vmatpush1.bf16.msra.mxu0 %v6166_v44  ;;  %2050 = vmatpush1.bf16.msra.mxu1 %v6170_v45  ;;  %7526 = vst [vmem:[#allocation39_spill] sm:$0xff] %v6339_v41  ;;  %v7411_v45 = vsub.s32 3, %v6333_v36 }
 0x116   :  { %2142 = vmatprep.subr.bf16.mxu0 %v6172_v46  ;;  %2185 = vmatprep.subr.bf16.mxu1 %v6179_v48 }
 0x117   :  { %v6348_v25 = vrot.slane %v192_v39, %v7411_v45 }
 0x119   :  { %7527 = vst [vmem:[#allocation40_spill] sm:$0xff] %v6348_v25 }
 0x1ab   :  { %v1544_v43 = vpop.f32.mrb[0].mxu0  ;;  %v1587_v44 = vpop.f32.mrb[0].mxu1 }
 0x1ac   :  { %v4736_v46 = vadd.f32 %v1544_v43, %v6337_v37  ;;  %v1546_v35 = vpop.f32.mrb[1].mxu0  ;;  %v1589_v48 = vpop.f32.mrb[1].mxu1 }
 0x1ad   :  { %v4737_v38 = vadd.f32 %v1546_v35, %v6339_v41  ;;  %v1548_v34 = vpop.f32.mrb[2].mxu0  ;;  %v1591_v32 = vpop.f32.mrb[2].mxu1  ;;  %v4769_v24 = vadd.f32 %v1589_v48, %v6348_v25 }
 0x1ae   :  { %v4418_v33 = vmul.f32 -1.442695, %v4736_v46  ;;  %v4738_v31 = vadd.f32 %v1548_v34, %v6337_v37  ;;  %v1550_v27 = vpop.f32.mrb[3].mxu0  ;;  %v1593_v28 = vpop.f32.mrb[3].mxu1  ;;  %v6353_v46 = vrot.slane %v192_v39, %v7415_v30 }
 0x1af   :  { %v4420_v26 = vmul.f32 -1.442695, %v4737_v38  ;;  %v4739_v43 = vadd.f32 %v1550_v27, %v6339_v41  ;;  %v4771_v34 = vadd.f32 %v1593_v28, %v6348_v25  ;;  %v4422_v45 = vmul.f32 -1.442695, %v4769_v24 }
 0x1b0   :  { %5210 = vpow2.f32 %v4418_v33  ;;  %v4419_v23 = vmul.f32 -1.442695, %v4738_v31  ;;  %7528 = vst [vmem:[#allocation41_spill] sm:$0xff] %v6353_v46  ;;  %v4768_v38 = vadd.f32 %v1587_v44, %v6353_v46 }
 0x1b1   :  { %5212 = vpow2.f32 %v4420_v26  ;;  %v4421_v35 = vmul.f32 -1.442695, %v4739_v43  ;;  %v4423_v37 = vmul.f32 -1.442695, %v4771_v34  ;;  %v4770_v26 = vadd.f32 %v1591_v32, %v6353_v46  ;;  %v194_v43 = vld [vmem:[#allocation9 + $0x4] sm:$0xf] }
 0x1b2   :  { %5214 = vpow2.f32 %v4419_v23 }
 0x1b3   :  { %5216 = vpow2.f32 %v4421_v35 }
 0x1b4   :  { %5218 = vtanh.f32 %v4768_v38  ;;  %v6359_v38 = vrot.slane %v194_v43, %v230_v40 }
 0x1b5   :  { %5220 = vpow2.f32 %v4422_v45 }
 0x1b6   :  { %5222 = vpow2.f32 %v4423_v37 }
 0x1ba   :  { %v5211_v21 = vpop.eup %5210 }
 0x1bb   :  { %v5213_v27 = vpop.eup %5212  ;;  %v1610_v31 = vadd.f32 1.0, %v5211_v21 }
 0x1bc   :  { %v1622_v33 = vadd.f32 1.0, %v5213_v27  ;;  %v5215_v39 = vpop.eup %5214 }
 0x1bd   :  { %5224 = vrcp.f32 %v1610_v31  ;;  %v1611_v23 = vadd.f32 1.0, %v5215_v39  ;;  %v5217_v48 = vpop.eup %5216  ;;  %v6361_v31 = vrot.slane %v194_v43, %v234_v42 }
 0x1be   :  { %5226 = vrcp.f32 %v1622_v33  ;;  %v1623_v28 = vadd.f32 1.0, %v5217_v48  ;;  %v5219_v24 = vpop.eup %5218 }
 0x1bf   :  { %5228 = vtanh.f32 %v4770_v26  ;;  %v5221_v44 = vpop.eup %5220  ;;  %7529 = vst [vmem:[#allocation42_spill] sm:$0xff] %v6361_v31 }
 0x1c0   :  { %5230 = vrcp.f32 %v1611_v23  ;;  %v5223_v35 = vpop.eup %5222  ;;  %v1636_v27 = vadd.f32 1.0, %v5221_v44 }
 0x1c1   :  { %5232 = vrcp.f32 %v1623_v28  ;;  %v1637_v39 = vadd.f32 1.0, %v5223_v35 }
 0x1c2   :  { %5234 = vrcp.f32 %v1636_v27 }
 0x1c3   :  { %5236 = vrcp.f32 %v1637_v39  ;;  %v7531_v39 = vsub.s32 2, %v6333_v36 }
 0x1c7   :  { %v5225_v34 = vpop.eup %5224 }
 0x1c8   :  { %v5227_v21 = vpop.eup %5226  ;;  %v1644_v45 = vmul.f32 %v5225_v34, %v5219_v24 }
 0x1c9   :  { %v5229_v32 = vpop.eup %5228  ;;  %v1642_v37 = vmul.f32 0.0, %v5227_v21 }
 0x1ca   :  { %v5231_v33 = vpop.eup %5230 }
 0x1cb   :  { %v6363_v26 = vadd.f32 %v1644_v45, %v1642_v37  ;;  %v1645_v23 = vmul.f32 %v5231_v33, %v5229_v32  ;;  %v1855_v48 = vpop.f32.mrb[60].mxu0  ;;  %v1898_v28 = vpop.f32.mrb[60].mxu1 }
 0x1cc   :  { %v5233_v30 = vpop.eup %5232  ;;  %v4828_v46 = vadd.f32 %v1855_v48, %v6359_v38  ;;  %v1857_v25 = vpop.f32.mrb[61].mxu0  ;;  %v6379_v48 = vrot.slane %v194_v43, %v7531_v39 }
 0x1cd   :  { %v1900_v41 = vpop.f32.mrb[61].mxu1  ;;  %v1643_v40 = vmul.f32 0.0, %v5233_v30  ;;  %v4829_v24 = vadd.f32 %v1857_v25, %v6361_v31  ;;  %v1859_v34 = vpop.f32.mrb[62].mxu0  ;;  %5238 = vtanh.f32 %v6363_v26  ;;  %v7530_v30 = vsub.s32 3, %v6333_v36 }
 0x1ce   :  { %v1902_v44 = vpop.f32.mrb[62].mxu1  ;;  %v4456_v42 = vmul.f32 -1.442695, %v4828_v46  ;;  %v4830_v35 = vadd.f32 %v1859_v34, %v6359_v38  ;;  %v1861_v21 = vpop.f32.mrb[63].mxu0 }
 0x1cf   :  { %v1904_v45 = vpop.f32.mrb[63].mxu1  ;;  %v6369_v32 = vadd.f32 %v1645_v23, %v1643_v40  ;;  %v4458_v37 = vmul.f32 -1.442695, %v4829_v24  ;;  %v4831_v33 = vadd.f32 %v1861_v21, %v6361_v31  ;;  %v6374_v27 = vrot.slane %v194_v43, %v7530_v30  ;;  %v5235_v40 = vpop.eup %5234 }
 0x1d0   :  { %5240 = vpow2.f32 %v4456_v42  ;;  %v4457_v25 = vmul.f32 -1.442695, %v4830_v35  ;;  %v4860_v24 = vadd.f32 %v1898_v28, %v6379_v48  ;;  %v5237_v34 = vpop.eup %5236 }
 0x1d1   :  { %5242 = vtanh.f32 %v6369_v32  ;;  %v4459_v46 = vmul.f32 -1.442695, %v4831_v33  ;;  %v4861_v23 = vadd.f32 %v1900_v41, %v6374_v27  ;;  %v4863_v21 = vadd.f32 %v1904_v45, %v6374_v27 }
 0x1d2   :  { %5244 = vpow2.f32 %v4458_v37  ;;  %v4862_v37 = vadd.f32 %v1902_v44, %v6379_v48 }
 0x1d3   :  { %5246 = vpow2.f32 %v4457_v25  ;;  %v4460_v42 = vmul.f32 -1.442695, %v4861_v23  ;;  %v4461_v43 = vmul.f32 -1.442695, %v4863_v21 }
 0x1d4   :  { %5248 = vpow2.f32 %v4459_v46 }
 0x1d5   :  { %5250 = vtanh.f32 %v4860_v24 }
 0x1d6   :  { %5252 = vpow2.f32 %v4460_v42 }
 0x1d7   :  { %v5239_v35 = vpop.eup %5238 }
 0x1d8   :  { %v1650_v41 = vmul.f32 %v5239_v35, %v5235_v40 }
 0x1da   :  { %v5241_v30 = vpop.eup %5240 }
 0x1db   :  { %v5243_v33 = vpop.eup %5242  ;;  %v1921_v31 = vadd.f32 1.0, %v5241_v30 }
 0x1dc   :  { %v5245_v36 = vpop.eup %5244  ;;  %v1651_v25 = vmul.f32 %v5243_v33, %v5237_v34 }
 0x1dd   :  { %5254 = vrcp.f32 %v1921_v31  ;;  %v1933_v46 = vadd.f32 1.0, %v5245_v36  ;;  %v5247_v39 = vpop.eup %5246 }
 0x1de   :  { %5256 = vtanh.f32 %v4862_v37  ;;  %v1963_v28 = vpack.c.bf16 %v1651_v25, %v1650_v41  ;;  %v1922_v23 = vadd.f32 1.0, %v5247_v39  ;;  %v5249_v45 = vpop.eup %5248 }
 0x1df   :  { %5258 = vrcp.f32 %v1933_v46  ;;  %v1934_v44 = vadd.f32 1.0, %v5249_v45  ;;  %v5251_v31 = vpop.eup %5250 }
 0x1e0   :  { %5260 = vpow2.f32 %v4461_v43  ;;  %4646 = vst [vmem:[%s7376_s5] sm:$0xff] %v1963_v28   ;;  %2025 = vmatmul.mubr.bf16.vlgmr.msra.gmra.mrb[4].mxu0 %v1963_v28  ;;  %2068 = vmatmul.mubr.bf16.vlgmr.msra.gmra.mrb[4].mxu1 %v1963_v28  ;;  %v5253_v40 = vpop.eup %5252  ;;  %v7532_v28 = vld [vmem:[#allocation36_spill] sm:$0xff] }
 0x1e1   :  { %5262 = vrcp.f32 %v1922_v23  ;;  %2143 = vmatpush1.bf16.msra.mxu0 %v6201_v52  ;;  %2186 = vmatpush1.bf16.msra.mxu1 %v6203_v53  ;;  %v1947_v33 = vadd.f32 1.0, %v5253_v40 }
 0x1e2   :  { %2144 = vmatprep.subr.bf16.mxu0 %v6205_v54  ;;  %2187 = vmatprep.subr.bf16.mxu1 %v6207_v55  ;;  %5264 = vrcp.f32 %v1934_v44  ;;  %v7533_v44 = vld [vmem:[#allocation37_spill] sm:$0xff] }
 0x1e3   :  { %2174 = vmatprep.mubr.bf16.mxu0 %v7524_v51  ;;  %2217 = vmatprep.mubr.bf16.mxu1 %v7524_v51  ;;  %5266 = vrcp.f32 %v1947_v33  ;;  %v7548_v33 = vld [vmem:[#allocation25_spill] sm:$0xff] }
 0x1e5   :  { %2145 = vmatpush1.bf16.msra.mxu0 %v6213_v57  ;;  %2188 = vmatpush1.bf16.msra.mxu1 %v6215_v58 }
 0x1e6   :  { %2146 = vmatprep.subr.bf16.mxu0 %v6219_v59  ;;  %2189 = vmatprep.subr.bf16.mxu1 %v6221_v60 }
 0x1e7   :  { %v5255_v24 = vpop.eup %5254 }
 0x1e8   :  { %v5257_v34 = vpop.eup %5256  ;;  %v1955_v42 = vmul.f32 %v5255_v24, %v5251_v31 }
 0x1e9   :  { %v5259_v21 = vpop.eup %5258  ;;  %2147 = vmatpush1.bf16.msra.mxu0 %v6227_v61  ;;  %2190 = vmatpush1.bf16.msra.mxu1 %v6229_v62 }
 0x1ea   :  { %v5261_v35 = vpop.eup %5260  ;;  %v1953_v30 = vmul.f32 0.0, %v5259_v21  ;;  %2148 = vmatprep.subr.bf16.mxu0 %v6233_v63  ;;  %2191 = vmatprep.subr.bf16.mxu1 %v6235_v1  ;;  %v7540_v21 = vld [vmem:[#allocation17_spill] sm:$0xff] }
 0x1eb   :  { %v5263_v37 = vpop.eup %5262  ;;  %v1948_v25 = vadd.f32 1.0, %v5261_v35  ;;  %v7545_v35 = vld [vmem:[#allocation23_spill] sm:$0xff] }
 0x1ec   :  { %v6402_v36 = vadd.f32 %v1955_v42, %v1953_v30  ;;  %v1956_v43 = vmul.f32 %v5263_v37, %v5257_v34  ;;  %v5265_v41 = vpop.eup %5264  ;;  %v7546_v30 = vld [vmem:[#allocation24_spill] sm:$0xff]  ;;  %v7547_v37 = vld [vmem:[#allocation26_spill] sm:$0xff] }
 0x1ed   :  { %2149 = vmatpush1.bf16.msra.mxu0 %v6239_v2  ;;  %2192 = vmatpush1.bf16.msra.mxu1 %v6241_v3  ;;  %v1954_v46 = vmul.f32 0.0, %v5265_v41  ;;  %v5267_v23 = vpop.eup %5266  ;;  %v7550_v41 = vld [vmem:[#allocation27_spill] sm:$0xff] }
 0x1ee   :  { %2150 = vmatprep.subr.bf16.mxu0 %v6245_v4  ;;  %2193 = vmatprep.subr.bf16.mxu1 %v6247_v5  ;;  %5268 = vtanh.f32 %v6402_v36 }
 0x1ef   :  { %v6409_v39 = vadd.f32 %v1956_v43, %v1954_v46  ;;  %5270 = vrcp.f32 %v1948_v25  ;;  %v7549_v43 = vld [vmem:[#allocation28_spill] sm:$0xff]  ;;  %v7551_v25 = vld [vmem:[#allocation30_spill] sm:$0xff]  ;;  %v7552_v46 = vld [vmem:[#allocation29_spill] sm:$0xff] }
 0x1f1   :  { %2151 = vmatpush1.bf16.msra.mxu0 %v6251_v7  ;;  %2194 = vmatpush1.bf16.msra.mxu1 %v6253_v9  ;;  %5272 = vtanh.f32 %v6409_v39 }
 0x1f2   :  { %2152 = vmatprep.subr.bf16.mxu0 %v6257_v10  ;;  %2195 = vmatprep.subr.bf16.mxu1 %v6259_v11 }
 0x1f5   :  { %2153 = vmatpush1.bf16.msra.mxu0 %v6263_v12  ;;  %2196 = vmatpush1.bf16.msra.mxu1 %v6265_v20 }
 0x1f6   :  { %2154 = vmatprep.subr.bf16.mxu0 %v6269_v29  ;;  %2197 = vmatprep.subr.bf16.mxu1 %v7532_v28 }
 0x1f8   :  { %v5269_v45 = vpop.eup %5268 }
 0x1f9   :  { %2155 = vmatpush1.bf16.msra.mxu0 %v6275_v47  ;;  %2198 = vmatpush1.bf16.msra.mxu1 %v6277_v49  ;;  %v5271_v31 = vpop.eup %5270  ;;  %v1961_v24 = vmul.f32 %v5269_v45, %v5267_v23  ;;  %v7553_v23 = vld [vmem:[#allocation31_spill] sm:$0xff]  ;;  %v7554_v45 = vld [vmem:[#allocation32_spill] sm:$0xff] }
 0x1fa   :  { %2156 = vmatprep.subr.bf16.mxu0 %v6281_v50  ;;  %2199 = vmatprep.subr.bf16.mxu1 %v7533_v44 }
 0x1fb   :  { %v5273_v40 = vpop.eup %5272 }
 0x1fc   :  { %v1962_v34 = vmul.f32 %v5273_v40, %v5271_v31  ;;  %v7555_v31 = vld [vmem:[#allocation33_spill] sm:$0xff]  ;;  %v7556_v40 = vld [vmem:[#allocation34_spill] sm:$0xff] }
 0x1fd   :  { %2157 = vmatpush1.bf16.msra.mxu0 %v6287_v0  ;;  %2200 = vmatpush1.bf16.msra.mxu1 %v6289_v56 }
 0x1fe   :  { %2314 = vmatprep.subr.bf16.mxu0 %v6039_v6  ;;  %2357 = vmatprep.subr.bf16.mxu1 %v6044_v8  ;;  %v1973_v42 = vpack.c.bf16 %v1962_v34, %v1961_v24  ;;  %v7534_v6 = vld [vmem:[#allocation12_spill] sm:$0xff]  ;;  %v7535_v8 = vld [vmem:[#allocation14_spill] sm:$0xff]  ;;  %v7557_v24 = vld [vmem:[#allocation35_spill] sm:$0xff] }
 0x200   :  { %4722 = vst [vmem:[%s7377_s6 + $0x38] sm:$0xff] %v1973_v42   ;;  %2175 = vmatmul.mubr.bf16.vlgmr.msra.gmra.mrb[56].mxu0 %v1973_v42  ;;  %2218 = vmatmul.mubr.bf16.vlgmr.msra.gmra.mrb[56].mxu1 %v1973_v42 }
 0x201   :  { %2315 = vmatpush1.bf16.msra.mxu0 %v6068_v13  ;;  %2358 = vmatpush1.bf16.msra.mxu1 %v6072_v15  ;;  %v7536_v13 = vld [vmem:[#allocation13_spill] sm:$0xff]  ;;  %v7538_v15 = vld [vmem:[#allocation16_spill] sm:$0xff] }
 0x202   :  { %2316 = vmatprep.subr.bf16.mxu0 %v6070_v14  ;;  %2359 = vmatprep.subr.bf16.mxu1 %v6074_v16  ;;  %v7537_v14 = vld [vmem:[#allocation15_spill] sm:$0xff]  ;;  %v7539_v16 = vld [vmem:[#allocation18_spill] sm:$0xff] }
 0x203   :  { %2346 = vmatprep.mubr.bf16.mxu0 %v7524_v51  ;;  %2389 = vmatprep.mubr.bf16.mxu1 %v7524_v51 }
 0x205   :  { %2317 = vmatpush1.bf16.msra.mxu0 %v6078_v17  ;;  %2360 = vmatpush1.bf16.msra.mxu1 %v6085_v19  ;;  %v7541_v17 = vld [vmem:[#allocation20_spill] sm:$0xff]  ;;  %v7542_v19 = vld [vmem:[#allocation19_spill] sm:$0xff] }
 0x206   :  { %2318 = vmatprep.subr.bf16.mxu0 %v6082_v18  ;;  %2361 = vmatprep.subr.bf16.mxu1 %v6095_v22  ;;  %v7543_v18 = vld [vmem:[#allocation22_spill] sm:$0xff]  ;;  %v7544_v22 = vld [vmem:[#allocation21_spill] sm:$0xff] }
 0x209   :  { %2319 = vmatpush1.bf16.msra.mxu0 %v7534_v6  ;;  %2362 = vmatpush1.bf16.msra.mxu1 %v7535_v8  ;;  %v7558_v6 = vld [vmem:[#allocation38_spill] sm:$0xff] }
 0x20a   :  { %2320 = vmatprep.subr.bf16.mxu0 %v7536_v13  ;;  %2363 = vmatprep.subr.bf16.mxu1 %v7537_v14 }
 0x20d   :  { %2321 = vmatpush1.bf16.msra.mxu0 %v7538_v15  ;;  %2364 = vmatpush1.bf16.msra.mxu1 %v7539_v16  ;;  %v7559_v15 = vld [vmem:[#allocation39_spill] sm:$0xff] }
 0x20e   :  { %2322 = vmatprep.subr.bf16.mxu0 %v7540_v21  ;;  %2365 = vmatprep.subr.bf16.mxu1 %v7541_v17 }
 0x211   :  { %2323 = vmatpush1.bf16.msra.mxu0 %v7542_v19  ;;  %2366 = vmatpush1.bf16.msra.mxu1 %v7543_v18 }
 0x212   :  { %2324 = vmatprep.subr.bf16.mxu0 %v7544_v22  ;;  %2367 = vmatprep.subr.bf16.mxu1 %v7545_v35 }
 0x215   :  { %2325 = vmatpush1.bf16.msra.mxu0 %v7546_v30  ;;  %2368 = vmatpush1.bf16.msra.mxu1 %v7547_v37 }
 0x216   :  { %2326 = vmatprep.subr.bf16.mxu0 %v7548_v33  ;;  %2369 = vmatprep.subr.bf16.mxu1 %v7549_v43 }
 0x219   :  { %2327 = vmatpush1.bf16.msra.mxu0 %v7550_v41  ;;  %2370 = vmatpush1.bf16.msra.mxu1 %v7551_v25  ;;  %v7560_v41 = vld [vmem:[#allocation40_spill] sm:$0xff] }
 0x21a   :  { %2328 = vmatprep.subr.bf16.mxu0 %v7552_v46  ;;  %2371 = vmatprep.subr.bf16.mxu1 %v7553_v23  ;;  %v7561_v46 = vld [vmem:[#allocation41_spill] sm:$0xff] }
 0x21d   :  { %2329 = vmatpush1.bf16.msra.mxu0 %v7554_v45  ;;  %2372 = vmatpush1.bf16.msra.mxu1 %v7555_v31 }
 0x21e   :  { %2464 = vmatprep.subr.bf16.mxu0 %v7556_v40  ;;  %2507 = vmatprep.subr.bf16.mxu1 %v7557_v24 }
 0x2b3   :  { %v2026_v34 = vpop.f32.mrb[4].mxu0  ;;  %v2069_v42 = vpop.f32.mrb[4].mxu1 }
 0x2b4   :  { %v4740_v8 = vadd.f32 %v2026_v34, %v7558_v6  ;;  %v2028_v13 = vpop.f32.mrb[5].mxu0  ;;  %v2071_v14 = vpop.f32.mrb[5].mxu1  ;;  %v4772_v23 = vadd.f32 %v2069_v42, %v7561_v46 }
 0x2b5   :  { %v4741_v16 = vadd.f32 %v2028_v13, %v7559_v15  ;;  %v2030_v21 = vpop.f32.mrb[6].mxu0  ;;  %v2073_v17 = vpop.f32.mrb[6].mxu1  ;;  %v4773_v25 = vadd.f32 %v2071_v14, %v7560_v41 }
 0x2b6   :  { %v4468_v19 = vmul.f32 -1.442695, %v4740_v8  ;;  %v4742_v18 = vadd.f32 %v2030_v21, %v7558_v6  ;;  %v2032_v22 = vpop.f32.mrb[7].mxu0  ;;  %v2075_v35 = vpop.f32.mrb[7].mxu1  ;;  %v4774_v40 = vadd.f32 %v2073_v17, %v7561_v46 }
 0x2b7   :  { %v4470_v30 = vmul.f32 -1.442695, %v4741_v16  ;;  %v4743_v37 = vadd.f32 %v2032_v22, %v7559_v15  ;;  %v4472_v45 = vmul.f32 -1.442695, %v4773_v25  ;;  %v4775_v31 = vadd.f32 %v2075_v35, %v7560_v41 }
 0x2b8   :  { %5274 = vpow2.f32 %v4468_v19  ;;  %v4469_v33 = vmul.f32 -1.442695, %v4742_v18 }
 0x2b9   :  { %5276 = vpow2.f32 %v4470_v30  ;;  %v4471_v43 = vmul.f32 -1.442695, %v4743_v37  ;;  %v4473_v13 = vmul.f32 -1.442695, %v4775_v31 }
 0x2ba   :  { %5278 = vpow2.f32 %v4469_v33 }
 0x2bb   :  { %5280 = vpow2.f32 %v4471_v43 }
 0x2bc   :  { %5282 = vtanh.f32 %v4772_v23 }
 0x2bd   :  { %5284 = vpow2.f32 %v4472_v45 }
 0x2be   :  { %5286 = vtanh.f32 %v4774_v40 }
 0x2c2   :  { %v5275_v24 = vpop.eup %5274 }
 0x2c3   :  { %v5277_v34 = vpop.eup %5276  ;;  %v2092_v8 = vadd.f32 1.0, %v5275_v24 }
 0x2c4   :  { %v2104_v16 = vadd.f32 1.0, %v5277_v34  ;;  %v5279_v21 = vpop.eup %5278 }
 0x2c5   :  { %5288 = vrcp.f32 %v2092_v8  ;;  %v2093_v14 = vadd.f32 1.0, %v5279_v21  ;;  %v5281_v19 = vpop.eup %5280 }
 0x2c6   :  { %5290 = vrcp.f32 %v2104_v16  ;;  %v2105_v42 = vadd.f32 1.0, %v5281_v19  ;;  %v5283_v18 = vpop.eup %5282  ;;  %v7562_v19 = vld [vmem:[#allocation42_spill] sm:$0xff] }
 0x2c7   :  { %5292 = vpow2.f32 %v4473_v13  ;;  %v5285_v22 = vpop.eup %5284 }
 0x2c8   :  { %5294 = vrcp.f32 %v2093_v14  ;;  %v5287_v17 = vpop.eup %5286  ;;  %v2118_v23 = vadd.f32 1.0, %v5285_v22 }
 0x2c9   :  { %5296 = vrcp.f32 %v2105_v42 }
 0x2ca   :  { %5298 = vrcp.f32 %v2118_v23 }
 0x2cf   :  { %v5289_v35 = vpop.eup %5288 }
 0x2d0   :  { %v5291_v30 = vpop.eup %5290  ;;  %v2126_v37 = vmul.f32 %v5289_v35, %v5283_v18 }
 0x2d1   :  { %v5293_v33 = vpop.eup %5292  ;;  %v2124_v43 = vmul.f32 %v5291_v30, %v6363_v26 }
 0x2d2   :  { %v5295_v25 = vpop.eup %5294  ;;  %v2119_v24 = vadd.f32 1.0, %v5293_v33 }
 0x2d3   :  { %v6474_v45 = vadd.f32 %v2126_v37, %v2124_v43  ;;  %v2127_v31 = vmul.f32 %v5295_v25, %v5287_v17  ;;  %v5297_v40 = vpop.eup %5296  ;;  %v2176_v34 = vpop.f32.mrb[56].mxu0 }
 0x2d4   :  { %v2219_v8 = vpop.f32.mrb[56].mxu1  ;;  %v2125_v13 = vmul.f32 %v5297_v40, %v6369_v32  ;;  %v4824_v16 = vadd.f32 %v2176_v34, %v6359_v38  ;;  %v2178_v21 = vpop.f32.mrb[57].mxu0 }
 0x2d5   :  { %v2221_v14 = vpop.f32.mrb[57].mxu1  ;;  %v4825_v42 = vadd.f32 %v2178_v21, %v7562_v19  ;;  %v2180_v18 = vpop.f32.mrb[58].mxu0  ;;  %5300 = vtanh.f32 %v6474_v45  ;;  %v4856_v40 = vadd.f32 %v2219_v8, %v6379_v48 }
 0x2d6   :  { %v2223_v26 = vpop.f32.mrb[58].mxu1  ;;  %v6480_v22 = vadd.f32 %v2127_v31, %v2125_v13  ;;  %v4474_v17 = vmul.f32 -1.442695, %v4824_v16  ;;  %v4826_v35 = vadd.f32 %v2180_v18, %v6359_v38  ;;  %v2182_v30 = vpop.f32.mrb[59].mxu0  ;;  %5302 = vrcp.f32 %v2119_v24 }
 0x2d7   :  { %v2225_v37 = vpop.f32.mrb[59].mxu1  ;;  %v4476_v32 = vmul.f32 -1.442695, %v4825_v42  ;;  %v4827_v33 = vadd.f32 %v2182_v30, %v7562_v19  ;;  %v4857_v23 = vadd.f32 %v2221_v14, %v6374_v27  ;;  %v5299_v31 = vpop.eup %5298  ;;  %v4858_v21 = vadd.f32 %v2223_v26, %v6379_v48 }
 0x2d8   :  { %5304 = vtanh.f32 %v6480_v22  ;;  %v4475_v43 = vmul.f32 -1.442695, %v4826_v35  ;;  %v4859_v24 = vadd.f32 %v2225_v37, %v6374_v27 }
 0x2d9   :  { %5306 = vpow2.f32 %v4474_v17  ;;  %v4477_v25 = vmul.f32 -1.442695, %v4827_v33  ;;  %v4478_v13 = vmul.f32 -1.442695, %v4857_v23 }
 0x2da   :  { %5308 = vpow2.f32 %v4476_v32  ;;  %v4479_v14 = vmul.f32 -1.442695, %v4859_v24  ;;  %v6579_v24 = vld [vmem:[#allocation7 + $0x60] ss:$16 sps:$4 sm:$0xff]  }
 0x2db   :  { %5310 = vpow2.f32 %v4475_v43 }
 0x2dc   :  { %5312 = vpow2.f32 %v4477_v25 }
 0x2dd   :  { %5314 = vtanh.f32 %v4856_v40 }
 0x2de   :  { %5316 = vpow2.f32 %v4478_v13  ;;  %v6576_v13 = vld [vmem:[#allocation7 + $0x6c] ss:$16 sps:$4 sm:$0xff]  }
 0x2df   :  { %v5301_v34 = vpop.eup %5300  ;;  %5318 = vtanh.f32 %v4858_v21  ;;  %v6585_v21 = vld [vmem:[#allocation7 + $0x84] ss:$16 sps:$4 sm:$0xff]  }
 0x2e0   :  { %v5303_v16 = vpop.eup %5302  ;;  %v2132_v17 = vmul.f32 %v5301_v34, %v5299_v31 }
 0x2e2   :  { %v5305_v42 = vpop.eup %5304 }
 0x2e3   :  { %v5307_v18 = vpop.eup %5306  ;;  %v2133_v35 = vmul.f32 %v5305_v42, %v5303_v16  ;;  %v6582_v16 = vld [vmem:[#allocation7 + $0x68] ss:$16 sps:$4 sm:$0xff]   ;;  %v6588_v42 = vld [vmem:[#allocation7 + $0x8c] ss:$16 sps:$4 sm:$0xff]  }
 0x2e4   :  { %v5309_v30 = vpop.eup %5308  ;;  %v2242_v32 = vadd.f32 1.0, %v5307_v18  ;;  %v6591_v18 = vld [vmem:[#allocation7 + $0x80] ss:$16 sps:$4 sm:$0xff]  }
 0x2e5   :  { %v2254_v33 = vadd.f32 1.0, %v5309_v30  ;;  %v2284_v43 = vpack.c.bf16 %v2133_v35, %v2132_v17  ;;  %v5311_v8 = vpop.eup %5310  ;;  %v6594_v17 = vld [vmem:[#allocation7 + $0x88] ss:$16 sps:$4 sm:$0xff]   ;;  %v6597_v35 = vld [vmem:[#allocation7 + $0xa4] ss:$16 sps:$4 sm:$0xff]  }
 0x2e6   :  { %5320 = vrcp.f32 %v2242_v32  ;;  %v2243_v25 = vadd.f32 1.0, %v5311_v8  ;;  %v5313_v26 = vpop.eup %5312  ;;  %7563 = vst [vmem:[#allocation36_spill] sm:$0xff] %v6597_v35  ;;  %v6600_v30 = vld [vmem:[#allocation7 + $0xac] ss:$16 sps:$4 sm:$0xff]   ;;  %v6603_v32 = vld [vmem:[#allocation7 + $0xa0] ss:$16 sps:$4 sm:$0xff]  }
 0x2e7   :  { %5322 = vrcp.f32 %v2254_v33  ;;  %4723 = vst [vmem:[%s7376_s5 + $0x8] sm:$0xff] %v2284_v43   ;;  %2347 = vmatmul.mubr.bf16.vlgmr.msra.gmra.mrb[8].mxu0 %v2284_v43  ;;  %2390 = vmatmul.mubr.bf16.vlgmr.msra.gmra.mrb[8].mxu1 %v2284_v43  ;;  %v2255_v37 = vadd.f32 1.0, %v5313_v26  ;;  %v5315_v23 = vpop.eup %5314  ;;  %7564 = vst [vmem:[#allocation37_spill] sm:$0xff] %v6600_v30  ;;  %v6609_v33 = vld [vmem:[#allocation7 + $0xc4] ss:$16 sps:$4 sm:$0xff]  }
 0x2e8   :  { %5324 = vpow2.f32 %v4479_v14  ;;  %2465 = vmatpush1.bf16.msra.mxu0 %v6201_v52  ;;  %2508 = vmatpush1.bf16.msra.mxu1 %v6203_v53  ;;  %v5317_v52 = vpop.eup %5316  ;;  %7565 = vst [vmem:[#allocation12_spill] sm:$0xff] %v6603_v32  ;;  %v6606_v14 = vld [vmem:[#allocation7 + $0xa8] ss:$16 sps:$4 sm:$0xff]   ;;  %7567 = vst [vmem:[#allocation13_spill] sm:$0xff] %v6609_v33  ;;  %v6612_v43 = vld [vmem:[#allocation7 + $0xcc] ss:$16 sps:$4 sm:$0xff]  }
 0x2e9   :  { %5326 = vrcp.f32 %v2243_v25  ;;  %2466 = vmatprep.subr.bf16.mxu0 %v6205_v54  ;;  %2509 = vmatprep.subr.bf16.mxu1 %v6207_v55  ;;  %v5319_v53 = vpop.eup %5318  ;;  %7566 = vst [vmem:[#allocation14_spill] sm:$0xff] %v6606_v14  ;;  %7568 = vst [vmem:[#allocation15_spill] sm:$0xff] %v6612_v43  ;;  %v6615_v8 = vld [vmem:[#allocation7 + $0xc0] ss:$16 sps:$4 sm:$0xff]   ;;  %v6618_v25 = vld [vmem:[#allocation7 + $0xc8] ss:$16 sps:$4 sm:$0xff]  }
 0x2ea   :  { %2496 = vmatprep.mubr.bf16.mxu0 %v7524_v51  ;;  %2539 = vmatprep.mubr.bf16.mxu1 %v7524_v51  ;;  %5328 = vrcp.f32 %v2255_v37  ;;  %7569 = vst [vmem:[#allocation16_spill] sm:$0xff] %v6615_v8  ;;  %7570 = vst [vmem:[#allocation18_spill] sm:$0xff] %v6618_v25  ;;  %v6621_v26 = vld [vmem:[#allocation7 + $0xe4] ss:$16 sps:$4 sm:$0xff]   ;;  %v6624_v37 = vld [vmem:[#allocation7 + $0xec] ss:$16 sps:$4 sm:$0xff]  }
 0x2eb   :  { %7571 = vst [vmem:[#allocation17_spill] sm:$0xff] %v6621_v26  ;;  %7572 = vst [vmem:[#allocation20_spill] sm:$0xff] %v6624_v37 }
 0x2ec   :  { %2467 = vmatpush1.bf16.msra.mxu0 %v6213_v57  ;;  %2510 = vmatpush1.bf16.msra.mxu1 %v6215_v58 }
 0x2ed   :  { %2468 = vmatprep.subr.bf16.mxu0 %v6219_v59  ;;  %2511 = vmatprep.subr.bf16.mxu1 %v6221_v60  ;;  %v2268_v59 = vadd.f32 1.0, %v5317_v52  ;;  %v6630_v52 = vld [vmem:[#allocation7 + $0xe8] ss:$16 sps:$4 sm:$0xff]  }
 0x2ee   :  { %7574 = vst [vmem:[#allocation22_spill] sm:$0xff] %v6630_v52 }
 0x2ef   :  { %5330 = vrcp.f32 %v2268_v59 }
 0x2f0   :  { %v5321_v31 = vpop.eup %5320  ;;  %2469 = vmatpush1.bf16.msra.mxu0 %v6227_v61  ;;  %2512 = vmatpush1.bf16.msra.mxu1 %v6229_v62 }
 0x2f1   :  { %v5323_v54 = vpop.eup %5322  ;;  %v2276_v55 = vmul.f32 %v5321_v31, %v5315_v23  ;;  %2470 = vmatprep.subr.bf16.mxu0 %v6233_v63  ;;  %2513 = vmatprep.subr.bf16.mxu1 %v6235_v1  ;;  %v6627_v23 = vld [vmem:[#allocation7 + $0xe0] ss:$16 sps:$4 sm:$0xff]   ;;  %v6636_v31 = vld [vmem:[#allocation7 + $0x10c] ss:$16 sps:$4 sm:$0xff]  }
 0x2f2   :  { %v5325_v57 = vpop.eup %5324  ;;  %v2274_v58 = vmul.f32 %v5323_v54, %v6402_v36  ;;  %v6564_v36 = vld [vmem:[#allocation7 + $0x4c] ss:$16 sps:$4 sm:$0xff]   ;;  %7573 = vst [vmem:[#allocation19_spill] sm:$0xff] %v6627_v23  ;;  %7576 = vst [vmem:[#allocation23_spill] sm:$0xff] %v6636_v31 }
 0x2f3   :  { %v5327_v40 = vpop.eup %5326  ;;  %v2269_v62 = vadd.f32 1.0, %v5325_v57 }
 0x2f4   :  { %v6507_v34 = vadd.f32 %v2276_v55, %v2274_v58  ;;  %v2277_v60 = vmul.f32 %v5327_v40, %v5319_v53  ;;  %2471 = vmatpush1.bf16.msra.mxu0 %v6239_v2  ;;  %2514 = vmatpush1.bf16.msra.mxu1 %v6241_v3  ;;  %v5329_v61 = vpop.eup %5328  ;;  %v6633_v53 = vld [vmem:[#allocation7 + $0x104] ss:$16 sps:$4 sm:$0xff]  }
 0x2f5   :  { %2472 = vmatprep.subr.bf16.mxu0 %v6245_v4  ;;  %2515 = vmatprep.subr.bf16.mxu1 %v6247_v5  ;;  %v2275_v63 = vmul.f32 %v5329_v61, %v6409_v39  ;;  %v6567_v39 = vld [vmem:[#allocation7 + $0x40] ss:$16 sps:$4 sm:$0xff]   ;;  %7575 = vst [vmem:[#allocation21_spill] sm:$0xff] %v6633_v53 }
 0x2f6   :  { %5332 = vtanh.f32 %v6507_v34 }
 0x2f7   :  { %v6515_v1 = vadd.f32 %v2277_v60, %v2275_v63  ;;  %5334 = vrcp.f32 %v2269_v62 }
 0x2f8   :  { %2473 = vmatpush1.bf16.msra.mxu0 %v6251_v7  ;;  %2516 = vmatpush1.bf16.msra.mxu1 %v6253_v9 }
 0x2f9   :  { %2474 = vmatprep.subr.bf16.mxu0 %v6257_v10  ;;  %2517 = vmatprep.subr.bf16.mxu1 %v6259_v11  ;;  %5336 = vtanh.f32 %v6515_v1  ;;  %v5331_v2 = vpop.eup %5330  ;;  %v6532_v10 = vld [vmem:[#allocation7 + $0x4] ss:$16 sps:$4 sm:$0xff]   ;;  %v6535_v11 = vld [vmem:[#allocation7 + $0xc] ss:$16 sps:$4 sm:$0xff]  }
 0x2fc   :  { %2475 = vmatpush1.bf16.msra.mxu0 %v6263_v12  ;;  %2518 = vmatpush1.bf16.msra.mxu1 %v6265_v20  ;;  %v6547_v20 = vld [vmem:[#allocation7 + $0x24] ss:$16 sps:$4 sm:$0xff]  }
 0x2fd   :  { %2476 = vmatprep.subr.bf16.mxu0 %v6269_v29  ;;  %2519 = vmatprep.subr.bf16.mxu1 %v7532_v28  ;;  %v6550_v29 = vld [vmem:[#allocation7 + $0x2c] ss:$16 sps:$4 sm:$0xff]   ;;  %v6570_v28 = vld [vmem:[#allocation7 + $0x48] ss:$16 sps:$4 sm:$0xff]  }
 0x300   :  { %2477 = vmatpush1.bf16.msra.mxu0 %v6275_v47  ;;  %2520 = vmatpush1.bf16.msra.mxu1 %v6277_v49  ;;  %v5333_v3 = vpop.eup %5332  ;;  %v6555_v47 = vld [vmem:[#allocation7 + $0x20] ss:$16 sps:$4 sm:$0xff]   ;;  %v6558_v49 = vld [vmem:[#allocation7 + $0x28] ss:$16 sps:$4 sm:$0xff]  }
 0x301   :  { %2478 = vmatprep.subr.bf16.mxu0 %v6281_v50  ;;  %2521 = vmatprep.subr.bf16.mxu1 %v7533_v44  ;;  %v5335_v4 = vpop.eup %5334  ;;  %v2282_v7 = vmul.f32 %v5333_v3, %v5331_v2  ;;  %v6561_v50 = vld [vmem:[#allocation7 + $0x44] ss:$16 sps:$4 sm:$0xff]  }
 0x302   :  { %v6573_v44 = vld [vmem:[#allocation7 + $0x64] ss:$16 sps:$4 sm:$0xff]  }
 0x303   :  { %v5337_v5 = vpop.eup %5336 }
 0x304   :  { %2479 = vmatpush1.bf16.msra.mxu0 %v6287_v0  ;;  %2522 = vmatpush1.bf16.msra.mxu1 %v6289_v56  ;;  %v2283_v9 = vmul.f32 %v5337_v5, %v5335_v4  ;;  %v6541_v0 = vld [vmem:[#allocation7] ss:$16 sps:$4 sm:$0xff]   ;;  %v6544_v56 = vld [vmem:[#allocation7 + $0x8] ss:$16 sps:$4 sm:$0xff]  }
 0x305   :  { %2636 = vmatprep.subr.bf16.mxu0 %v6532_v10  ;;  %2679 = vmatprep.subr.bf16.mxu1 %v6535_v11 }
 0x306   :  { %v2295_v12 = vpack.c.bf16 %v2283_v9, %v2282_v7 }
 0x308   :  { %4724 = vst [vmem:[%s7377_s6 + $0x30] sm:$0xff] %v2295_v12   ;;  %2497 = vmatmul.mubr.bf16.vlgmr.msra.gmra.mrb[52].mxu0 %v2295_v12  ;;  %2540 = vmatmul.mubr.bf16.vlgmr.msra.gmra.mrb[52].mxu1 %v2295_v12 }
 0x309   :  { %2637 = vmatpush1.bf16.msra.mxu0 %v6541_v0  ;;  %2680 = vmatpush1.bf16.msra.mxu1 %v6544_v56 }
 0x30a   :  { %2638 = vmatprep.subr.bf16.mxu0 %v6547_v20  ;;  %2681 = vmatprep.subr.bf16.mxu1 %v6550_v29 }
 0x30b   :  { %2668 = vmatprep.mubr.bf16.mxu0 %v7524_v51  ;;  %2711 = vmatprep.mubr.bf16.mxu1 %v7524_v51 }
 0x30d   :  { %2639 = vmatpush1.bf16.msra.mxu0 %v6555_v47  ;;  %2682 = vmatpush1.bf16.msra.mxu1 %v6558_v49 }
 0x30e   :  { %2640 = vmatprep.subr.bf16.mxu0 %v6561_v50  ;;  %2683 = vmatprep.subr.bf16.mxu1 %v6564_v36 }
 0x311   :  { %2641 = vmatpush1.bf16.msra.mxu0 %v6567_v39  ;;  %2684 = vmatpush1.bf16.msra.mxu1 %v6570_v28 }
 0x312   :  { %2642 = vmatprep.subr.bf16.mxu0 %v6573_v44  ;;  %2685 = vmatprep.subr.bf16.mxu1 %v6576_v13 }
 0x315   :  { %2643 = vmatpush1.bf16.msra.mxu0 %v6579_v24  ;;  %2686 = vmatpush1.bf16.msra.mxu1 %v6582_v16 }
 0x316   :  { %2644 = vmatprep.subr.bf16.mxu0 %v6585_v21  ;;  %2687 = vmatprep.subr.bf16.mxu1 %v6588_v42 }
 0x319   :  { %2645 = vmatpush1.bf16.msra.mxu0 %v6591_v18  ;;  %2688 = vmatpush1.bf16.msra.mxu1 %v6594_v17 }
 0x31a   :  { %2646 = vmatprep.subr.bf16.mxu0 %v6597_v35  ;;  %2689 = vmatprep.subr.bf16.mxu1 %v6600_v30 }
 0x31d   :  { %2647 = vmatpush1.bf16.msra.mxu0 %v6603_v32  ;;  %2690 = vmatpush1.bf16.msra.mxu1 %v6606_v14 }
 0x31e   :  { %2648 = vmatprep.subr.bf16.mxu0 %v6609_v33  ;;  %2691 = vmatprep.subr.bf16.mxu1 %v6612_v43 }
 0x321   :  { %2649 = vmatpush1.bf16.msra.mxu0 %v6615_v8  ;;  %2692 = vmatpush1.bf16.msra.mxu1 %v6618_v25 }
 0x322   :  { %2650 = vmatprep.subr.bf16.mxu0 %v6621_v26  ;;  %2693 = vmatprep.subr.bf16.mxu1 %v6624_v37 }
 0x325   :  { %2651 = vmatpush1.bf16.msra.mxu0 %v6627_v23  ;;  %2694 = vmatpush1.bf16.msra.mxu1 %v6630_v52 }
 0x326   :  { %2786 = vmatprep.subr.bf16.mxu0 %v6633_v53  ;;  %2829 = vmatprep.subr.bf16.mxu1 %v6636_v31 }
 0x3ba   :  { %v2348_v54 = vpop.f32.mrb[8].mxu0  ;;  %v2391_v55 = vpop.f32.mrb[8].mxu1 }
 0x3bb   :  { %v4744_v57 = vadd.f32 %v2348_v54, %v7558_v6  ;;  %v2350_v58 = vpop.f32.mrb[9].mxu0  ;;  %v2393_v40 = vpop.f32.mrb[9].mxu1  ;;  %v4776_v54 = vadd.f32 %v2391_v55, %v7561_v46 }
 0x3bc   :  { %v4745_v59 = vadd.f32 %v2350_v58, %v7559_v15  ;;  %v2352_v60 = vpop.f32.mrb[10].mxu0  ;;  %v2395_v61 = vpop.f32.mrb[10].mxu1  ;;  %v4777_v12 = vadd.f32 %v2393_v40, %v7560_v41 }
 0x3bd   :  { %v4488_v62 = vmul.f32 -1.442695, %v4744_v57  ;;  %v4746_v63 = vadd.f32 %v2352_v60, %v7558_v6  ;;  %v2354_v2 = vpop.f32.mrb[11].mxu0  ;;  %v2397_v3 = vpop.f32.mrb[11].mxu1  ;;  %v4778_v60 = vadd.f32 %v2395_v61, %v7561_v46 }
 0x3be   :  { %v4490_v4 = vmul.f32 -1.442695, %v4745_v59  ;;  %v4747_v5 = vadd.f32 %v2354_v2, %v7559_v15  ;;  %v4492_v58 = vmul.f32 -1.442695, %v4777_v12  ;;  %v4779_v57 = vadd.f32 %v2397_v3, %v7560_v41 }
 0x3bf   :  { %5338 = vpow2.f32 %v4488_v62  ;;  %v4489_v7 = vmul.f32 -1.442695, %v4746_v63 }
 0x3c0   :  { %5340 = vpow2.f32 %v4490_v4  ;;  %v4491_v9 = vmul.f32 -1.442695, %v4747_v5  ;;  %v4493_v62 = vmul.f32 -1.442695, %v4779_v57 }
 0x3c1   :  { %5342 = vpow2.f32 %v4489_v7 }
 0x3c2   :  { %5344 = vpow2.f32 %v4491_v9 }
 0x3c3   :  { %5346 = vtanh.f32 %v4776_v54 }
 0x3c4   :  { %5348 = vpow2.f32 %v4492_v58 }
 0x3c5   :  { %5350 = vtanh.f32 %v4778_v60 }
 0x3c9   :  { %v5339_v6 = vpop.eup %5338 }
 0x3ca   :  { %v5341_v59 = vpop.eup %5340  ;;  %v2414_v31 = vadd.f32 1.0, %v5339_v6 }
 0x3cb   :  { %v2426_v63 = vadd.f32 1.0, %v5341_v59  ;;  %v5343_v2 = vpop.eup %5342 }
 0x3cc   :  { %5352 = vrcp.f32 %v2414_v31  ;;  %v2415_v40 = vadd.f32 1.0, %v5343_v2  ;;  %v5345_v4 = vpop.eup %5344 }
 0x3cd   :  { %5354 = vrcp.f32 %v2426_v63  ;;  %v2427_v55 = vadd.f32 1.0, %v5345_v4  ;;  %v5347_v3 = vpop.eup %5346 }
 0x3ce   :  { %5356 = vpow2.f32 %v4493_v62  ;;  %v5349_v5 = vpop.eup %5348 }
 0x3cf   :  { %5358 = vrcp.f32 %v2415_v40  ;;  %v5351_v61 = vpop.eup %5350  ;;  %v2440_v57 = vadd.f32 1.0, %v5349_v5 }
 0x3d0   :  { %5360 = vrcp.f32 %v2427_v55 }
 0x3d1   :  { %5362 = vrcp.f32 %v2440_v57 }
 0x3d6   :  { %v5353_v7 = vpop.eup %5352 }
 0x3d7   :  { %v5355_v9 = vpop.eup %5354  ;;  %v2448_v12 = vmul.f32 %v5353_v7, %v5347_v3 }
 0x3d8   :  { %v5357_v6 = vpop.eup %5356  ;;  %v2446_v54 = vmul.f32 %v5355_v9, %v6474_v45 }
 0x3d9   :  { %v5359_v58 = vpop.eup %5358  ;;  %v2441_v63 = vadd.f32 1.0, %v5357_v6 }
 0x3da   :  { %v6648_v60 = vadd.f32 %v2448_v12, %v2446_v54  ;;  %v2449_v31 = vmul.f32 %v5359_v58, %v5351_v61  ;;  %v5361_v59 = vpop.eup %5360 }
 0x3db   :  { %v2447_v62 = vmul.f32 %v5361_v59, %v6480_v22  ;;  %v2498_v2 = vpop.f32.mrb[52].mxu0  ;;  %v2541_v40 = vpop.f32.mrb[52].mxu1 }
 0x3dc   :  { %v4820_v4 = vadd.f32 %v2498_v2, %v6359_v38  ;;  %v2500_v55 = vpop.f32.mrb[53].mxu0  ;;  %v2543_v46 = vpop.f32.mrb[53].mxu1  ;;  %5364 = vtanh.f32 %v6648_v60 }
 0x3dd   :  { %v6653_v3 = vadd.f32 %v2449_v31, %v2447_v62  ;;  %v4821_v45 = vadd.f32 %v2500_v55, %v7562_v19  ;;  %v2502_v5 = vpop.f32.mrb[54].mxu0  ;;  %v2545_v7 = vpop.f32.mrb[54].mxu1  ;;  %5366 = vrcp.f32 %v2441_v63  ;;  %v4853_v31 = vadd.f32 %v2543_v46, %v6374_v27 }
 0x3de   :  { %v4494_v61 = vmul.f32 -1.442695, %v4820_v4  ;;  %v4822_v9 = vadd.f32 %v2502_v5, %v6359_v38  ;;  %v2504_v22 = vpop.f32.mrb[55].mxu0  ;;  %v2547_v12 = vpop.f32.mrb[55].mxu1  ;;  %v4852_v63 = vadd.f32 %v2541_v40, %v6379_v48 }
 0x3df   :  { %5368 = vtanh.f32 %v6653_v3  ;;  %v4496_v6 = vmul.f32 -1.442695, %v4821_v45  ;;  %v4823_v54 = vadd.f32 %v2504_v22, %v7562_v19  ;;  %v5363_v59 = vpop.eup %5362  ;;  %v4498_v2 = vmul.f32 -1.442695, %v4853_v31 }
 0x3e0   :  { %5370 = vpow2.f32 %v4494_v61  ;;  %v4495_v58 = vmul.f32 -1.442695, %v4822_v9  ;;  %v4855_v4 = vadd.f32 %v2547_v12, %v6374_v27  ;;  %v4854_v45 = vadd.f32 %v2545_v7, %v6379_v48  ;;  %v6666_v12 = vld [vmem:[#allocation7 + $0x100] ss:$16 sps:$4 sm:$0xff]  }
 0x3e1   :  { %5372 = vpow2.f32 %v4496_v6  ;;  %v4497_v57 = vmul.f32 -1.442695, %v4823_v54 }
 0x3e2   :  { %5374 = vpow2.f32 %v4495_v58  ;;  %v4499_v46 = vmul.f32 -1.442695, %v4855_v4  ;;  %v6680_v4 = vld [vmem:[#allocation7 + $0x120] ss:$16 sps:$4 sm:$0xff]  }
 0x3e3   :  { %5376 = vpow2.f32 %v4497_v57  ;;  %7577 = vst [vmem:[#allocation24_spill] sm:$0xff] %v6680_v4 }
 0x3e4   :  { %5378 = vtanh.f32 %v4852_v63 }
 0x3e5   :  { %5380 = vpow2.f32 %v4498_v2  ;;  %v6675_v2 = vld [vmem:[#allocation7 + $0x12c] ss:$16 sps:$4 sm:$0xff]  }
 0x3e6   :  { %v5365_v62 = vpop.eup %5364  ;;  %5382 = vtanh.f32 %v4854_v45 }
 0x3e7   :  { %v5367_v55 = vpop.eup %5366  ;;  %v2454_v61 = vmul.f32 %v5365_v62, %v5363_v59  ;;  %v6669_v59 = vld [vmem:[#allocation7 + $0x108] ss:$16 sps:$4 sm:$0xff]   ;;  %v6672_v62 = vld [vmem:[#allocation7 + $0x124] ss:$16 sps:$4 sm:$0xff]  }
 0x3e9   :  { %v5369_v5 = vpop.eup %5368 }
 0x3ea   :  { %v5371_v22 = vpop.eup %5370  ;;  %v2455_v9 = vmul.f32 %v5369_v5, %v5367_v55  ;;  %v6683_v55 = vld [vmem:[#allocation7 + $0x128] ss:$16 sps:$4 sm:$0xff]   ;;  %v6686_v5 = vld [vmem:[#allocation7 + $0x144] ss:$16 sps:$4 sm:$0xff]  }
 0x3eb   :  { %v5373_v6 = vpop.eup %5372  ;;  %v2564_v54 = vadd.f32 1.0, %v5371_v22  ;;  %7578 = vst [vmem:[#allocation26_spill] sm:$0xff] %v6683_v55  ;;  %7579 = vst [vmem:[#allocation25_spill] sm:$0xff] %v6686_v5  ;;  %v6689_v22 = vld [vmem:[#allocation7 + $0x14c] ss:$16 sps:$4 sm:$0xff]  }
 0x3ec   :  { %v2576_v58 = vadd.f32 1.0, %v5373_v6  ;;  %v2606_v57 = vpack.c.bf16 %v2455_v9, %v2454_v61  ;;  %v5375_v40 = vpop.eup %5374  ;;  %7580 = vst [vmem:[#allocation28_spill] sm:$0xff] %v6689_v22 }
 0x3ed   :  { %5384 = vrcp.f32 %v2564_v54  ;;  %v2565_v31 = vadd.f32 1.0, %v5375_v40  ;;  %v5377_v7 = vpop.eup %5376  ;;  %v6692_v54 = vld [vmem:[#allocation7 + $0x140] ss:$16 sps:$4 sm:$0xff]   ;;  %v6698_v40 = vld [vmem:[#allocation7 + $0x164] ss:$16 sps:$4 sm:$0xff]  }
 0x3ee   :  { %5386 = vrcp.f32 %v2576_v58  ;;  %4725 = vst [vmem:[%s7376_s5 + $0x10] sm:$0xff] %v2606_v57   ;;  %2669 = vmatmul.mubr.bf16.vlgmr.msra.gmra.mrb[12].mxu0 %v2606_v57  ;;  %2712 = vmatmul.mubr.bf16.vlgmr.msra.gmra.mrb[12].mxu1 %v2606_v57  ;;  %v2577_v63 = vadd.f32 1.0, %v5377_v7  ;;  %v5379_v45 = vpop.eup %5378  ;;  %7581 = vst [vmem:[#allocation27_spill] sm:$0xff] %v6692_v54 }
 0x3ef   :  { %5388 = vpow2.f32 %v4499_v46  ;;  %2787 = vmatpush1.bf16.msra.mxu0 %v6666_v12  ;;  %2830 = vmatpush1.bf16.msra.mxu1 %v6669_v59  ;;  %v5381_v61 = vpop.eup %5380  ;;  %v6695_v46 = vld [vmem:[#allocation7 + $0x148] ss:$16 sps:$4 sm:$0xff]   ;;  %7583 = vst [vmem:[#allocation29_spill] sm:$0xff] %v6698_v40 }
 0x3f0   :  { %5390 = vrcp.f32 %v2565_v31  ;;  %2788 = vmatprep.subr.bf16.mxu0 %v6672_v62  ;;  %2831 = vmatprep.subr.bf16.mxu1 %v6675_v2  ;;  %v5383_v9 = vpop.eup %5382  ;;  %7582 = vst [vmem:[#allocation30_spill] sm:$0xff] %v6695_v46  ;;  %v6701_v31 = vld [vmem:[#allocation7 + $0x16c] ss:$16 sps:$4 sm:$0xff]  }
 0x3f1   :  { %2818 = vmatprep.mubr.bf16.mxu0 %v7524_v51  ;;  %2861 = vmatprep.mubr.bf16.mxu1 %v7524_v51  ;;  %5392 = vrcp.f32 %v2577_v63 }
 0x3f3   :  { %2789 = vmatpush1.bf16.msra.mxu0 %v6680_v4  ;;  %2832 = vmatpush1.bf16.msra.mxu1 %v6683_v55  ;;  %v6707_v4 = vld [vmem:[#allocation7 + $0x160] ss:$16 sps:$4 sm:$0xff]  }
 0x3f4   :  { %2790 = vmatprep.subr.bf16.mxu0 %v6686_v5  ;;  %2833 = vmatprep.subr.bf16.mxu1 %v6689_v22  ;;  %v2590_v5 = vadd.f32 1.0, %v5381_v61 }
 0x3f6   :  { %5394 = vrcp.f32 %v2590_v5  ;;  %v6742_v5 = vld [vmem:[#allocation7 + $0x1c4] ss:$16 sps:$4 sm:$0xff]  }
 0x3f7   :  { %v5385_v6 = vpop.eup %5384  ;;  %2791 = vmatpush1.bf16.msra.mxu0 %v6692_v54  ;;  %2834 = vmatpush1.bf16.msra.mxu1 %v6695_v46  ;;  %v6713_v46 = vld [vmem:[#allocation7 + $0x184] ss:$16 sps:$4 sm:$0xff]   ;;  %7589 = vst [vmem:[#allocation39_spill] sm:$0xff] %v6742_v5 }
 0x3f8   :  { %v5387_v58 = vpop.eup %5386  ;;  %v2598_v57 = vmul.f32 %v5385_v6, %v5379_v45  ;;  %2792 = vmatprep.subr.bf16.mxu0 %v6698_v40  ;;  %2835 = vmatprep.subr.bf16.mxu1 %v6701_v31  ;;  %v6710_v45 = vld [vmem:[#allocation7 + $0x168] ss:$16 sps:$4 sm:$0xff]  }
 0x3f9   :  { %v5389_v7 = vpop.eup %5388  ;;  %v2596_v63 = vmul.f32 %v5387_v58, %v6507_v34  ;;  %v6716_v34 = vld [vmem:[#allocation7 + $0x18c] ss:$16 sps:$4 sm:$0xff]   ;;  %v6726_v58 = vld [vmem:[#allocation7 + $0x188] ss:$16 sps:$4 sm:$0xff]  }
 0x3fa   :  { %v5391_v22 = vpop.eup %5390  ;;  %v2591_v40 = vadd.f32 1.0, %v5389_v7  ;;  %7584 = vst [vmem:[#allocation31_spill] sm:$0xff] %v6726_v58  ;;  %v6732_v7 = vld [vmem:[#allocation7 + $0x1ac] ss:$16 sps:$4 sm:$0xff]  }
 0x3fb   :  { %v6705_v54 = vadd.f32 %v2598_v57, %v2596_v63  ;;  %v2599_v55 = vmul.f32 %v5391_v22, %v5383_v9  ;;  %2793 = vmatpush1.bf16.msra.mxu0 %v6707_v4  ;;  %2836 = vmatpush1.bf16.msra.mxu1 %v6710_v45  ;;  %v5393_v6 = vpop.eup %5392  ;;  %v6723_v9 = vld [vmem:[#allocation7 + $0x180] ss:$16 sps:$4 sm:$0xff]   ;;  %v6729_v57 = vld [vmem:[#allocation7 + $0x1a4] ss:$16 sps:$4 sm:$0xff]   ;;  %7586 = vst [vmem:[#allocation33_spill] sm:$0xff] %v6732_v7 }
 0x3fc   :  { %2794 = vmatprep.subr.bf16.mxu0 %v6713_v46  ;;  %2837 = vmatprep.subr.bf16.mxu1 %v6716_v34  ;;  %v2597_v22 = vmul.f32 %v5393_v6, %v6515_v1  ;;  %7585 = vst [vmem:[#allocation32_spill] sm:$0xff] %v6729_v57  ;;  %v6736_v1 = vld [vmem:[#allocation7 + $0x1a0] ss:$16 sps:$4 sm:$0xff]   ;;  %v6751_v6 = vld [vmem:[#allocation7 + $0x1c8] ss:$16 sps:$4 sm:$0xff]  }
 0x3fd   :  { %5396 = vtanh.f32 %v6705_v54  ;;  %7587 = vst [vmem:[#allocation34_spill] sm:$0xff] %v6736_v1  ;;  %v6748_v63 = vld [vmem:[#allocation7 + $0x1c0] ss:$16 sps:$4 sm:$0xff]   ;;  %7592 = vst [vmem:[#allocation43_spill] sm:$0xff] %v6751_v6 }
 0x3fe   :  { %v6721_v61 = vadd.f32 %v2599_v55, %v2597_v22  ;;  %5398 = vrcp.f32 %v2591_v40  ;;  %v6739_v55 = vld [vmem:[#allocation7 + $0x1a8] ss:$16 sps:$4 sm:$0xff]   ;;  %v6745_v40 = vld [vmem:[#allocation7 + $0x1cc] ss:$16 sps:$4 sm:$0xff]   ;;  %7591 = vst [vmem:[#allocation42_spill] sm:$0xff] %v6748_v63 }
 0x3ff   :  { %2795 = vmatpush1.bf16.msra.mxu0 %v6723_v9  ;;  %2838 = vmatpush1.bf16.msra.mxu1 %v6726_v58  ;;  %7588 = vst [vmem:[#allocation35_spill] sm:$0xff] %v6739_v55  ;;  %7590 = vst [vmem:[#allocation40_spill] sm:$0xff] %v6745_v40 }
 0x400   :  { %2796 = vmatprep.subr.bf16.mxu0 %v6729_v57  ;;  %2839 = vmatprep.subr.bf16.mxu1 %v6732_v7  ;;  %5400 = vtanh.f32 %v6721_v61  ;;  %v5395_v22 = vpop.eup %5394  ;;  %v6760_v57 = vld [vmem:[#allocation7 + $0x1e0] ss:$16 sps:$4 sm:$0xff]  }
 0x403   :  { %2797 = vmatpush1.bf16.msra.mxu0 %v6736_v1  ;;  %2840 = vmatpush1.bf16.msra.mxu1 %v6739_v55  ;;  %v6754_v1 = vld [vmem:[#allocation7 + $0x1e4] ss:$16 sps:$4 sm:$0xff]   ;;  %v6757_v55 = vld [vmem:[#allocation7 + $0x1ec] ss:$16 sps:$4 sm:$0xff]  }
 0x404   :  { %2798 = vmatprep.subr.bf16.mxu0 %v6742_v5  ;;  %2841 = vmatprep.subr.bf16.mxu1 %v6745_v40  ;;  %7593 = vst [vmem:[#allocation44_spill] sm:$0xff] %v6754_v1 }
 0x407   :  { %2799 = vmatpush1.bf16.msra.mxu0 %v6748_v63  ;;  %2842 = vmatpush1.bf16.msra.mxu1 %v6751_v6  ;;  %v5397_v5 = vpop.eup %5396  ;;  %v6763_v63 = vld [vmem:[#allocation7 + $0x1e8] ss:$16 sps:$4 sm:$0xff]  }
 0x408   :  { %2800 = vmatprep.subr.bf16.mxu0 %v6754_v1  ;;  %2843 = vmatprep.subr.bf16.mxu1 %v6757_v55  ;;  %v5399_v7 = vpop.eup %5398  ;;  %v2604_v6 = vmul.f32 %v5397_v5, %v5395_v22  ;;  %v7595_v5 = vld [vmem:[#allocation38_spill] sm:$0xff] }
 0x40a   :  { %v5401_v40 = vpop.eup %5400 }
 0x40b   :  { %2801 = vmatpush1.bf16.msra.mxu0 %v6760_v57  ;;  %2844 = vmatpush1.bf16.msra.mxu1 %v6763_v63  ;;  %v2605_v58 = vmul.f32 %v5401_v40, %v5399_v7 }
 0x40c   :  { %2958 = vmatprep.subr.bf16.mxu0 %v6532_v10  ;;  %3001 = vmatprep.subr.bf16.mxu1 %v6535_v11 }
 0x40d   :  { %v2617_v1 = vpack.c.bf16 %v2605_v58, %v2604_v6  ;;  %v7594_v58 = vld [vmem:[#allocation23_spill] sm:$0xff] }
 0x40f   :  { %4726 = vst [vmem:[%s7377_s6 + $0x28] sm:$0xff] %v2617_v1   ;;  %2819 = vmatmul.mubr.bf16.vlgmr.msra.gmra.mrb[48].mxu0 %v2617_v1  ;;  %2862 = vmatmul.mubr.bf16.vlgmr.msra.gmra.mrb[48].mxu1 %v2617_v1 }
 0x410   :  { %2959 = vmatpush1.bf16.msra.mxu0 %v6541_v0  ;;  %3002 = vmatpush1.bf16.msra.mxu1 %v6544_v56 }
 0x411   :  { %2960 = vmatprep.subr.bf16.mxu0 %v6547_v20  ;;  %3003 = vmatprep.subr.bf16.mxu1 %v6550_v29 }
 0x412   :  { %2990 = vmatprep.mubr.bf16.mxu0 %v7524_v51  ;;  %3033 = vmatprep.mubr.bf16.mxu1 %v7524_v51 }
 0x414   :  { %2961 = vmatpush1.bf16.msra.mxu0 %v6555_v47  ;;  %3004 = vmatpush1.bf16.msra.mxu1 %v6558_v49 }
 0x415   :  { %2962 = vmatprep.subr.bf16.mxu0 %v6561_v50  ;;  %3005 = vmatprep.subr.bf16.mxu1 %v6564_v36 }
 0x418   :  { %2963 = vmatpush1.bf16.msra.mxu0 %v6567_v39  ;;  %3006 = vmatpush1.bf16.msra.mxu1 %v6570_v28 }
 0x419   :  { %2964 = vmatprep.subr.bf16.mxu0 %v6573_v44  ;;  %3007 = vmatprep.subr.bf16.mxu1 %v6576_v13 }
 0x41c   :  { %2965 = vmatpush1.bf16.msra.mxu0 %v6579_v24  ;;  %3008 = vmatpush1.bf16.msra.mxu1 %v6582_v16 }
 0x41d   :  { %2966 = vmatprep.subr.bf16.mxu0 %v6585_v21  ;;  %3009 = vmatprep.subr.bf16.mxu1 %v6588_v42 }
 0x420   :  { %2967 = vmatpush1.bf16.msra.mxu0 %v6591_v18  ;;  %3010 = vmatpush1.bf16.msra.mxu1 %v6594_v17 }
 0x421   :  { %2968 = vmatprep.subr.bf16.mxu0 %v6597_v35  ;;  %3011 = vmatprep.subr.bf16.mxu1 %v6600_v30 }
 0x424   :  { %2969 = vmatpush1.bf16.msra.mxu0 %v6603_v32  ;;  %3012 = vmatpush1.bf16.msra.mxu1 %v6606_v14  ;;  %v7596_v32 = vld [vmem:[#allocation41_spill] sm:$0xff] }
 0x425   :  { %2970 = vmatprep.subr.bf16.mxu0 %v6609_v33  ;;  %3013 = vmatprep.subr.bf16.mxu1 %v6612_v43 }
 0x428   :  { %2971 = vmatpush1.bf16.msra.mxu0 %v6615_v8  ;;  %3014 = vmatpush1.bf16.msra.mxu1 %v6618_v25 }
 0x429   :  { %2972 = vmatprep.subr.bf16.mxu0 %v6621_v26  ;;  %3015 = vmatprep.subr.bf16.mxu1 %v6624_v37 }
 0x42c   :  { %2973 = vmatpush1.bf16.msra.mxu0 %v6627_v23  ;;  %3016 = vmatpush1.bf16.msra.mxu1 %v6630_v52 }
 0x42d   :  { %3108 = vmatprep.subr.bf16.mxu0 %v6633_v53  ;;  %3151 = vmatprep.subr.bf16.mxu1 %v7594_v58 }
 0x4c1   :  { %v2670_v7 = vpop.f32.mrb[12].mxu0  ;;  %v2713_v1 = vpop.f32.mrb[12].mxu1 }
 0x4c2   :  { %v4748_v40 = vadd.f32 %v2670_v7, %v7595_v5  ;;  %v2672_v6 = vpop.f32.mrb[13].mxu0  ;;  %v2715_v22 = vpop.f32.mrb[13].mxu1 }
 0x4c3   :  { %v4749_v25 = vadd.f32 %v2672_v6, %v7559_v15  ;;  %v2674_v8 = vpop.f32.mrb[14].mxu0  ;;  %v2717_v26 = vpop.f32.mrb[14].mxu1  ;;  %v4781_v7 = vadd.f32 %v2715_v22, %v7560_v41  ;;  %v4780_v6 = vadd.f32 %v2713_v1, %v7596_v32 }
 0x4c4   :  { %v4508_v43 = vmul.f32 -1.442695, %v4748_v40  ;;  %v4750_v37 = vadd.f32 %v2674_v8, %v7595_v5  ;;  %v2676_v23 = vpop.f32.mrb[15].mxu0  ;;  %v2719_v33 = vpop.f32.mrb[15].mxu1  ;;  %v4782_v8 = vadd.f32 %v2717_v26, %v7596_v32 }
 0x4c5   :  { %v4510_v52 = vmul.f32 -1.442695, %v4749_v25  ;;  %v4751_v53 = vadd.f32 %v2676_v23, %v7559_v15  ;;  %v4512_v30 = vmul.f32 -1.442695, %v4781_v7  ;;  %v4783_v40 = vadd.f32 %v2719_v33, %v7560_v41 }
 0x4c6   :  { %5402 = vpow2.f32 %v4508_v43  ;;  %v4509_v58 = vmul.f32 -1.442695, %v4750_v37 }
 0x4c7   :  { %5404 = vpow2.f32 %v4510_v52  ;;  %v4511_v14 = vmul.f32 -1.442695, %v4751_v53  ;;  %v4513_v43 = vmul.f32 -1.442695, %v4783_v40 }
 0x4c8   :  { %5406 = vpow2.f32 %v4509_v58 }
 0x4c9   :  { %5408 = vpow2.f32 %v4511_v14 }
 0x4ca   :  { %5410 = vtanh.f32 %v4780_v6 }
 0x4cb   :  { %5412 = vpow2.f32 %v4512_v30 }
 0x4cc   :  { %5414 = vtanh.f32 %v4782_v8 }
 0x4d0   :  { %v5403_v5 = vpop.eup %5402 }
 0x4d1   :  { %v5405_v25 = vpop.eup %5404  ;;  %v2736_v35 = vadd.f32 1.0, %v5403_v5 }
 0x4d2   :  { %v2748_v37 = vadd.f32 1.0, %v5405_v25  ;;  %v5407_v23 = vpop.eup %5406 }
 0x4d3   :  { %5416 = vrcp.f32 %v2736_v35  ;;  %v2737_v52 = vadd.f32 1.0, %v5407_v23  ;;  %v5409_v14 = vpop.eup %5408 }
 0x4d4   :  { %5418 = vrcp.f32 %v2748_v37  ;;  %v2749_v53 = vadd.f32 1.0, %v5409_v14  ;;  %v5411_v33 = vpop.eup %5410 }
 0x4d5   :  { %5420 = vpow2.f32 %v4513_v43  ;;  %v5413_v58 = vpop.eup %5412 }
 0x4d6   :  { %5422 = vrcp.f32 %v2737_v52  ;;  %v5415_v26 = vpop.eup %5414  ;;  %v2762_v40 = vadd.f32 1.0, %v5413_v58 }
 0x4d7   :  { %5424 = vrcp.f32 %v2749_v53 }
 0x4d8   :  { %5426 = vrcp.f32 %v2762_v40 }
 0x4dd   :  { %v5417_v1 = vpop.eup %5416 }
 0x4de   :  { %v5419_v22 = vpop.eup %5418  ;;  %v2770_v7 = vmul.f32 %v5417_v1, %v5411_v33 }
 0x4df   :  { %v5421_v5 = vpop.eup %5420  ;;  %v2768_v30 = vmul.f32 %v5419_v22, %v6648_v60 }
 0x4e0   :  { %v5423_v6 = vpop.eup %5422  ;;  %v2763_v37 = vadd.f32 1.0, %v5421_v5 }
 0x4e1   :  { %v6814_v8 = vadd.f32 %v2770_v7, %v2768_v30  ;;  %v2771_v35 = vmul.f32 %v5423_v6, %v5415_v26  ;;  %v5425_v25 = vpop.eup %5424 }
 0x4e2   :  { %v2769_v43 = vmul.f32 %v5425_v25, %v6653_v3  ;;  %v2820_v23 = vpop.f32.mrb[48].mxu0  ;;  %v2863_v52 = vpop.f32.mrb[48].mxu1 }
 0x4e3   :  { %v4816_v14 = vadd.f32 %v2820_v23, %v6359_v38  ;;  %v2822_v53 = vpop.f32.mrb[49].mxu0  ;;  %v2865_v32 = vpop.f32.mrb[49].mxu1  ;;  %5428 = vtanh.f32 %v6814_v8 }
 0x4e4   :  { %v6819_v33 = vadd.f32 %v2771_v35, %v2769_v43  ;;  %v4817_v60 = vadd.f32 %v2822_v53, %v7562_v19  ;;  %v2824_v58 = vpop.f32.mrb[50].mxu0  ;;  %v2867_v1 = vpop.f32.mrb[50].mxu1  ;;  %5430 = vrcp.f32 %v2763_v37  ;;  %v4849_v35 = vadd.f32 %v2865_v32, %v6374_v27 }
 0x4e5   :  { %v4514_v26 = vmul.f32 -1.442695, %v4816_v14  ;;  %v4818_v22 = vadd.f32 %v2824_v58, %v6359_v38  ;;  %v2826_v3 = vpop.f32.mrb[51].mxu0  ;;  %v2869_v7 = vpop.f32.mrb[51].mxu1  ;;  %v4848_v37 = vadd.f32 %v2863_v52, %v6379_v48 }
 0x4e6   :  { %5432 = vtanh.f32 %v6819_v33  ;;  %v4516_v5 = vmul.f32 -1.442695, %v4817_v60  ;;  %v4819_v30 = vadd.f32 %v2826_v3, %v7562_v19  ;;  %v5427_v25 = vpop.eup %5426  ;;  %v4518_v23 = vmul.f32 -1.442695, %v4849_v35 }
 0x4e7   :  { %5434 = vpow2.f32 %v4514_v26  ;;  %v4515_v6 = vmul.f32 -1.442695, %v4818_v22  ;;  %v4851_v14 = vadd.f32 %v2869_v7, %v6374_v27  ;;  %v4850_v60 = vadd.f32 %v2867_v1, %v6379_v48 }
 0x4e8   :  { %5436 = vpow2.f32 %v4516_v5  ;;  %v4517_v40 = vmul.f32 -1.442695, %v4819_v30 }
 0x4e9   :  { %5438 = vpow2.f32 %v4515_v6  ;;  %v4519_v32 = vmul.f32 -1.442695, %v4851_v14  ;;  %v7600_v14 = vld [vmem:[#allocation28_spill] sm:$0xff] }
 0x4ea   :  { %5440 = vpow2.f32 %v4517_v40 }
 0x4eb   :  { %5442 = vtanh.f32 %v4848_v37  ;;  %v7598_v37 = vld [vmem:[#allocation26_spill] sm:$0xff] }
 0x4ec   :  { %5444 = vpow2.f32 %v4518_v23  ;;  %v7599_v23 = vld [vmem:[#allocation25_spill] sm:$0xff] }
 0x4ed   :  { %v5429_v43 = vpop.eup %5428  ;;  %5446 = vtanh.f32 %v4850_v60 }
 0x4ee   :  { %v5431_v53 = vpop.eup %5430  ;;  %v2776_v26 = vmul.f32 %v5429_v43, %v5427_v25  ;;  %v7597_v25 = vld [vmem:[#allocation24_spill] sm:$0xff] }
 0x4f0   :  { %v5433_v58 = vpop.eup %5432 }
 0x4f1   :  { %v5435_v3 = vpop.eup %5434  ;;  %v2777_v22 = vmul.f32 %v5433_v58, %v5431_v53 }
 0x4f2   :  { %v5437_v5 = vpop.eup %5436  ;;  %v2886_v30 = vadd.f32 1.0, %v5435_v3  ;;  %v7601_v3 = vld [vmem:[#allocation27_spill] sm:$0xff] }
 0x4f3   :  { %v2898_v6 = vadd.f32 1.0, %v5437_v5  ;;  %v2928_v40 = vpack.c.bf16 %v2777_v22, %v2776_v26  ;;  %v5439_v52 = vpop.eup %5438  ;;  %v7602_v26 = vld [vmem:[#allocation30_spill] sm:$0xff] }
 0x4f4   :  { %5448 = vrcp.f32 %v2886_v30  ;;  %v2887_v35 = vadd.f32 1.0, %v5439_v52  ;;  %v5441_v1 = vpop.eup %5440  ;;  %v7603_v30 = vld [vmem:[#allocation29_spill] sm:$0xff] }
 0x4f5   :  { %5450 = vrcp.f32 %v2898_v6  ;;  %4727 = vst [vmem:[%s7376_s5 + $0x18] sm:$0xff] %v2928_v40   ;;  %2991 = vmatmul.mubr.bf16.vlgmr.msra.gmra.mrb[16].mxu0 %v2928_v40  ;;  %3034 = vmatmul.mubr.bf16.vlgmr.msra.gmra.mrb[16].mxu1 %v2928_v40  ;;  %v2899_v7 = vadd.f32 1.0, %v5441_v1  ;;  %v5443_v43 = vpop.eup %5442 }
 0x4f6   :  { %5452 = vpow2.f32 %v4519_v32  ;;  %3109 = vmatpush1.bf16.msra.mxu0 %v6666_v12  ;;  %3152 = vmatpush1.bf16.msra.mxu1 %v6669_v59  ;;  %v5445_v53 = vpop.eup %5444 }
 0x4f7   :  { %5454 = vrcp.f32 %v2887_v35  ;;  %3110 = vmatprep.subr.bf16.mxu0 %v6672_v62  ;;  %3153 = vmatprep.subr.bf16.mxu1 %v6675_v2  ;;  %v5447_v60 = vpop.eup %5446  ;;  %v2912_v52 = vadd.f32 1.0, %v5445_v53  ;;  %v7604_v53 = vld [vmem:[#allocation31_spill] sm:$0xff] }
 0x4f8   :  { %3140 = vmatprep.mubr.bf16.mxu0 %v7524_v51  ;;  %3183 = vmatprep.mubr.bf16.mxu1 %v7524_v51  ;;  %5456 = vrcp.f32 %v2899_v7 }
 0x4f9   :  { %5458 = vrcp.f32 %v2912_v52 }
 0x4fa   :  { %3111 = vmatpush1.bf16.msra.mxu0 %v7597_v25  ;;  %3154 = vmatpush1.bf16.msra.mxu1 %v7598_v37 }
 0x4fb   :  { %3112 = vmatprep.subr.bf16.mxu0 %v7599_v23  ;;  %3155 = vmatprep.subr.bf16.mxu1 %v7600_v14 }
 0x4fe   :  { %v5449_v58 = vpop.eup %5448  ;;  %3113 = vmatpush1.bf16.msra.mxu0 %v7601_v3  ;;  %3156 = vmatpush1.bf16.msra.mxu1 %v7602_v26 }
 0x4ff   :  { %v5451_v22 = vpop.eup %5450  ;;  %v2920_v5 = vmul.f32 %v5449_v58, %v5443_v43  ;;  %3114 = vmatprep.subr.bf16.mxu0 %v7603_v30  ;;  %3157 = vmatprep.subr.bf16.mxu1 %v6701_v31  ;;  %v7606_v58 = vld [vmem:[#allocation33_spill] sm:$0xff] }
 0x500   :  { %v5453_v32 = vpop.eup %5452  ;;  %v2918_v6 = vmul.f32 %v5451_v22, %v6705_v54  ;;  %v7607_v22 = vld [vmem:[#allocation34_spill] sm:$0xff] }
 0x501   :  { %v5455_v40 = vpop.eup %5454  ;;  %v2913_v26 = vadd.f32 1.0, %v5453_v32  ;;  %v7610_v32 = vld [vmem:[#allocation40_spill] sm:$0xff] }
 0x502   :  { %v6847_v35 = vadd.f32 %v2920_v5, %v2918_v6  ;;  %v2921_v1 = vmul.f32 %v5455_v40, %v5447_v60  ;;  %3115 = vmatpush1.bf16.msra.mxu0 %v6707_v4  ;;  %3158 = vmatpush1.bf16.msra.mxu1 %v6710_v45  ;;  %v5457_v7 = vpop.eup %5456  ;;  %v7605_v60 = vld [vmem:[#allocation32_spill] sm:$0xff]  ;;  %v7608_v5 = vld [vmem:[#allocation35_spill] sm:$0xff]  ;;  %v7611_v6 = vld [vmem:[#allocation42_spill] sm:$0xff] }
 0x503   :  { %3116 = vmatprep.subr.bf16.mxu0 %v6713_v46  ;;  %3159 = vmatprep.subr.bf16.mxu1 %v6716_v34  ;;  %v2919_v43 = vmul.f32 %v5457_v7, %v6721_v61  ;;  %v7609_v61 = vld [vmem:[#allocation39_spill] sm:$0xff]  ;;  %v5459_v52 = vpop.eup %5458 }
 0x504   :  { %5460 = vtanh.f32 %v6847_v35  ;;  %v7612_v40 = vld [vmem:[#allocation43_spill] sm:$0xff] }
 0x505   :  { %v6855_v54 = vadd.f32 %v2921_v1, %v2919_v43  ;;  %5462 = vrcp.f32 %v2913_v26  ;;  %v7613_v26 = vld [vmem:[#allocation44_spill] sm:$0xff] }
 0x506   :  { %3117 = vmatpush1.bf16.msra.mxu0 %v6723_v9  ;;  %3160 = vmatpush1.bf16.msra.mxu1 %v7604_v53 }
 0x507   :  { %3118 = vmatprep.subr.bf16.mxu0 %v7605_v60  ;;  %3161 = vmatprep.subr.bf16.mxu1 %v7606_v58  ;;  %5464 = vtanh.f32 %v6855_v54 }
 0x50a   :  { %3119 = vmatpush1.bf16.msra.mxu0 %v7607_v22  ;;  %3162 = vmatpush1.bf16.msra.mxu1 %v7608_v5 }
 0x50b   :  { %3120 = vmatprep.subr.bf16.mxu0 %v7609_v61  ;;  %3163 = vmatprep.subr.bf16.mxu1 %v7610_v32 }
 0x50e   :  { %3121 = vmatpush1.bf16.msra.mxu0 %v7611_v6  ;;  %3164 = vmatpush1.bf16.msra.mxu1 %v7612_v40  ;;  %v5461_v1 = vpop.eup %5460 }
 0x50f   :  { %3122 = vmatprep.subr.bf16.mxu0 %v7613_v26  ;;  %3165 = vmatprep.subr.bf16.mxu1 %v6757_v55  ;;  %v5463_v7 = vpop.eup %5462  ;;  %v2926_v5 = vmul.f32 %v5461_v1, %v5459_v52 }
 0x511   :  { %v5465_v43 = vpop.eup %5464 }
 0x512   :  { %3123 = vmatpush1.bf16.msra.mxu0 %v6760_v57  ;;  %3166 = vmatpush1.bf16.msra.mxu1 %v6763_v63  ;;  %v2927_v61 = vmul.f32 %v5465_v43, %v5463_v7 }
 0x513   :  { %3280 = vmatprep.subr.bf16.mxu0 %v6532_v10  ;;  %3323 = vmatprep.subr.bf16.mxu1 %v6535_v11  ;;  %v7614_v10 = vld [vmem:[#allocation36_spill] sm:$0xff]  ;;  %v7615_v11 = vld [vmem:[#allocation37_spill] sm:$0xff] }
 0x514   :  { %v2939_v6 = vpack.c.bf16 %v2927_v61, %v2926_v5 }
 0x516   :  { %4728 = vst [vmem:[%s7377_s6 + $0x20] sm:$0xff] %v2939_v6   ;;  %3141 = vmatmul.mubr.bf16.vlgmr.msra.gmra.mrb[44].mxu0 %v2939_v6  ;;  %3184 = vmatmul.mubr.bf16.vlgmr.msra.gmra.mrb[44].mxu1 %v2939_v6 }
 0x517   :  { %3281 = vmatpush1.bf16.msra.mxu0 %v6541_v0  ;;  %3324 = vmatpush1.bf16.msra.mxu1 %v6544_v56  ;;  %v7616_v0 = vld [vmem:[#allocation12_spill] sm:$0xff]  ;;  %v7617_v56 = vld [vmem:[#allocation14_spill] sm:$0xff] }
 0x518   :  { %3282 = vmatprep.subr.bf16.mxu0 %v6547_v20  ;;  %3325 = vmatprep.subr.bf16.mxu1 %v6550_v29  ;;  %v7618_v20 = vld [vmem:[#allocation13_spill] sm:$0xff]  ;;  %v7619_v29 = vld [vmem:[#allocation15_spill] sm:$0xff] }
 0x519   :  { %3312 = vmatprep.mubr.bf16.mxu0 %v7524_v51  ;;  %3355 = vmatprep.mubr.bf16.mxu1 %v7524_v51 }
 0x51b   :  { %3283 = vmatpush1.bf16.msra.mxu0 %v6555_v47  ;;  %3326 = vmatpush1.bf16.msra.mxu1 %v6558_v49  ;;  %v7620_v47 = vld [vmem:[#allocation16_spill] sm:$0xff]  ;;  %v7621_v49 = vld [vmem:[#allocation18_spill] sm:$0xff] }
 0x51c   :  { %3284 = vmatprep.subr.bf16.mxu0 %v6561_v50  ;;  %3327 = vmatprep.subr.bf16.mxu1 %v6564_v36  ;;  %v7622_v50 = vld [vmem:[#allocation17_spill] sm:$0xff]  ;;  %v7623_v36 = vld [vmem:[#allocation20_spill] sm:$0xff] }
 0x51f   :  { %3285 = vmatpush1.bf16.msra.mxu0 %v6567_v39  ;;  %3328 = vmatpush1.bf16.msra.mxu1 %v6570_v28  ;;  %v7624_v39 = vld [vmem:[#allocation19_spill] sm:$0xff]  ;;  %v7625_v28 = vld [vmem:[#allocation22_spill] sm:$0xff] }
 0x520   :  { %3286 = vmatprep.subr.bf16.mxu0 %v6573_v44  ;;  %3329 = vmatprep.subr.bf16.mxu1 %v6576_v13  ;;  %v7626_v44 = vld [vmem:[#allocation21_spill] sm:$0xff]  ;;  %v7627_v13 = vld [vmem:[#allocation23_spill] sm:$0xff] }
 0x523   :  { %3287 = vmatpush1.bf16.msra.mxu0 %v6579_v24  ;;  %3330 = vmatpush1.bf16.msra.mxu1 %v6582_v16 }
 0x524   :  { %3288 = vmatprep.subr.bf16.mxu0 %v6585_v21  ;;  %3331 = vmatprep.subr.bf16.mxu1 %v6588_v42  ;;  %v7628_v21 = vld [vmem:[#allocation38_spill] sm:$0xff] }
 0x527   :  { %3289 = vmatpush1.bf16.msra.mxu0 %v6591_v18  ;;  %3332 = vmatpush1.bf16.msra.mxu1 %v6594_v17 }
 0x528   :  { %3290 = vmatprep.subr.bf16.mxu0 %v7614_v10  ;;  %3333 = vmatprep.subr.bf16.mxu1 %v7615_v11 }
 0x52b   :  { %3291 = vmatpush1.bf16.msra.mxu0 %v7616_v0  ;;  %3334 = vmatpush1.bf16.msra.mxu1 %v7617_v56 }
 0x52c   :  { %3292 = vmatprep.subr.bf16.mxu0 %v7618_v20  ;;  %3335 = vmatprep.subr.bf16.mxu1 %v7619_v29  ;;  %v7629_v29 = vld [vmem:[#allocation41_spill] sm:$0xff] }
 0x52f   :  { %3293 = vmatpush1.bf16.msra.mxu0 %v7620_v47  ;;  %3336 = vmatpush1.bf16.msra.mxu1 %v7621_v49 }
 0x530   :  { %3294 = vmatprep.subr.bf16.mxu0 %v7622_v50  ;;  %3337 = vmatprep.subr.bf16.mxu1 %v7623_v36 }
 0x533   :  { %3295 = vmatpush1.bf16.msra.mxu0 %v7624_v39  ;;  %3338 = vmatpush1.bf16.msra.mxu1 %v7625_v28 }
 0x534   :  { %3430 = vmatprep.subr.bf16.mxu0 %v7626_v44  ;;  %3473 = vmatprep.subr.bf16.mxu1 %v7627_v13 }
 0x5c8   :  { %v2992_v24 = vpop.f32.mrb[16].mxu0  ;;  %v3035_v16 = vpop.f32.mrb[16].mxu1 }
 0x5c9   :  { %v4752_v42 = vadd.f32 %v2992_v24, %v7628_v21  ;;  %v2994_v18 = vpop.f32.mrb[17].mxu0  ;;  %v3037_v17 = vpop.f32.mrb[17].mxu1  ;;  %v4784_v47 = vadd.f32 %v3035_v16, %v7629_v29 }
 0x5ca   :  { %v4753_v5 = vadd.f32 %v2994_v18, %v7559_v15  ;;  %v2996_v61 = vpop.f32.mrb[18].mxu0  ;;  %v3039_v6 = vpop.f32.mrb[18].mxu1  ;;  %v4785_v20 = vadd.f32 %v3037_v17, %v7560_v41 }
 0x5cb   :  { %v4528_v52 = vmul.f32 -1.442695, %v4752_v42  ;;  %v4754_v1 = vadd.f32 %v2996_v61, %v7628_v21  ;;  %v2998_v7 = vpop.f32.mrb[19].mxu0  ;;  %v3041_v43 = vpop.f32.mrb[19].mxu1  ;;  %v4786_v36 = vadd.f32 %v3039_v6, %v7629_v29 }
 0x5cc   :  { %v4530_v10 = vmul.f32 -1.442695, %v4753_v5  ;;  %v4755_v11 = vadd.f32 %v2998_v7, %v7559_v15  ;;  %v4532_v49 = vmul.f32 -1.442695, %v4785_v20  ;;  %v4787_v50 = vadd.f32 %v3041_v43, %v7560_v41 }
 0x5cd   :  { %5466 = vpow2.f32 %v4528_v52  ;;  %v4529_v0 = vmul.f32 -1.442695, %v4754_v1 }
 0x5ce   :  { %5468 = vpow2.f32 %v4530_v10  ;;  %v4531_v56 = vmul.f32 -1.442695, %v4755_v11  ;;  %v4533_v13 = vmul.f32 -1.442695, %v4787_v50 }
 0x5cf   :  { %5470 = vpow2.f32 %v4529_v0 }
 0x5d0   :  { %5472 = vpow2.f32 %v4531_v56 }
 0x5d1   :  { %5474 = vtanh.f32 %v4784_v47 }
 0x5d2   :  { %5476 = vpow2.f32 %v4532_v49 }
 0x5d3   :  { %5478 = vtanh.f32 %v4786_v36 }
 0x5d7   :  { %v5467_v39 = vpop.eup %5466 }
 0x5d8   :  { %v5469_v28 = vpop.eup %5468  ;;  %v3058_v44 = vadd.f32 1.0, %v5467_v39 }
 0x5d9   :  { %v3070_v24 = vadd.f32 1.0, %v5469_v28  ;;  %v5471_v42 = vpop.eup %5470 }
 0x5da   :  { %5480 = vrcp.f32 %v3058_v44  ;;  %v3059_v18 = vadd.f32 1.0, %v5471_v42  ;;  %v5473_v17 = vpop.eup %5472 }
 0x5db   :  { %5482 = vrcp.f32 %v3070_v24  ;;  %v3071_v16 = vadd.f32 1.0, %v5473_v17  ;;  %v5475_v5 = vpop.eup %5474 }
 0x5dc   :  { %5484 = vpow2.f32 %v4533_v13  ;;  %v5477_v61 = vpop.eup %5476 }
 0x5dd   :  { %5486 = vrcp.f32 %v3059_v18  ;;  %v5479_v6 = vpop.eup %5478  ;;  %v3084_v0 = vadd.f32 1.0, %v5477_v61 }
 0x5de   :  { %5488 = vrcp.f32 %v3071_v16 }
 0x5df   :  { %5490 = vrcp.f32 %v3084_v0 }
 0x5e4   :  { %v5481_v52 = vpop.eup %5480 }
 0x5e5   :  { %v5483_v1 = vpop.eup %5482  ;;  %v3092_v7 = vmul.f32 %v5481_v52, %v5475_v5 }
 0x5e6   :  { %v5485_v43 = vpop.eup %5484  ;;  %v3090_v10 = vmul.f32 %v5483_v1, %v6814_v8 }
 0x5e7   :  { %v5487_v11 = vpop.eup %5486  ;;  %v3085_v49 = vadd.f32 1.0, %v5485_v43 }
 0x5e8   :  { %v6920_v56 = vadd.f32 %v3092_v7, %v3090_v10  ;;  %v3093_v20 = vmul.f32 %v5487_v11, %v5479_v6  ;;  %v5489_v47 = vpop.eup %5488 }
 0x5e9   :  { %v3091_v50 = vmul.f32 %v5489_v47, %v6819_v33  ;;  %v3142_v36 = vpop.f32.mrb[44].mxu0  ;;  %v3185_v39 = vpop.f32.mrb[44].mxu1 }
 0x5ea   :  { %v4812_v28 = vadd.f32 %v3142_v36, %v6359_v38  ;;  %v3144_v44 = vpop.f32.mrb[45].mxu0  ;;  %v3187_v13 = vpop.f32.mrb[45].mxu1  ;;  %5492 = vtanh.f32 %v6920_v56  ;;  %v4844_v10 = vadd.f32 %v3185_v39, %v6379_v48 }
 0x5eb   :  { %v6925_v24 = vadd.f32 %v3093_v20, %v3091_v50  ;;  %v4813_v8 = vadd.f32 %v3144_v44, %v7562_v19  ;;  %v3146_v42 = vpop.f32.mrb[46].mxu0  ;;  %v3189_v18 = vpop.f32.mrb[46].mxu1  ;;  %5494 = vrcp.f32 %v3085_v49  ;;  %v4845_v7 = vadd.f32 %v3187_v13, %v6374_v27 }
 0x5ec   :  { %v4534_v17 = vmul.f32 -1.442695, %v4812_v28  ;;  %v4814_v16 = vadd.f32 %v3146_v42, %v6359_v38  ;;  %v3148_v33 = vpop.f32.mrb[47].mxu0  ;;  %v3191_v5 = vpop.f32.mrb[47].mxu1  ;;  %v4846_v49 = vadd.f32 %v3189_v18, %v6379_v48 }
 0x5ed   :  { %5496 = vtanh.f32 %v6925_v24  ;;  %v4536_v61 = vmul.f32 -1.442695, %v4813_v8  ;;  %v4815_v6 = vadd.f32 %v3148_v33, %v7562_v19  ;;  %v5491_v43 = vpop.eup %5490  ;;  %v4538_v0 = vmul.f32 -1.442695, %v4845_v7 }
 0x5ee   :  { %5498 = vpow2.f32 %v4534_v17  ;;  %v4535_v52 = vmul.f32 -1.442695, %v4814_v16  ;;  %v4847_v20 = vadd.f32 %v3191_v5, %v6374_v27 }
 0x5ef   :  { %5500 = vpow2.f32 %v4536_v61  ;;  %v4537_v1 = vmul.f32 -1.442695, %v4815_v6 }
 0x5f0   :  { %5502 = vpow2.f32 %v4535_v52  ;;  %v4539_v13 = vmul.f32 -1.442695, %v4847_v20  ;;  %v7013_v20 = vld [vmem:[#allocation7 + $0x40] ss:$16 sps:$4 sm:$0xff]  }
 0x5f1   :  { %5504 = vpow2.f32 %v4537_v1 }
 0x5f2   :  { %5506 = vtanh.f32 %v4844_v10  ;;  %v7004_v10 = vld [vmem:[#allocation7 + $0x28] ss:$16 sps:$4 sm:$0xff]  }
 0x5f3   :  { %5508 = vpow2.f32 %v4538_v0  ;;  %v7010_v0 = vld [vmem:[#allocation7 + $0x4c] ss:$16 sps:$4 sm:$0xff]  }
 0x5f4   :  { %v5493_v11 = vpop.eup %5492  ;;  %5510 = vtanh.f32 %v4846_v49  ;;  %v7019_v49 = vld [vmem:[#allocation7 + $0x64] ss:$16 sps:$4 sm:$0xff]  }
 0x5f5   :  { %v5495_v47 = vpop.eup %5494  ;;  %v3098_v28 = vmul.f32 %v5493_v11, %v5491_v43  ;;  %v7007_v11 = vld [vmem:[#allocation7 + $0x44] ss:$16 sps:$4 sm:$0xff]  }
 0x5f7   :  { %v5497_v50 = vpop.eup %5496 }
 0x5f8   :  { %v5499_v36 = vpop.eup %5498  ;;  %v3099_v44 = vmul.f32 %v5497_v50, %v5495_v47  ;;  %v7016_v47 = vld [vmem:[#allocation7 + $0x48] ss:$16 sps:$4 sm:$0xff]   ;;  %v7022_v50 = vld [vmem:[#allocation7 + $0x6c] ss:$16 sps:$4 sm:$0xff]  }
 0x5f9   :  { %v5501_v8 = vpop.eup %5500  ;;  %v3208_v42 = vadd.f32 1.0, %v5499_v36  ;;  %v7025_v36 = vld [vmem:[#allocation7 + $0x60] ss:$16 sps:$4 sm:$0xff]  }
 0x5fa   :  { %v3220_v17 = vadd.f32 1.0, %v5501_v8  ;;  %v3250_v16 = vpack.c.bf16 %v3099_v44, %v3098_v28  ;;  %v5503_v39 = vpop.eup %5502  ;;  %v7028_v28 = vld [vmem:[#allocation7 + $0x68] ss:$16 sps:$4 sm:$0xff]   ;;  %v7031_v44 = vld [vmem:[#allocation7 + $0x84] ss:$16 sps:$4 sm:$0xff]  }
 0x5fb   :  { %5512 = vrcp.f32 %v3208_v42  ;;  %v3209_v33 = vadd.f32 1.0, %v5503_v39  ;;  %v5505_v18 = vpop.eup %5504  ;;  %v7034_v8 = vld [vmem:[#allocation7 + $0x8c] ss:$16 sps:$4 sm:$0xff]   ;;  %v7037_v42 = vld [vmem:[#allocation7 + $0x80] ss:$16 sps:$4 sm:$0xff]  }
 0x5fc   :  { %5514 = vrcp.f32 %v3220_v17  ;;  %4729 = vst [vmem:[%s7376_s5 + $0x20] sm:$0xff] %v3250_v16   ;;  %3313 = vmatmul.mubr.bf16.vlgmr.msra.gmra.mrb[20].mxu0 %v3250_v16  ;;  %3356 = vmatmul.mubr.bf16.vlgmr.msra.gmra.mrb[20].mxu1 %v3250_v16  ;;  %v3221_v5 = vadd.f32 1.0, %v5505_v18  ;;  %v5507_v61 = vpop.eup %5506  ;;  %v7043_v17 = vld [vmem:[#allocation7 + $0xa4] ss:$16 sps:$4 sm:$0xff]   ;;  %v7046_v16 = vld [vmem:[#allocation7 + $0xac] ss:$16 sps:$4 sm:$0xff]  }
 0x5fd   :  { %5516 = vpow2.f32 %v4539_v13  ;;  %3431 = vmatpush1.bf16.msra.mxu0 %v6666_v12  ;;  %3474 = vmatpush1.bf16.msra.mxu1 %v6669_v59  ;;  %v5509_v12 = vpop.eup %5508  ;;  %v7040_v13 = vld [vmem:[#allocation7 + $0x88] ss:$16 sps:$4 sm:$0xff]   ;;  %v7049_v39 = vld [vmem:[#allocation7 + $0xa0] ss:$16 sps:$4 sm:$0xff]   ;;  %v7055_v18 = vld [vmem:[#allocation7 + $0xc4] ss:$16 sps:$4 sm:$0xff]  }
 0x5fe   :  { %5518 = vrcp.f32 %v3209_v33  ;;  %3432 = vmatprep.subr.bf16.mxu0 %v6672_v62  ;;  %3475 = vmatprep.subr.bf16.mxu1 %v6675_v2  ;;  %v5511_v59 = vpop.eup %5510  ;;  %v7630_v62 = vld [vmem:[#allocation30_spill] sm:$0xff] }
 0x5ff   :  { %3462 = vmatprep.mubr.bf16.mxu0 %v7524_v51  ;;  %3505 = vmatprep.mubr.bf16.mxu1 %v7524_v51  ;;  %5520 = vrcp.f32 %v3221_v5  ;;  %v7052_v33 = vld [vmem:[#allocation7 + $0xa8] ss:$16 sps:$4 sm:$0xff]   ;;  %v7058_v5 = vld [vmem:[#allocation7 + $0xcc] ss:$16 sps:$4 sm:$0xff]  }
 0x601   :  { %3433 = vmatpush1.bf16.msra.mxu0 %v7597_v25  ;;  %3476 = vmatpush1.bf16.msra.mxu1 %v7598_v37 }
 0x602   :  { %3434 = vmatprep.subr.bf16.mxu0 %v7599_v23  ;;  %3477 = vmatprep.subr.bf16.mxu1 %v7600_v14  ;;  %v3234_v23 = vadd.f32 1.0, %v5509_v12  ;;  %v7064_v12 = vld [vmem:[#allocation7 + $0xc8] ss:$16 sps:$4 sm:$0xff]  }
 0x604   :  { %5522 = vrcp.f32 %v3234_v23 }
 0x605   :  { %v5513_v6 = vpop.eup %5512  ;;  %3435 = vmatpush1.bf16.msra.mxu0 %v7601_v3  ;;  %3478 = vmatpush1.bf16.msra.mxu1 %v7630_v62  ;;  %v7073_v62 = vld [vmem:[#allocation7 + $0xe0] ss:$16 sps:$4 sm:$0xff]  }
 0x606   :  { %v5515_v2 = vpop.eup %5514  ;;  %v3242_v52 = vmul.f32 %v5513_v6, %v5507_v61  ;;  %3436 = vmatprep.subr.bf16.mxu0 %v7603_v30  ;;  %3479 = vmatprep.subr.bf16.mxu1 %v6701_v31  ;;  %v7061_v61 = vld [vmem:[#allocation7 + $0xc0] ss:$16 sps:$4 sm:$0xff]   ;;  %v7070_v6 = vld [vmem:[#allocation7 + $0xec] ss:$16 sps:$4 sm:$0xff]  }
 0x607   :  { %v5517_v25 = vpop.eup %5516  ;;  %v3240_v37 = vmul.f32 %v5515_v2, %v6847_v35  ;;  %v7076_v2 = vld [vmem:[#allocation7 + $0xe8] ss:$16 sps:$4 sm:$0xff]  }
 0x608   :  { %v5519_v1 = vpop.eup %5518  ;;  %v3235_v43 = vadd.f32 1.0, %v5517_v25  ;;  %v7082_v25 = vld [vmem:[#allocation7 + $0x10c] ss:$16 sps:$4 sm:$0xff]  }
 0x609   :  { %v6953_v7 = vadd.f32 %v3242_v52, %v3240_v37  ;;  %v3243_v14 = vmul.f32 %v5519_v1, %v5511_v59  ;;  %3437 = vmatpush1.bf16.msra.mxu0 %v6707_v4  ;;  %3480 = vmatpush1.bf16.msra.mxu1 %v6710_v45  ;;  %v5521_v3 = vpop.eup %5520  ;;  %v7631_v4 = vld [vmem:[#allocation35_spill] sm:$0xff]  ;;  %v7633_v45 = vld [vmem:[#allocation42_spill] sm:$0xff]  ;;  %7634 = vst [vmem:[#allocation24_spill] sm:$0xff] %v7082_v25 }
 0x60a   :  { %3438 = vmatprep.subr.bf16.mxu0 %v6713_v46  ;;  %3481 = vmatprep.subr.bf16.mxu1 %v6716_v34  ;;  %v3241_v31 = vmul.f32 %v5521_v3, %v6855_v54  ;;  %v7632_v46 = vld [vmem:[#allocation39_spill] sm:$0xff] }
 0x60b   :  { %5524 = vtanh.f32 %v6953_v7  ;;  %v7067_v59 = vld [vmem:[#allocation7 + $0xe4] ss:$16 sps:$4 sm:$0xff]  }
 0x60c   :  { %v6961_v30 = vadd.f32 %v3243_v14, %v3241_v31  ;;  %5526 = vrcp.f32 %v3235_v43  ;;  %v7079_v52 = vld [vmem:[#allocation7 + $0x104] ss:$16 sps:$4 sm:$0xff]  }
 0x60d   :  { %3439 = vmatpush1.bf16.msra.mxu0 %v6723_v9  ;;  %3482 = vmatpush1.bf16.msra.mxu1 %v7604_v53 }
 0x60e   :  { %3440 = vmatprep.subr.bf16.mxu0 %v7605_v60  ;;  %3483 = vmatprep.subr.bf16.mxu1 %v7606_v58  ;;  %5528 = vtanh.f32 %v6961_v30  ;;  %v5523_v34 = vpop.eup %5522  ;;  %v6978_v58 = vld [vmem:[#allocation7 + $0x4] ss:$16 sps:$4 sm:$0xff]  }
 0x611   :  { %3441 = vmatpush1.bf16.msra.mxu0 %v7607_v22  ;;  %3484 = vmatpush1.bf16.msra.mxu1 %v7631_v4  ;;  %v6981_v22 = vld [vmem:[#allocation7 + $0xc] ss:$16 sps:$4 sm:$0xff]  }
 0x612   :  { %3442 = vmatprep.subr.bf16.mxu0 %v7632_v46  ;;  %3485 = vmatprep.subr.bf16.mxu1 %v7610_v32 }
 0x615   :  { %3443 = vmatpush1.bf16.msra.mxu0 %v7633_v45  ;;  %3486 = vmatpush1.bf16.msra.mxu1 %v7612_v40  ;;  %v5525_v9 = vpop.eup %5524  ;;  %v6996_v40 = vld [vmem:[#allocation7 + $0x2c] ss:$16 sps:$4 sm:$0xff]  }
 0x616   :  { %3444 = vmatprep.subr.bf16.mxu0 %v7613_v26  ;;  %3487 = vmatprep.subr.bf16.mxu1 %v6757_v55  ;;  %v5527_v35 = vpop.eup %5526  ;;  %v3248_v53 = vmul.f32 %v5525_v9, %v5523_v34  ;;  %v6990_v55 = vld [vmem:[#allocation7 + $0x8] ss:$16 sps:$4 sm:$0xff]   ;;  %v7001_v26 = vld [vmem:[#allocation7 + $0x20] ss:$16 sps:$4 sm:$0xff]  }
 0x618   :  { %v5529_v54 = vpop.eup %5528 }
 0x619   :  { %3445 = vmatpush1.bf16.msra.mxu0 %v6760_v57  ;;  %3488 = vmatpush1.bf16.msra.mxu1 %v6763_v63  ;;  %v3249_v60 = vmul.f32 %v5529_v54, %v5527_v35  ;;  %v6987_v57 = vld [vmem:[#allocation7] ss:$16 sps:$4 sm:$0xff]   ;;  %v6993_v63 = vld [vmem:[#allocation7 + $0x24] ss:$16 sps:$4 sm:$0xff]  }
 0x61a   :  { %3602 = vmatprep.subr.bf16.mxu0 %v6978_v58  ;;  %3645 = vmatprep.subr.bf16.mxu1 %v6981_v22 }
 0x61b   :  { %v3261_v32 = vpack.c.bf16 %v3249_v60, %v3248_v53 }
 0x61d   :  { %4730 = vst [vmem:[%s7377_s6 + $0x18] sm:$0xff] %v3261_v32   ;;  %3463 = vmatmul.mubr.bf16.vlgmr.msra.gmra.mrb[40].mxu0 %v3261_v32  ;;  %3506 = vmatmul.mubr.bf16.vlgmr.msra.gmra.mrb[40].mxu1 %v3261_v32 }
 0x61e   :  { %3603 = vmatpush1.bf16.msra.mxu0 %v6987_v57  ;;  %3646 = vmatpush1.bf16.msra.mxu1 %v6990_v55 }
 0x61f   :  { %3604 = vmatprep.subr.bf16.mxu0 %v6993_v63  ;;  %3647 = vmatprep.subr.bf16.mxu1 %v6996_v40 }
 0x620   :  { %3634 = vmatprep.mubr.bf16.mxu0 %v7524_v51  ;;  %3677 = vmatprep.mubr.bf16.mxu1 %v7524_v51 }
 0x622   :  { %3605 = vmatpush1.bf16.msra.mxu0 %v7001_v26  ;;  %3648 = vmatpush1.bf16.msra.mxu1 %v7004_v10 }
 0x623   :  { %3606 = vmatprep.subr.bf16.mxu0 %v7007_v11  ;;  %3649 = vmatprep.subr.bf16.mxu1 %v7010_v0 }
 0x626   :  { %3607 = vmatpush1.bf16.msra.mxu0 %v7013_v20  ;;  %3650 = vmatpush1.bf16.msra.mxu1 %v7016_v47 }
 0x627   :  { %3608 = vmatprep.subr.bf16.mxu0 %v7019_v49  ;;  %3651 = vmatprep.subr.bf16.mxu1 %v7022_v50 }
 0x62a   :  { %3609 = vmatpush1.bf16.msra.mxu0 %v7025_v36  ;;  %3652 = vmatpush1.bf16.msra.mxu1 %v7028_v28 }
 0x62b   :  { %3610 = vmatprep.subr.bf16.mxu0 %v7031_v44  ;;  %3653 = vmatprep.subr.bf16.mxu1 %v7034_v8 }
 0x62e   :  { %3611 = vmatpush1.bf16.msra.mxu0 %v7037_v42  ;;  %3654 = vmatpush1.bf16.msra.mxu1 %v7040_v13 }
 0x62f   :  { %3612 = vmatprep.subr.bf16.mxu0 %v7043_v17  ;;  %3655 = vmatprep.subr.bf16.mxu1 %v7046_v16 }
 0x632   :  { %3613 = vmatpush1.bf16.msra.mxu0 %v7049_v39  ;;  %3656 = vmatpush1.bf16.msra.mxu1 %v7052_v33 }
 0x633   :  { %3614 = vmatprep.subr.bf16.mxu0 %v7055_v18  ;;  %3657 = vmatprep.subr.bf16.mxu1 %v7058_v5 }
 0x636   :  { %3615 = vmatpush1.bf16.msra.mxu0 %v7061_v61  ;;  %3658 = vmatpush1.bf16.msra.mxu1 %v7064_v12 }
 0x637   :  { %3616 = vmatprep.subr.bf16.mxu0 %v7067_v59  ;;  %3659 = vmatprep.subr.bf16.mxu1 %v7070_v6 }
 0x63a   :  { %3617 = vmatpush1.bf16.msra.mxu0 %v7073_v62  ;;  %3660 = vmatpush1.bf16.msra.mxu1 %v7076_v2 }
 0x63b   :  { %3752 = vmatprep.subr.bf16.mxu0 %v7079_v52  ;;  %3795 = vmatprep.subr.bf16.mxu1 %v7082_v25 }
 0x6cf   :  { %v3314_v37 = vpop.f32.mrb[20].mxu0  ;;  %v3357_v1 = vpop.f32.mrb[20].mxu1 }
 0x6d0   :  { %v4756_v23 = vadd.f32 %v3314_v37, %v7628_v21  ;;  %v3316_v14 = vpop.f32.mrb[21].mxu0  ;;  %v3359_v3 = vpop.f32.mrb[21].mxu1  ;;  %v4788_v37 = vadd.f32 %v3357_v1, %v7629_v29 }
 0x6d1   :  { %v4757_v43 = vadd.f32 %v3316_v14, %v7559_v15  ;;  %v3318_v31 = vpop.f32.mrb[22].mxu0  ;;  %v3361_v4 = vpop.f32.mrb[22].mxu1  ;;  %v4789_v32 = vadd.f32 %v3359_v3, %v7560_v41 }
 0x6d2   :  { %v4548_v46 = vmul.f32 -1.442695, %v4756_v23  ;;  %v4758_v45 = vadd.f32 %v3318_v31, %v7628_v21  ;;  %v3320_v34 = vpop.f32.mrb[23].mxu0  ;;  %v3363_v9 = vpop.f32.mrb[23].mxu1  ;;  %v4790_v31 = vadd.f32 %v3361_v4, %v7629_v29 }
 0x6d3   :  { %v4550_v35 = vmul.f32 -1.442695, %v4757_v43  ;;  %v4759_v54 = vadd.f32 %v3320_v34, %v7559_v15  ;;  %v4552_v14 = vmul.f32 -1.442695, %v4789_v32  ;;  %v4791_v23 = vadd.f32 %v3363_v9, %v7560_v41 }
 0x6d4   :  { %5530 = vpow2.f32 %v4548_v46  ;;  %v4549_v53 = vmul.f32 -1.442695, %v4758_v45 }
 0x6d5   :  { %5532 = vpow2.f32 %v4550_v35  ;;  %v4551_v60 = vmul.f32 -1.442695, %v4759_v54  ;;  %v4553_v46 = vmul.f32 -1.442695, %v4791_v23 }
 0x6d6   :  { %5534 = vpow2.f32 %v4549_v53 }
 0x6d7   :  { %5536 = vpow2.f32 %v4551_v60 }
 0x6d8   :  { %5538 = vtanh.f32 %v4788_v37 }
 0x6d9   :  { %5540 = vpow2.f32 %v4552_v14 }
 0x6da   :  { %5542 = vtanh.f32 %v4790_v31 }
 0x6de   :  { %v5531_v21 = vpop.eup %5530 }
 0x6df   :  { %v5533_v43 = vpop.eup %5532  ;;  %v3380_v25 = vadd.f32 1.0, %v5531_v21 }
 0x6e0   :  { %v3392_v45 = vadd.f32 1.0, %v5533_v43  ;;  %v5535_v34 = vpop.eup %5534 }
 0x6e1   :  { %5544 = vrcp.f32 %v3380_v25  ;;  %v3381_v3 = vadd.f32 1.0, %v5535_v34  ;;  %v5537_v35 = vpop.eup %5536 }
 0x6e2   :  { %5546 = vrcp.f32 %v3392_v45  ;;  %v3393_v1 = vadd.f32 1.0, %v5537_v35  ;;  %v5539_v9 = vpop.eup %5538 }
 0x6e3   :  { %5548 = vpow2.f32 %v4553_v46  ;;  %v5541_v54 = vpop.eup %5540 }
 0x6e4   :  { %5550 = vrcp.f32 %v3381_v3  ;;  %v5543_v4 = vpop.eup %5542  ;;  %v3406_v23 = vadd.f32 1.0, %v5541_v54 }
 0x6e5   :  { %5552 = vrcp.f32 %v3393_v1 }
 0x6e6   :  { %5554 = vrcp.f32 %v3406_v23 }
 0x6eb   :  { %v5545_v53 = vpop.eup %5544 }
 0x6ec   :  { %v5547_v60 = vpop.eup %5546  ;;  %v3414_v32 = vmul.f32 %v5545_v53, %v5539_v9 }
 0x6ed   :  { %v5549_v21 = vpop.eup %5548  ;;  %v3412_v37 = vmul.f32 %v5547_v60, %v6920_v56 }
 0x6ee   :  { %v5551_v14 = vpop.eup %5550  ;;  %v3407_v45 = vadd.f32 1.0, %v5549_v21 }
 0x6ef   :  { %v7094_v31 = vadd.f32 %v3414_v32, %v3412_v37  ;;  %v3415_v25 = vmul.f32 %v5551_v14, %v5543_v4  ;;  %v5553_v43 = vpop.eup %5552 }
 0x6f0   :  { %v3413_v46 = vmul.f32 %v5553_v43, %v6925_v24  ;;  %v3464_v34 = vpop.f32.mrb[40].mxu0  ;;  %v3507_v3 = vpop.f32.mrb[40].mxu1 }
 0x6f1   :  { %v4808_v35 = vadd.f32 %v3464_v34, %v6359_v38  ;;  %v3466_v1 = vpop.f32.mrb[41].mxu0  ;;  %v3509_v29 = vpop.f32.mrb[41].mxu1  ;;  %5556 = vtanh.f32 %v7094_v31 }
 0x6f2   :  { %v7099_v9 = vadd.f32 %v3415_v25, %v3413_v46  ;;  %v4809_v56 = vadd.f32 %v3466_v1, %v7562_v19  ;;  %v3468_v54 = vpop.f32.mrb[42].mxu0  ;;  %v3511_v53 = vpop.f32.mrb[42].mxu1  ;;  %5558 = vrcp.f32 %v3407_v45  ;;  %v4841_v25 = vadd.f32 %v3509_v29, %v6374_v27 }
 0x6f3   :  { %v4554_v4 = vmul.f32 -1.442695, %v4808_v35  ;;  %v4810_v60 = vadd.f32 %v3468_v54, %v6359_v38  ;;  %v3470_v24 = vpop.f32.mrb[43].mxu0  ;;  %v3513_v32 = vpop.f32.mrb[43].mxu1  ;;  %v4840_v45 = vadd.f32 %v3507_v3, %v6379_v48 }
 0x6f4   :  { %5560 = vtanh.f32 %v7099_v9  ;;  %v4556_v21 = vmul.f32 -1.442695, %v4809_v56  ;;  %v4811_v37 = vadd.f32 %v3470_v24, %v7562_v19  ;;  %v5555_v43 = vpop.eup %5554  ;;  %v4558_v34 = vmul.f32 -1.442695, %v4841_v25 }
 0x6f5   :  { %5562 = vpow2.f32 %v4554_v4  ;;  %v4555_v14 = vmul.f32 -1.442695, %v4810_v60  ;;  %v4843_v35 = vadd.f32 %v3513_v32, %v6374_v27  ;;  %v4842_v56 = vadd.f32 %v3511_v53, %v6379_v48  ;;  %v7112_v32 = vld [vmem:[#allocation7 + $0x100] ss:$16 sps:$4 sm:$0xff]  }
 0x6f6   :  { %5564 = vpow2.f32 %v4556_v21  ;;  %v4557_v23 = vmul.f32 -1.442695, %v4811_v37 }
 0x6f7   :  { %5566 = vpow2.f32 %v4555_v14  ;;  %v4559_v29 = vmul.f32 -1.442695, %v4843_v35  ;;  %v7126_v35 = vld [vmem:[#allocation7 + $0x120] ss:$16 sps:$4 sm:$0xff]  }
 0x6f8   :  { %5568 = vpow2.f32 %v4557_v23  ;;  %7635 = vst [vmem:[#allocation26_spill] sm:$0xff] %v7126_v35 }
 0x6f9   :  { %5570 = vtanh.f32 %v4840_v45 }
 0x6fa   :  { %5572 = vpow2.f32 %v4558_v34  ;;  %v7121_v34 = vld [vmem:[#allocation7 + $0x12c] ss:$16 sps:$4 sm:$0xff]  }
 0x6fb   :  { %v5557_v46 = vpop.eup %5556  ;;  %5574 = vtanh.f32 %v4842_v56 }
 0x6fc   :  { %v5559_v1 = vpop.eup %5558  ;;  %v3420_v4 = vmul.f32 %v5557_v46, %v5555_v43  ;;  %v7115_v43 = vld [vmem:[#allocation7 + $0x108] ss:$16 sps:$4 sm:$0xff]   ;;  %v7118_v46 = vld [vmem:[#allocation7 + $0x124] ss:$16 sps:$4 sm:$0xff]  }
 0x6fe   :  { %v5561_v54 = vpop.eup %5560 }
 0x6ff   :  { %v5563_v24 = vpop.eup %5562  ;;  %v3421_v60 = vmul.f32 %v5561_v54, %v5559_v1  ;;  %v7129_v1 = vld [vmem:[#allocation7 + $0x128] ss:$16 sps:$4 sm:$0xff]   ;;  %v7132_v54 = vld [vmem:[#allocation7 + $0x144] ss:$16 sps:$4 sm:$0xff]  }
 0x700   :  { %v5565_v21 = vpop.eup %5564  ;;  %v3530_v37 = vadd.f32 1.0, %v5563_v24  ;;  %7636 = vst [vmem:[#allocation25_spill] sm:$0xff] %v7129_v1  ;;  %7637 = vst [vmem:[#allocation28_spill] sm:$0xff] %v7132_v54  ;;  %v7135_v24 = vld [vmem:[#allocation7 + $0x14c] ss:$16 sps:$4 sm:$0xff]  }
 0x701   :  { %v3542_v14 = vadd.f32 1.0, %v5565_v21  ;;  %v3572_v23 = vpack.c.bf16 %v3421_v60, %v3420_v4  ;;  %v5567_v3 = vpop.eup %5566  ;;  %7638 = vst [vmem:[#allocation27_spill] sm:$0xff] %v7135_v24 }
 0x702   :  { %5576 = vrcp.f32 %v3530_v37  ;;  %v3531_v25 = vadd.f32 1.0, %v5567_v3  ;;  %v5569_v53 = vpop.eup %5568  ;;  %v7138_v37 = vld [vmem:[#allocation7 + $0x140] ss:$16 sps:$4 sm:$0xff]   ;;  %v7144_v3 = vld [vmem:[#allocation7 + $0x164] ss:$16 sps:$4 sm:$0xff]  }
 0x703   :  { %5578 = vrcp.f32 %v3542_v14  ;;  %4731 = vst [vmem:[%s7376_s5 + $0x28] sm:$0xff] %v3572_v23   ;;  %3635 = vmatmul.mubr.bf16.vlgmr.msra.gmra.mrb[24].mxu0 %v3572_v23  ;;  %3678 = vmatmul.mubr.bf16.vlgmr.msra.gmra.mrb[24].mxu1 %v3572_v23  ;;  %v3543_v45 = vadd.f32 1.0, %v5569_v53  ;;  %v5571_v56 = vpop.eup %5570  ;;  %7639 = vst [vmem:[#allocation29_spill] sm:$0xff] %v7138_v37 }
 0x704   :  { %5580 = vpow2.f32 %v4559_v29  ;;  %3753 = vmatpush1.bf16.msra.mxu0 %v7112_v32  ;;  %3796 = vmatpush1.bf16.msra.mxu1 %v7115_v43  ;;  %v5573_v4 = vpop.eup %5572  ;;  %v7141_v29 = vld [vmem:[#allocation7 + $0x148] ss:$16 sps:$4 sm:$0xff]   ;;  %7641 = vst [vmem:[#allocation32_spill] sm:$0xff] %v7144_v3 }
 0x705   :  { %5582 = vrcp.f32 %v3531_v25  ;;  %3754 = vmatprep.subr.bf16.mxu0 %v7118_v46  ;;  %3797 = vmatprep.subr.bf16.mxu1 %v7121_v34  ;;  %v5575_v60 = vpop.eup %5574  ;;  %7640 = vst [vmem:[#allocation31_spill] sm:$0xff] %v7141_v29  ;;  %v7147_v25 = vld [vmem:[#allocation7 + $0x16c] ss:$16 sps:$4 sm:$0xff]  }
 0x706   :  { %3784 = vmatprep.mubr.bf16.mxu0 %v7524_v51  ;;  %3827 = vmatprep.mubr.bf16.mxu1 %v7524_v51  ;;  %5584 = vrcp.f32 %v3543_v45 }
 0x708   :  { %3755 = vmatpush1.bf16.msra.mxu0 %v7126_v35  ;;  %3798 = vmatpush1.bf16.msra.mxu1 %v7129_v1  ;;  %v7153_v35 = vld [vmem:[#allocation7 + $0x160] ss:$16 sps:$4 sm:$0xff]  }
 0x709   :  { %3756 = vmatprep.subr.bf16.mxu0 %v7132_v54  ;;  %3799 = vmatprep.subr.bf16.mxu1 %v7135_v24  ;;  %v3556_v54 = vadd.f32 1.0, %v5573_v4 }
 0x70b   :  { %5586 = vrcp.f32 %v3556_v54  ;;  %v7188_v54 = vld [vmem:[#allocation7 + $0x1c4] ss:$16 sps:$4 sm:$0xff]  }
 0x70c   :  { %v5577_v21 = vpop.eup %5576  ;;  %3757 = vmatpush1.bf16.msra.mxu0 %v7138_v37  ;;  %3800 = vmatpush1.bf16.msra.mxu1 %v7141_v29  ;;  %v7159_v29 = vld [vmem:[#allocation7 + $0x184] ss:$16 sps:$4 sm:$0xff]   ;;  %7647 = vst [vmem:[#allocation36_spill] sm:$0xff] %v7188_v54 }
 0x70d   :  { %v5579_v14 = vpop.eup %5578  ;;  %v3564_v23 = vmul.f32 %v5577_v21, %v5571_v56  ;;  %3758 = vmatprep.subr.bf16.mxu0 %v7144_v3  ;;  %3801 = vmatprep.subr.bf16.mxu1 %v7147_v25  ;;  %v7156_v56 = vld [vmem:[#allocation7 + $0x168] ss:$16 sps:$4 sm:$0xff]  }
 0x70e   :  { %v5581_v53 = vpop.eup %5580  ;;  %v3562_v45 = vmul.f32 %v5579_v14, %v6953_v7  ;;  %v7162_v7 = vld [vmem:[#allocation7 + $0x18c] ss:$16 sps:$4 sm:$0xff]   ;;  %v7172_v14 = vld [vmem:[#allocation7 + $0x188] ss:$16 sps:$4 sm:$0xff]  }
 0x70f   :  { %v5583_v24 = vpop.eup %5582  ;;  %v3557_v3 = vadd.f32 1.0, %v5581_v53  ;;  %7642 = vst [vmem:[#allocation33_spill] sm:$0xff] %v7172_v14  ;;  %v7178_v53 = vld [vmem:[#allocation7 + $0x1ac] ss:$16 sps:$4 sm:$0xff]  }
 0x710   :  { %v7151_v37 = vadd.f32 %v3564_v23, %v3562_v45  ;;  %v3565_v1 = vmul.f32 %v5583_v24, %v5575_v60  ;;  %3759 = vmatpush1.bf16.msra.mxu0 %v7153_v35  ;;  %3802 = vmatpush1.bf16.msra.mxu1 %v7156_v56  ;;  %v5585_v21 = vpop.eup %5584  ;;  %v7169_v60 = vld [vmem:[#allocation7 + $0x180] ss:$16 sps:$4 sm:$0xff]   ;;  %v7175_v23 = vld [vmem:[#allocation7 + $0x1a4] ss:$16 sps:$4 sm:$0xff]   ;;  %7644 = vst [vmem:[#allocation40_spill] sm:$0xff] %v7178_v53 }
 0x711   :  { %3760 = vmatprep.subr.bf16.mxu0 %v7159_v29  ;;  %3803 = vmatprep.subr.bf16.mxu1 %v7162_v7  ;;  %v3563_v24 = vmul.f32 %v5585_v21, %v6961_v30  ;;  %7643 = vst [vmem:[#allocation34_spill] sm:$0xff] %v7175_v23  ;;  %v7182_v30 = vld [vmem:[#allocation7 + $0x1a0] ss:$16 sps:$4 sm:$0xff]   ;;  %v7197_v21 = vld [vmem:[#allocation7 + $0x1c8] ss:$16 sps:$4 sm:$0xff]  }
 0x712   :  { %5588 = vtanh.f32 %v7151_v37  ;;  %7645 = vst [vmem:[#allocation43_spill] sm:$0xff] %v7182_v30  ;;  %v7194_v45 = vld [vmem:[#allocation7 + $0x1c0] ss:$16 sps:$4 sm:$0xff]   ;;  %7650 = vst [vmem:[#allocation14_spill] sm:$0xff] %v7197_v21 }
 0x713   :  { %v7167_v4 = vadd.f32 %v3565_v1, %v3563_v24  ;;  %5590 = vrcp.f32 %v3557_v3  ;;  %v7185_v1 = vld [vmem:[#allocation7 + $0x1a8] ss:$16 sps:$4 sm:$0xff]   ;;  %v7191_v3 = vld [vmem:[#allocation7 + $0x1cc] ss:$16 sps:$4 sm:$0xff]   ;;  %7649 = vst [vmem:[#allocation12_spill] sm:$0xff] %v7194_v45 }
 0x714   :  { %3761 = vmatpush1.bf16.msra.mxu0 %v7169_v60  ;;  %3804 = vmatpush1.bf16.msra.mxu1 %v7172_v14  ;;  %7646 = vst [vmem:[#allocation44_spill] sm:$0xff] %v7185_v1  ;;  %7648 = vst [vmem:[#allocation37_spill] sm:$0xff] %v7191_v3 }
 0x715   :  { %3762 = vmatprep.subr.bf16.mxu0 %v7175_v23  ;;  %3805 = vmatprep.subr.bf16.mxu1 %v7178_v53  ;;  %5592 = vtanh.f32 %v7167_v4  ;;  %v5587_v24 = vpop.eup %5586  ;;  %v7206_v23 = vld [vmem:[#allocation7 + $0x1e0] ss:$16 sps:$4 sm:$0xff]  }
 0x718   :  { %3763 = vmatpush1.bf16.msra.mxu0 %v7182_v30  ;;  %3806 = vmatpush1.bf16.msra.mxu1 %v7185_v1  ;;  %v7200_v30 = vld [vmem:[#allocation7 + $0x1e4] ss:$16 sps:$4 sm:$0xff]   ;;  %v7203_v1 = vld [vmem:[#allocation7 + $0x1ec] ss:$16 sps:$4 sm:$0xff]  }
 0x719   :  { %3764 = vmatprep.subr.bf16.mxu0 %v7188_v54  ;;  %3807 = vmatprep.subr.bf16.mxu1 %v7191_v3  ;;  %7651 = vst [vmem:[#allocation13_spill] sm:$0xff] %v7200_v30 }
 0x71c   :  { %3765 = vmatpush1.bf16.msra.mxu0 %v7194_v45  ;;  %3808 = vmatpush1.bf16.msra.mxu1 %v7197_v21  ;;  %v5589_v54 = vpop.eup %5588  ;;  %v7209_v45 = vld [vmem:[#allocation7 + $0x1e8] ss:$16 sps:$4 sm:$0xff]  }
 0x71d   :  { %3766 = vmatprep.subr.bf16.mxu0 %v7200_v30  ;;  %3809 = vmatprep.subr.bf16.mxu1 %v7203_v1  ;;  %v5591_v53 = vpop.eup %5590  ;;  %v3570_v21 = vmul.f32 %v5589_v54, %v5587_v24 }
 0x71f   :  { %v5593_v3 = vpop.eup %5592 }
 0x720   :  { %3767 = vmatpush1.bf16.msra.mxu0 %v7206_v23  ;;  %3810 = vmatpush1.bf16.msra.mxu1 %v7209_v45  ;;  %v3571_v14 = vmul.f32 %v5593_v3, %v5591_v53 }
 0x721   :  { %3924 = vmatprep.subr.bf16.mxu0 %v6978_v58  ;;  %3967 = vmatprep.subr.bf16.mxu1 %v6981_v22  ;;  %v7652_v58 = vld [vmem:[#allocation24_spill] sm:$0xff] }
 0x722   :  { %v3583_v30 = vpack.c.bf16 %v3571_v14, %v3570_v21 }
 0x724   :  { %4732 = vst [vmem:[%s7377_s6 + $0x10] sm:$0xff] %v3583_v30   ;;  %3785 = vmatmul.mubr.bf16.vlgmr.msra.gmra.mrb[36].mxu0 %v3583_v30  ;;  %3828 = vmatmul.mubr.bf16.vlgmr.msra.gmra.mrb[36].mxu1 %v3583_v30 }
 0x725   :  { %3925 = vmatpush1.bf16.msra.mxu0 %v6987_v57  ;;  %3968 = vmatpush1.bf16.msra.mxu1 %v6990_v55  ;;  %v7653_v55 = vld [vmem:[#allocation38_spill] sm:$0xff] }
 0x726   :  { %3926 = vmatprep.subr.bf16.mxu0 %v6993_v63  ;;  %3969 = vmatprep.subr.bf16.mxu1 %v6996_v40 }
 0x727   :  { %3956 = vmatprep.mubr.bf16.mxu0 %v7524_v51  ;;  %3999 = vmatprep.mubr.bf16.mxu1 %v7524_v51 }
 0x729   :  { %3927 = vmatpush1.bf16.msra.mxu0 %v7001_v26  ;;  %3970 = vmatpush1.bf16.msra.mxu1 %v7004_v10 }
 0x72a   :  { %3928 = vmatprep.subr.bf16.mxu0 %v7007_v11  ;;  %3971 = vmatprep.subr.bf16.mxu1 %v7010_v0 }
 0x72d   :  { %3929 = vmatpush1.bf16.msra.mxu0 %v7013_v20  ;;  %3972 = vmatpush1.bf16.msra.mxu1 %v7016_v47 }
 0x72e   :  { %3930 = vmatprep.subr.bf16.mxu0 %v7019_v49  ;;  %3973 = vmatprep.subr.bf16.mxu1 %v7022_v50 }
 0x731   :  { %3931 = vmatpush1.bf16.msra.mxu0 %v7025_v36  ;;  %3974 = vmatpush1.bf16.msra.mxu1 %v7028_v28 }
 0x732   :  { %3932 = vmatprep.subr.bf16.mxu0 %v7031_v44  ;;  %3975 = vmatprep.subr.bf16.mxu1 %v7034_v8 }
 0x735   :  { %3933 = vmatpush1.bf16.msra.mxu0 %v7037_v42  ;;  %3976 = vmatpush1.bf16.msra.mxu1 %v7040_v13  ;;  %v7654_v13 = vld [vmem:[#allocation41_spill] sm:$0xff] }
 0x736   :  { %3934 = vmatprep.subr.bf16.mxu0 %v7043_v17  ;;  %3977 = vmatprep.subr.bf16.mxu1 %v7046_v16 }
 0x739   :  { %3935 = vmatpush1.bf16.msra.mxu0 %v7049_v39  ;;  %3978 = vmatpush1.bf16.msra.mxu1 %v7052_v33 }
 0x73a   :  { %3936 = vmatprep.subr.bf16.mxu0 %v7055_v18  ;;  %3979 = vmatprep.subr.bf16.mxu1 %v7058_v5 }
 0x73d   :  { %3937 = vmatpush1.bf16.msra.mxu0 %v7061_v61  ;;  %3980 = vmatpush1.bf16.msra.mxu1 %v7064_v12 }
 0x73e   :  { %3938 = vmatprep.subr.bf16.mxu0 %v7067_v59  ;;  %3981 = vmatprep.subr.bf16.mxu1 %v7070_v6 }
 0x741   :  { %3939 = vmatpush1.bf16.msra.mxu0 %v7073_v62  ;;  %3982 = vmatpush1.bf16.msra.mxu1 %v7076_v2 }
 0x742   :  { %4074 = vmatprep.subr.bf16.mxu0 %v7079_v52  ;;  %4117 = vmatprep.subr.bf16.mxu1 %v7652_v58 }
 0x7d6   :  { %v3636_v22 = vpop.f32.mrb[24].mxu0  ;;  %v3679_v57 = vpop.f32.mrb[24].mxu1 }
 0x7d7   :  { %v4760_v63 = vadd.f32 %v3636_v22, %v7653_v55  ;;  %v3638_v40 = vpop.f32.mrb[25].mxu0  ;;  %v3681_v26 = vpop.f32.mrb[25].mxu1  ;;  %v4792_v17 = vadd.f32 %v3679_v57, %v7654_v13 }
 0x7d8   :  { %v4761_v10 = vadd.f32 %v3638_v40, %v7559_v15  ;;  %v3640_v11 = vpop.f32.mrb[26].mxu0  ;;  %v3683_v0 = vpop.f32.mrb[26].mxu1  ;;  %v4793_v42 = vadd.f32 %v3681_v26, %v7560_v41 }
 0x7d9   :  { %v4568_v20 = vmul.f32 -1.442695, %v4760_v63  ;;  %v4762_v47 = vadd.f32 %v3640_v11, %v7653_v55  ;;  %v3642_v49 = vpop.f32.mrb[27].mxu0  ;;  %v3685_v50 = vpop.f32.mrb[27].mxu1  ;;  %v4794_v33 = vadd.f32 %v3683_v0, %v7654_v13 }
 0x7da   :  { %v4570_v36 = vmul.f32 -1.442695, %v4761_v10  ;;  %v4763_v28 = vadd.f32 %v3642_v49, %v7559_v15  ;;  %v4572_v16 = vmul.f32 -1.442695, %v4793_v42  ;;  %v4795_v39 = vadd.f32 %v3685_v50, %v7560_v41 }
 0x7db   :  { %5594 = vpow2.f32 %v4568_v20  ;;  %v4569_v44 = vmul.f32 -1.442695, %v4762_v47 }
 0x7dc   :  { %5596 = vpow2.f32 %v4570_v36  ;;  %v4571_v8 = vmul.f32 -1.442695, %v4763_v28  ;;  %v4573_v12 = vmul.f32 -1.442695, %v4795_v39 }
 0x7dd   :  { %5598 = vpow2.f32 %v4569_v44 }
 0x7de   :  { %5600 = vpow2.f32 %v4571_v8 }
 0x7df   :  { %5602 = vtanh.f32 %v4792_v17 }
 0x7e0   :  { %5604 = vpow2.f32 %v4572_v16 }
 0x7e1   :  { %5606 = vtanh.f32 %v4794_v33 }
 0x7e5   :  { %v5595_v18 = vpop.eup %5594 }
 0x7e6   :  { %v5597_v5 = vpop.eup %5596  ;;  %v3702_v61 = vadd.f32 1.0, %v5595_v18 }
 0x7e7   :  { %v3714_v59 = vadd.f32 1.0, %v5597_v5  ;;  %v5599_v6 = vpop.eup %5598 }
 0x7e8   :  { %5608 = vrcp.f32 %v3702_v61  ;;  %v3703_v62 = vadd.f32 1.0, %v5599_v6  ;;  %v5601_v2 = vpop.eup %5600 }
 0x7e9   :  { %5610 = vrcp.f32 %v3714_v59  ;;  %v3715_v52 = vadd.f32 1.0, %v5601_v2  ;;  %v5603_v14 = vpop.eup %5602 }
 0x7ea   :  { %5612 = vpow2.f32 %v4573_v12  ;;  %v5605_v53 = vpop.eup %5604 }
 0x7eb   :  { %5614 = vrcp.f32 %v3703_v62  ;;  %v5607_v30 = vpop.eup %5606  ;;  %v3728_v57 = vadd.f32 1.0, %v5605_v53 }
 0x7ec   :  { %5616 = vrcp.f32 %v3715_v52 }
 0x7ed   :  { %5618 = vrcp.f32 %v3728_v57 }
 0x7f2   :  { %v5609_v54 = vpop.eup %5608 }
 0x7f3   :  { %v5611_v3 = vpop.eup %5610  ;;  %v3736_v21 = vmul.f32 %v5609_v54, %v5603_v14 }
 0x7f4   :  { %v5613_v24 = vpop.eup %5612  ;;  %v3734_v58 = vmul.f32 %v5611_v3, %v7094_v31 }
 0x7f5   :  { %v5615_v22 = vpop.eup %5614  ;;  %v3729_v10 = vadd.f32 1.0, %v5613_v24 }
 0x7f6   :  { %v7260_v63 = vadd.f32 %v3736_v21, %v3734_v58  ;;  %v3737_v40 = vmul.f32 %v5615_v22, %v5607_v30  ;;  %v5617_v26 = vpop.eup %5616 }
 0x7f7   :  { %v3735_v11 = vmul.f32 %v5617_v26, %v7099_v9  ;;  %v3786_v0 = vpop.f32.mrb[36].mxu0  ;;  %v3829_v20 = vpop.f32.mrb[36].mxu1 }
 0x7f8   :  { %v4804_v47 = vadd.f32 %v3786_v0, %v6359_v38  ;;  %v3788_v49 = vpop.f32.mrb[37].mxu0  ;;  %v3831_v50 = vpop.f32.mrb[37].mxu1  ;;  %5620 = vtanh.f32 %v7260_v63  ;;  %v4836_v12 = vadd.f32 %v3829_v20, %v6379_v48  ;;  %v7656_v0 = vld [vmem:[#allocation25_spill] sm:$0xff] }
 0x7f9   :  { %v7265_v36 = vadd.f32 %v3737_v40, %v3735_v11  ;;  %v4805_v31 = vadd.f32 %v3788_v49, %v7562_v19  ;;  %v3790_v28 = vpop.f32.mrb[38].mxu0  ;;  %v3833_v44 = vpop.f32.mrb[38].mxu1  ;;  %5622 = vrcp.f32 %v3729_v10  ;;  %v4837_v5 = vadd.f32 %v3831_v50, %v6374_v27  ;;  %v7655_v11 = vld [vmem:[#allocation26_spill] sm:$0xff] }
 0x7fa   :  { %v4574_v8 = vmul.f32 -1.442695, %v4804_v47  ;;  %v4806_v42 = vadd.f32 %v3790_v28, %v6359_v38  ;;  %v3792_v9 = vpop.f32.mrb[39].mxu0  ;;  %v3835_v17 = vpop.f32.mrb[39].mxu1  ;;  %v4838_v52 = vadd.f32 %v3833_v44, %v6379_v48  ;;  %v7657_v47 = vld [vmem:[#allocation28_spill] sm:$0xff] }
 0x7fb   :  { %5624 = vtanh.f32 %v7265_v36  ;;  %v4576_v16 = vmul.f32 -1.442695, %v4805_v31  ;;  %v4807_v39 = vadd.f32 %v3792_v9, %v7562_v19  ;;  %v5619_v61 = vpop.eup %5618  ;;  %v4578_v6 = vmul.f32 -1.442695, %v4837_v5  ;;  %v7668_v5 = vld [vmem:[#allocation37_spill] sm:$0xff] }
 0x7fc   :  { %5626 = vpow2.f32 %v4574_v8  ;;  %v4575_v33 = vmul.f32 -1.442695, %v4806_v42  ;;  %v4839_v62 = vadd.f32 %v3835_v17, %v6374_v27 }
 0x7fd   :  { %5628 = vpow2.f32 %v4576_v16  ;;  %v4577_v18 = vmul.f32 -1.442695, %v4807_v39 }
 0x7fe   :  { %5630 = vpow2.f32 %v4575_v33  ;;  %v4579_v24 = vmul.f32 -1.442695, %v4839_v62 }
 0x7ff   :  { %5632 = vpow2.f32 %v4577_v18  ;;  %v7662_v18 = vld [vmem:[#allocation33_spill] sm:$0xff] }
 0x800   :  { %5634 = vtanh.f32 %v4836_v12 }
 0x801   :  { %5636 = vpow2.f32 %v4578_v6 }
 0x802   :  { %v5621_v59 = vpop.eup %5620  ;;  %5638 = vtanh.f32 %v4838_v52 }
 0x803   :  { %v5623_v2 = vpop.eup %5622  ;;  %v3742_v30 = vmul.f32 %v5621_v59, %v5619_v61  ;;  %v7669_v61 = vld [vmem:[#allocation12_spill] sm:$0xff]  ;;  %v7671_v59 = vld [vmem:[#allocation13_spill] sm:$0xff] }
 0x805   :  { %v5625_v14 = vpop.eup %5624 }
 0x806   :  { %v5627_v53 = vpop.eup %5626  ;;  %v3743_v54 = vmul.f32 %v5625_v14, %v5623_v2 }
 0x807   :  { %v5629_v3 = vpop.eup %5628  ;;  %v3852_v21 = vadd.f32 1.0, %v5627_v53 }
 0x808   :  { %v3864_v58 = vadd.f32 1.0, %v5629_v3  ;;  %v3894_v22 = vpack.c.bf16 %v3743_v54, %v3742_v30  ;;  %v5631_v57 = vpop.eup %5630 }
 0x809   :  { %5640 = vrcp.f32 %v3852_v21  ;;  %v3853_v40 = vadd.f32 1.0, %v5631_v57  ;;  %v5633_v26 = vpop.eup %5632 }
 0x80a   :  { %5642 = vrcp.f32 %v3864_v58  ;;  %4733 = vst [vmem:[%s7376_s5 + $0x30] sm:$0xff] %v3894_v22   ;;  %3957 = vmatmul.mubr.bf16.vlgmr.msra.gmra.mrb[28].mxu0 %v3894_v22  ;;  %4000 = vmatmul.mubr.bf16.vlgmr.msra.gmra.mrb[28].mxu1 %v3894_v22  ;;  %v3865_v10 = vadd.f32 1.0, %v5633_v26  ;;  %v5635_v20 = vpop.eup %5634 }
 0x80b   :  { %5644 = vpow2.f32 %v4579_v24  ;;  %4075 = vmatpush1.bf16.msra.mxu0 %v7112_v32  ;;  %4118 = vmatpush1.bf16.msra.mxu1 %v7115_v43  ;;  %v7658_v32 = vld [vmem:[#allocation27_spill] sm:$0xff]  ;;  %v5637_v43 = vpop.eup %5636 }
 0x80c   :  { %5646 = vrcp.f32 %v3853_v40  ;;  %4076 = vmatprep.subr.bf16.mxu0 %v7118_v46  ;;  %4119 = vmatprep.subr.bf16.mxu1 %v7121_v34  ;;  %v5639_v49 = vpop.eup %5638  ;;  %v7659_v46 = vld [vmem:[#allocation29_spill] sm:$0xff]  ;;  %v7660_v34 = vld [vmem:[#allocation31_spill] sm:$0xff]  ;;  %v3878_v9 = vadd.f32 1.0, %v5637_v43 }
 0x80d   :  { %4106 = vmatprep.mubr.bf16.mxu0 %v7524_v51  ;;  %4149 = vmatprep.mubr.bf16.mxu1 %v7524_v51  ;;  %5648 = vrcp.f32 %v3865_v10  ;;  %v7661_v51 = vld [vmem:[#allocation32_spill] sm:$0xff] }
 0x80e   :  { %5650 = vrcp.f32 %v3878_v9 }
 0x80f   :  { %4077 = vmatpush1.bf16.msra.mxu0 %v7655_v11  ;;  %4120 = vmatpush1.bf16.msra.mxu1 %v7656_v0 }
 0x810   :  { %4078 = vmatprep.subr.bf16.mxu0 %v7657_v47  ;;  %4121 = vmatprep.subr.bf16.mxu1 %v7658_v32 }
 0x813   :  { %v5641_v50 = vpop.eup %5640  ;;  %4079 = vmatpush1.bf16.msra.mxu0 %v7659_v46  ;;  %4122 = vmatpush1.bf16.msra.mxu1 %v7660_v34 }
 0x814   :  { %v5643_v31 = vpop.eup %5642  ;;  %v3886_v28 = vmul.f32 %v5641_v50, %v5635_v20  ;;  %4080 = vmatprep.subr.bf16.mxu0 %v7661_v51  ;;  %4123 = vmatprep.subr.bf16.mxu1 %v7147_v25 }
 0x815   :  { %v5645_v44 = vpop.eup %5644  ;;  %v3884_v8 = vmul.f32 %v5643_v31, %v7151_v37 }
 0x816   :  { %v5647_v42 = vpop.eup %5646  ;;  %v3879_v33 = vadd.f32 1.0, %v5645_v44 }
 0x817   :  { %v7293_v17 = vadd.f32 %v3886_v28, %v3884_v8  ;;  %v3887_v16 = vmul.f32 %v5647_v42, %v5639_v49  ;;  %4081 = vmatpush1.bf16.msra.mxu0 %v7153_v35  ;;  %4124 = vmatpush1.bf16.msra.mxu1 %v7156_v56  ;;  %v5649_v39 = vpop.eup %5648  ;;  %v7663_v35 = vld [vmem:[#allocation34_spill] sm:$0xff]  ;;  %v7664_v56 = vld [vmem:[#allocation40_spill] sm:$0xff] }
 0x818   :  { %4082 = vmatprep.subr.bf16.mxu0 %v7159_v29  ;;  %4125 = vmatprep.subr.bf16.mxu1 %v7162_v7  ;;  %v3885_v25 = vmul.f32 %v5649_v39, %v7167_v4  ;;  %v7665_v29 = vld [vmem:[#allocation43_spill] sm:$0xff]  ;;  %v7666_v7 = vld [vmem:[#allocation44_spill] sm:$0xff]  ;;  %v5651_v12 = vpop.eup %5650 }
 0x819   :  { %5652 = vtanh.f32 %v7293_v17  ;;  %v7667_v4 = vld [vmem:[#allocation36_spill] sm:$0xff] }
 0x81a   :  { %v7301_v37 = vadd.f32 %v3887_v16, %v3885_v25  ;;  %5654 = vrcp.f32 %v3879_v33 }
 0x81b   :  { %4083 = vmatpush1.bf16.msra.mxu0 %v7169_v60  ;;  %4126 = vmatpush1.bf16.msra.mxu1 %v7662_v18  ;;  %v7670_v60 = vld [vmem:[#allocation14_spill] sm:$0xff] }
 0x81c   :  { %4084 = vmatprep.subr.bf16.mxu0 %v7663_v35  ;;  %4127 = vmatprep.subr.bf16.mxu1 %v7664_v56  ;;  %5656 = vtanh.f32 %v7301_v37 }
 0x81f   :  { %4085 = vmatpush1.bf16.msra.mxu0 %v7665_v29  ;;  %4128 = vmatpush1.bf16.msra.mxu1 %v7666_v7 }
 0x820   :  { %4086 = vmatprep.subr.bf16.mxu0 %v7667_v4  ;;  %4129 = vmatprep.subr.bf16.mxu1 %v7668_v5 }
 0x823   :  { %4087 = vmatpush1.bf16.msra.mxu0 %v7669_v61  ;;  %4130 = vmatpush1.bf16.msra.mxu1 %v7670_v60  ;;  %v5653_v6 = vpop.eup %5652 }
 0x824   :  { %4088 = vmatprep.subr.bf16.mxu0 %v7671_v59  ;;  %4131 = vmatprep.subr.bf16.mxu1 %v7203_v1  ;;  %v5655_v62 = vpop.eup %5654  ;;  %v3892_v52 = vmul.f32 %v5653_v6, %v5651_v12 }
 0x826   :  { %v5657_v2 = vpop.eup %5656 }
 0x827   :  { %4089 = vmatpush1.bf16.msra.mxu0 %v7206_v23  ;;  %4132 = vmatpush1.bf16.msra.mxu1 %v7209_v45  ;;  %v3893_v14 = vmul.f32 %v5657_v2, %v5655_v62 }
 0x829   :  { %v3905_v53 = vpack.c.bf16 %v3893_v14, %v3892_v52 }
 0x82b   :  { %4734 = vst [vmem:[%s7377_s6 + $0x8] sm:$0xff] %v3905_v53   ;;  %4107 = vmatmul.mubr.bf16.vlgmr.msra.gmra.mrb[32].mxu0 %v3905_v53  ;;  %4150 = vmatmul.mubr.bf16.vlgmr.msra.gmra.mrb[32].mxu1 %v3905_v53 }
 0x8dd   :  { %v3958_v30 = vpop.f32.mrb[28].mxu0  ;;  %v4001_v54 = vpop.f32.mrb[28].mxu1 }
 0x8de   :  { %v4764_v1 = vadd.f32 %v3958_v30, %v7653_v55  ;;  %v3960_v3 = vpop.f32.mrb[29].mxu0  ;;  %v4003_v21 = vpop.f32.mrb[29].mxu1  ;;  %v4796_v47 = vadd.f32 %v4001_v54, %v7654_v13 }
 0x8df   :  { %v4765_v24 = vadd.f32 %v3960_v3, %v7559_v15  ;;  %v3962_v23 = vpop.f32.mrb[30].mxu0  ;;  %v4005_v58 = vpop.f32.mrb[30].mxu1  ;;  %v4797_v20 = vadd.f32 %v4003_v21, %v7560_v41 }
 0x8e0   :  { %v4588_v45 = vmul.f32 -1.442695, %v4764_v1  ;;  %v4766_v22 = vadd.f32 %v3962_v23, %v7653_v55  ;;  %v3964_v57 = vpop.f32.mrb[31].mxu0  ;;  %v4007_v40 = vpop.f32.mrb[31].mxu1  ;;  %v4798_v55 = vadd.f32 %v4005_v58, %v7654_v13 }
 0x8e1   :  { %v4590_v26 = vmul.f32 -1.442695, %v4765_v24  ;;  %v4767_v10 = vadd.f32 %v3964_v57, %v7559_v15  ;;  %v4592_v32 = vmul.f32 -1.442695, %v4797_v20  ;;  %v4799_v43 = vadd.f32 %v4007_v40, %v7560_v41 }
 0x8e2   :  { %5658 = vpow2.f32 %v4588_v45  ;;  %v4589_v11 = vmul.f32 -1.442695, %v4766_v22 }
 0x8e3   :  { %5660 = vpow2.f32 %v4590_v26  ;;  %v4591_v0 = vmul.f32 -1.442695, %v4767_v10  ;;  %v4593_v15 = vmul.f32 -1.442695, %v4799_v43 }
 0x8e4   :  { %5662 = vpow2.f32 %v4589_v11 }
 0x8e5   :  { %5664 = vpow2.f32 %v4591_v0 }
 0x8e6   :  { %5666 = vtanh.f32 %v4796_v47 }
 0x8e7   :  { %5668 = vpow2.f32 %v4592_v32 }
 0x8e8   :  { %5670 = vtanh.f32 %v4798_v55 }
 0x8ec   :  { %v5659_v49 = vpop.eup %5658 }
 0x8ed   :  { %v5661_v50 = vpop.eup %5660  ;;  %v4024_v46 = vadd.f32 1.0, %v5659_v49 }
 0x8ee   :  { %v4036_v34 = vadd.f32 1.0, %v5661_v50  ;;  %v5663_v31 = vpop.eup %5662 }
 0x8ef   :  { %5672 = vrcp.f32 %v4024_v46  ;;  %v4025_v28 = vadd.f32 1.0, %v5663_v31  ;;  %v5665_v51 = vpop.eup %5664 }
 0x8f0   :  { %5674 = vrcp.f32 %v4036_v34  ;;  %v4037_v44 = vadd.f32 1.0, %v5665_v51  ;;  %v5667_v41 = vpop.eup %5666 }
 0x8f1   :  { %5676 = vpow2.f32 %v4593_v15  ;;  %v5669_v8 = vpop.eup %5668 }
 0x8f2   :  { %5678 = vrcp.f32 %v4025_v28  ;;  %v5671_v13 = vpop.eup %5670  ;;  %v4050_v39 = vadd.f32 1.0, %v5669_v8 }
 0x8f3   :  { %5680 = vrcp.f32 %v4037_v44 }
 0x8f4   :  { %5682 = vrcp.f32 %v4050_v39 }
 0x8f9   :  { %v5673_v42 = vpop.eup %5672 }
 0x8fa   :  { %v5675_v9 = vpop.eup %5674  ;;  %v4058_v16 = vmul.f32 %v5673_v42, %v5667_v41 }
 0x8fb   :  { %v5677_v33 = vpop.eup %5676  ;;  %v4056_v25 = vmul.f32 %v5675_v9, %v7260_v63 }
 0x8fc   :  { %v5679_v18 = vpop.eup %5678  ;;  %v4051_v7 = vadd.f32 1.0, %v5677_v33 }
 0x8fd   :  { %v4060_v35 = vadd.f32 %v4058_v16, %v4056_v25  ;;  %v4059_v56 = vmul.f32 %v5679_v18, %v5671_v13  ;;  %v5681_v29 = vpop.eup %5680 }
 0x8fe   :  { %v4057_v4 = vmul.f32 %v5681_v29, %v7265_v36  ;;  %v4108_v5 = vpop.f32.mrb[32].mxu0  ;;  %v4151_v61 = vpop.f32.mrb[32].mxu1 }
 0x8ff   :  { %5684 = vtanh.f32 %v4060_v35  ;;  %4242 = vst [vmem:[%s7379_s8] sm:$0xff] %v4060_v35  ;;  %v4800_v60 = vadd.f32 %v4108_v5, %v6359_v38  ;;  %v4110_v12 = vpop.f32.mrb[33].mxu0  ;;  %v4153_v59 = vpop.f32.mrb[33].mxu1  ;;  %v4832_v58 = vadd.f32 %v4151_v61, %v6379_v48 }
 0x900   :  { %v4061_v63 = vadd.f32 %v4059_v56, %v4057_v4  ;;  %v4801_v6 = vadd.f32 %v4110_v12, %v7562_v19  ;;  %v4112_v62 = vpop.f32.mrb[34].mxu0  ;;  %v4155_v2 = vpop.f32.mrb[34].mxu1  ;;  %5686 = vrcp.f32 %v4051_v7  ;;  %v4833_v21 = vadd.f32 %v4153_v59, %v6374_v27 }
 0x901   :  { %v4594_v52 = vmul.f32 -1.442695, %v4800_v60  ;;  %v4802_v14 = vadd.f32 %v4112_v62, %v6359_v38  ;;  %v4114_v53 = vpop.f32.mrb[35].mxu0  ;;  %v4157_v30 = vpop.f32.mrb[35].mxu1 }
 0x902   :  { %5688 = vtanh.f32 %v4061_v63  ;;  %4243 = vst [vmem:[%s7379_s8 + $0x8] sm:$0xff] %v4061_v63  ;;  %v4596_v36 = vmul.f32 -1.442695, %v4801_v6  ;;  %v4803_v54 = vadd.f32 %v4114_v53, %v7562_v19  ;;  %v5683_v24 = vpop.eup %5682  ;;  %v4598_v45 = vmul.f32 -1.442695, %v4833_v21 }
 0x903   :  { %5690 = vpow2.f32 %v4594_v52  ;;  %v4595_v1 = vmul.f32 -1.442695, %v4802_v14  ;;  %v4835_v22 = vadd.f32 %v4157_v30, %v6374_v27  ;;  %v4834_v19 = vadd.f32 %v4155_v2, %v6379_v48 }
 0x904   :  { %5692 = vpow2.f32 %v4596_v36  ;;  %v4597_v3 = vmul.f32 -1.442695, %v4803_v54 }
 0x905   :  { %5694 = vpow2.f32 %v4595_v1  ;;  %v4599_v20 = vmul.f32 -1.442695, %v4835_v22 }
 0x906   :  { %5696 = vpow2.f32 %v4597_v3 }
 0x907   :  { %5698 = vtanh.f32 %v4832_v58 }
 0x908   :  { %5700 = vpow2.f32 %v4598_v45 }
 0x909   :  { %v5685_v23 = vpop.eup %5684  ;;  %5702 = vtanh.f32 %v4834_v19 }
 0x90a   :  { %v4064_v38 = vmul.f32 %v5685_v23, %v5683_v24  ;;  %v5687_v57 = vpop.eup %5686 }
 0x90c   :  { %4240 = vst [vmem:[%s7378_s7] sm:$0xff] %v4064_v38  ;;  %v5689_v40 = vpop.eup %5688 }
 0x90d   :  { %v5691_v26 = vpop.eup %5690  ;;  %v4065_v10 = vmul.f32 %v5689_v40, %v5687_v57 }
 0x90e   :  { %v5693_v11 = vpop.eup %5692  ;;  %v4174_v0 = vadd.f32 1.0, %v5691_v26 }
 0x90f   :  { %v4715_v47 = vpack.c.bf16 %v4065_v10, %v4064_v38  ;;  %4241 = vst [vmem:[%s7378_s7 + $0x8] sm:$0xff] %v4065_v10  ;;  %v4186_v27 = vadd.f32 1.0, %v5693_v11  ;;  %v5695_v32 = vpop.eup %5694 }
 0x910   :  { %5704 = vrcp.f32 %v4174_v0  ;;  %v4175_v48 = vadd.f32 1.0, %v5695_v32  ;;  %v5697_v43 = vpop.eup %5696 }
 0x911   :  { %4735 = vst [vmem:[%s7376_s5 + $0x38] sm:$0xff] %v4715_v47   ;;  %5706 = vrcp.f32 %v4186_v27  ;;  %v4187_v55 = vadd.f32 1.0, %v5697_v43  ;;  %v5699_v49 = vpop.eup %5698 }
 0x912   :  { %5708 = vpow2.f32 %v4599_v20  ;;  %v5701_v50 = vpop.eup %5700 }
 0x913   :  { %5710 = vrcp.f32 %v4175_v48  ;;  %v5703_v46 = vpop.eup %5702  ;;  %v4200_v28 = vadd.f32 1.0, %v5701_v50 }
 0x914   :  { %5712 = vrcp.f32 %v4187_v55 }
 0x915   :  { %5714 = vrcp.f32 %v4200_v28 }
 0x91a   :  { %v5705_v15 = vpop.eup %5704 }
 0x91b   :  { %v5707_v34 = vpop.eup %5706  ;;  %v4208_v31 = vmul.f32 %v5705_v15, %v5699_v49 }
 0x91c   :  { %v5709_v51 = vpop.eup %5708  ;;  %v4206_v44 = vmul.f32 %v5707_v34, %v7293_v17 }
 0x91d   :  { %v5711_v41 = vpop.eup %5710  ;;  %v4201_v9 = vadd.f32 1.0, %v5709_v51 }
 0x91e   :  { %v4210_v8 = vadd.f32 %v4208_v31, %v4206_v44  ;;  %v4209_v13 = vmul.f32 %v5711_v41, %v5703_v46  ;;  %v5713_v42 = vpop.eup %5712 }
 0x91f   :  { %v4207_v16 = vmul.f32 %v5713_v42, %v7301_v37  ;;  %v5715_v17 = vpop.eup %5714 }
 0x920   :  { %5716 = vtanh.f32 %v4210_v8  ;;  %4608 = vst [vmem:[%s7379_s8 + $0x10] sm:$0xff] %v4210_v8 }
 0x921   :  { %v4211_v39 = vadd.f32 %v4209_v13, %v4207_v16  ;;  %5718 = vrcp.f32 %v4201_v9 }
 0x923   :  { %5720 = vtanh.f32 %v4211_v39  ;;  %4609 = vst [vmem:[%s7379_s8 + $0x18] sm:$0xff] %v4211_v39 }
 0x92a   :  { %v5717_v33 = vpop.eup %5716 }
 0x92b   :  { %v4214_v25 = vmul.f32 %v5717_v33, %v5715_v17  ;;  %v5719_v18 = vpop.eup %5718 }
 0x92d   :  { %4606 = vst [vmem:[%s7378_s7 + $0x10] sm:$0xff] %v4214_v25  ;;  %v5721_v35 = vpop.eup %5720 }
 0x92e   :  { %v4215_v56 = vmul.f32 %v5721_v35, %v5719_v18 }
 0x930   :  { %v4720_v29 = vpack.c.bf16 %v4215_v56, %v4214_v25  ;;  %4607 = vst [vmem:[%s7378_s7 + $0x18] sm:$0xff] %v4215_v56 }
 0x932   :  { %4721 = vst [vmem:[%s7377_s6] sm:$0xff] %v4720_v29  }
 0x933   :  { %4290 = vsyncpa [#allocation6], 1 }
 0x934   :  { %4291 = vsyncpa [#allocation8], 1 }

// kernel: encoder_forward.3
= control target key start
LH: loop header
LB: loop body
LE: loop exit
PB: predicated region body
PF: predicated region fallthrough
CT: control target
= control target key end

     0   :  { %s8712_s2 = inlined_call_operand.vmem [shape: bf16[2,256,512], index: 2, kind: input, shape index: {}]   ;;  %s8713_s0 = inlined_call_operand.vmem [shape: bf16[8,16,256], index: 0, kind: input, shape index: {}, may-alias: {0,1}]   ;;  %s8714_s1 = inlined_call_operand.vmem [shape: bf16[8,16,256], index: 1, kind: input, shape index: {}, may-alias: {0,1}]   ;;  %s8715_s3 = inlined_call_operand.vmem [shape: bf16[2,128,512], index: 3, kind: input, shape index: {}]   ;;  %s8716_s4 = inlined_call_operand.vmem [shape: f32[2,1,512], index: 4, kind: input, shape index: {}]   ;;  %s8717_s5 = inlined_call_operand.vmem [shape: f32[8,16,128], index: 5, kind: output, shape index: {0}]   ;;  %s8718_s6 = inlined_call_operand.vmem [shape: f32[8,16,128], index: 6, kind: output, shape index: {1}]   ;;  %s8719_s8 = inlined_call_operand.vmem [shape: f32[2,16,128], index: 8, kind: output, shape index: {3}]   ;;  %s8720_s7 = inlined_call_operand.vmem [shape: f32[2,16,128], index: 7, kind: output, shape index: {2}]  }
   0x1   :  { %v5305_v0 = vld [vmem:[%s8712_s2 + $0x4] ss:$16 sps:$4 sm:$0xff]   ;;  %v5307_v1 = vld [vmem:[%s8712_s2 + $0xc] ss:$16 sps:$4 sm:$0xff]   ;;  %v5309_v2 = vld [vmem:[%s8712_s2] ss:$16 sps:$4 sm:$0xff]  }
   0x2   :  { %671 = vmatprep.subr.bf16.mxu0 %v5305_v0  ;;  %v5310_v3 = vld [vmem:[%s8712_s2 + $0x8] ss:$16 sps:$4 sm:$0xff]   ;;  %784 = vmatprep.subr.bf16.mxu1 %v5307_v1  ;;  %v5311_v4 = vld [vmem:[%s8712_s2 + $0x24] ss:$16 sps:$4 sm:$0xff]   ;;  %v5313_v5 = vld [vmem:[%s8712_s2 + $0x2c] ss:$16 sps:$4 sm:$0xff]  }
   0x3   :  { %672 = vmatpush1.bf16.msra.mxu0 %v5309_v2  ;;  %785 = vmatpush1.bf16.msra.mxu1 %v5310_v3  ;;  %v5315_v6 = vld [vmem:[%s8712_s2 + $0x20] ss:$16 sps:$4 sm:$0xff]   ;;  %v5316_v7 = vld [vmem:[%s8712_s2 + $0x28] ss:$16 sps:$4 sm:$0xff]   ;;  %v5317_v8 = vld [vmem:[%s8712_s2 + $0x44] ss:$16 sps:$4 sm:$0xff]  }
   0x4   :  { %673 = vmatprep.subr.bf16.mxu0 %v5311_v4  ;;  %786 = vmatprep.subr.bf16.mxu1 %v5313_v5  ;;  %v5319_v9 = vld [vmem:[%s8712_s2 + $0x4c] ss:$16 sps:$4 sm:$0xff]   ;;  %v5321_v10 = vld [vmem:[%s8712_s2 + $0x40] ss:$16 sps:$4 sm:$0xff]   ;;  %v5322_v11 = vld [vmem:[%s8712_s2 + $0x48] ss:$16 sps:$4 sm:$0xff]  }
   0x5   :  { %v5323_v12 = vld [vmem:[%s8712_s2 + $0x64] ss:$16 sps:$4 sm:$0xff]   ;;  %v5325_v13 = vld [vmem:[%s8712_s2 + $0x6c] ss:$16 sps:$4 sm:$0xff]   ;;  %v5327_v14 = vld [vmem:[%s8712_s2 + $0x60] ss:$16 sps:$4 sm:$0xff]  }
   0x6   :  { %v5328_v15 = vld [vmem:[%s8712_s2 + $0x68] ss:$16 sps:$4 sm:$0xff]   ;;  %v5329_v16 = vld [vmem:[%s8712_s2 + $0x84] ss:$16 sps:$4 sm:$0xff]   ;;  %v5331_v17 = vld [vmem:[%s8712_s2 + $0x8c] ss:$16 sps:$4 sm:$0xff]  }
   0x7   :  { %674 = vmatpush1.bf16.msra.mxu0 %v5315_v6  ;;  %787 = vmatpush1.bf16.msra.mxu1 %v5316_v7  ;;  %v5333_v18 = vld [vmem:[%s8712_s2 + $0x80] ss:$16 sps:$4 sm:$0xff]   ;;  %v5334_v19 = vld [vmem:[%s8712_s2 + $0x88] ss:$16 sps:$4 sm:$0xff]   ;;  %v5335_v20 = vld [vmem:[%s8712_s2 + $0xa4] ss:$16 sps:$4 sm:$0xff]  }
   0x8   :  { %675 = vmatprep.subr.bf16.mxu0 %v5317_v8  ;;  %788 = vmatprep.subr.bf16.mxu1 %v5319_v9  ;;  %v5337_v21 = vld [vmem:[%s8712_s2 + $0xac] ss:$16 sps:$4 sm:$0xff]   ;;  %v5339_v22 = vld [vmem:[%s8712_s2 + $0xa0] ss:$16 sps:$4 sm:$0xff]   ;;  %v5340_v23 = vld [vmem:[%s8712_s2 + $0xa8] ss:$16 sps:$4 sm:$0xff]  }
   0x9   :  { %v5341_v24 = vld [vmem:[%s8712_s2 + $0xc4] ss:$16 sps:$4 sm:$0xff]   ;;  %v5343_v25 = vld [vmem:[%s8712_s2 + $0xcc] ss:$16 sps:$4 sm:$0xff]   ;;  %v5345_v26 = vld [vmem:[%s8712_s2 + $0xc0] ss:$16 sps:$4 sm:$0xff]  }
   0xa   :  { %v5346_v27 = vld [vmem:[%s8712_s2 + $0xc8] ss:$16 sps:$4 sm:$0xff]   ;;  %v5347_v28 = vld [vmem:[%s8712_s2 + $0xe4] ss:$16 sps:$4 sm:$0xff]   ;;  %v5349_v29 = vld [vmem:[%s8712_s2 + $0xec] ss:$16 sps:$4 sm:$0xff]  }
   0xb   :  { %676 = vmatpush1.bf16.msra.mxu0 %v5321_v10  ;;  %789 = vmatpush1.bf16.msra.mxu1 %v5322_v11  ;;  %v5351_v30 = vld [vmem:[%s8712_s2 + $0xe0] ss:$16 sps:$4 sm:$0xff]   ;;  %v5352_v31 = vld [vmem:[%s8712_s2 + $0xe8] ss:$16 sps:$4 sm:$0xff]   ;;  %v5353_v32 = vld [vmem:[%s8712_s2 + $0x104] ss:$16 sps:$4 sm:$0xff]  }
   0xc   :  { %677 = vmatprep.subr.bf16.mxu0 %v5323_v12  ;;  %790 = vmatprep.subr.bf16.mxu1 %v5325_v13  ;;  %v5355_v33 = vld [vmem:[%s8712_s2 + $0x10c] ss:$16 sps:$4 sm:$0xff]   ;;  %v5357_v34 = vld [vmem:[%s8712_s2 + $0x100] ss:$16 sps:$4 sm:$0xff]   ;;  %v5358_v35 = vld [vmem:[%s8712_s2 + $0x108] ss:$16 sps:$4 sm:$0xff]  }
   0xd   :  { %v5359_v36 = vld [vmem:[%s8712_s2 + $0x124] ss:$16 sps:$4 sm:$0xff]   ;;  %v5361_v37 = vld [vmem:[%s8712_s2 + $0x12c] ss:$16 sps:$4 sm:$0xff]   ;;  %v5363_v38 = vld [vmem:[%s8712_s2 + $0x120] ss:$16 sps:$4 sm:$0xff]  }
   0xe   :  { %v5364_v39 = vld [vmem:[%s8712_s2 + $0x128] ss:$16 sps:$4 sm:$0xff]   ;;  %v5365_v40 = vld [vmem:[%s8712_s2 + $0x144] ss:$16 sps:$4 sm:$0xff]   ;;  %v5367_v41 = vld [vmem:[%s8712_s2 + $0x14c] ss:$16 sps:$4 sm:$0xff]  }
   0xf   :  { %678 = vmatpush1.bf16.msra.mxu0 %v5327_v14  ;;  %791 = vmatpush1.bf16.msra.mxu1 %v5328_v15  ;;  %v5369_v42 = vld [vmem:[%s8712_s2 + $0x140] ss:$16 sps:$4 sm:$0xff]   ;;  %v5370_v43 = vld [vmem:[%s8712_s2 + $0x148] ss:$16 sps:$4 sm:$0xff]   ;;  %v5371_v44 = vld [vmem:[%s8712_s2 + $0x164] ss:$16 sps:$4 sm:$0xff]  }
  0x10   :  { %679 = vmatprep.subr.bf16.mxu0 %v5329_v16  ;;  %792 = vmatprep.subr.bf16.mxu1 %v5331_v17  ;;  %v5373_v45 = vld [vmem:[%s8712_s2 + $0x16c] ss:$16 sps:$4 sm:$0xff]   ;;  %v5375_v46 = vld [vmem:[%s8712_s2 + $0x160] ss:$16 sps:$4 sm:$0xff]   ;;  %v5376_v47 = vld [vmem:[%s8712_s2 + $0x168] ss:$16 sps:$4 sm:$0xff]  }
  0x11   :  { %v5403_v48 = vld [vmem:[%s8713_s0 + $0x4] ss:$8 sps:$4 sm:$0xff]   ;;  %v5381_v51 = vld [vmem:[%s8712_s2 + $0x180] ss:$16 sps:$4 sm:$0xff]   ;;  %v5382_v52 = vld [vmem:[%s8712_s2 + $0x188] ss:$16 sps:$4 sm:$0xff]  }
  0x12   :  { %v5377_v49 = vld [vmem:[%s8712_s2 + $0x184] ss:$16 sps:$4 sm:$0xff]   ;;  %v5379_v50 = vld [vmem:[%s8712_s2 + $0x18c] ss:$16 sps:$4 sm:$0xff]   ;;  %703 = vmatprep.mubr.bf16.mxu0 %v5403_v48  ;;  %816 = vmatprep.mubr.bf16.mxu1 %v5403_v48  ;;  %v5387_v55 = vld [vmem:[%s8712_s2 + $0x1a0] ss:$16 sps:$4 sm:$0xff]  }
  0x13   :  { %680 = vmatpush1.bf16.msra.mxu0 %v5333_v18  ;;  %793 = vmatpush1.bf16.msra.mxu1 %v5334_v19  ;;  %v5383_v53 = vld [vmem:[%s8712_s2 + $0x1a4] ss:$16 sps:$4 sm:$0xff]   ;;  %v5385_v54 = vld [vmem:[%s8712_s2 + $0x1ac] ss:$16 sps:$4 sm:$0xff]   ;;  %v5388_v56 = vld [vmem:[%s8712_s2 + $0x1a8] ss:$16 sps:$4 sm:$0xff]  }
  0x14   :  { %681 = vmatprep.subr.bf16.mxu0 %v5335_v20  ;;  %794 = vmatprep.subr.bf16.mxu1 %v5337_v21  ;;  %v5389_v57 = vld [vmem:[%s8712_s2 + $0x1c4] ss:$16 sps:$4 sm:$0xff]   ;;  %v5391_v58 = vld [vmem:[%s8712_s2 + $0x1cc] ss:$16 sps:$4 sm:$0xff]   ;;  %v5393_v59 = vld [vmem:[%s8712_s2 + $0x1c0] ss:$16 sps:$4 sm:$0xff]  }
  0x15   :  { %v5394_v60 = vld [vmem:[%s8712_s2 + $0x1c8] ss:$16 sps:$4 sm:$0xff]   ;;  %v5395_v61 = vld [vmem:[%s8712_s2 + $0x1e4] ss:$16 sps:$4 sm:$0xff]   ;;  %v5397_v62 = vld [vmem:[%s8712_s2 + $0x1ec] ss:$16 sps:$4 sm:$0xff]  }
  0x16   :  { %v5399_v63 = vld [vmem:[%s8712_s2 + $0x1e0] ss:$16 sps:$4 sm:$0xff]   ;;  %v5400_v0 = vld [vmem:[%s8712_s2 + $0x1e8] ss:$16 sps:$4 sm:$0xff]   ;;  %v5406_v1 = vld [vmem:[%s8712_s2 + $0x204] ss:$16 sps:$4 sm:$0xff]  }
  0x17   :  { %682 = vmatpush1.bf16.msra.mxu0 %v5339_v22  ;;  %795 = vmatpush1.bf16.msra.mxu1 %v5340_v23  ;;  %v5409_v2 = vld [vmem:[%s8712_s2 + $0x20c] ss:$16 sps:$4 sm:$0xff]   ;;  %v5401_v3 = vld [vmem:[%s8713_s0] ss:$8 sps:$4 sm:$0xff]   ;;  %v5412_v6 = vld [vmem:[%s8712_s2 + $0x224] ss:$16 sps:$4 sm:$0xff]  }
  0x18   :  { %683 = vmatprep.subr.bf16.mxu0 %v5341_v24  ;;  %796 = vmatprep.subr.bf16.mxu1 %v5343_v25  ;;  %v5404_v4 = vld [vmem:[%s8712_s2 + $0x200] ss:$16 sps:$4 sm:$0xff]   ;;  %v5407_v5 = vld [vmem:[%s8712_s2 + $0x208] ss:$16 sps:$4 sm:$0xff]   ;;  %v5415_v7 = vld [vmem:[%s8712_s2 + $0x22c] ss:$16 sps:$4 sm:$0xff]  }
  0x19   :  { %v5416_v8 = vld [vmem:[%s8713_s0 + $0x14] ss:$8 sps:$4 sm:$0xff]   ;;  %v5410_v9 = vld [vmem:[%s8712_s2 + $0x220] ss:$16 sps:$4 sm:$0xff]   ;;  %v5413_v10 = vld [vmem:[%s8712_s2 + $0x228] ss:$16 sps:$4 sm:$0xff]  }
  0x1a   :  { %v5421_v11 = vld [vmem:[%s8712_s2 + $0x244] ss:$16 sps:$4 sm:$0xff]   ;;  %v5424_v12 = vld [vmem:[%s8712_s2 + $0x24c] ss:$16 sps:$4 sm:$0xff]   ;;  %v5418_v13 = vld [vmem:[%s8713_s0 + $0x10] ss:$8 sps:$4 sm:$0xff]  }
  0x1b   :  { %684 = vmatpush1.bf16.msra.mxu0 %v5345_v26  ;;  %797 = vmatpush1.bf16.msra.mxu1 %v5346_v27  ;;  %v5419_v14 = vld [vmem:[%s8712_s2 + $0x240] ss:$16 sps:$4 sm:$0xff]   ;;  %v5422_v15 = vld [vmem:[%s8712_s2 + $0x248] ss:$16 sps:$4 sm:$0xff]   ;;  %v5427_v16 = vld [vmem:[%s8712_s2 + $0x264] ss:$16 sps:$4 sm:$0xff]  }
  0x1c   :  { %685 = vmatprep.subr.bf16.mxu0 %v5347_v28  ;;  %798 = vmatprep.subr.bf16.mxu1 %v5349_v29  ;;  %v5430_v17 = vld [vmem:[%s8712_s2 + $0x26c] ss:$16 sps:$4 sm:$0xff]   ;;  %v5425_v19 = vld [vmem:[%s8712_s2 + $0x260] ss:$16 sps:$4 sm:$0xff]   ;;  %v5428_v20 = vld [vmem:[%s8712_s2 + $0x268] ss:$16 sps:$4 sm:$0xff]  }
  0x1d   :  { %v5431_v18 = vld [vmem:[%s8713_s0 + $0x24] ss:$8 sps:$4 sm:$0xff]   ;;  %v5433_v23 = vld [vmem:[%s8713_s0 + $0x20] ss:$8 sps:$4 sm:$0xff]   ;;  %v5446_v28 = vld [vmem:[%s8713_s0 + $0x34] ss:$8 sps:$4 sm:$0xff]  }
  0x1e   :  { %v5436_v21 = vld [vmem:[%s8712_s2 + $0x284] ss:$16 sps:$4 sm:$0xff]   ;;  %v5439_v22 = vld [vmem:[%s8712_s2 + $0x28c] ss:$16 sps:$4 sm:$0xff]   ;;  %v5434_v24 = vld [vmem:[%s8712_s2 + $0x280] ss:$16 sps:$4 sm:$0xff]  }
  0x1f   :  { %686 = vmatpush1.bf16.msra.mxu0 %v5351_v30  ;;  %799 = vmatpush1.bf16.msra.mxu1 %v5352_v31  ;;  %v5437_v25 = vld [vmem:[%s8712_s2 + $0x288] ss:$16 sps:$4 sm:$0xff]   ;;  %v5442_v26 = vld [vmem:[%s8712_s2 + $0x2a4] ss:$16 sps:$4 sm:$0xff]   ;;  %v5445_v27 = vld [vmem:[%s8712_s2 + $0x2ac] ss:$16 sps:$4 sm:$0xff]  }
  0x20   :  { %687 = vmatprep.subr.bf16.mxu0 %v5353_v32  ;;  %800 = vmatprep.subr.bf16.mxu1 %v5355_v33  ;;  %v5440_v29 = vld [vmem:[%s8712_s2 + $0x2a0] ss:$16 sps:$4 sm:$0xff]   ;;  %v5443_v30 = vld [vmem:[%s8712_s2 + $0x2a8] ss:$16 sps:$4 sm:$0xff]   ;;  %v5451_v31 = vld [vmem:[%s8712_s2 + $0x2c4] ss:$16 sps:$4 sm:$0xff]  }
  0x21   :  { %v5454_v32 = vld [vmem:[%s8712_s2 + $0x2cc] ss:$16 sps:$4 sm:$0xff]   ;;  %v5448_v33 = vld [vmem:[%s8713_s0 + $0x30] ss:$8 sps:$4 sm:$0xff]  }
  0x22   :  { %v5476_v48 = vld [vmem:[%s8713_s0 + $0x54] ss:$8 sps:$4 sm:$0xff]  }
  0x23   :  { %688 = vmatpush1.bf16.msra.mxu0 %v5357_v34  ;;  %801 = vmatpush1.bf16.msra.mxu1 %v5358_v35  ;;  %v5449_v34 = vld [vmem:[%s8712_s2 + $0x2c0] ss:$16 sps:$4 sm:$0xff]   ;;  %v5452_v35 = vld [vmem:[%s8712_s2 + $0x2c8] ss:$16 sps:$4 sm:$0xff]  }
  0x24   :  { %689 = vmatprep.subr.bf16.mxu0 %v5359_v36  ;;  %802 = vmatprep.subr.bf16.mxu1 %v5361_v37  ;;  %v5457_v36 = vld [vmem:[%s8712_s2 + $0x2e4] ss:$16 sps:$4 sm:$0xff]   ;;  %v5460_v37 = vld [vmem:[%s8712_s2 + $0x2ec] ss:$16 sps:$4 sm:$0xff]  }
  0x27   :  { %690 = vmatpush1.bf16.msra.mxu0 %v5363_v38  ;;  %803 = vmatpush1.bf16.msra.mxu1 %v5364_v39  ;;  %v5461_v38 = vld [vmem:[%s8713_s0 + $0x44] ss:$8 sps:$4 sm:$0xff]   ;;  %v5455_v39 = vld [vmem:[%s8712_s2 + $0x2e0] ss:$16 sps:$4 sm:$0xff]  }
  0x28   :  { %691 = vmatprep.subr.bf16.mxu0 %v5365_v40  ;;  %804 = vmatprep.subr.bf16.mxu1 %v5367_v41  ;;  %v5458_v40 = vld [vmem:[%s8712_s2 + $0x2e8] ss:$16 sps:$4 sm:$0xff]   ;;  %v5466_v41 = vld [vmem:[%s8712_s2 + $0x304] ss:$16 sps:$4 sm:$0xff]  }
  0x2b   :  { %692 = vmatpush1.bf16.msra.mxu0 %v5369_v42  ;;  %805 = vmatpush1.bf16.msra.mxu1 %v5370_v43  ;;  %v5469_v42 = vld [vmem:[%s8712_s2 + $0x30c] ss:$16 sps:$4 sm:$0xff]   ;;  %v5463_v43 = vld [vmem:[%s8713_s0 + $0x40] ss:$8 sps:$4 sm:$0xff]  }
  0x2c   :  { %693 = vmatprep.subr.bf16.mxu0 %v5371_v44  ;;  %806 = vmatprep.subr.bf16.mxu1 %v5373_v45  ;;  %v5464_v44 = vld [vmem:[%s8712_s2 + $0x300] ss:$16 sps:$4 sm:$0xff]   ;;  %v5467_v45 = vld [vmem:[%s8712_s2 + $0x308] ss:$16 sps:$4 sm:$0xff]  }
  0x2f   :  { %694 = vmatpush1.bf16.msra.mxu0 %v5375_v46  ;;  %807 = vmatpush1.bf16.msra.mxu1 %v5376_v47  ;;  %v5472_v46 = vld [vmem:[%s8712_s2 + $0x324] ss:$16 sps:$4 sm:$0xff]   ;;  %v5475_v47 = vld [vmem:[%s8712_s2 + $0x32c] ss:$16 sps:$4 sm:$0xff]  }
  0x30   :  { %695 = vmatprep.subr.bf16.mxu0 %v5377_v49  ;;  %808 = vmatprep.subr.bf16.mxu1 %v5379_v50  ;;  %v5470_v49 = vld [vmem:[%s8712_s2 + $0x320] ss:$16 sps:$4 sm:$0xff]   ;;  %v5473_v50 = vld [vmem:[%s8712_s2 + $0x328] ss:$16 sps:$4 sm:$0xff]  }
  0x33   :  { %696 = vmatpush1.bf16.msra.mxu0 %v5381_v51  ;;  %809 = vmatpush1.bf16.msra.mxu1 %v5382_v52  ;;  %v5481_v51 = vld [vmem:[%s8712_s2 + $0x344] ss:$16 sps:$4 sm:$0xff]   ;;  %v5484_v52 = vld [vmem:[%s8712_s2 + $0x34c] ss:$16 sps:$4 sm:$0xff]  }
  0x34   :  { %697 = vmatprep.subr.bf16.mxu0 %v5383_v53  ;;  %810 = vmatprep.subr.bf16.mxu1 %v5385_v54  ;;  %v5478_v53 = vld [vmem:[%s8713_s0 + $0x50] ss:$8 sps:$4 sm:$0xff]  }
  0x35   :  { %v5479_v54 = vld [vmem:[%s8712_s2 + $0x340] ss:$16 sps:$4 sm:$0xff]  }
  0x37   :  { %698 = vmatpush1.bf16.msra.mxu0 %v5387_v55  ;;  %811 = vmatpush1.bf16.msra.mxu1 %v5388_v56  ;;  %v5482_v55 = vld [vmem:[%s8712_s2 + $0x348] ss:$16 sps:$4 sm:$0xff]   ;;  %v5487_v56 = vld [vmem:[%s8712_s2 + $0x364] ss:$16 sps:$4 sm:$0xff]  }
  0x38   :  { %699 = vmatprep.subr.bf16.mxu0 %v5389_v57  ;;  %812 = vmatprep.subr.bf16.mxu1 %v5391_v58  ;;  %v5490_v57 = vld [vmem:[%s8712_s2 + $0x36c] ss:$16 sps:$4 sm:$0xff]  }
  0x39   :  { %v5491_v58 = vld [vmem:[%s8713_s0 + $0x64] ss:$8 sps:$4 sm:$0xff]  }
  0x3b   :  { %700 = vmatpush1.bf16.msra.mxu0 %v5393_v59  ;;  %813 = vmatpush1.bf16.msra.mxu1 %v5394_v60  ;;  %v5485_v59 = vld [vmem:[%s8712_s2 + $0x360] ss:$16 sps:$4 sm:$0xff]   ;;  %v5488_v60 = vld [vmem:[%s8712_s2 + $0x368] ss:$16 sps:$4 sm:$0xff]  }
  0x3c   :  { %701 = vmatprep.subr.bf16.mxu0 %v5395_v61  ;;  %814 = vmatprep.subr.bf16.mxu1 %v5397_v62  ;;  %v5496_v61 = vld [vmem:[%s8712_s2 + $0x384] ss:$16 sps:$4 sm:$0xff]   ;;  %v5499_v62 = vld [vmem:[%s8712_s2 + $0x38c] ss:$16 sps:$4 sm:$0xff]  }
  0x3f   :  { %702 = vmatpush1.bf16.msra.mxu0 %v5399_v63  ;;  %815 = vmatpush1.bf16.msra.mxu1 %v5400_v0  ;;  %v5493_v63 = vld [vmem:[%s8713_s0 + $0x60] ss:$8 sps:$4 sm:$0xff]  }
  0x40   :  { %1382 = vmatprep.subr.bf16.mxu0 %v5406_v1  ;;  %1495 = vmatprep.subr.bf16.mxu1 %v5409_v2  ;;  %v5494_v0 = vld [vmem:[%s8712_s2 + $0x380] ss:$16 sps:$4 sm:$0xff]   ;;  %v5497_v1 = vld [vmem:[%s8712_s2 + $0x388] ss:$16 sps:$4 sm:$0xff]   ;;  %v5502_v2 = vld [vmem:[%s8712_s2 + $0x3a4] ss:$16 sps:$4 sm:$0xff]  }
  0x42   :  { %704 = vmatmul.mubr.bf16.vlgmr.msra.gmra.mrb[0].mxu0 %v5401_v3  ;;  %817 = vmatmul.mubr.bf16.vlgmr.msra.gmra.mrb[0].mxu1 %v5401_v3  ;;  %v5505_v3 = vld [vmem:[%s8712_s2 + $0x3ac] ss:$16 sps:$4 sm:$0xff]  }
  0x43   :  { %1383 = vmatpush1.bf16.msra.mxu0 %v5404_v4  ;;  %1496 = vmatpush1.bf16.msra.mxu1 %v5407_v5  ;;  %v5506_v4 = vld [vmem:[%s8713_s0 + $0x74] ss:$8 sps:$4 sm:$0xff]   ;;  %v5500_v5 = vld [vmem:[%s8712_s2 + $0x3a0] ss:$16 sps:$4 sm:$0xff]  }
  0x44   :  { %1384 = vmatprep.subr.bf16.mxu0 %v5412_v6  ;;  %1497 = vmatprep.subr.bf16.mxu1 %v5415_v7  ;;  %v5503_v6 = vld [vmem:[%s8712_s2 + $0x3a8] ss:$16 sps:$4 sm:$0xff]   ;;  %v5511_v7 = vld [vmem:[%s8712_s2 + $0x3c4] ss:$16 sps:$4 sm:$0xff]  }
  0x45   :  { %713 = vmatprep.mubr.bf16.mxu0 %v5416_v8  ;;  %826 = vmatprep.mubr.bf16.mxu1 %v5416_v8  ;;  %v5514_v8 = vld [vmem:[%s8712_s2 + $0x3cc] ss:$16 sps:$4 sm:$0xff]  }
  0x47   :  { %1385 = vmatpush1.bf16.msra.mxu0 %v5410_v9  ;;  %1498 = vmatpush1.bf16.msra.mxu1 %v5413_v10  ;;  %v5508_v9 = vld [vmem:[%s8713_s0 + $0x70] ss:$8 sps:$4 sm:$0xff]  }
  0x48   :  { %1386 = vmatprep.subr.bf16.mxu0 %v5421_v11  ;;  %1499 = vmatprep.subr.bf16.mxu1 %v5424_v12  ;;  %v5509_v10 = vld [vmem:[%s8712_s2 + $0x3c0] ss:$16 sps:$4 sm:$0xff]   ;;  %v5512_v11 = vld [vmem:[%s8712_s2 + $0x3c8] ss:$16 sps:$4 sm:$0xff]   ;;  %v5517_v12 = vld [vmem:[%s8712_s2 + $0x3e4] ss:$16 sps:$4 sm:$0xff]  }
  0x4a   :  { %714 = vmatmul.mubr.bf16.gmra.mrb[4].mxu0 %v5418_v13  ;;  %827 = vmatmul.mubr.bf16.gmra.mrb[4].mxu1 %v5418_v13  ;;  %v5520_v13 = vld [vmem:[%s8712_s2 + $0x3ec] ss:$16 sps:$4 sm:$0xff]  }
  0x4b   :  { %1387 = vmatpush1.bf16.msra.mxu0 %v5419_v14  ;;  %1500 = vmatpush1.bf16.msra.mxu1 %v5422_v15  ;;  %v5523_v14 = vld [vmem:[%s8714_s1 + $0x4] ss:$8 sps:$4 sm:$0xff]   ;;  %v5515_v15 = vld [vmem:[%s8712_s2 + $0x3e0] ss:$16 sps:$4 sm:$0xff]  }
  0x4c   :  { %1388 = vmatprep.subr.bf16.mxu0 %v5427_v16  ;;  %1501 = vmatprep.subr.bf16.mxu1 %v5430_v17  ;;  %v5518_v16 = vld [vmem:[%s8712_s2 + $0x3e8] ss:$16 sps:$4 sm:$0xff]   ;;  %v6766_v17 = vld [vmem:[%s8715_s3 + $0x4] ss:$16 sps:$4 sm:$0xff]  }
  0x4d   :  { %723 = vmatprep.mubr.bf16.mxu0 %v5431_v18  ;;  %836 = vmatprep.mubr.bf16.mxu1 %v5431_v18  ;;  %v6771_v18 = vld [vmem:[%s8715_s3 + $0xc] ss:$16 sps:$4 sm:$0xff]  }
  0x4f   :  { %1389 = vmatpush1.bf16.msra.mxu0 %v5425_v19  ;;  %1502 = vmatpush1.bf16.msra.mxu1 %v5428_v20  ;;  %v5521_v19 = vld [vmem:[%s8714_s1] ss:$8 sps:$4 sm:$0xff]  }
  0x50   :  { %1390 = vmatprep.subr.bf16.mxu0 %v5436_v21  ;;  %1503 = vmatprep.subr.bf16.mxu1 %v5439_v22  ;;  %v6779_v20 = vld [vmem:[%s8715_s3] ss:$16 sps:$4 sm:$0xff]   ;;  %v5527_v21 = vld [vmem:[%s8714_s1 + $0x14] ss:$8 sps:$4 sm:$0xff]  }
  0x51   :  { %v6788_v22 = vld [vmem:[%s8715_s3 + $0x24] ss:$16 sps:$4 sm:$0xff]  }
  0x52   :  { %724 = vmatmul.mubr.bf16.gmra.mrb[8].mxu0 %v5433_v23  ;;  %837 = vmatmul.mubr.bf16.gmra.mrb[8].mxu1 %v5433_v23  ;;  %v6794_v23 = vld [vmem:[%s8715_s3 + $0x8] ss:$16 sps:$4 sm:$0xff]  }
  0x53   :  { %1391 = vmatpush1.bf16.msra.mxu0 %v5434_v24  ;;  %1504 = vmatpush1.bf16.msra.mxu1 %v5437_v25  ;;  %v6799_v24 = vld [vmem:[%s8715_s3 + $0x2c] ss:$16 sps:$4 sm:$0xff]   ;;  %v6805_v25 = vld [vmem:[%s8715_s3 + $0x20] ss:$16 sps:$4 sm:$0xff]  }
  0x54   :  { %1392 = vmatprep.subr.bf16.mxu0 %v5442_v26  ;;  %1505 = vmatprep.subr.bf16.mxu1 %v5445_v27  ;;  %v6811_v26 = vld [vmem:[%s8715_s3 + $0x44] ss:$16 sps:$4 sm:$0xff]   ;;  %v6817_v27 = vld [vmem:[%s8715_s3 + $0x28] ss:$16 sps:$4 sm:$0xff]  }
  0x55   :  { %733 = vmatprep.mubr.bf16.mxu0 %v5446_v28  ;;  %846 = vmatprep.mubr.bf16.mxu1 %v5446_v28  ;;  %v5529_v28 = vld [vmem:[%s8714_s1 + $0x10] ss:$8 sps:$4 sm:$0xff]  }
  0x57   :  { %1393 = vmatpush1.bf16.msra.mxu0 %v5440_v29  ;;  %1506 = vmatpush1.bf16.msra.mxu1 %v5443_v30  ;;  %v5533_v29 = vld [vmem:[%s8714_s1 + $0x24] ss:$8 sps:$4 sm:$0xff]   ;;  %v6830_v30 = vld [vmem:[%s8715_s3 + $0x40] ss:$16 sps:$4 sm:$0xff]  }
  0x58   :  { %1394 = vmatprep.subr.bf16.mxu0 %v5451_v31  ;;  %1507 = vmatprep.subr.bf16.mxu1 %v5454_v32  ;;  %8834 = vst [vmem:[#allocation5_spill] sm:$0xff] %v6830_v30  ;;  %v6836_v31 = vld [vmem:[%s8715_s3 + $0x4c] ss:$16 sps:$4 sm:$0xff]   ;;  %v6841_v32 = vld [vmem:[%s8715_s3 + $0x64] ss:$16 sps:$4 sm:$0xff]  }
  0x59   :  { %8835 = vst [vmem:[#allocation6_spill] sm:$0xff] %v6841_v32 }
  0x5a   :  { %734 = vmatmul.mubr.bf16.gmra.mrb[12].mxu0 %v5448_v33  ;;  %847 = vmatmul.mubr.bf16.gmra.mrb[12].mxu1 %v5448_v33  ;;  %v6847_v33 = vld [vmem:[%s8715_s3 + $0x48] ss:$16 sps:$4 sm:$0xff]  }
  0x5b   :  { %1395 = vmatpush1.bf16.msra.mxu0 %v5449_v34  ;;  %1508 = vmatpush1.bf16.msra.mxu1 %v5452_v35  ;;  %8836 = vst [vmem:[#allocation7_spill] sm:$0xff] %v6847_v33  ;;  %v6852_v34 = vld [vmem:[%s8715_s3 + $0x6c] ss:$16 sps:$4 sm:$0xff]   ;;  %v6857_v35 = vld [vmem:[%s8715_s3 + $0x60] ss:$16 sps:$4 sm:$0xff]  }
  0x5c   :  { %1396 = vmatprep.subr.bf16.mxu0 %v5457_v36  ;;  %1509 = vmatprep.subr.bf16.mxu1 %v5460_v37  ;;  %8837 = vst [vmem:[#allocation8_spill] sm:$0xff] %v6852_v34  ;;  %8838 = vst [vmem:[#allocation9_spill] sm:$0xff] %v6857_v35  ;;  %v6864_v36 = vld [vmem:[%s8715_s3 + $0x84] ss:$16 sps:$4 sm:$0xff]   ;;  %v6871_v37 = vld [vmem:[%s8715_s3 + $0x68] ss:$16 sps:$4 sm:$0xff]  }
  0x5d   :  { %743 = vmatprep.mubr.bf16.mxu0 %v5461_v38  ;;  %856 = vmatprep.mubr.bf16.mxu1 %v5461_v38  ;;  %8839 = vst [vmem:[#allocation10_spill] sm:$0xff] %v6864_v36  ;;  %8840 = vst [vmem:[#allocation11_spill] sm:$0xff] %v6871_v37  ;;  %v5537_v38 = vld [vmem:[%s8714_s1 + $0x20] ss:$8 sps:$4 sm:$0xff]  }
  0x5f   :  { %1397 = vmatpush1.bf16.msra.mxu0 %v5455_v39  ;;  %1510 = vmatpush1.bf16.msra.mxu1 %v5458_v40  ;;  %v5542_v39 = vld [vmem:[%s8714_s1 + $0x34] ss:$8 sps:$4 sm:$0xff]   ;;  %v6883_v40 = vld [vmem:[%s8715_s3 + $0x80] ss:$16 sps:$4 sm:$0xff]  }
  0x60   :  { %1398 = vmatprep.subr.bf16.mxu0 %v5466_v41  ;;  %1511 = vmatprep.subr.bf16.mxu1 %v5469_v42  ;;  %8841 = vst [vmem:[#allocation12_spill] sm:$0xff] %v6883_v40  ;;  %v6889_v41 = vld [vmem:[%s8715_s3 + $0x8c] ss:$16 sps:$4 sm:$0xff]   ;;  %v6895_v42 = vld [vmem:[%s8715_s3 + $0xa4] ss:$16 sps:$4 sm:$0xff]  }
  0x61   :  { %8842 = vst [vmem:[#allocation13_spill] sm:$0xff] %v6889_v41  ;;  %8843 = vst [vmem:[#allocation14_spill] sm:$0xff] %v6895_v42 }
  0x62   :  { %744 = vmatmul.mubr.bf16.gmra.mrb[16].mxu0 %v5463_v43  ;;  %857 = vmatmul.mubr.bf16.gmra.mrb[16].mxu1 %v5463_v43  ;;  %v6901_v43 = vld [vmem:[%s8715_s3 + $0x88] ss:$16 sps:$4 sm:$0xff]  }
  0x63   :  { %1399 = vmatpush1.bf16.msra.mxu0 %v5464_v44  ;;  %1512 = vmatpush1.bf16.msra.mxu1 %v5467_v45  ;;  %8844 = vst [vmem:[#allocation15_spill] sm:$0xff] %v6901_v43  ;;  %v6906_v44 = vld [vmem:[%s8715_s3 + $0xac] ss:$16 sps:$4 sm:$0xff]   ;;  %v6912_v45 = vld [vmem:[%s8715_s3 + $0xa0] ss:$16 sps:$4 sm:$0xff]  }
  0x64   :  { %1400 = vmatprep.subr.bf16.mxu0 %v5472_v46  ;;  %1513 = vmatprep.subr.bf16.mxu1 %v5475_v47  ;;  %8845 = vst [vmem:[#allocation16_spill] sm:$0xff] %v6906_v44  ;;  %8846 = vst [vmem:[#allocation17_spill] sm:$0xff] %v6912_v45  ;;  %v6919_v46 = vld [vmem:[%s8715_s3 + $0xc4] ss:$16 sps:$4 sm:$0xff]   ;;  %v6925_v47 = vld [vmem:[%s8715_s3 + $0xa8] ss:$16 sps:$4 sm:$0xff]  }
  0x65   :  { %753 = vmatprep.mubr.bf16.mxu0 %v5476_v48  ;;  %866 = vmatprep.mubr.bf16.mxu1 %v5476_v48  ;;  %8847 = vst [vmem:[#allocation18_spill] sm:$0xff] %v6919_v46  ;;  %8848 = vst [vmem:[#allocation19_spill] sm:$0xff] %v6925_v47  ;;  %v5546_v48 = vld [vmem:[%s8714_s1 + $0x30] ss:$8 sps:$4 sm:$0xff]  }
  0x67   :  { %1401 = vmatpush1.bf16.msra.mxu0 %v5470_v49  ;;  %1514 = vmatpush1.bf16.msra.mxu1 %v5473_v50  ;;  %v5551_v49 = vld [vmem:[%s8714_s1 + $0x44] ss:$8 sps:$4 sm:$0xff]   ;;  %v6938_v50 = vld [vmem:[%s8715_s3 + $0xc0] ss:$16 sps:$4 sm:$0xff]  }
  0x68   :  { %1402 = vmatprep.subr.bf16.mxu0 %v5481_v51  ;;  %1515 = vmatprep.subr.bf16.mxu1 %v5484_v52  ;;  %8849 = vst [vmem:[#allocation20_spill] sm:$0xff] %v6938_v50  ;;  %v6943_v51 = vld [vmem:[%s8715_s3 + $0xcc] ss:$16 sps:$4 sm:$0xff]   ;;  %v6950_v52 = vld [vmem:[%s8715_s3 + $0xe4] ss:$16 sps:$4 sm:$0xff]  }
  0x69   :  { %8850 = vst [vmem:[#allocation21_spill] sm:$0xff] %v6943_v51  ;;  %8851 = vst [vmem:[#allocation22_spill] sm:$0xff] %v6950_v52 }
  0x6a   :  { %754 = vmatmul.mubr.bf16.gmra.mrb[20].mxu0 %v5478_v53  ;;  %867 = vmatmul.mubr.bf16.gmra.mrb[20].mxu1 %v5478_v53  ;;  %v6955_v53 = vld [vmem:[%s8715_s3 + $0xc8] ss:$16 sps:$4 sm:$0xff]  }
  0x6b   :  { %1403 = vmatpush1.bf16.msra.mxu0 %v5479_v54  ;;  %1516 = vmatpush1.bf16.msra.mxu1 %v5482_v55  ;;  %8852 = vst [vmem:[#allocation23_spill] sm:$0xff] %v6955_v53  ;;  %v6960_v54 = vld [vmem:[%s8715_s3 + $0xec] ss:$16 sps:$4 sm:$0xff]   ;;  %v6967_v55 = vld [vmem:[%s8715_s3 + $0xe0] ss:$16 sps:$4 sm:$0xff]  }
  0x6c   :  { %1404 = vmatprep.subr.bf16.mxu0 %v5487_v56  ;;  %1517 = vmatprep.subr.bf16.mxu1 %v5490_v57  ;;  %8853 = vst [vmem:[#allocation24_spill] sm:$0xff] %v6960_v54  ;;  %8854 = vst [vmem:[#allocation25_spill] sm:$0xff] %v6967_v55  ;;  %v6974_v56 = vld [vmem:[%s8715_s3 + $0xe8] ss:$16 sps:$4 sm:$0xff]   ;;  %v6979_v57 = vld [vmem:[%s8715_s3 + $0x104] ss:$16 sps:$4 sm:$0xff]  }
  0x6d   :  { %763 = vmatprep.mubr.bf16.mxu0 %v5491_v58  ;;  %876 = vmatprep.mubr.bf16.mxu1 %v5491_v58  ;;  %8855 = vst [vmem:[#allocation26_spill] sm:$0xff] %v6974_v56  ;;  %8856 = vst [vmem:[#allocation27_spill] sm:$0xff] %v6979_v57  ;;  %v5555_v58 = vld [vmem:[%s8714_s1 + $0x40] ss:$8 sps:$4 sm:$0xff]  }
  0x6f   :  { %1405 = vmatpush1.bf16.msra.mxu0 %v5485_v59  ;;  %1518 = vmatpush1.bf16.msra.mxu1 %v5488_v60  ;;  %v5560_v59 = vld [vmem:[%s8714_s1 + $0x54] ss:$8 sps:$4 sm:$0xff]  }
  0x70   :  { %1406 = vmatprep.subr.bf16.mxu0 %v5496_v61  ;;  %1519 = vmatprep.subr.bf16.mxu1 %v5499_v62  ;;  %v6992_v60 = vld [vmem:[%s8715_s3 + $0x10c] ss:$16 sps:$4 sm:$0xff]   ;;  %v5564_v61 = vld [vmem:[%s8714_s1 + $0x50] ss:$8 sps:$4 sm:$0xff]  }
  0x71   :  { %8857 = vst [vmem:[#allocation28_spill] sm:$0xff] %v6992_v60  ;;  %v5569_v62 = vld [vmem:[%s8714_s1 + $0x64] ss:$8 sps:$4 sm:$0xff]  }
  0x72   :  { %764 = vmatmul.mubr.bf16.gmra.mrb[24].mxu0 %v5493_v63  ;;  %877 = vmatmul.mubr.bf16.gmra.mrb[24].mxu1 %v5493_v63  ;;  %v5573_v63 = vld [vmem:[%s8714_s1 + $0x60] ss:$8 sps:$4 sm:$0xff]  }
  0x73   :  { %1407 = vmatpush1.bf16.msra.mxu0 %v5494_v0  ;;  %1520 = vmatpush1.bf16.msra.mxu1 %v5497_v1  ;;  %v5581_v0 = vld [vmem:[%s8714_s1 + $0x74] ss:$8 sps:$4 sm:$0xff]   ;;  %v5585_v1 = vld [vmem:[%s8714_s1 + $0x70] ss:$8 sps:$4 sm:$0xff]  }
  0x74   :  { %1408 = vmatprep.subr.bf16.mxu0 %v5502_v2  ;;  %1521 = vmatprep.subr.bf16.mxu1 %v5505_v3  ;;  %v8721_v2 = vmov 0   ;;  %v7017_v3 = vld [vmem:[%s8715_s3 + $0x100] ss:$16 sps:$4 sm:$0xff]  }
  0x75   :  { %773 = vmatprep.mubr.bf16.mxu0 %v5506_v4  ;;  %886 = vmatprep.mubr.bf16.mxu1 %v5506_v4  ;;  %v7022_v4 = vld [vmem:[%s8715_s3 + $0x108] ss:$16 sps:$4 sm:$0xff]  }
  0x77   :  { %1409 = vmatpush1.bf16.msra.mxu0 %v5500_v5  ;;  %1522 = vmatpush1.bf16.msra.mxu1 %v5503_v6  ;;  %v7027_v5 = vld [vmem:[%s8715_s3 + $0x124] ss:$16 sps:$4 sm:$0xff]   ;;  %v7032_v6 = vld [vmem:[%s8715_s3 + $0x12c] ss:$16 sps:$4 sm:$0xff]  }
  0x78   :  { %1410 = vmatprep.subr.bf16.mxu0 %v5511_v7  ;;  %1523 = vmatprep.subr.bf16.mxu1 %v5514_v8  ;;  %v8723_v7 = vmov 0.0|0.0   ;;  %v7041_v8 = vld [vmem:[%s8715_s3 + $0x120] ss:$16 sps:$4 sm:$0xff]  }
  0x7a   :  { %774 = vmatmul.mubr.bf16.gmra.mrb[28].mxu0 %v5508_v9  ;;  %887 = vmatmul.mubr.bf16.gmra.mrb[28].mxu1 %v5508_v9  ;;  %v7046_v9 = vld [vmem:[%s8715_s3 + $0x128] ss:$16 sps:$4 sm:$0xff]  }
  0x7b   :  { %1411 = vmatpush1.bf16.msra.mxu0 %v5509_v10  ;;  %1524 = vmatpush1.bf16.msra.mxu1 %v5512_v11  ;;  %v7053_v10 = vld [vmem:[%s8715_s3 + $0x144] ss:$16 sps:$4 sm:$0xff]   ;;  %v7058_v11 = vld [vmem:[%s8715_s3 + $0x14c] ss:$16 sps:$4 sm:$0xff]  }
  0x7c   :  { %1412 = vmatprep.subr.bf16.mxu0 %v5517_v12  ;;  %1525 = vmatprep.subr.bf16.mxu1 %v5520_v13  ;;  %v7067_v12 = vld [vmem:[%s8715_s3 + $0x140] ss:$16 sps:$4 sm:$0xff]   ;;  %v7072_v13 = vld [vmem:[%s8715_s3 + $0x148] ss:$16 sps:$4 sm:$0xff]  }
  0x7d   :  { %1414 = vmatprep.mubr.bf16.mxu0 %v5523_v14  ;;  %1527 = vmatprep.mubr.bf16.mxu1 %v5523_v14  ;;  %v7079_v14 = vld [vmem:[%s8715_s3 + $0x164] ss:$16 sps:$4 sm:$0xff]  }
  0x7f   :  { %1413 = vmatpush1.bf16.msra.mxu0 %v5515_v15  ;;  %1526 = vmatpush1.bf16.msra.mxu1 %v5518_v16  ;;  %v7084_v15 = vld [vmem:[%s8715_s3 + $0x16c] ss:$16 sps:$4 sm:$0xff]   ;;  %v7091_v16 = vld [vmem:[%s8715_s3 + $0x160] ss:$16 sps:$4 sm:$0xff]  }
  0x80   :  { %1917 = vmatprep.subr.bf16.mxu0 %v6766_v17  ;;  %1960 = vmatprep.subr.bf16.mxu1 %v6771_v18 }
  0x82   :  { %1415 = vmatmul.mubr.bf16.vlgmr.msra.gmra.mrb[32].mxu0 %v5521_v19  ;;  %1528 = vmatmul.mubr.bf16.vlgmr.msra.gmra.mrb[32].mxu1 %v5521_v19  ;;  %v7096_v19 = vld [vmem:[%s8715_s3 + $0x168] ss:$16 sps:$4 sm:$0xff]  }
  0x83   :  { %1918 = vmatpush1.bf16.msra.mxu0 %v6779_v20  ;;  %1424 = vmatprep.mubr.bf16.mxu0 %v5527_v21 }
  0x84   :  { %1537 = vmatprep.mubr.bf16.mxu1 %v5527_v21  ;;  %1919 = vmatprep.subr.bf16.mxu0 %v6788_v22  ;;  %v7103_v21 = vld [vmem:[%s8715_s3 + $0x184] ss:$16 sps:$4 sm:$0xff]  }
  0x85   :  { %1961 = vmatpush1.bf16.msra.mxu1 %v6794_v23 }
  0x86   :  { %1962 = vmatprep.subr.bf16.mxu1 %v6799_v24 }
  0x87   :  { %1920 = vmatpush1.bf16.msra.mxu0 %v6805_v25 }
  0x88   :  { %1921 = vmatprep.subr.bf16.mxu0 %v6811_v26 }
  0x89   :  { %1963 = vmatpush1.bf16.msra.mxu1 %v6817_v27 }
  0x8a   :  { %1425 = vmatmul.mubr.bf16.gmra.mrb[36].mxu0 %v5529_v28  ;;  %1538 = vmatmul.mubr.bf16.gmra.mrb[36].mxu1 %v5529_v28  ;;  %v7108_v28 = vld [vmem:[%s8715_s3 + $0x18c] ss:$16 sps:$4 sm:$0xff]  }
  0x8b   :  { %1434 = vmatprep.mubr.bf16.mxu0 %v5533_v29  ;;  %1547 = vmatprep.mubr.bf16.mxu1 %v5533_v29  ;;  %v7115_v29 = vld [vmem:[%s8715_s3 + $0x180] ss:$16 sps:$4 sm:$0xff]  }
  0x8c   :  { %1922 = vmatpush1.bf16.msra.mxu0 %v6830_v30  ;;  %1964 = vmatprep.subr.bf16.mxu1 %v6836_v31 }
  0x8d   :  { %1923 = vmatprep.subr.bf16.mxu0 %v6841_v32  ;;  %1965 = vmatpush1.bf16.msra.mxu1 %v6847_v33 }
  0x8e   :  { %1966 = vmatprep.subr.bf16.mxu1 %v6852_v34 }
  0x90   :  { %1924 = vmatpush1.bf16.msra.mxu0 %v6857_v35 }
  0x91   :  { %1925 = vmatprep.subr.bf16.mxu0 %v6864_v36  ;;  %1967 = vmatpush1.bf16.msra.mxu1 %v6871_v37 }
  0x92   :  { %1435 = vmatmul.mubr.bf16.gmra.mrb[40].mxu0 %v5537_v38  ;;  %1548 = vmatmul.mubr.bf16.gmra.mrb[40].mxu1 %v5537_v38  ;;  %v7120_v38 = vld [vmem:[%s8715_s3 + $0x188] ss:$16 sps:$4 sm:$0xff]  }
  0x93   :  { %1444 = vmatprep.mubr.bf16.mxu0 %v5542_v39  ;;  %1557 = vmatprep.mubr.bf16.mxu1 %v5542_v39  ;;  %v7127_v39 = vld [vmem:[%s8715_s3 + $0x1a4] ss:$16 sps:$4 sm:$0xff]  }
  0x94   :  { %1926 = vmatpush1.bf16.msra.mxu0 %v6883_v40  ;;  %1968 = vmatprep.subr.bf16.mxu1 %v6889_v41 }
  0x95   :  { %1927 = vmatprep.subr.bf16.mxu0 %v6895_v42  ;;  %1969 = vmatpush1.bf16.msra.mxu1 %v6901_v43 }
  0x96   :  { %1970 = vmatprep.subr.bf16.mxu1 %v6906_v44 }
  0x98   :  { %1928 = vmatpush1.bf16.msra.mxu0 %v6912_v45 }
  0x99   :  { %1929 = vmatprep.subr.bf16.mxu0 %v6919_v46  ;;  %1971 = vmatpush1.bf16.msra.mxu1 %v6925_v47 }
  0x9a   :  { %1445 = vmatmul.mubr.bf16.gmra.mrb[44].mxu0 %v5546_v48  ;;  %1558 = vmatmul.mubr.bf16.gmra.mrb[44].mxu1 %v5546_v48  ;;  %v7132_v48 = vld [vmem:[%s8715_s3 + $0x1ac] ss:$16 sps:$4 sm:$0xff]  }
  0x9b   :  { %1454 = vmatprep.mubr.bf16.mxu0 %v5551_v49  ;;  %1567 = vmatprep.mubr.bf16.mxu1 %v5551_v49  ;;  %v7139_v49 = vld [vmem:[%s8715_s3 + $0x1a0] ss:$16 sps:$4 sm:$0xff]  }
  0x9c   :  { %1930 = vmatpush1.bf16.msra.mxu0 %v6938_v50  ;;  %1972 = vmatprep.subr.bf16.mxu1 %v6943_v51 }
  0x9d   :  { %1931 = vmatprep.subr.bf16.mxu0 %v6950_v52  ;;  %1973 = vmatpush1.bf16.msra.mxu1 %v6955_v53 }
  0x9e   :  { %1974 = vmatprep.subr.bf16.mxu1 %v6960_v54 }
  0xa0   :  { %1932 = vmatpush1.bf16.msra.mxu0 %v6967_v55 }
  0xa1   :  { %1975 = vmatpush1.bf16.msra.mxu1 %v6974_v56  ;;  %2228 = vmatprep.subr.bf16.mxu0 %v6979_v57 }
  0xa2   :  { %1455 = vmatmul.mubr.bf16.gmra.mrb[48].mxu0 %v5555_v58  ;;  %1568 = vmatmul.mubr.bf16.gmra.mrb[48].mxu1 %v5555_v58  ;;  %v7144_v58 = vld [vmem:[%s8715_s3 + $0x1a8] ss:$16 sps:$4 sm:$0xff]  }
  0xa3   :  { %1464 = vmatprep.mubr.bf16.mxu0 %v5560_v59  ;;  %1577 = vmatprep.mubr.bf16.mxu1 %v5560_v59  ;;  %v7151_v59 = vld [vmem:[%s8715_s3 + $0x1c4] ss:$16 sps:$4 sm:$0xff]  }
  0xa4   :  { %2271 = vmatprep.subr.bf16.mxu1 %v6992_v60 }
  0xaa   :  { %1465 = vmatmul.mubr.bf16.gmra.mrb[52].mxu0 %v5564_v61  ;;  %1578 = vmatmul.mubr.bf16.gmra.mrb[52].mxu1 %v5564_v61  ;;  %v7156_v61 = vld [vmem:[%s8715_s3 + $0x1cc] ss:$16 sps:$4 sm:$0xff]  }
  0xab   :  { %1474 = vmatprep.mubr.bf16.mxu0 %v5569_v62  ;;  %1587 = vmatprep.mubr.bf16.mxu1 %v5569_v62  ;;  %v7163_v62 = vld [vmem:[%s8715_s3 + $0x1c0] ss:$16 sps:$4 sm:$0xff]  }
  0xb2   :  { %1475 = vmatmul.mubr.bf16.gmra.mrb[56].mxu0 %v5573_v63  ;;  %1588 = vmatmul.mubr.bf16.gmra.mrb[56].mxu1 %v5573_v63  ;;  %v7168_v63 = vld [vmem:[%s8715_s3 + $0x1c8] ss:$16 sps:$4 sm:$0xff]  }
  0xb3   :  { %1484 = vmatprep.mubr.bf16.mxu0 %v5581_v0  ;;  %1597 = vmatprep.mubr.bf16.mxu1 %v5581_v0  ;;  %8858 = vst [vmem:[#allocation29_spill] sm:$0xff] %v7168_v63  ;;  %v7175_v0 = vld [vmem:[%s8715_s3 + $0x1e4] ss:$16 sps:$4 sm:$0xff]  }
  0xba   :  { %1485 = vmatmul.mubr.bf16.gmra.mrb[60].mxu0 %v5585_v1  ;;  %1598 = vmatmul.mubr.bf16.gmra.mrb[60].mxu1 %v5585_v1  ;;  %v7180_v1 = vld [vmem:[%s8715_s3 + $0x1ec] ss:$16 sps:$4 sm:$0xff]  }
  0xbb   :  { %1949 = vmatprep.mubr.bf16.mxu0 %v8721_v2  ;;  %1992 = vmatprep.mubr.bf16.mxu1 %v8721_v2  ;;  %8859 = vst [vmem:[#allocation30_spill] sm:$0xff] %v7180_v1 }
  0xc2   :  { %1950 = vmatmul.mubr.bf16.vlgmr.msra.gmra.mrb[0].mxu0 %v8723_v7  ;;  %1993 = vmatmul.mubr.bf16.vlgmr.msra.gmra.mrb[0].mxu1 %v8723_v7  ;;  %v7192_v7 = vld [vmem:[%s8715_s3 + $0x1e8] ss:$16 sps:$4 sm:$0xff]  }
  0xc3   :  { %2229 = vmatpush1.bf16.msra.mxu0 %v7017_v3  ;;  %2272 = vmatpush1.bf16.msra.mxu1 %v7022_v4 }
  0xc4   :  { %2230 = vmatprep.subr.bf16.mxu0 %v7027_v5  ;;  %2273 = vmatprep.subr.bf16.mxu1 %v7032_v6 }
  0xc5   :  { %2260 = vmatprep.mubr.bf16.mxu0 %v8721_v2  ;;  %2303 = vmatprep.mubr.bf16.mxu1 %v8721_v2  ;;  %v7187_v2 = vld [vmem:[%s8715_s3 + $0x1e0] ss:$16 sps:$4 sm:$0xff]  }
  0xc7   :  { %2231 = vmatpush1.bf16.msra.mxu0 %v7041_v8  ;;  %2274 = vmatpush1.bf16.msra.mxu1 %v7046_v9 }
  0xc8   :  { %2232 = vmatprep.subr.bf16.mxu0 %v7053_v10  ;;  %2275 = vmatprep.subr.bf16.mxu1 %v7058_v11 }
  0xcb   :  { %2233 = vmatpush1.bf16.msra.mxu0 %v7067_v12  ;;  %2276 = vmatpush1.bf16.msra.mxu1 %v7072_v13 }
  0xcc   :  { %2234 = vmatprep.subr.bf16.mxu0 %v7079_v14  ;;  %2277 = vmatprep.subr.bf16.mxu1 %v7084_v15 }
  0xcf   :  { %2235 = vmatpush1.bf16.msra.mxu0 %v7091_v16  ;;  %2278 = vmatpush1.bf16.msra.mxu1 %v7096_v19 }
  0xd0   :  { %2236 = vmatprep.subr.bf16.mxu0 %v7103_v21  ;;  %2279 = vmatprep.subr.bf16.mxu1 %v7108_v28 }
  0xd3   :  { %2237 = vmatpush1.bf16.msra.mxu0 %v7115_v29  ;;  %2280 = vmatpush1.bf16.msra.mxu1 %v7120_v38 }
  0xd4   :  { %2238 = vmatprep.subr.bf16.mxu0 %v7127_v39  ;;  %2281 = vmatprep.subr.bf16.mxu1 %v7132_v48 }
  0xd7   :  { %2239 = vmatpush1.bf16.msra.mxu0 %v7139_v49  ;;  %2282 = vmatpush1.bf16.msra.mxu1 %v7144_v58 }
  0xd8   :  { %2240 = vmatprep.subr.bf16.mxu0 %v7151_v59  ;;  %2283 = vmatprep.subr.bf16.mxu1 %v7156_v61 }
  0xdb   :  { %2241 = vmatpush1.bf16.msra.mxu0 %v7163_v62  ;;  %2284 = vmatpush1.bf16.msra.mxu1 %v7168_v63  ;;  %v8860_v63 = vmov 0.0|0.0  }
  0xdc   :  { %2242 = vmatprep.subr.bf16.mxu0 %v7175_v0  ;;  %2285 = vmatprep.subr.bf16.mxu1 %v7180_v1  ;;  %v8861_v1 = vmov 0  }
  0xdf   :  { %2243 = vmatpush1.bf16.msra.mxu0 %v7187_v2  ;;  %2286 = vmatpush1.bf16.msra.mxu1 %v7192_v7 }
  0xe0   :  { %2384 = vmatprep.subr.bf16.mxu0 %v6766_v17  ;;  %2427 = vmatprep.subr.bf16.mxu1 %v6771_v18 }
  0xe2   :  { %2261 = vmatmul.mubr.bf16.vlgmr.msra.gmra.mrb[60].mxu0 %v8860_v63  ;;  %2304 = vmatmul.mubr.bf16.vlgmr.msra.gmra.mrb[60].mxu1 %v8860_v63  ;;  %v251_v63 = vlaneseq }
  0xe3   :  { %2385 = vmatpush1.bf16.msra.mxu0 %v6779_v20  ;;  %2428 = vmatpush1.bf16.msra.mxu1 %v6794_v23 }
  0xe4   :  { %2386 = vmatprep.subr.bf16.mxu0 %v6788_v22  ;;  %2429 = vmatprep.subr.bf16.mxu1 %v6799_v24 }
  0xe5   :  { %2416 = vmatprep.mubr.bf16.mxu0 %v8861_v1  ;;  %2459 = vmatprep.mubr.bf16.mxu1 %v8861_v1 }
  0xe7   :  { %2387 = vmatpush1.bf16.msra.mxu0 %v6805_v25  ;;  %2430 = vmatpush1.bf16.msra.mxu1 %v6817_v27 }
  0xe8   :  { %2388 = vmatprep.subr.bf16.mxu0 %v6811_v26  ;;  %2431 = vmatprep.subr.bf16.mxu1 %v6836_v31 }
  0xeb   :  { %2389 = vmatpush1.bf16.msra.mxu0 %v6830_v30  ;;  %2432 = vmatpush1.bf16.msra.mxu1 %v6847_v33 }
  0xec   :  { %2390 = vmatprep.subr.bf16.mxu0 %v6841_v32  ;;  %2433 = vmatprep.subr.bf16.mxu1 %v6852_v34 }
  0xef   :  { %2391 = vmatpush1.bf16.msra.mxu0 %v6857_v35  ;;  %2434 = vmatpush1.bf16.msra.mxu1 %v6871_v37 }
  0xf0   :  { %2392 = vmatprep.subr.bf16.mxu0 %v6864_v36  ;;  %2435 = vmatprep.subr.bf16.mxu1 %v6889_v41 }
  0xf3   :  { %2393 = vmatpush1.bf16.msra.mxu0 %v6883_v40  ;;  %2436 = vmatpush1.bf16.msra.mxu1 %v6901_v43 }
  0xf4   :  { %2394 = vmatprep.subr.bf16.mxu0 %v6895_v42  ;;  %2437 = vmatprep.subr.bf16.mxu1 %v6906_v44 }
  0xf7   :  { %2395 = vmatpush1.bf16.msra.mxu0 %v6912_v45  ;;  %2438 = vmatpush1.bf16.msra.mxu1 %v6925_v47 }
  0xf8   :  { %2396 = vmatprep.subr.bf16.mxu0 %v6919_v46  ;;  %2439 = vmatprep.subr.bf16.mxu1 %v6943_v51  ;;  %v7236_v46 = vshrl.u32 %v251_v63, 7 }
  0xfa   :  { %v253_v51 = vsub.s32 0, %v7236_v46  ;;  %v8756_v40 = vsub.s32 2, %v7236_v46 }
  0xfb   :  { %2397 = vmatpush1.bf16.msra.mxu0 %v6938_v50  ;;  %2440 = vmatpush1.bf16.msra.mxu1 %v6955_v53  ;;  %v215_v53 = vld [vmem:[%s8716_s4] sm:$0xf] }
  0xfc   :  { %2398 = vmatprep.subr.bf16.mxu0 %v6950_v52  ;;  %2441 = vmatprep.subr.bf16.mxu1 %v6960_v54  ;;  %v257_v52 = vsub.s32 1, %v7236_v46  ;;  %v7243_v54 = vrot.slane %v215_v53, %v253_v51 }
  0xfe   :  { %8862 = vst [vmem:[#allocation31_spill] sm:$0xff] %v7243_v54 }
  0xff   :  { %2399 = vmatpush1.bf16.msra.mxu0 %v6967_v55  ;;  %2442 = vmatpush1.bf16.msra.mxu1 %v6974_v56  ;;  %v7245_v55 = vrot.slane %v215_v53, %v257_v52 }
 0x100   :  { %2535 = vmatprep.subr.bf16.mxu0 %v6979_v57  ;;  %2578 = vmatprep.subr.bf16.mxu1 %v6992_v60  ;;  %v8752_v57 = vsub.s32 3, %v7236_v46 }
 0x102   :  { %v7254_v34 = vrot.slane %v215_v53, %v8752_v57 }
 0x104   :  { %8863 = vst [vmem:[#allocation32_spill] sm:$0xff] %v7254_v34 }
 0x195   :  { %v1951_v56 = vpop.f32.mrb[0].mxu0  ;;  %v1994_v50 = vpop.f32.mrb[0].mxu1 }
 0x196   :  { %v5046_v60 = vadd.f32 %v1951_v56, %v7243_v54  ;;  %v1953_v63 = vpop.f32.mrb[1].mxu0  ;;  %v1996_v47 = vpop.f32.mrb[1].mxu1 }
 0x197   :  { %v5047_v45 = vadd.f32 %v1953_v63, %v7245_v55  ;;  %v1955_v44 = vpop.f32.mrb[2].mxu0  ;;  %v1998_v42 = vpop.f32.mrb[2].mxu1  ;;  %v5079_v33 = vadd.f32 %v1996_v47, %v7254_v34 }
 0x198   :  { %v4886_v43 = vmul.f32 -1.442695, %v5046_v60  ;;  %v5048_v41 = vadd.f32 %v1955_v44, %v7243_v54  ;;  %v1957_v36 = vpop.f32.mrb[3].mxu0  ;;  %v2000_v37 = vpop.f32.mrb[3].mxu1  ;;  %v7259_v60 = vrot.slane %v215_v53, %v8756_v40 }
 0x199   :  { %v4888_v35 = vmul.f32 -1.442695, %v5047_v45  ;;  %v5049_v56 = vadd.f32 %v1957_v36, %v7245_v55  ;;  %v5081_v44 = vadd.f32 %v2000_v37, %v7254_v34  ;;  %v4890_v57 = vmul.f32 -1.442695, %v5079_v33 }
 0x19a   :  { %5641 = vpow2.f32 %v4886_v43  ;;  %v4887_v32 = vmul.f32 -1.442695, %v5048_v41  ;;  %8864 = vst [vmem:[#allocation33_spill] sm:$0xff] %v7259_v60  ;;  %v5078_v45 = vadd.f32 %v1994_v50, %v7259_v60 }
 0x19b   :  { %5643 = vpow2.f32 %v4888_v35  ;;  %v4889_v63 = vmul.f32 -1.442695, %v5049_v56  ;;  %v4891_v54 = vmul.f32 -1.442695, %v5081_v44  ;;  %v5080_v35 = vadd.f32 %v1998_v42, %v7259_v60 }
 0x19c   :  { %5645 = vpow2.f32 %v4887_v32 }
 0x19d   :  { %5647 = vpow2.f32 %v4889_v63 }
 0x19e   :  { %5649 = vtanh.f32 %v5078_v45 }
 0x19f   :  { %5651 = vpow2.f32 %v4890_v57 }
 0x1a0   :  { %5653 = vpow2.f32 %v4891_v54 }
 0x1a4   :  { %v5642_v30 = vpop.eup %5641 }
 0x1a5   :  { %v5644_v36 = vpop.eup %5643  ;;  %v2017_v41 = vadd.f32 1.0, %v5642_v30  ;;  %v4661_v30 = vld [vmem:[%s8716_s4 + $0x4] sm:$0xf] }
 0x1a6   :  { %v2029_v43 = vadd.f32 1.0, %v5644_v36  ;;  %v5646_v53 = vpop.eup %5645  ;;  %v7268_v44 = vrot.slane %v4661_v30, %v253_v51 }
 0x1a7   :  { %5655 = vrcp.f32 %v2017_v41  ;;  %v2018_v32 = vadd.f32 1.0, %v5646_v53  ;;  %v5648_v47 = vpop.eup %5647  ;;  %v7270_v41 = vrot.slane %v4661_v30, %v257_v52 }
 0x1a8   :  { %5657 = vrcp.f32 %v2029_v43  ;;  %v2030_v37 = vadd.f32 1.0, %v5648_v47  ;;  %v5650_v33 = vpop.eup %5649  ;;  %8865 = vst [vmem:[#allocation34_spill] sm:$0xff] %v7268_v44 }
 0x1a9   :  { %5659 = vtanh.f32 %v5080_v35  ;;  %v5652_v50 = vpop.eup %5651  ;;  %8866 = vst [vmem:[#allocation35_spill] sm:$0xff] %v7270_v41 }
 0x1aa   :  { %5661 = vrcp.f32 %v2018_v32  ;;  %v5654_v57 = vpop.eup %5653  ;;  %v2043_v54 = vadd.f32 1.0, %v5652_v50 }
 0x1ab   :  { %5663 = vrcp.f32 %v2030_v37  ;;  %v2044_v32 = vadd.f32 1.0, %v5654_v57 }
 0x1ac   :  { %5665 = vrcp.f32 %v2043_v54 }
 0x1b1   :  { %v5656_v56 = vpop.eup %5655 }
 0x1b2   :  { %v5658_v42 = vpop.eup %5657  ;;  %v2051_v63 = vmul.f32 %v5656_v56, %v5650_v33 }
 0x1b3   :  { %v5660_v45 = vpop.eup %5659  ;;  %v2049_v36 = vmul.f32 0.0, %v5658_v42 }
 0x1b4   :  { %v5662_v35 = vpop.eup %5661 }
 0x1b5   :  { %v7272_v43 = vadd.f32 %v2051_v63, %v2049_v36  ;;  %v2052_v53 = vmul.f32 %v5662_v35, %v5660_v45  ;;  %v2262_v47 = vpop.f32.mrb[60].mxu0  ;;  %v2305_v37 = vpop.f32.mrb[60].mxu1 }
 0x1b6   :  { %v5664_v40 = vpop.eup %5663  ;;  %v5138_v60 = vadd.f32 %v2262_v47, %v7268_v44  ;;  %v2264_v34 = vpop.f32.mrb[61].mxu0  ;;  %v8868_v47 = vsub.s32 3, %v7236_v46 }
 0x1b7   :  { %8867 = vst [vmem:[#allocation36_spill] sm:$0xff] %v7272_v43  ;;  %v2307_v33 = vpop.f32.mrb[61].mxu1  ;;  %5667 = vtanh.f32 %v7272_v43  ;;  %v2050_v51 = vmul.f32 0.0, %v5664_v40  ;;  %v5139_v50 = vadd.f32 %v2264_v34, %v7270_v41  ;;  %v2266_v52 = vpop.f32.mrb[62].mxu0 }
 0x1b8   :  { %v2309_v56 = vpop.f32.mrb[62].mxu1  ;;  %v4924_v42 = vmul.f32 -1.442695, %v5138_v60  ;;  %v5140_v63 = vadd.f32 %v2266_v52, %v7268_v44  ;;  %v2268_v45 = vpop.f32.mrb[63].mxu0  ;;  %5669 = vrcp.f32 %v2044_v32  ;;  %v7283_v43 = vrot.slane %v4661_v30, %v8868_v47 }
 0x1b9   :  { %v2311_v57 = vpop.f32.mrb[63].mxu1  ;;  %v7278_v36 = vadd.f32 %v2052_v53, %v2050_v51  ;;  %v4926_v54 = vmul.f32 -1.442695, %v5139_v50  ;;  %v5141_v35 = vadd.f32 %v2268_v45, %v7270_v41  ;;  %v8869_v60 = vsub.s32 2, %v7236_v46  ;;  %v5666_v32 = vpop.eup %5665 }
 0x1ba   :  { %5671 = vpow2.f32 %v4924_v42  ;;  %v4925_v40 = vmul.f32 -1.442695, %v5140_v63  ;;  %v5171_v53 = vadd.f32 %v2307_v33, %v7283_v43  ;;  %v5173_v45 = vadd.f32 %v2311_v57, %v7283_v43 }
 0x1bb   :  { %5673 = vtanh.f32 %v7278_v36  ;;  %v4927_v34 = vmul.f32 -1.442695, %v5141_v35  ;;  %v7288_v52 = vrot.slane %v4661_v30, %v8869_v60 }
 0x1bc   :  { %5675 = vpow2.f32 %v4926_v54  ;;  %v4928_v42 = vmul.f32 -1.442695, %v5171_v53  ;;  %v4929_v35 = vmul.f32 -1.442695, %v5173_v45 }
 0x1bd   :  { %5677 = vpow2.f32 %v4925_v40  ;;  %v5170_v50 = vadd.f32 %v2305_v37, %v7288_v52  ;;  %v5172_v54 = vadd.f32 %v2309_v56, %v7288_v52 }
 0x1be   :  { %5679 = vpow2.f32 %v4927_v34 }
 0x1bf   :  { %5681 = vtanh.f32 %v5170_v50 }
 0x1c0   :  { %5683 = vpow2.f32 %v4928_v42 }
 0x1c1   :  { %v5668_v51 = vpop.eup %5667 }
 0x1c2   :  { %v2057_v63 = vmul.f32 %v5668_v51, %v5666_v32  ;;  %v5670_v47 = vpop.eup %5669 }
 0x1c4   :  { %v5672_v41 = vpop.eup %5671  ;;  %2370 = vst [vmem:[%s8717_s5] sm:$0xff] %v2057_v63 }
 0x1c5   :  { %v5674_v46 = vpop.eup %5673  ;;  %v2328_v30 = vadd.f32 1.0, %v5672_v41 }
 0x1c6   :  { %v5676_v33 = vpop.eup %5675  ;;  %v2058_v40 = vmul.f32 %v5674_v46, %v5670_v47 }
 0x1c7   :  { %5685 = vrcp.f32 %v2328_v30  ;;  %v2340_v37 = vadd.f32 1.0, %v5676_v33  ;;  %v5678_v34 = vpop.eup %5677 }
 0x1c8   :  { %5687 = vtanh.f32 %v5172_v54  ;;  %2371 = vst [vmem:[%s8717_s5 + $0x8] sm:$0xff] %v2058_v40  ;;  %v2383_v56 = vpack.c.bf16 %v2058_v40, %v2057_v63  ;;  %v2329_v57 = vadd.f32 1.0, %v5678_v34  ;;  %v5680_v60 = vpop.eup %5679 }
 0x1c9   :  { %5689 = vrcp.f32 %v2340_v37  ;;  %v2341_v41 = vadd.f32 1.0, %v5680_v60  ;;  %v5682_v53 = vpop.eup %5681  ;;  %v8870_v60 = vld [vmem:[#allocation29_spill] sm:$0xff] }
 0x1ca   :  { %5691 = vpow2.f32 %v4929_v35  ;;  %2417 = vmatmul.mubr.bf16.vlgmr.msra.gmra.mrb[4].mxu0 %v2383_v56  ;;  %2460 = vmatmul.mubr.bf16.vlgmr.msra.gmra.mrb[4].mxu1 %v2383_v56  ;;  %v5684_v32 = vpop.eup %5683 }
 0x1cb   :  { %5693 = vrcp.f32 %v2329_v57  ;;  %2536 = vmatpush1.bf16.msra.mxu0 %v7017_v3  ;;  %2579 = vmatpush1.bf16.msra.mxu1 %v7022_v4  ;;  %v2354_v63 = vadd.f32 1.0, %v5684_v32 }
 0x1cc   :  { %2537 = vmatprep.subr.bf16.mxu0 %v7027_v5  ;;  %2580 = vmatprep.subr.bf16.mxu1 %v7032_v6  ;;  %5695 = vrcp.f32 %v2341_v41 }
 0x1cd   :  { %2567 = vmatprep.mubr.bf16.mxu0 %v8861_v1  ;;  %2610 = vmatprep.mubr.bf16.mxu1 %v8861_v1  ;;  %5697 = vrcp.f32 %v2354_v63  ;;  %v8883_v63 = vld [vmem:[#allocation16_spill] sm:$0xff] }
 0x1cf   :  { %2538 = vmatpush1.bf16.msra.mxu0 %v7041_v8  ;;  %2581 = vmatpush1.bf16.msra.mxu1 %v7046_v9 }
 0x1d0   :  { %2539 = vmatprep.subr.bf16.mxu0 %v7053_v10  ;;  %2582 = vmatprep.subr.bf16.mxu1 %v7058_v11 }
 0x1d1   :  { %v5686_v51 = vpop.eup %5685 }
 0x1d2   :  { %v5688_v50 = vpop.eup %5687  ;;  %v2362_v42 = vmul.f32 %v5686_v51, %v5682_v53  ;;  %v8871_v53 = vld [vmem:[#allocation30_spill] sm:$0xff] }
 0x1d3   :  { %v5690_v45 = vpop.eup %5689  ;;  %2540 = vmatpush1.bf16.msra.mxu0 %v7067_v12  ;;  %2583 = vmatpush1.bf16.msra.mxu1 %v7072_v13 }
 0x1d4   :  { %v5692_v47 = vpop.eup %5691  ;;  %v2360_v54 = vmul.f32 0.0, %v5690_v45  ;;  %2541 = vmatprep.subr.bf16.mxu0 %v7079_v14  ;;  %2584 = vmatprep.subr.bf16.mxu1 %v7084_v15  ;;  %v8878_v45 = vld [vmem:[#allocation10_spill] sm:$0xff] }
 0x1d5   :  { %v5694_v46 = vpop.eup %5693  ;;  %v2355_v40 = vadd.f32 1.0, %v5692_v47  ;;  %v8884_v47 = vld [vmem:[#allocation17_spill] sm:$0xff] }
 0x1d6   :  { %v7314_v30 = vadd.f32 %v2362_v42, %v2360_v54  ;;  %v2363_v33 = vmul.f32 %v5694_v46, %v5688_v50  ;;  %v5696_v35 = vpop.eup %5695  ;;  %v8885_v54 = vld [vmem:[#allocation19_spill] sm:$0xff]  ;;  %v8886_v46 = vld [vmem:[#allocation18_spill] sm:$0xff] }
 0x1d7   :  { %2542 = vmatpush1.bf16.msra.mxu0 %v7091_v16  ;;  %2585 = vmatpush1.bf16.msra.mxu1 %v7096_v19  ;;  %v2361_v37 = vmul.f32 0.0, %v5696_v35  ;;  %v5698_v56 = vpop.eup %5697  ;;  %v8888_v35 = vld [vmem:[#allocation20_spill] sm:$0xff] }
 0x1d8   :  { %5699 = vtanh.f32 %v7314_v30  ;;  %2543 = vmatprep.subr.bf16.mxu0 %v7103_v21  ;;  %2586 = vmatprep.subr.bf16.mxu1 %v7108_v28 }
 0x1d9   :  { %v7321_v34 = vadd.f32 %v2363_v33, %v2361_v37  ;;  %5701 = vrcp.f32 %v2355_v40  ;;  %v8887_v33 = vld [vmem:[#allocation21_spill] sm:$0xff]  ;;  %v8889_v40 = vld [vmem:[#allocation23_spill] sm:$0xff]  ;;  %v8890_v37 = vld [vmem:[#allocation22_spill] sm:$0xff] }
 0x1db   :  { %2544 = vmatpush1.bf16.msra.mxu0 %v7115_v29  ;;  %2587 = vmatpush1.bf16.msra.mxu1 %v7120_v38  ;;  %5703 = vtanh.f32 %v7321_v34 }
 0x1dc   :  { %2545 = vmatprep.subr.bf16.mxu0 %v7127_v39  ;;  %2588 = vmatprep.subr.bf16.mxu1 %v7132_v48 }
 0x1df   :  { %2546 = vmatpush1.bf16.msra.mxu0 %v7139_v49  ;;  %2589 = vmatpush1.bf16.msra.mxu1 %v7144_v58 }
 0x1e0   :  { %2547 = vmatprep.subr.bf16.mxu0 %v7151_v59  ;;  %2590 = vmatprep.subr.bf16.mxu1 %v7156_v61 }
 0x1e2   :  { %v5700_v57 = vpop.eup %5699 }
 0x1e3   :  { %2548 = vmatpush1.bf16.msra.mxu0 %v7163_v62  ;;  %2591 = vmatpush1.bf16.msra.mxu1 %v8870_v60  ;;  %v2368_v41 = vmul.f32 %v5700_v57, %v5698_v56  ;;  %v5702_v32 = vpop.eup %5701  ;;  %v8891_v56 = vld [vmem:[#allocation24_spill] sm:$0xff]  ;;  %v8892_v57 = vld [vmem:[#allocation25_spill] sm:$0xff] }
 0x1e4   :  { %2549 = vmatprep.subr.bf16.mxu0 %v7175_v0  ;;  %2592 = vmatprep.subr.bf16.mxu1 %v8871_v53 }
 0x1e5   :  { %4930 = vst [vmem:[%s8718_s6 + $0x70] sm:$0xff] %v2368_v41  ;;  %v5704_v51 = vpop.eup %5703 }
 0x1e6   :  { %v2369_v50 = vmul.f32 %v5704_v51, %v5702_v32  ;;  %v8894_v32 = vld [vmem:[#allocation27_spill] sm:$0xff]  ;;  %v8895_v51 = vld [vmem:[#allocation28_spill] sm:$0xff] }
 0x1e7   :  { %2550 = vmatpush1.bf16.msra.mxu0 %v7187_v2  ;;  %2593 = vmatpush1.bf16.msra.mxu1 %v7192_v7 }
 0x1e8   :  { %2692 = vmatprep.subr.bf16.mxu0 %v6766_v17  ;;  %2735 = vmatprep.subr.bf16.mxu1 %v6771_v18  ;;  %4931 = vst [vmem:[%s8718_s6 + $0x78] sm:$0xff] %v2369_v50  ;;  %v2534_v42 = vpack.c.bf16 %v2369_v50, %v2368_v41  ;;  %v8872_v17 = vld [vmem:[#allocation5_spill] sm:$0xff]  ;;  %v8873_v18 = vld [vmem:[#allocation7_spill] sm:$0xff]  ;;  %v8893_v41 = vld [vmem:[#allocation26_spill] sm:$0xff] }
 0x1ea   :  { %2568 = vmatmul.mubr.bf16.vlgmr.msra.gmra.mrb[56].mxu0 %v2534_v42  ;;  %2611 = vmatmul.mubr.bf16.vlgmr.msra.gmra.mrb[56].mxu1 %v2534_v42 }
 0x1eb   :  { %2693 = vmatpush1.bf16.msra.mxu0 %v6779_v20  ;;  %2736 = vmatpush1.bf16.msra.mxu1 %v6794_v23  ;;  %v8874_v20 = vld [vmem:[#allocation6_spill] sm:$0xff]  ;;  %v8876_v23 = vld [vmem:[#allocation9_spill] sm:$0xff] }
 0x1ec   :  { %2694 = vmatprep.subr.bf16.mxu0 %v6788_v22  ;;  %2737 = vmatprep.subr.bf16.mxu1 %v6799_v24  ;;  %v8875_v22 = vld [vmem:[#allocation8_spill] sm:$0xff]  ;;  %v8877_v24 = vld [vmem:[#allocation11_spill] sm:$0xff] }
 0x1ed   :  { %2724 = vmatprep.mubr.bf16.mxu0 %v8861_v1  ;;  %2767 = vmatprep.mubr.bf16.mxu1 %v8861_v1 }
 0x1ef   :  { %2695 = vmatpush1.bf16.msra.mxu0 %v6805_v25  ;;  %2738 = vmatpush1.bf16.msra.mxu1 %v6817_v27  ;;  %v8879_v25 = vld [vmem:[#allocation13_spill] sm:$0xff]  ;;  %v8880_v27 = vld [vmem:[#allocation12_spill] sm:$0xff] }
 0x1f0   :  { %2696 = vmatprep.subr.bf16.mxu0 %v6811_v26  ;;  %2739 = vmatprep.subr.bf16.mxu1 %v6836_v31  ;;  %v8881_v26 = vld [vmem:[#allocation15_spill] sm:$0xff]  ;;  %v8882_v31 = vld [vmem:[#allocation14_spill] sm:$0xff] }
 0x1f3   :  { %2697 = vmatpush1.bf16.msra.mxu0 %v8872_v17  ;;  %2740 = vmatpush1.bf16.msra.mxu1 %v8873_v18  ;;  %v8896_v17 = vld [vmem:[#allocation31_spill] sm:$0xff] }
 0x1f4   :  { %2698 = vmatprep.subr.bf16.mxu0 %v8874_v20  ;;  %2741 = vmatprep.subr.bf16.mxu1 %v8875_v22 }
 0x1f7   :  { %2699 = vmatpush1.bf16.msra.mxu0 %v8876_v23  ;;  %2742 = vmatpush1.bf16.msra.mxu1 %v8877_v24 }
 0x1f8   :  { %2700 = vmatprep.subr.bf16.mxu0 %v8878_v45  ;;  %2743 = vmatprep.subr.bf16.mxu1 %v8879_v25 }
 0x1fb   :  { %2701 = vmatpush1.bf16.msra.mxu0 %v8880_v27  ;;  %2744 = vmatpush1.bf16.msra.mxu1 %v8881_v26 }
 0x1fc   :  { %2702 = vmatprep.subr.bf16.mxu0 %v8882_v31  ;;  %2745 = vmatprep.subr.bf16.mxu1 %v8883_v63 }
 0x1ff   :  { %2703 = vmatpush1.bf16.msra.mxu0 %v8884_v47  ;;  %2746 = vmatpush1.bf16.msra.mxu1 %v8885_v54 }
 0x200   :  { %2704 = vmatprep.subr.bf16.mxu0 %v8886_v46  ;;  %2747 = vmatprep.subr.bf16.mxu1 %v8887_v33  ;;  %v8897_v33 = vld [vmem:[#allocation32_spill] sm:$0xff] }
 0x203   :  { %2705 = vmatpush1.bf16.msra.mxu0 %v8888_v35  ;;  %2748 = vmatpush1.bf16.msra.mxu1 %v8889_v40  ;;  %v8898_v40 = vld [vmem:[#allocation33_spill] sm:$0xff] }
 0x204   :  { %2706 = vmatprep.subr.bf16.mxu0 %v8890_v37  ;;  %2749 = vmatprep.subr.bf16.mxu1 %v8891_v56 }
 0x207   :  { %2707 = vmatpush1.bf16.msra.mxu0 %v8892_v57  ;;  %2750 = vmatpush1.bf16.msra.mxu1 %v8893_v41 }
 0x208   :  { %2843 = vmatprep.subr.bf16.mxu0 %v8894_v32  ;;  %2886 = vmatprep.subr.bf16.mxu1 %v8895_v51 }
 0x29d   :  { %v2418_v50 = vpop.f32.mrb[4].mxu0  ;;  %v2461_v42 = vpop.f32.mrb[4].mxu1 }
 0x29e   :  { %v5050_v18 = vadd.f32 %v2418_v50, %v8896_v17  ;;  %v2420_v20 = vpop.f32.mrb[5].mxu0  ;;  %v2463_v22 = vpop.f32.mrb[5].mxu1  ;;  %v5082_v37 = vadd.f32 %v2461_v42, %v8898_v40 }
 0x29f   :  { %v5051_v23 = vadd.f32 %v2420_v20, %v7245_v55  ;;  %v2422_v24 = vpop.f32.mrb[6].mxu0  ;;  %v2465_v45 = vpop.f32.mrb[6].mxu1  ;;  %v5083_v35 = vadd.f32 %v2463_v22, %v8897_v33 }
 0x2a0   :  { %v4932_v25 = vmul.f32 -1.442695, %v5050_v18  ;;  %v5052_v27 = vadd.f32 %v2422_v24, %v8896_v17  ;;  %v2424_v26 = vpop.f32.mrb[7].mxu0  ;;  %v2467_v31 = vpop.f32.mrb[7].mxu1  ;;  %v5084_v41 = vadd.f32 %v2465_v45, %v8898_v40 }
 0x2a1   :  { %v4934_v63 = vmul.f32 -1.442695, %v5051_v23  ;;  %v5053_v47 = vadd.f32 %v2424_v26, %v7245_v55  ;;  %v4936_v56 = vmul.f32 -1.442695, %v5083_v35  ;;  %v5085_v57 = vadd.f32 %v2467_v31, %v8897_v33 }
 0x2a2   :  { %5705 = vpow2.f32 %v4932_v25  ;;  %v4933_v54 = vmul.f32 -1.442695, %v5052_v27 }
 0x2a3   :  { %5707 = vpow2.f32 %v4934_v63  ;;  %v4935_v46 = vmul.f32 -1.442695, %v5053_v47  ;;  %v4937_v18 = vmul.f32 -1.442695, %v5085_v57 }
 0x2a4   :  { %5709 = vpow2.f32 %v4933_v54 }
 0x2a5   :  { %5711 = vpow2.f32 %v4935_v46  ;;  %v8899_v46 = vld [vmem:[#allocation36_spill] sm:$0xff] }
 0x2a6   :  { %5713 = vtanh.f32 %v5082_v37 }
 0x2a7   :  { %5715 = vpow2.f32 %v4936_v56 }
 0x2a8   :  { %5717 = vtanh.f32 %v5084_v41 }
 0x2ac   :  { %v5706_v32 = vpop.eup %5705 }
 0x2ad   :  { %v5708_v51 = vpop.eup %5707  ;;  %v2484_v50 = vadd.f32 1.0, %v5706_v32 }
 0x2ae   :  { %v2496_v20 = vadd.f32 1.0, %v5708_v51  ;;  %v5710_v23 = vpop.eup %5709 }
 0x2af   :  { %5719 = vrcp.f32 %v2484_v50  ;;  %v2485_v22 = vadd.f32 1.0, %v5710_v23  ;;  %v5712_v24 = vpop.eup %5711 }
 0x2b0   :  { %5721 = vrcp.f32 %v2496_v20  ;;  %v2497_v42 = vadd.f32 1.0, %v5712_v24  ;;  %v5714_v25 = vpop.eup %5713  ;;  %v8900_v24 = vld [vmem:[#allocation35_spill] sm:$0xff] }
 0x2b1   :  { %5723 = vpow2.f32 %v4937_v18  ;;  %v5716_v27 = vpop.eup %5715 }
 0x2b2   :  { %5725 = vrcp.f32 %v2485_v22  ;;  %v5718_v45 = vpop.eup %5717  ;;  %v2510_v47 = vadd.f32 1.0, %v5716_v27 }
 0x2b3   :  { %5727 = vrcp.f32 %v2497_v42 }
 0x2b4   :  { %5729 = vrcp.f32 %v2510_v47 }
 0x2b9   :  { %v5720_v26 = vpop.eup %5719 }
 0x2ba   :  { %v5722_v31 = vpop.eup %5721  ;;  %v2518_v63 = vmul.f32 %v5720_v26, %v5714_v25 }
 0x2bb   :  { %v5724_v54 = vpop.eup %5723  ;;  %v2516_v35 = vmul.f32 %v5722_v31, %v8899_v46 }
 0x2bc   :  { %v5726_v37 = vpop.eup %5725  ;;  %v2511_v32 = vadd.f32 1.0, %v5724_v54 }
 0x2bd   :  { %v7389_v56 = vadd.f32 %v2518_v63, %v2516_v35  ;;  %v2519_v57 = vmul.f32 %v5726_v37, %v5718_v45  ;;  %v5728_v41 = vpop.eup %5727  ;;  %v2569_v51 = vpop.f32.mrb[56].mxu0 }
 0x2be   :  { %v2612_v50 = vpop.f32.mrb[56].mxu1  ;;  %v2517_v18 = vmul.f32 %v5728_v41, %v7278_v36  ;;  %v5134_v20 = vadd.f32 %v2569_v51, %v7268_v44  ;;  %v2571_v23 = vpop.f32.mrb[57].mxu0 }
 0x2bf   :  { %5731 = vtanh.f32 %v7389_v56  ;;  %v2614_v22 = vpop.f32.mrb[57].mxu1  ;;  %v5135_v42 = vadd.f32 %v2571_v23, %v8900_v24  ;;  %v2573_v25 = vpop.f32.mrb[58].mxu0  ;;  %v5166_v51 = vadd.f32 %v2612_v50, %v7288_v52 }
 0x2c0   :  { %v2616_v27 = vpop.f32.mrb[58].mxu1  ;;  %v7395_v26 = vadd.f32 %v2519_v57, %v2517_v18  ;;  %v4938_v45 = vmul.f32 -1.442695, %v5134_v20  ;;  %v5136_v31 = vadd.f32 %v2573_v25, %v7268_v44  ;;  %v2575_v63 = vpop.f32.mrb[59].mxu0  ;;  %5733 = vrcp.f32 %v2511_v32 }
 0x2c1   :  { %v2618_v47 = vpop.f32.mrb[59].mxu1  ;;  %v4940_v54 = vmul.f32 -1.442695, %v5135_v42  ;;  %v5137_v46 = vadd.f32 %v2575_v63, %v8900_v24  ;;  %v5167_v37 = vadd.f32 %v2614_v22, %v7283_v43  ;;  %v5730_v57 = vpop.eup %5729  ;;  %v5168_v42 = vadd.f32 %v2616_v27, %v7288_v52 }
 0x2c2   :  { %5735 = vtanh.f32 %v7395_v26  ;;  %v4939_v36 = vmul.f32 -1.442695, %v5136_v31  ;;  %v5169_v32 = vadd.f32 %v2618_v47, %v7283_v43 }
 0x2c3   :  { %5737 = vpow2.f32 %v4938_v45  ;;  %v4941_v35 = vmul.f32 -1.442695, %v5137_v46  ;;  %v4942_v20 = vmul.f32 -1.442695, %v5167_v37 }
 0x2c4   :  { %5739 = vpow2.f32 %v4940_v54  ;;  %v4943_v54 = vmul.f32 -1.442695, %v5169_v32  ;;  %v7551_v32 = vld [vmem:[%s8715_s3 + $0x68] ss:$16 sps:$4 sm:$0xff]  }
 0x2c5   :  { %5741 = vpow2.f32 %v4939_v36 }
 0x2c6   :  { %5743 = vpow2.f32 %v4941_v35 }
 0x2c7   :  { %5745 = vtanh.f32 %v5166_v51 }
 0x2c8   :  { %5747 = vpow2.f32 %v4942_v20  ;;  %v7545_v20 = vld [vmem:[%s8715_s3 + $0x60] ss:$16 sps:$4 sm:$0xff]  }
 0x2c9   :  { %v5732_v41 = vpop.eup %5731  ;;  %5749 = vtanh.f32 %v5168_v42  ;;  %v7563_v42 = vld [vmem:[%s8715_s3 + $0x8c] ss:$16 sps:$4 sm:$0xff]  }
 0x2ca   :  { %v2524_v18 = vmul.f32 %v5732_v41, %v5730_v57  ;;  %v5734_v23 = vpop.eup %5733 }
 0x2cc   :  { %4944 = vst [vmem:[%s8717_s5 + $0x10] sm:$0xff] %v2524_v18  ;;  %v5736_v25 = vpop.eup %5735 }
 0x2cd   :  { %v5738_v45 = vpop.eup %5737  ;;  %v2525_v22 = vmul.f32 %v5736_v25, %v5734_v23  ;;  %v7557_v23 = vld [vmem:[%s8715_s3 + $0x84] ss:$16 sps:$4 sm:$0xff]   ;;  %v7569_v25 = vld [vmem:[%s8715_s3 + $0x80] ss:$16 sps:$4 sm:$0xff]  }
 0x2ce   :  { %v5740_v31 = vpop.eup %5739  ;;  %v2635_v63 = vadd.f32 1.0, %v5738_v45  ;;  %v7575_v45 = vld [vmem:[%s8715_s3 + $0x88] ss:$16 sps:$4 sm:$0xff]  }
 0x2cf   :  { %v2647_v50 = vadd.f32 1.0, %v5740_v31  ;;  %4945 = vst [vmem:[%s8717_s5 + $0x18] sm:$0xff] %v2525_v22  ;;  %v2691_v47 = vpack.c.bf16 %v2525_v22, %v2524_v18  ;;  %v5742_v27 = vpop.eup %5741  ;;  %v7539_v18 = vld [vmem:[%s8715_s3 + $0x6c] ss:$16 sps:$4 sm:$0xff]   ;;  %8901 = vst [vmem:[#allocation29_spill] sm:$0xff] %v7575_v45 }
 0x2d0   :  { %5751 = vrcp.f32 %v2635_v63  ;;  %v2636_v46 = vadd.f32 1.0, %v5742_v27  ;;  %v5744_v36 = vpop.eup %5743  ;;  %v7581_v22 = vld [vmem:[%s8715_s3 + $0xa4] ss:$16 sps:$4 sm:$0xff]   ;;  %v7587_v31 = vld [vmem:[%s8715_s3 + $0xac] ss:$16 sps:$4 sm:$0xff]  }
 0x2d1   :  { %5753 = vrcp.f32 %v2647_v50  ;;  %2725 = vmatmul.mubr.bf16.vlgmr.msra.gmra.mrb[8].mxu0 %v2691_v47  ;;  %2768 = vmatmul.mubr.bf16.vlgmr.msra.gmra.mrb[8].mxu1 %v2691_v47  ;;  %v2648_v35 = vadd.f32 1.0, %v5744_v36  ;;  %v5746_v37 = vpop.eup %5745  ;;  %8902 = vst [vmem:[#allocation30_spill] sm:$0xff] %v7581_v22  ;;  %8903 = vst [vmem:[#allocation5_spill] sm:$0xff] %v7587_v31  ;;  %v7593_v63 = vld [vmem:[%s8715_s3 + $0xa0] ss:$16 sps:$4 sm:$0xff]  }
 0x2d2   :  { %5755 = vpow2.f32 %v4943_v54  ;;  %2844 = vmatpush1.bf16.msra.mxu0 %v7017_v3  ;;  %2887 = vmatpush1.bf16.msra.mxu1 %v7022_v4  ;;  %v5748_v3 = vpop.eup %5747  ;;  %8904 = vst [vmem:[#allocation7_spill] sm:$0xff] %v7593_v63  ;;  %v7599_v54 = vld [vmem:[%s8715_s3 + $0xa8] ss:$16 sps:$4 sm:$0xff]   ;;  %v7605_v50 = vld [vmem:[%s8715_s3 + $0xc4] ss:$16 sps:$4 sm:$0xff]  }
 0x2d3   :  { %5757 = vrcp.f32 %v2636_v46  ;;  %2845 = vmatprep.subr.bf16.mxu0 %v7027_v5  ;;  %2888 = vmatprep.subr.bf16.mxu1 %v7032_v6  ;;  %v5750_v4 = vpop.eup %5749  ;;  %v2661_v41 = vadd.f32 1.0, %v5748_v3  ;;  %8905 = vst [vmem:[#allocation6_spill] sm:$0xff] %v7599_v54  ;;  %8906 = vst [vmem:[#allocation8_spill] sm:$0xff] %v7605_v50  ;;  %v7611_v47 = vld [vmem:[%s8715_s3 + $0xcc] ss:$16 sps:$4 sm:$0xff]  }
 0x2d4   :  { %2875 = vmatprep.mubr.bf16.mxu0 %v8861_v1  ;;  %2918 = vmatprep.mubr.bf16.mxu1 %v8861_v1  ;;  %5759 = vrcp.f32 %v2648_v35  ;;  %8907 = vst [vmem:[#allocation9_spill] sm:$0xff] %v7611_v47  ;;  %v7617_v27 = vld [vmem:[%s8715_s3 + $0xc0] ss:$16 sps:$4 sm:$0xff]   ;;  %v7623_v46 = vld [vmem:[%s8715_s3 + $0xc8] ss:$16 sps:$4 sm:$0xff]  }
 0x2d5   :  { %5761 = vrcp.f32 %v2661_v41  ;;  %8908 = vst [vmem:[#allocation11_spill] sm:$0xff] %v7617_v27  ;;  %8909 = vst [vmem:[#allocation10_spill] sm:$0xff] %v7623_v46  ;;  %v7629_v36 = vld [vmem:[%s8715_s3 + $0xe4] ss:$16 sps:$4 sm:$0xff]   ;;  %v7635_v35 = vld [vmem:[%s8715_s3 + $0xec] ss:$16 sps:$4 sm:$0xff]  }
 0x2d6   :  { %2846 = vmatpush1.bf16.msra.mxu0 %v7041_v8  ;;  %2889 = vmatpush1.bf16.msra.mxu1 %v7046_v9  ;;  %8910 = vst [vmem:[#allocation13_spill] sm:$0xff] %v7629_v36  ;;  %8911 = vst [vmem:[#allocation12_spill] sm:$0xff] %v7635_v35  ;;  %v7647_v3 = vld [vmem:[%s8715_s3 + $0xe8] ss:$16 sps:$4 sm:$0xff]  }
 0x2d7   :  { %2847 = vmatprep.subr.bf16.mxu0 %v7053_v10  ;;  %2890 = vmatprep.subr.bf16.mxu1 %v7058_v11  ;;  %8913 = vst [vmem:[#allocation14_spill] sm:$0xff] %v7647_v3 }
 0x2da   :  { %v5752_v57 = vpop.eup %5751  ;;  %2848 = vmatpush1.bf16.msra.mxu0 %v7067_v12  ;;  %2891 = vmatpush1.bf16.msra.mxu1 %v7072_v13 }
 0x2db   :  { %v5754_v5 = vpop.eup %5753  ;;  %v2669_v6 = vmul.f32 %v5752_v57, %v5746_v37  ;;  %2849 = vmatprep.subr.bf16.mxu0 %v7079_v14  ;;  %2892 = vmatprep.subr.bf16.mxu1 %v7084_v15  ;;  %v7641_v37 = vld [vmem:[%s8715_s3 + $0xe0] ss:$16 sps:$4 sm:$0xff]   ;;  %v7659_v57 = vld [vmem:[%s8715_s3 + $0x10c] ss:$16 sps:$4 sm:$0xff]  }
 0x2dc   :  { %v5756_v8 = vpop.eup %5755  ;;  %v2667_v9 = vmul.f32 %v5754_v5, %v7314_v30  ;;  %v7515_v30 = vld [vmem:[%s8715_s3 + $0x4c] ss:$16 sps:$4 sm:$0xff]   ;;  %8912 = vst [vmem:[#allocation15_spill] sm:$0xff] %v7641_v37  ;;  %8915 = vst [vmem:[#allocation17_spill] sm:$0xff] %v7659_v57 }
 0x2dd   :  { %v5758_v10 = vpop.eup %5757  ;;  %v2662_v13 = vadd.f32 1.0, %v5756_v8 }
 0x2de   :  { %v7425_v51 = vadd.f32 %v2669_v6, %v2667_v9  ;;  %v2670_v11 = vmul.f32 %v5758_v10, %v5750_v4  ;;  %2850 = vmatpush1.bf16.msra.mxu0 %v7091_v16  ;;  %2893 = vmatpush1.bf16.msra.mxu1 %v7096_v19  ;;  %v5760_v12 = vpop.eup %5759  ;;  %v7653_v4 = vld [vmem:[%s8715_s3 + $0x104] ss:$16 sps:$4 sm:$0xff]  }
 0x2df   :  { %2851 = vmatprep.subr.bf16.mxu0 %v7103_v21  ;;  %2894 = vmatprep.subr.bf16.mxu1 %v7108_v28  ;;  %v2668_v14 = vmul.f32 %v5760_v12, %v7321_v34  ;;  %v5762_v16 = vpop.eup %5761  ;;  %v7521_v34 = vld [vmem:[%s8715_s3 + $0x40] ss:$16 sps:$4 sm:$0xff]   ;;  %8914 = vst [vmem:[#allocation16_spill] sm:$0xff] %v7653_v4 }
 0x2e0   :  { %5763 = vtanh.f32 %v7425_v51 }
 0x2e1   :  { %v7433_v15 = vadd.f32 %v2670_v11, %v2668_v14  ;;  %5765 = vrcp.f32 %v2662_v13 }
 0x2e2   :  { %2852 = vmatpush1.bf16.msra.mxu0 %v7115_v29  ;;  %2895 = vmatpush1.bf16.msra.mxu1 %v7120_v38 }
 0x2e3   :  { %2853 = vmatprep.subr.bf16.mxu0 %v7127_v39  ;;  %2896 = vmatprep.subr.bf16.mxu1 %v7132_v48  ;;  %5767 = vtanh.f32 %v7433_v15  ;;  %v7456_v39 = vld [vmem:[%s8715_s3 + $0x4] ss:$16 sps:$4 sm:$0xff]   ;;  %v7462_v48 = vld [vmem:[%s8715_s3 + $0xc] ss:$16 sps:$4 sm:$0xff]  }
 0x2e6   :  { %2854 = vmatpush1.bf16.msra.mxu0 %v7139_v49  ;;  %2897 = vmatpush1.bf16.msra.mxu1 %v7144_v58  ;;  %v7477_v49 = vld [vmem:[%s8715_s3 + $0x8] ss:$16 sps:$4 sm:$0xff]   ;;  %v7483_v58 = vld [vmem:[%s8715_s3 + $0x24] ss:$16 sps:$4 sm:$0xff]  }
 0x2e7   :  { %2855 = vmatprep.subr.bf16.mxu0 %v7151_v59  ;;  %2898 = vmatprep.subr.bf16.mxu1 %v7156_v61  ;;  %v7489_v59 = vld [vmem:[%s8715_s3 + $0x2c] ss:$16 sps:$4 sm:$0xff]   ;;  %v7497_v61 = vld [vmem:[%s8715_s3 + $0x20] ss:$16 sps:$4 sm:$0xff]  }
 0x2ea   :  { %v5764_v19 = vpop.eup %5763  ;;  %2856 = vmatpush1.bf16.msra.mxu0 %v7163_v62  ;;  %2899 = vmatpush1.bf16.msra.mxu1 %v8870_v60  ;;  %v7503_v62 = vld [vmem:[%s8715_s3 + $0x28] ss:$16 sps:$4 sm:$0xff]  }
 0x2eb   :  { %2857 = vmatprep.subr.bf16.mxu0 %v7175_v0  ;;  %2900 = vmatprep.subr.bf16.mxu1 %v8871_v53  ;;  %v2675_v21 = vmul.f32 %v5764_v19, %v5762_v16  ;;  %v5766_v28 = vpop.eup %5765  ;;  %v7509_v0 = vld [vmem:[%s8715_s3 + $0x44] ss:$16 sps:$4 sm:$0xff]   ;;  %v7527_v60 = vld [vmem:[%s8715_s3 + $0x48] ss:$16 sps:$4 sm:$0xff]  }
 0x2ec   :  { %v7533_v53 = vld [vmem:[%s8715_s3 + $0x64] ss:$16 sps:$4 sm:$0xff]  }
 0x2ed   :  { %4946 = vst [vmem:[%s8718_s6 + $0x60] sm:$0xff] %v2675_v21  ;;  %v5768_v29 = vpop.eup %5767 }
 0x2ee   :  { %2858 = vmatpush1.bf16.msra.mxu0 %v7187_v2  ;;  %2901 = vmatpush1.bf16.msra.mxu1 %v7192_v7  ;;  %v2676_v38 = vmul.f32 %v5768_v29, %v5766_v28  ;;  %v7471_v7 = vld [vmem:[%s8715_s3] ss:$16 sps:$4 sm:$0xff]  }
 0x2ef   :  { %3000 = vmatprep.subr.bf16.mxu0 %v7456_v39  ;;  %3043 = vmatprep.subr.bf16.mxu1 %v7462_v48 }
 0x2f0   :  { %4947 = vst [vmem:[%s8718_s6 + $0x68] sm:$0xff] %v2676_v38  ;;  %v2842_v2 = vpack.c.bf16 %v2676_v38, %v2675_v21 }
 0x2f2   :  { %2876 = vmatmul.mubr.bf16.vlgmr.msra.gmra.mrb[52].mxu0 %v2842_v2  ;;  %2919 = vmatmul.mubr.bf16.vlgmr.msra.gmra.mrb[52].mxu1 %v2842_v2 }
 0x2f3   :  { %3001 = vmatpush1.bf16.msra.mxu0 %v7471_v7  ;;  %3044 = vmatpush1.bf16.msra.mxu1 %v7477_v49 }
 0x2f4   :  { %3002 = vmatprep.subr.bf16.mxu0 %v7483_v58  ;;  %3045 = vmatprep.subr.bf16.mxu1 %v7489_v59 }
 0x2f5   :  { %3032 = vmatprep.mubr.bf16.mxu0 %v8861_v1  ;;  %3075 = vmatprep.mubr.bf16.mxu1 %v8861_v1 }
 0x2f7   :  { %3003 = vmatpush1.bf16.msra.mxu0 %v7497_v61  ;;  %3046 = vmatpush1.bf16.msra.mxu1 %v7503_v62 }
 0x2f8   :  { %3004 = vmatprep.subr.bf16.mxu0 %v7509_v0  ;;  %3047 = vmatprep.subr.bf16.mxu1 %v7515_v30 }
 0x2fb   :  { %3005 = vmatpush1.bf16.msra.mxu0 %v7521_v34  ;;  %3048 = vmatpush1.bf16.msra.mxu1 %v7527_v60 }
 0x2fc   :  { %3006 = vmatprep.subr.bf16.mxu0 %v7533_v53  ;;  %3049 = vmatprep.subr.bf16.mxu1 %v7539_v18 }
 0x2ff   :  { %3007 = vmatpush1.bf16.msra.mxu0 %v7545_v20  ;;  %3050 = vmatpush1.bf16.msra.mxu1 %v7551_v32 }
 0x300   :  { %3008 = vmatprep.subr.bf16.mxu0 %v7557_v23  ;;  %3051 = vmatprep.subr.bf16.mxu1 %v7563_v42 }
 0x303   :  { %3009 = vmatpush1.bf16.msra.mxu0 %v7569_v25  ;;  %3052 = vmatpush1.bf16.msra.mxu1 %v7575_v45 }
 0x304   :  { %3010 = vmatprep.subr.bf16.mxu0 %v7581_v22  ;;  %3053 = vmatprep.subr.bf16.mxu1 %v7587_v31 }
 0x307   :  { %3011 = vmatpush1.bf16.msra.mxu0 %v7593_v63  ;;  %3054 = vmatpush1.bf16.msra.mxu1 %v7599_v54 }
 0x308   :  { %3012 = vmatprep.subr.bf16.mxu0 %v7605_v50  ;;  %3055 = vmatprep.subr.bf16.mxu1 %v7611_v47 }
 0x30b   :  { %3013 = vmatpush1.bf16.msra.mxu0 %v7617_v27  ;;  %3056 = vmatpush1.bf16.msra.mxu1 %v7623_v46 }
 0x30c   :  { %3014 = vmatprep.subr.bf16.mxu0 %v7629_v36  ;;  %3057 = vmatprep.subr.bf16.mxu1 %v7635_v35 }
 0x30f   :  { %3015 = vmatpush1.bf16.msra.mxu0 %v7641_v37  ;;  %3058 = vmatpush1.bf16.msra.mxu1 %v7647_v3 }
 0x310   :  { %3151 = vmatprep.subr.bf16.mxu0 %v7653_v4  ;;  %3194 = vmatprep.subr.bf16.mxu1 %v7659_v57 }
 0x3a4   :  { %v2726_v5 = vpop.f32.mrb[8].mxu0  ;;  %v2769_v6 = vpop.f32.mrb[8].mxu1 }
 0x3a5   :  { %v5054_v41 = vadd.f32 %v2726_v5, %v8896_v17  ;;  %v2728_v8 = vpop.f32.mrb[9].mxu0  ;;  %v2771_v9 = vpop.f32.mrb[9].mxu1  ;;  %v5086_v5 = vadd.f32 %v2769_v6, %v8898_v40 }
 0x3a6   :  { %v5055_v10 = vadd.f32 %v2728_v8, %v7245_v55  ;;  %v2730_v11 = vpop.f32.mrb[10].mxu0  ;;  %v2773_v12 = vpop.f32.mrb[10].mxu1  ;;  %v5087_v2 = vadd.f32 %v2771_v9, %v8897_v33 }
 0x3a7   :  { %v4948_v13 = vmul.f32 -1.442695, %v5054_v41  ;;  %v5056_v14 = vadd.f32 %v2730_v11, %v8896_v17  ;;  %v2732_v16 = vpop.f32.mrb[11].mxu0  ;;  %v2775_v19 = vpop.f32.mrb[11].mxu1  ;;  %v5088_v11 = vadd.f32 %v2773_v12, %v8898_v40 }
 0x3a8   :  { %v4950_v21 = vmul.f32 -1.442695, %v5055_v10  ;;  %v5057_v28 = vadd.f32 %v2732_v16, %v7245_v55  ;;  %v4952_v8 = vmul.f32 -1.442695, %v5087_v2  ;;  %v5089_v41 = vadd.f32 %v2775_v19, %v8897_v33 }
 0x3a9   :  { %5769 = vpow2.f32 %v4948_v13  ;;  %v4949_v29 = vmul.f32 -1.442695, %v5056_v14 }
 0x3aa   :  { %5771 = vpow2.f32 %v4950_v21  ;;  %v4951_v38 = vmul.f32 -1.442695, %v5057_v28  ;;  %v4953_v13 = vmul.f32 -1.442695, %v5089_v41 }
 0x3ab   :  { %5773 = vpow2.f32 %v4949_v29 }
 0x3ac   :  { %5775 = vpow2.f32 %v4951_v38 }
 0x3ad   :  { %5777 = vtanh.f32 %v5086_v5 }
 0x3ae   :  { %5779 = vpow2.f32 %v4952_v8 }
 0x3af   :  { %5781 = vtanh.f32 %v5088_v11 }
 0x3b3   :  { %v5770_v17 = vpop.eup %5769 }
 0x3b4   :  { %v5772_v10 = vpop.eup %5771  ;;  %v2792_v57 = vadd.f32 1.0, %v5770_v17 }
 0x3b5   :  { %v2804_v14 = vadd.f32 1.0, %v5772_v10  ;;  %v5774_v16 = vpop.eup %5773 }
 0x3b6   :  { %5783 = vrcp.f32 %v2792_v57  ;;  %v2793_v9 = vadd.f32 1.0, %v5774_v16  ;;  %v5776_v21 = vpop.eup %5775 }
 0x3b7   :  { %5785 = vrcp.f32 %v2804_v14  ;;  %v2805_v6 = vadd.f32 1.0, %v5776_v21  ;;  %v5778_v19 = vpop.eup %5777 }
 0x3b8   :  { %5787 = vpow2.f32 %v4953_v13  ;;  %v5780_v28 = vpop.eup %5779 }
 0x3b9   :  { %5789 = vrcp.f32 %v2793_v9  ;;  %v5782_v12 = vpop.eup %5781  ;;  %v2818_v17 = vadd.f32 1.0, %v5780_v28 }
 0x3ba   :  { %5791 = vrcp.f32 %v2805_v6 }
 0x3bb   :  { %5793 = vrcp.f32 %v2818_v17 }
 0x3c0   :  { %v5784_v29 = vpop.eup %5783 }
 0x3c1   :  { %v5786_v38 = vpop.eup %5785  ;;  %v2826_v2 = vmul.f32 %v5784_v29, %v5778_v19 }
 0x3c2   :  { %v5788_v5 = vpop.eup %5787  ;;  %v2824_v8 = vmul.f32 %v5786_v38, %v7389_v56 }
 0x3c3   :  { %v5790_v41 = vpop.eup %5789  ;;  %v2819_v13 = vadd.f32 1.0, %v5788_v5 }
 0x3c4   :  { %v7671_v11 = vadd.f32 %v2826_v2, %v2824_v8  ;;  %v2827_v57 = vmul.f32 %v5790_v41, %v5782_v12  ;;  %v5792_v10 = vpop.eup %5791 }
 0x3c5   :  { %v2825_v14 = vmul.f32 %v5792_v10, %v7395_v26  ;;  %v2877_v16 = vpop.f32.mrb[52].mxu0  ;;  %v2920_v9 = vpop.f32.mrb[52].mxu1 }
 0x3c6   :  { %5795 = vtanh.f32 %v7671_v11  ;;  %v5130_v21 = vadd.f32 %v2877_v16, %v7268_v44  ;;  %v2879_v6 = vpop.f32.mrb[53].mxu0  ;;  %v2922_v19 = vpop.f32.mrb[53].mxu1 }
 0x3c7   :  { %v7676_v28 = vadd.f32 %v2827_v57, %v2825_v14  ;;  %v5131_v56 = vadd.f32 %v2879_v6, %v8900_v24  ;;  %v2881_v29 = vpop.f32.mrb[54].mxu0  ;;  %v2924_v38 = vpop.f32.mrb[54].mxu1  ;;  %5797 = vrcp.f32 %v2819_v13  ;;  %v5163_v10 = vadd.f32 %v2922_v19, %v7283_v43 }
 0x3c8   :  { %v4954_v12 = vmul.f32 -1.442695, %v5130_v21  ;;  %v5132_v2 = vadd.f32 %v2881_v29, %v7268_v44  ;;  %v2883_v17 = vpop.f32.mrb[55].mxu0  ;;  %v2926_v5 = vpop.f32.mrb[55].mxu1  ;;  %v5162_v13 = vadd.f32 %v2920_v9, %v7288_v52 }
 0x3c9   :  { %5799 = vtanh.f32 %v7676_v28  ;;  %v4956_v26 = vmul.f32 -1.442695, %v5131_v56  ;;  %v5133_v8 = vadd.f32 %v2883_v17, %v8900_v24  ;;  %v5794_v14 = vpop.eup %5793  ;;  %v4958_v6 = vmul.f32 -1.442695, %v5163_v10  ;;  %v7701_v10 = vld [vmem:[%s8715_s3 + $0x108] ss:$16 sps:$4 sm:$0xff]  }
 0x3ca   :  { %5801 = vpow2.f32 %v4954_v12  ;;  %v4955_v41 = vmul.f32 -1.442695, %v5132_v2  ;;  %v5165_v29 = vadd.f32 %v2926_v5, %v7283_v43  ;;  %v5164_v56 = vadd.f32 %v2924_v38, %v7288_v52 }
 0x3cb   :  { %5803 = vpow2.f32 %v4956_v26  ;;  %v4957_v57 = vmul.f32 -1.442695, %v5133_v8 }
 0x3cc   :  { %5805 = vpow2.f32 %v4955_v41  ;;  %v4959_v8 = vmul.f32 -1.442695, %v5165_v29 }
 0x3cd   :  { %5807 = vpow2.f32 %v4957_v57 }
 0x3ce   :  { %5809 = vtanh.f32 %v5162_v13  ;;  %v7713_v13 = vld [vmem:[%s8715_s3 + $0x12c] ss:$16 sps:$4 sm:$0xff]  }
 0x3cf   :  { %5811 = vpow2.f32 %v4958_v6  ;;  %v7727_v6 = vld [vmem:[%s8715_s3 + $0x128] ss:$16 sps:$4 sm:$0xff]  }
 0x3d0   :  { %v5796_v16 = vpop.eup %5795  ;;  %5813 = vtanh.f32 %v5164_v56  ;;  %v7733_v56 = vld [vmem:[%s8715_s3 + $0x144] ss:$16 sps:$4 sm:$0xff]  }
 0x3d1   :  { %v2832_v21 = vmul.f32 %v5796_v16, %v5794_v14  ;;  %v5798_v44 = vpop.eup %5797  ;;  %v7707_v16 = vld [vmem:[%s8715_s3 + $0x124] ss:$16 sps:$4 sm:$0xff]  }
 0x3d3   :  { %4960 = vst [vmem:[%s8717_s5 + $0x20] sm:$0xff] %v2832_v21  ;;  %v5800_v12 = vpop.eup %5799 }
 0x3d4   :  { %v5802_v2 = vpop.eup %5801  ;;  %v2833_v19 = vmul.f32 %v5800_v12, %v5798_v44  ;;  %v7695_v44 = vld [vmem:[%s8715_s3 + $0x100] ss:$16 sps:$4 sm:$0xff]   ;;  %v7739_v12 = vld [vmem:[%s8715_s3 + $0x14c] ss:$16 sps:$4 sm:$0xff]  }
 0x3d5   :  { %v5804_v17 = vpop.eup %5803  ;;  %v2943_v26 = vadd.f32 1.0, %v5802_v2 }
 0x3d6   :  { %v2955_v9 = vadd.f32 1.0, %v5804_v17  ;;  %4961 = vst [vmem:[%s8717_s5 + $0x28] sm:$0xff] %v2833_v19  ;;  %v2999_v5 = vpack.c.bf16 %v2833_v19, %v2832_v21  ;;  %v5806_v38 = vpop.eup %5805  ;;  %v7721_v21 = vld [vmem:[%s8715_s3 + $0x120] ss:$16 sps:$4 sm:$0xff]  }
 0x3d7   :  { %5815 = vrcp.f32 %v2943_v26  ;;  %v2944_v41 = vadd.f32 1.0, %v5806_v38  ;;  %v5808_v57 = vpop.eup %5807  ;;  %v7745_v26 = vld [vmem:[%s8715_s3 + $0x140] ss:$16 sps:$4 sm:$0xff]  }
 0x3d8   :  { %5817 = vrcp.f32 %v2955_v9  ;;  %3033 = vmatmul.mubr.bf16.vlgmr.msra.gmra.mrb[12].mxu0 %v2999_v5  ;;  %3076 = vmatmul.mubr.bf16.vlgmr.msra.gmra.mrb[12].mxu1 %v2999_v5  ;;  %v2956_v14 = vadd.f32 1.0, %v5808_v57  ;;  %v5810_v29 = vpop.eup %5809  ;;  %8916 = vst [vmem:[#allocation19_spill] sm:$0xff] %v7745_v26  ;;  %v7763_v57 = vld [vmem:[%s8715_s3 + $0x16c] ss:$16 sps:$4 sm:$0xff]  }
 0x3d9   :  { %5819 = vpow2.f32 %v4959_v8  ;;  %3152 = vmatpush1.bf16.msra.mxu0 %v7695_v44  ;;  %3195 = vmatpush1.bf16.msra.mxu1 %v7701_v10  ;;  %v5812_v2 = vpop.eup %5811  ;;  %v7751_v8 = vld [vmem:[%s8715_s3 + $0x148] ss:$16 sps:$4 sm:$0xff]   ;;  %8919 = vst [vmem:[#allocation20_spill] sm:$0xff] %v7763_v57 }
 0x3da   :  { %5821 = vrcp.f32 %v2944_v41  ;;  %3153 = vmatprep.subr.bf16.mxu0 %v7707_v16  ;;  %3196 = vmatprep.subr.bf16.mxu1 %v7713_v13  ;;  %v5814_v19 = vpop.eup %5813  ;;  %8917 = vst [vmem:[#allocation18_spill] sm:$0xff] %v7751_v8  ;;  %v2969_v38 = vadd.f32 1.0, %v5812_v2  ;;  %v7757_v41 = vld [vmem:[%s8715_s3 + $0x164] ss:$16 sps:$4 sm:$0xff]  }
 0x3db   :  { %3183 = vmatprep.mubr.bf16.mxu0 %v8861_v1  ;;  %3226 = vmatprep.mubr.bf16.mxu1 %v8861_v1  ;;  %5823 = vrcp.f32 %v2956_v14  ;;  %8918 = vst [vmem:[#allocation21_spill] sm:$0xff] %v7757_v41 }
 0x3dc   :  { %5825 = vrcp.f32 %v2969_v38  ;;  %v7806_v38 = vld [vmem:[%s8715_s3 + $0x188] ss:$16 sps:$4 sm:$0xff]  }
 0x3dd   :  { %3154 = vmatpush1.bf16.msra.mxu0 %v7721_v21  ;;  %3197 = vmatpush1.bf16.msra.mxu1 %v7727_v6  ;;  %8921 = vst [vmem:[#allocation22_spill] sm:$0xff] %v7806_v38 }
 0x3de   :  { %3155 = vmatprep.subr.bf16.mxu0 %v7733_v56  ;;  %3198 = vmatprep.subr.bf16.mxu1 %v7739_v12 }
 0x3e1   :  { %v5816_v17 = vpop.eup %5815  ;;  %3156 = vmatpush1.bf16.msra.mxu0 %v7745_v26  ;;  %3199 = vmatpush1.bf16.msra.mxu1 %v7751_v8 }
 0x3e2   :  { %v5818_v9 = vpop.eup %5817  ;;  %v2977_v5 = vmul.f32 %v5816_v17, %v5810_v29  ;;  %3157 = vmatprep.subr.bf16.mxu0 %v7757_v41  ;;  %3200 = vmatprep.subr.bf16.mxu1 %v7763_v57  ;;  %v7772_v17 = vld [vmem:[%s8715_s3 + $0x160] ss:$16 sps:$4 sm:$0xff]   ;;  %v7778_v41 = vld [vmem:[%s8715_s3 + $0x168] ss:$16 sps:$4 sm:$0xff]  }
 0x3e3   :  { %v5820_v14 = vpop.eup %5819  ;;  %v2975_v8 = vmul.f32 %v5818_v9, %v7425_v51 }
 0x3e4   :  { %v5822_v26 = vpop.eup %5821  ;;  %v2970_v51 = vadd.f32 1.0, %v5820_v14  ;;  %v7825_v14 = vld [vmem:[%s8715_s3 + $0x1a0] ss:$16 sps:$4 sm:$0xff]  }
 0x3e5   :  { %v7767_v29 = vadd.f32 %v2977_v5, %v2975_v8  ;;  %v2978_v2 = vmul.f32 %v5822_v26, %v5814_v19  ;;  %3158 = vmatpush1.bf16.msra.mxu0 %v7772_v17  ;;  %3201 = vmatpush1.bf16.msra.mxu1 %v7778_v41  ;;  %v5824_v57 = vpop.eup %5823  ;;  %v7784_v19 = vld [vmem:[%s8715_s3 + $0x184] ss:$16 sps:$4 sm:$0xff]   ;;  %v7790_v26 = vld [vmem:[%s8715_s3 + $0x18c] ss:$16 sps:$4 sm:$0xff]   ;;  %v7800_v5 = vld [vmem:[%s8715_s3 + $0x180] ss:$16 sps:$4 sm:$0xff]  }
 0x3e6   :  { %3159 = vmatprep.subr.bf16.mxu0 %v7784_v19  ;;  %3202 = vmatprep.subr.bf16.mxu1 %v7790_v26  ;;  %v2976_v8 = vmul.f32 %v5824_v57, %v7433_v15  ;;  %8920 = vst [vmem:[#allocation23_spill] sm:$0xff] %v7800_v5  ;;  %v7812_v15 = vld [vmem:[%s8715_s3 + $0x1a4] ss:$16 sps:$4 sm:$0xff]   ;;  %v7818_v57 = vld [vmem:[%s8715_s3 + $0x1ac] ss:$16 sps:$4 sm:$0xff]   ;;  %8924 = vst [vmem:[#allocation26_spill] sm:$0xff] %v7825_v14 }
 0x3e7   :  { %5827 = vtanh.f32 %v7767_v29  ;;  %8922 = vst [vmem:[#allocation24_spill] sm:$0xff] %v7812_v15  ;;  %8923 = vst [vmem:[#allocation25_spill] sm:$0xff] %v7818_v57 }
 0x3e8   :  { %v7795_v9 = vadd.f32 %v2978_v2, %v2976_v8  ;;  %5829 = vrcp.f32 %v2970_v51  ;;  %v7831_v2 = vld [vmem:[%s8715_s3 + $0x1a8] ss:$16 sps:$4 sm:$0xff]   ;;  %v7837_v51 = vld [vmem:[%s8715_s3 + $0x1c4] ss:$16 sps:$4 sm:$0xff]   ;;  %v7843_v8 = vld [vmem:[%s8715_s3 + $0x1cc] ss:$16 sps:$4 sm:$0xff]  }
 0x3e9   :  { %3160 = vmatpush1.bf16.msra.mxu0 %v7800_v5  ;;  %3203 = vmatpush1.bf16.msra.mxu1 %v7806_v38  ;;  %8925 = vst [vmem:[#allocation27_spill] sm:$0xff] %v7831_v2  ;;  %8926 = vst [vmem:[#allocation28_spill] sm:$0xff] %v7837_v51  ;;  %v7876_v5 = vld [vmem:[%s8715_s3 + $0x1e0] ss:$16 sps:$4 sm:$0xff]  }
 0x3ea   :  { %3161 = vmatprep.subr.bf16.mxu0 %v7812_v15  ;;  %3204 = vmatprep.subr.bf16.mxu1 %v7818_v57  ;;  %5831 = vtanh.f32 %v7795_v9  ;;  %8927 = vst [vmem:[#allocation32_spill] sm:$0xff] %v7843_v8  ;;  %v7867_v15 = vld [vmem:[%s8715_s3 + $0x1ec] ss:$16 sps:$4 sm:$0xff]  }
 0x3ed   :  { %3162 = vmatpush1.bf16.msra.mxu0 %v7825_v14  ;;  %3205 = vmatpush1.bf16.msra.mxu1 %v7831_v2  ;;  %v5826_v14 = vpop.eup %5825  ;;  %v7849_v2 = vld [vmem:[%s8715_s3 + $0x1c0] ss:$16 sps:$4 sm:$0xff]  }
 0x3ee   :  { %3163 = vmatprep.subr.bf16.mxu0 %v7837_v51  ;;  %3206 = vmatprep.subr.bf16.mxu1 %v7843_v8  ;;  %8928 = vst [vmem:[#allocation33_spill] sm:$0xff] %v7849_v2  ;;  %v7855_v51 = vld [vmem:[%s8715_s3 + $0x1c8] ss:$16 sps:$4 sm:$0xff]   ;;  %v7861_v8 = vld [vmem:[%s8715_s3 + $0x1e4] ss:$16 sps:$4 sm:$0xff]  }
 0x3ef   :  { %8929 = vst [vmem:[#allocation36_spill] sm:$0xff] %v7855_v51  ;;  %8930 = vst [vmem:[#allocation35_spill] sm:$0xff] %v7861_v8 }
 0x3f1   :  { %v5828_v57 = vpop.eup %5827  ;;  %3164 = vmatpush1.bf16.msra.mxu0 %v7849_v2  ;;  %3207 = vmatpush1.bf16.msra.mxu1 %v7855_v51 }
 0x3f2   :  { %3165 = vmatprep.subr.bf16.mxu0 %v7861_v8  ;;  %3208 = vmatprep.subr.bf16.mxu1 %v7867_v15  ;;  %v2983_v2 = vmul.f32 %v5828_v57, %v5826_v14  ;;  %v5830_v38 = vpop.eup %5829  ;;  %v7882_v8 = vld [vmem:[%s8715_s3 + $0x1e8] ss:$16 sps:$4 sm:$0xff]  }
 0x3f4   :  { %4962 = vst [vmem:[%s8718_s6 + $0x50] sm:$0xff] %v2983_v2  ;;  %v5832_v51 = vpop.eup %5831 }
 0x3f5   :  { %3166 = vmatpush1.bf16.msra.mxu0 %v7876_v5  ;;  %3209 = vmatpush1.bf16.msra.mxu1 %v7882_v8  ;;  %v2984_v57 = vmul.f32 %v5832_v51, %v5830_v38  ;;  %v8931_v38 = vld [vmem:[#allocation17_spill] sm:$0xff] }
 0x3f6   :  { %3308 = vmatprep.subr.bf16.mxu0 %v7456_v39  ;;  %3351 = vmatprep.subr.bf16.mxu1 %v7462_v48 }
 0x3f7   :  { %4963 = vst [vmem:[%s8718_s6 + $0x58] sm:$0xff] %v2984_v57  ;;  %v3150_v14 = vpack.c.bf16 %v2984_v57, %v2983_v2  ;;  %v8932_v57 = vld [vmem:[#allocation31_spill] sm:$0xff] }
 0x3f9   :  { %3184 = vmatmul.mubr.bf16.vlgmr.msra.gmra.mrb[48].mxu0 %v3150_v14  ;;  %3227 = vmatmul.mubr.bf16.vlgmr.msra.gmra.mrb[48].mxu1 %v3150_v14 }
 0x3fa   :  { %3309 = vmatpush1.bf16.msra.mxu0 %v7471_v7  ;;  %3352 = vmatpush1.bf16.msra.mxu1 %v7477_v49 }
 0x3fb   :  { %3310 = vmatprep.subr.bf16.mxu0 %v7483_v58  ;;  %3353 = vmatprep.subr.bf16.mxu1 %v7489_v59 }
 0x3fc   :  { %3340 = vmatprep.mubr.bf16.mxu0 %v8861_v1  ;;  %3383 = vmatprep.mubr.bf16.mxu1 %v8861_v1 }
 0x3fe   :  { %3311 = vmatpush1.bf16.msra.mxu0 %v7497_v61  ;;  %3354 = vmatpush1.bf16.msra.mxu1 %v7503_v62 }
 0x3ff   :  { %3312 = vmatprep.subr.bf16.mxu0 %v7509_v0  ;;  %3355 = vmatprep.subr.bf16.mxu1 %v7515_v30 }
 0x402   :  { %3313 = vmatpush1.bf16.msra.mxu0 %v7521_v34  ;;  %3356 = vmatpush1.bf16.msra.mxu1 %v7527_v60 }
 0x403   :  { %3314 = vmatprep.subr.bf16.mxu0 %v7533_v53  ;;  %3357 = vmatprep.subr.bf16.mxu1 %v7539_v18 }
 0x406   :  { %3315 = vmatpush1.bf16.msra.mxu0 %v7545_v20  ;;  %3358 = vmatpush1.bf16.msra.mxu1 %v7551_v32 }
 0x407   :  { %3316 = vmatprep.subr.bf16.mxu0 %v7557_v23  ;;  %3359 = vmatprep.subr.bf16.mxu1 %v7563_v42 }
 0x40a   :  { %3317 = vmatpush1.bf16.msra.mxu0 %v7569_v25  ;;  %3360 = vmatpush1.bf16.msra.mxu1 %v7575_v45 }
 0x40b   :  { %3318 = vmatprep.subr.bf16.mxu0 %v7581_v22  ;;  %3361 = vmatprep.subr.bf16.mxu1 %v7587_v31 }
 0x40e   :  { %3319 = vmatpush1.bf16.msra.mxu0 %v7593_v63  ;;  %3362 = vmatpush1.bf16.msra.mxu1 %v7599_v54 }
 0x40f   :  { %3320 = vmatprep.subr.bf16.mxu0 %v7605_v50  ;;  %3363 = vmatprep.subr.bf16.mxu1 %v7611_v47 }
 0x412   :  { %3321 = vmatpush1.bf16.msra.mxu0 %v7617_v27  ;;  %3364 = vmatpush1.bf16.msra.mxu1 %v7623_v46 }
 0x413   :  { %3322 = vmatprep.subr.bf16.mxu0 %v7629_v36  ;;  %3365 = vmatprep.subr.bf16.mxu1 %v7635_v35 }
 0x416   :  { %3323 = vmatpush1.bf16.msra.mxu0 %v7641_v37  ;;  %3366 = vmatpush1.bf16.msra.mxu1 %v7647_v3 }
 0x417   :  { %3459 = vmatprep.subr.bf16.mxu0 %v7653_v4  ;;  %3502 = vmatprep.subr.bf16.mxu1 %v8931_v38 }
 0x4ab   :  { %v3034_v2 = vpop.f32.mrb[12].mxu0  ;;  %v3077_v51 = vpop.f32.mrb[12].mxu1 }
 0x4ac   :  { %v5058_v14 = vadd.f32 %v3034_v2, %v8932_v57  ;;  %v3036_v47 = vpop.f32.mrb[13].mxu0  ;;  %v3079_v27 = vpop.f32.mrb[13].mxu1 }
 0x4ad   :  { %v5059_v46 = vadd.f32 %v3036_v47, %v7245_v55  ;;  %v3038_v50 = vpop.f32.mrb[14].mxu0  ;;  %v3081_v36 = vpop.f32.mrb[14].mxu1  ;;  %v5091_v2 = vadd.f32 %v3079_v27, %v8897_v33  ;;  %v5090_v47 = vadd.f32 %v3077_v51, %v8898_v40 }
 0x4ae   :  { %v4964_v54 = vmul.f32 -1.442695, %v5058_v14  ;;  %v5060_v35 = vadd.f32 %v3038_v50, %v8932_v57  ;;  %v3040_v37 = vpop.f32.mrb[15].mxu0  ;;  %v3083_v63 = vpop.f32.mrb[15].mxu1  ;;  %v5092_v50 = vadd.f32 %v3081_v36, %v8898_v40 }
 0x4af   :  { %v4966_v3 = vmul.f32 -1.442695, %v5059_v46  ;;  %v5061_v4 = vadd.f32 %v3040_v37, %v7245_v55  ;;  %v4968_v22 = vmul.f32 -1.442695, %v5091_v2  ;;  %v5093_v14 = vadd.f32 %v3083_v63, %v8897_v33 }
 0x4b0   :  { %5833 = vpow2.f32 %v4964_v54  ;;  %v4965_v38 = vmul.f32 -1.442695, %v5060_v35 }
 0x4b1   :  { %5835 = vpow2.f32 %v4966_v3  ;;  %v4967_v31 = vmul.f32 -1.442695, %v5061_v4  ;;  %v4969_v54 = vmul.f32 -1.442695, %v5093_v14 }
 0x4b2   :  { %5837 = vpow2.f32 %v4965_v38 }
 0x4b3   :  { %5839 = vpow2.f32 %v4967_v31 }
 0x4b4   :  { %5841 = vtanh.f32 %v5090_v47 }
 0x4b5   :  { %5843 = vpow2.f32 %v4968_v22 }
 0x4b6   :  { %5845 = vtanh.f32 %v5092_v50 }
 0x4ba   :  { %v5834_v57 = vpop.eup %5833 }
 0x4bb   :  { %v5836_v46 = vpop.eup %5835  ;;  %v3100_v45 = vadd.f32 1.0, %v5834_v57 }
 0x4bc   :  { %v3112_v35 = vadd.f32 1.0, %v5836_v46  ;;  %v5838_v37 = vpop.eup %5837 }
 0x4bd   :  { %5847 = vrcp.f32 %v3100_v45  ;;  %v3101_v27 = vadd.f32 1.0, %v5838_v37  ;;  %v5840_v31 = vpop.eup %5839 }
 0x4be   :  { %5849 = vrcp.f32 %v3112_v35  ;;  %v3113_v3 = vadd.f32 1.0, %v5840_v31  ;;  %v5842_v63 = vpop.eup %5841  ;;  %v8933_v31 = vld [vmem:[#allocation34_spill] sm:$0xff] }
 0x4bf   :  { %5851 = vpow2.f32 %v4969_v54  ;;  %v5844_v4 = vpop.eup %5843 }
 0x4c0   :  { %5853 = vrcp.f32 %v3101_v27  ;;  %v5846_v36 = vpop.eup %5845  ;;  %v3126_v57 = vadd.f32 1.0, %v5844_v4 }
 0x4c1   :  { %5855 = vrcp.f32 %v3113_v3 }
 0x4c2   :  { %5857 = vrcp.f32 %v3126_v57 }
 0x4c7   :  { %v5848_v38 = vpop.eup %5847 }
 0x4c8   :  { %v5850_v51 = vpop.eup %5849  ;;  %v3134_v2 = vmul.f32 %v5848_v38, %v5842_v63 }
 0x4c9   :  { %v5852_v22 = vpop.eup %5851  ;;  %v3132_v47 = vmul.f32 %v5850_v51, %v7671_v11 }
 0x4ca   :  { %v5854_v14 = vpop.eup %5853  ;;  %v3127_v54 = vadd.f32 1.0, %v5852_v22 }
 0x4cb   :  { %v7933_v50 = vadd.f32 %v3134_v2, %v3132_v47  ;;  %v3135_v45 = vmul.f32 %v5854_v14, %v5846_v36  ;;  %v5856_v46 = vpop.eup %5855 }
 0x4cc   :  { %v3133_v35 = vmul.f32 %v5856_v46, %v7676_v28  ;;  %v3185_v37 = vpop.f32.mrb[48].mxu0  ;;  %v3228_v27 = vpop.f32.mrb[48].mxu1 }
 0x4cd   :  { %5859 = vtanh.f32 %v7933_v50  ;;  %v5126_v3 = vadd.f32 %v3185_v37, %v8933_v31  ;;  %v3187_v63 = vpop.f32.mrb[49].mxu0  ;;  %v3230_v4 = vpop.f32.mrb[49].mxu1 }
 0x4ce   :  { %v7938_v38 = vadd.f32 %v3135_v45, %v3133_v35  ;;  %v5127_v11 = vadd.f32 %v3187_v63, %v8900_v24  ;;  %v3189_v51 = vpop.f32.mrb[50].mxu0  ;;  %v3232_v2 = vpop.f32.mrb[50].mxu1  ;;  %5861 = vrcp.f32 %v3127_v54  ;;  %v5159_v35 = vadd.f32 %v3230_v4, %v7283_v43 }
 0x4cf   :  { %v4970_v36 = vmul.f32 -1.442695, %v5126_v3  ;;  %v5128_v57 = vadd.f32 %v3189_v51, %v8933_v31  ;;  %v3191_v22 = vpop.f32.mrb[51].mxu0  ;;  %v3234_v47 = vpop.f32.mrb[51].mxu1  ;;  %v5158_v54 = vadd.f32 %v3228_v27, %v7288_v52 }
 0x4d0   :  { %8934 = vst [vmem:[#allocation37_spill] sm:$0xff] %v7938_v38  ;;  %5863 = vtanh.f32 %v7938_v38  ;;  %v4972_v28 = vmul.f32 -1.442695, %v5127_v11  ;;  %v5129_v14 = vadd.f32 %v3191_v22, %v8900_v24  ;;  %v5858_v37 = vpop.eup %5857  ;;  %v4974_v51 = vmul.f32 -1.442695, %v5159_v35 }
 0x4d1   :  { %5865 = vpow2.f32 %v4970_v36  ;;  %v4971_v46 = vmul.f32 -1.442695, %v5128_v57  ;;  %v5161_v31 = vadd.f32 %v3234_v47, %v7283_v43  ;;  %v5160_v11 = vadd.f32 %v3232_v2, %v7288_v52 }
 0x4d2   :  { %5867 = vpow2.f32 %v4972_v28  ;;  %v4973_v45 = vmul.f32 -1.442695, %v5129_v14 }
 0x4d3   :  { %5869 = vpow2.f32 %v4971_v46  ;;  %v4975_v14 = vmul.f32 -1.442695, %v5161_v31 }
 0x4d4   :  { %5871 = vpow2.f32 %v4973_v45 }
 0x4d5   :  { %5873 = vtanh.f32 %v5158_v54  ;;  %v8935_v54 = vld [vmem:[#allocation19_spill] sm:$0xff] }
 0x4d6   :  { %5875 = vpow2.f32 %v4974_v51 }
 0x4d7   :  { %v5860_v63 = vpop.eup %5859  ;;  %5877 = vtanh.f32 %v5160_v11 }
 0x4d8   :  { %v3140_v3 = vmul.f32 %v5860_v63, %v5858_v37  ;;  %v5862_v38 = vpop.eup %5861 }
 0x4da   :  { %4976 = vst [vmem:[%s8717_s5 + $0x30] sm:$0xff] %v3140_v3  ;;  %v5864_v36 = vpop.eup %5863 }
 0x4db   :  { %v5866_v57 = vpop.eup %5865  ;;  %v3141_v4 = vmul.f32 %v5864_v36, %v5862_v38 }
 0x4dc   :  { %v5868_v22 = vpop.eup %5867  ;;  %v3251_v28 = vadd.f32 1.0, %v5866_v57  ;;  %v8937_v57 = vld [vmem:[#allocation21_spill] sm:$0xff] }
 0x4dd   :  { %v3263_v27 = vadd.f32 1.0, %v5868_v22  ;;  %4977 = vst [vmem:[%s8717_s5 + $0x38] sm:$0xff] %v3141_v4  ;;  %v3307_v47 = vpack.c.bf16 %v3141_v4, %v3140_v3  ;;  %v5870_v2 = vpop.eup %5869  ;;  %v8936_v3 = vld [vmem:[#allocation18_spill] sm:$0xff]  ;;  %v8938_v4 = vld [vmem:[#allocation20_spill] sm:$0xff] }
 0x4de   :  { %5879 = vrcp.f32 %v3251_v28  ;;  %v3252_v46 = vadd.f32 1.0, %v5870_v2  ;;  %v5872_v45 = vpop.eup %5871 }
 0x4df   :  { %5881 = vrcp.f32 %v3263_v27  ;;  %3341 = vmatmul.mubr.bf16.vlgmr.msra.gmra.mrb[16].mxu0 %v3307_v47  ;;  %3384 = vmatmul.mubr.bf16.vlgmr.msra.gmra.mrb[16].mxu1 %v3307_v47  ;;  %v3264_v31 = vadd.f32 1.0, %v5872_v45  ;;  %v5874_v38 = vpop.eup %5873 }
 0x4e0   :  { %5883 = vpow2.f32 %v4975_v14  ;;  %3460 = vmatpush1.bf16.msra.mxu0 %v7695_v44  ;;  %3503 = vmatpush1.bf16.msra.mxu1 %v7701_v10  ;;  %v5876_v35 = vpop.eup %5875 }
 0x4e1   :  { %5885 = vrcp.f32 %v3252_v46  ;;  %3461 = vmatprep.subr.bf16.mxu0 %v7707_v16  ;;  %3504 = vmatprep.subr.bf16.mxu1 %v7713_v13  ;;  %v5878_v37 = vpop.eup %5877  ;;  %v3277_v36 = vadd.f32 1.0, %v5876_v35  ;;  %v8941_v35 = vld [vmem:[#allocation24_spill] sm:$0xff] }
 0x4e2   :  { %3491 = vmatprep.mubr.bf16.mxu0 %v8861_v1  ;;  %3534 = vmatprep.mubr.bf16.mxu1 %v8861_v1  ;;  %5887 = vrcp.f32 %v3264_v31  ;;  %v8939_v31 = vld [vmem:[#allocation23_spill] sm:$0xff] }
 0x4e3   :  { %5889 = vrcp.f32 %v3277_v36 }
 0x4e4   :  { %3462 = vmatpush1.bf16.msra.mxu0 %v7721_v21  ;;  %3505 = vmatpush1.bf16.msra.mxu1 %v7727_v6 }
 0x4e5   :  { %3463 = vmatprep.subr.bf16.mxu0 %v7733_v56  ;;  %3506 = vmatprep.subr.bf16.mxu1 %v7739_v12 }
 0x4e8   :  { %v5880_v63 = vpop.eup %5879  ;;  %3464 = vmatpush1.bf16.msra.mxu0 %v8935_v54  ;;  %3507 = vmatpush1.bf16.msra.mxu1 %v8936_v3 }
 0x4e9   :  { %v5882_v51 = vpop.eup %5881  ;;  %v3285_v11 = vmul.f32 %v5880_v63, %v5874_v38  ;;  %3465 = vmatprep.subr.bf16.mxu0 %v8937_v57  ;;  %3508 = vmatprep.subr.bf16.mxu1 %v8938_v4  ;;  %v8940_v38 = vld [vmem:[#allocation22_spill] sm:$0xff] }
 0x4ea   :  { %v5884_v22 = vpop.eup %5883  ;;  %v3283_v28 = vmul.f32 %v5882_v51, %v7767_v29  ;;  %v8943_v63 = vld [vmem:[#allocation26_spill] sm:$0xff]  ;;  %v8944_v51 = vld [vmem:[#allocation27_spill] sm:$0xff] }
 0x4eb   :  { %v5886_v14 = vpop.eup %5885  ;;  %v3278_v46 = vadd.f32 1.0, %v5884_v22 }
 0x4ec   :  { %v7969_v27 = vadd.f32 %v3285_v11, %v3283_v28  ;;  %v3286_v47 = vmul.f32 %v5886_v14, %v5878_v37  ;;  %3466 = vmatpush1.bf16.msra.mxu0 %v7772_v17  ;;  %3509 = vmatpush1.bf16.msra.mxu1 %v7778_v41  ;;  %v5888_v2 = vpop.eup %5887  ;;  %v8942_v37 = vld [vmem:[#allocation25_spill] sm:$0xff]  ;;  %v8945_v11 = vld [vmem:[#allocation28_spill] sm:$0xff] }
 0x4ed   :  { %3467 = vmatprep.subr.bf16.mxu0 %v7784_v19  ;;  %3510 = vmatprep.subr.bf16.mxu1 %v7790_v26  ;;  %v3284_v45 = vmul.f32 %v5888_v2, %v7795_v9  ;;  %v8946_v9 = vld [vmem:[#allocation32_spill] sm:$0xff]  ;;  %v5890_v36 = vpop.eup %5889  ;;  %v8947_v28 = vld [vmem:[#allocation33_spill] sm:$0xff] }
 0x4ee   :  { %5891 = vtanh.f32 %v7969_v27  ;;  %v8948_v14 = vld [vmem:[#allocation36_spill] sm:$0xff] }
 0x4ef   :  { %v7977_v29 = vadd.f32 %v3286_v47, %v3284_v45  ;;  %5893 = vrcp.f32 %v3278_v46  ;;  %v8949_v47 = vld [vmem:[#allocation35_spill] sm:$0xff] }
 0x4f0   :  { %3468 = vmatpush1.bf16.msra.mxu0 %v8939_v31  ;;  %3511 = vmatpush1.bf16.msra.mxu1 %v8940_v38 }
 0x4f1   :  { %3469 = vmatprep.subr.bf16.mxu0 %v8941_v35  ;;  %3512 = vmatprep.subr.bf16.mxu1 %v8942_v37  ;;  %5895 = vtanh.f32 %v7977_v29 }
 0x4f4   :  { %3470 = vmatpush1.bf16.msra.mxu0 %v8943_v63  ;;  %3513 = vmatpush1.bf16.msra.mxu1 %v8944_v51 }
 0x4f5   :  { %3471 = vmatprep.subr.bf16.mxu0 %v8945_v11  ;;  %3514 = vmatprep.subr.bf16.mxu1 %v8946_v9 }
 0x4f8   :  { %v5892_v22 = vpop.eup %5891  ;;  %3472 = vmatpush1.bf16.msra.mxu0 %v8947_v28  ;;  %3515 = vmatpush1.bf16.msra.mxu1 %v8948_v14 }
 0x4f9   :  { %3473 = vmatprep.subr.bf16.mxu0 %v8949_v47  ;;  %3516 = vmatprep.subr.bf16.mxu1 %v7867_v15  ;;  %v3291_v2 = vmul.f32 %v5892_v22, %v5890_v36  ;;  %v5894_v46 = vpop.eup %5893 }
 0x4fb   :  { %4978 = vst [vmem:[%s8718_s6 + $0x40] sm:$0xff] %v3291_v2  ;;  %v5896_v45 = vpop.eup %5895 }
 0x4fc   :  { %3474 = vmatpush1.bf16.msra.mxu0 %v7876_v5  ;;  %3517 = vmatpush1.bf16.msra.mxu1 %v7882_v8  ;;  %v3292_v9 = vmul.f32 %v5896_v45, %v5894_v46 }
 0x4fd   :  { %3616 = vmatprep.subr.bf16.mxu0 %v7456_v39  ;;  %3659 = vmatprep.subr.bf16.mxu1 %v7462_v48  ;;  %v8950_v39 = vld [vmem:[#allocation29_spill] sm:$0xff]  ;;  %v8951_v48 = vld [vmem:[#allocation30_spill] sm:$0xff] }
 0x4fe   :  { %4979 = vst [vmem:[%s8718_s6 + $0x48] sm:$0xff] %v3292_v9  ;;  %v3458_v36 = vpack.c.bf16 %v3292_v9, %v3291_v2 }
 0x500   :  { %3492 = vmatmul.mubr.bf16.vlgmr.msra.gmra.mrb[44].mxu0 %v3458_v36  ;;  %3535 = vmatmul.mubr.bf16.vlgmr.msra.gmra.mrb[44].mxu1 %v3458_v36 }
 0x501   :  { %3617 = vmatpush1.bf16.msra.mxu0 %v7471_v7  ;;  %3660 = vmatpush1.bf16.msra.mxu1 %v7477_v49  ;;  %v8952_v7 = vld [vmem:[#allocation5_spill] sm:$0xff]  ;;  %v8953_v49 = vld [vmem:[#allocation7_spill] sm:$0xff] }
 0x502   :  { %3618 = vmatprep.subr.bf16.mxu0 %v7483_v58  ;;  %3661 = vmatprep.subr.bf16.mxu1 %v7489_v59  ;;  %v8954_v58 = vld [vmem:[#allocation6_spill] sm:$0xff]  ;;  %v8955_v59 = vld [vmem:[#allocation8_spill] sm:$0xff] }
 0x503   :  { %3648 = vmatprep.mubr.bf16.mxu0 %v8861_v1  ;;  %3691 = vmatprep.mubr.bf16.mxu1 %v8861_v1 }
 0x505   :  { %3619 = vmatpush1.bf16.msra.mxu0 %v7497_v61  ;;  %3662 = vmatpush1.bf16.msra.mxu1 %v7503_v62  ;;  %v8956_v61 = vld [vmem:[#allocation9_spill] sm:$0xff]  ;;  %v8957_v62 = vld [vmem:[#allocation11_spill] sm:$0xff] }
 0x506   :  { %3620 = vmatprep.subr.bf16.mxu0 %v7509_v0  ;;  %3663 = vmatprep.subr.bf16.mxu1 %v7515_v30  ;;  %v8958_v0 = vld [vmem:[#allocation10_spill] sm:$0xff]  ;;  %v8959_v30 = vld [vmem:[#allocation13_spill] sm:$0xff] }
 0x509   :  { %3621 = vmatpush1.bf16.msra.mxu0 %v7521_v34  ;;  %3664 = vmatpush1.bf16.msra.mxu1 %v7527_v60  ;;  %v8960_v34 = vld [vmem:[#allocation12_spill] sm:$0xff]  ;;  %v8961_v60 = vld [vmem:[#allocation15_spill] sm:$0xff] }
 0x50a   :  { %3622 = vmatprep.subr.bf16.mxu0 %v7533_v53  ;;  %3665 = vmatprep.subr.bf16.mxu1 %v7539_v18  ;;  %v8962_v53 = vld [vmem:[#allocation14_spill] sm:$0xff]  ;;  %v8963_v18 = vld [vmem:[#allocation16_spill] sm:$0xff] }
 0x50d   :  { %3623 = vmatpush1.bf16.msra.mxu0 %v7545_v20  ;;  %3666 = vmatpush1.bf16.msra.mxu1 %v7551_v32  ;;  %v8964_v20 = vld [vmem:[#allocation17_spill] sm:$0xff] }
 0x50e   :  { %3624 = vmatprep.subr.bf16.mxu0 %v7557_v23  ;;  %3667 = vmatprep.subr.bf16.mxu1 %v7563_v42  ;;  %v8965_v42 = vld [vmem:[#allocation31_spill] sm:$0xff] }
 0x511   :  { %3625 = vmatpush1.bf16.msra.mxu0 %v7569_v25  ;;  %3668 = vmatpush1.bf16.msra.mxu1 %v8950_v39 }
 0x512   :  { %3626 = vmatprep.subr.bf16.mxu0 %v8951_v48  ;;  %3669 = vmatprep.subr.bf16.mxu1 %v8952_v7 }
 0x515   :  { %3627 = vmatpush1.bf16.msra.mxu0 %v8953_v49  ;;  %3670 = vmatpush1.bf16.msra.mxu1 %v8954_v58 }
 0x516   :  { %3628 = vmatprep.subr.bf16.mxu0 %v8955_v59  ;;  %3671 = vmatprep.subr.bf16.mxu1 %v8956_v61 }
 0x519   :  { %3629 = vmatpush1.bf16.msra.mxu0 %v8957_v62  ;;  %3672 = vmatpush1.bf16.msra.mxu1 %v8958_v0 }
 0x51a   :  { %3630 = vmatprep.subr.bf16.mxu0 %v8959_v30  ;;  %3673 = vmatprep.subr.bf16.mxu1 %v8960_v34 }
 0x51d   :  { %3631 = vmatpush1.bf16.msra.mxu0 %v8961_v60  ;;  %3674 = vmatpush1.bf16.msra.mxu1 %v8962_v53 }
 0x51e   :  { %3767 = vmatprep.subr.bf16.mxu0 %v8963_v18  ;;  %3810 = vmatprep.subr.bf16.mxu1 %v8964_v20 }
 0x5b2   :  { %v3342_v32 = vpop.f32.mrb[16].mxu0  ;;  %v3385_v23 = vpop.f32.mrb[16].mxu1 }
 0x5b3   :  { %v5062_v25 = vadd.f32 %v3342_v32, %v8965_v42  ;;  %v3344_v9 = vpop.f32.mrb[17].mxu0  ;;  %v3387_v22 = vpop.f32.mrb[17].mxu1  ;;  %v5094_v0 = vadd.f32 %v3385_v23, %v8898_v40 }
 0x5b4   :  { %v5063_v2 = vadd.f32 %v3344_v9, %v7245_v55  ;;  %v3346_v46 = vpop.f32.mrb[18].mxu0  ;;  %v3389_v45 = vpop.f32.mrb[18].mxu1  ;;  %v5095_v62 = vadd.f32 %v3387_v22, %v8897_v33 }
 0x5b5   :  { %v4980_v36 = vmul.f32 -1.442695, %v5062_v25  ;;  %v5064_v39 = vadd.f32 %v3346_v46, %v8965_v42  ;;  %v3348_v48 = vpop.f32.mrb[19].mxu0  ;;  %v3391_v7 = vpop.f32.mrb[19].mxu1  ;;  %v5096_v60 = vadd.f32 %v3389_v45, %v8898_v40 }
 0x5b6   :  { %v4982_v49 = vmul.f32 -1.442695, %v5063_v2  ;;  %v5065_v58 = vadd.f32 %v3348_v48, %v7245_v55  ;;  %v4984_v30 = vmul.f32 -1.442695, %v5095_v62  ;;  %v5097_v34 = vadd.f32 %v3391_v7, %v8897_v33 }
 0x5b7   :  { %5897 = vpow2.f32 %v4980_v36  ;;  %v4981_v59 = vmul.f32 -1.442695, %v5064_v39 }
 0x5b8   :  { %5899 = vpow2.f32 %v4982_v49  ;;  %v4983_v61 = vmul.f32 -1.442695, %v5065_v58  ;;  %v4985_v32 = vmul.f32 -1.442695, %v5097_v34 }
 0x5b9   :  { %5901 = vpow2.f32 %v4981_v59 }
 0x5ba   :  { %5903 = vpow2.f32 %v4983_v61 }
 0x5bb   :  { %5905 = vtanh.f32 %v5094_v0 }
 0x5bc   :  { %5907 = vpow2.f32 %v4984_v30 }
 0x5bd   :  { %5909 = vtanh.f32 %v5096_v60  ;;  %v8966_v60 = vld [vmem:[#allocation37_spill] sm:$0xff] }
 0x5c1   :  { %v5898_v53 = vpop.eup %5897 }
 0x5c2   :  { %v5900_v18 = vpop.eup %5899  ;;  %v3408_v20 = vadd.f32 1.0, %v5898_v53 }
 0x5c3   :  { %v3420_v25 = vadd.f32 1.0, %v5900_v18  ;;  %v5902_v9 = vpop.eup %5901 }
 0x5c4   :  { %5911 = vrcp.f32 %v3408_v20  ;;  %v3409_v22 = vadd.f32 1.0, %v5902_v9  ;;  %v5904_v2 = vpop.eup %5903 }
 0x5c5   :  { %5913 = vrcp.f32 %v3420_v25  ;;  %v3421_v23 = vadd.f32 1.0, %v5904_v2  ;;  %v5906_v46 = vpop.eup %5905 }
 0x5c6   :  { %5915 = vpow2.f32 %v4985_v32  ;;  %v5908_v36 = vpop.eup %5907  ;;  %v8967_v32 = vld [vmem:[#allocation34_spill] sm:$0xff] }
 0x5c7   :  { %5917 = vrcp.f32 %v3409_v22  ;;  %v5910_v45 = vpop.eup %5909  ;;  %v3434_v49 = vadd.f32 1.0, %v5908_v36 }
 0x5c8   :  { %5919 = vrcp.f32 %v3421_v23 }
 0x5c9   :  { %5921 = vrcp.f32 %v3434_v49 }
 0x5ce   :  { %v5912_v39 = vpop.eup %5911 }
 0x5cf   :  { %v5914_v48 = vpop.eup %5913  ;;  %v3442_v7 = vmul.f32 %v5912_v39, %v5906_v46 }
 0x5d0   :  { %v5916_v58 = vpop.eup %5915  ;;  %v3440_v59 = vmul.f32 %v5914_v48, %v7933_v50 }
 0x5d1   :  { %v5918_v61 = vpop.eup %5917  ;;  %v3435_v34 = vadd.f32 1.0, %v5916_v58 }
 0x5d2   :  { %v8045_v62 = vadd.f32 %v3442_v7, %v3440_v59  ;;  %v3443_v0 = vmul.f32 %v5918_v61, %v5910_v45  ;;  %v5920_v30 = vpop.eup %5919 }
 0x5d3   :  { %v3441_v53 = vmul.f32 %v5920_v30, %v8966_v60  ;;  %v3493_v18 = vpop.f32.mrb[44].mxu0  ;;  %v3536_v20 = vpop.f32.mrb[44].mxu1 }
 0x5d4   :  { %5923 = vtanh.f32 %v8045_v62  ;;  %v5122_v25 = vadd.f32 %v3493_v18, %v8967_v32  ;;  %v3495_v9 = vpop.f32.mrb[45].mxu0  ;;  %v3538_v22 = vpop.f32.mrb[45].mxu1 }
 0x5d5   :  { %v8050_v2 = vadd.f32 %v3443_v0, %v3441_v53  ;;  %v5123_v50 = vadd.f32 %v3495_v9, %v8900_v24  ;;  %v3497_v23 = vpop.f32.mrb[46].mxu0  ;;  %v3540_v46 = vpop.f32.mrb[46].mxu1  ;;  %5925 = vrcp.f32 %v3435_v34  ;;  %v5155_v61 = vadd.f32 %v3538_v22, %v7283_v43 }
 0x5d6   :  { %v4986_v36 = vmul.f32 -1.442695, %v5122_v25  ;;  %v5124_v45 = vadd.f32 %v3497_v23, %v8967_v32  ;;  %v3499_v39 = vpop.f32.mrb[47].mxu0  ;;  %v3542_v48 = vpop.f32.mrb[47].mxu1  ;;  %v5154_v34 = vadd.f32 %v3536_v20, %v7288_v52  ;;  %v5156_v9 = vadd.f32 %v3540_v46, %v7288_v52 }
 0x5d7   :  { %5927 = vtanh.f32 %v8050_v2  ;;  %v4988_v7 = vmul.f32 -1.442695, %v5123_v50  ;;  %v5125_v49 = vadd.f32 %v3499_v39, %v8900_v24  ;;  %v5922_v0 = vpop.eup %5921  ;;  %v4990_v53 = vmul.f32 -1.442695, %v5155_v61 }
 0x5d8   :  { %5929 = vpow2.f32 %v4986_v36  ;;  %v4987_v58 = vmul.f32 -1.442695, %v5124_v45  ;;  %v5157_v18 = vadd.f32 %v3542_v48, %v7283_v43 }
 0x5d9   :  { %5931 = vpow2.f32 %v4988_v7  ;;  %v4989_v59 = vmul.f32 -1.442695, %v5125_v49 }
 0x5da   :  { %5933 = vpow2.f32 %v4987_v58  ;;  %v4991_v39 = vmul.f32 -1.442695, %v5157_v18  ;;  %v8201_v18 = vld [vmem:[%s8715_s3 + $0x60] ss:$16 sps:$4 sm:$0xff]  }
 0x5db   :  { %5935 = vpow2.f32 %v4989_v59 }
 0x5dc   :  { %5937 = vtanh.f32 %v5154_v34  ;;  %v8183_v34 = vld [vmem:[%s8715_s3 + $0x48] ss:$16 sps:$4 sm:$0xff]  }
 0x5dd   :  { %5939 = vpow2.f32 %v4990_v53  ;;  %v8195_v53 = vld [vmem:[%s8715_s3 + $0x6c] ss:$16 sps:$4 sm:$0xff]  }
 0x5de   :  { %v5924_v30 = vpop.eup %5923  ;;  %5941 = vtanh.f32 %v5156_v9  ;;  %v8213_v9 = vld [vmem:[%s8715_s3 + $0x84] ss:$16 sps:$4 sm:$0xff]  }
 0x5df   :  { %v3448_v60 = vmul.f32 %v5924_v30, %v5922_v0  ;;  %v5926_v25 = vpop.eup %5925 }
 0x5e1   :  { %4992 = vst [vmem:[%s8717_s5 + $0x40] sm:$0xff] %v3448_v60  ;;  %v5928_v50 = vpop.eup %5927 }
 0x5e2   :  { %v5930_v23 = vpop.eup %5929  ;;  %v3449_v22 = vmul.f32 %v5928_v50, %v5926_v25  ;;  %v8207_v25 = vld [vmem:[%s8715_s3 + $0x68] ss:$16 sps:$4 sm:$0xff]   ;;  %v8219_v50 = vld [vmem:[%s8715_s3 + $0x8c] ss:$16 sps:$4 sm:$0xff]  }
 0x5e3   :  { %v5932_v36 = vpop.eup %5931  ;;  %v3559_v45 = vadd.f32 1.0, %v5930_v23  ;;  %v8225_v23 = vld [vmem:[%s8715_s3 + $0x80] ss:$16 sps:$4 sm:$0xff]  }
 0x5e4   :  { %v3571_v20 = vadd.f32 1.0, %v5932_v36  ;;  %4993 = vst [vmem:[%s8717_s5 + $0x48] sm:$0xff] %v3449_v22  ;;  %v3615_v48 = vpack.c.bf16 %v3449_v22, %v3448_v60  ;;  %v5934_v46 = vpop.eup %5933  ;;  %v8189_v60 = vld [vmem:[%s8715_s3 + $0x64] ss:$16 sps:$4 sm:$0xff]   ;;  %v8231_v22 = vld [vmem:[%s8715_s3 + $0x88] ss:$16 sps:$4 sm:$0xff]  }
 0x5e5   :  { %5943 = vrcp.f32 %v3559_v45  ;;  %v3560_v7 = vadd.f32 1.0, %v5934_v46  ;;  %v5936_v49 = vpop.eup %5935  ;;  %v8237_v36 = vld [vmem:[%s8715_s3 + $0xa4] ss:$16 sps:$4 sm:$0xff]   ;;  %v8243_v45 = vld [vmem:[%s8715_s3 + $0xac] ss:$16 sps:$4 sm:$0xff]  }
 0x5e6   :  { %5945 = vrcp.f32 %v3571_v20  ;;  %3649 = vmatmul.mubr.bf16.vlgmr.msra.gmra.mrb[20].mxu0 %v3615_v48  ;;  %3692 = vmatmul.mubr.bf16.vlgmr.msra.gmra.mrb[20].mxu1 %v3615_v48  ;;  %v3572_v58 = vadd.f32 1.0, %v5936_v49  ;;  %v5938_v59 = vpop.eup %5937  ;;  %v8255_v20 = vld [vmem:[%s8715_s3 + $0xa8] ss:$16 sps:$4 sm:$0xff]   ;;  %v8261_v48 = vld [vmem:[%s8715_s3 + $0xc4] ss:$16 sps:$4 sm:$0xff]  }
 0x5e7   :  { %5947 = vpow2.f32 %v4991_v39  ;;  %3768 = vmatpush1.bf16.msra.mxu0 %v7695_v44  ;;  %3811 = vmatpush1.bf16.msra.mxu1 %v7701_v10  ;;  %v5940_v44 = vpop.eup %5939  ;;  %v8249_v39 = vld [vmem:[%s8715_s3 + $0xa0] ss:$16 sps:$4 sm:$0xff]   ;;  %v8267_v46 = vld [vmem:[%s8715_s3 + $0xcc] ss:$16 sps:$4 sm:$0xff]   ;;  %v8279_v49 = vld [vmem:[%s8715_s3 + $0xc8] ss:$16 sps:$4 sm:$0xff]  }
 0x5e8   :  { %5949 = vrcp.f32 %v3560_v7  ;;  %3769 = vmatprep.subr.bf16.mxu0 %v7707_v16  ;;  %3812 = vmatprep.subr.bf16.mxu1 %v7713_v13  ;;  %v5942_v10 = vpop.eup %5941  ;;  %v3585_v0 = vadd.f32 1.0, %v5940_v44  ;;  %v8273_v7 = vld [vmem:[%s8715_s3 + $0xc0] ss:$16 sps:$4 sm:$0xff]  }
 0x5e9   :  { %3799 = vmatprep.mubr.bf16.mxu0 %v8861_v1  ;;  %3842 = vmatprep.mubr.bf16.mxu1 %v8861_v1  ;;  %5951 = vrcp.f32 %v3572_v58  ;;  %v8285_v58 = vld [vmem:[%s8715_s3 + $0xe4] ss:$16 sps:$4 sm:$0xff]   ;;  %v8297_v44 = vld [vmem:[%s8715_s3 + $0xe0] ss:$16 sps:$4 sm:$0xff]  }
 0x5ea   :  { %5953 = vrcp.f32 %v3585_v0 }
 0x5eb   :  { %3770 = vmatpush1.bf16.msra.mxu0 %v7721_v21  ;;  %3813 = vmatpush1.bf16.msra.mxu1 %v7727_v6 }
 0x5ec   :  { %3771 = vmatprep.subr.bf16.mxu0 %v7733_v56  ;;  %3814 = vmatprep.subr.bf16.mxu1 %v7739_v12 }
 0x5ef   :  { %v5944_v61 = vpop.eup %5943  ;;  %3772 = vmatpush1.bf16.msra.mxu0 %v8935_v54  ;;  %3815 = vmatpush1.bf16.msra.mxu1 %v8936_v3 }
 0x5f0   :  { %v5946_v16 = vpop.eup %5945  ;;  %v3593_v13 = vmul.f32 %v5944_v61, %v5938_v59  ;;  %3773 = vmatprep.subr.bf16.mxu0 %v8937_v57  ;;  %3816 = vmatprep.subr.bf16.mxu1 %v8938_v4  ;;  %v8291_v59 = vld [vmem:[%s8715_s3 + $0xec] ss:$16 sps:$4 sm:$0xff]   ;;  %v8309_v61 = vld [vmem:[%s8715_s3 + $0x104] ss:$16 sps:$4 sm:$0xff]  }
 0x5f1   :  { %v5948_v21 = vpop.eup %5947  ;;  %v3591_v6 = vmul.f32 %v5946_v16, %v7969_v27  ;;  %v8315_v16 = vld [vmem:[%s8715_s3 + $0x10c] ss:$16 sps:$4 sm:$0xff]  }
 0x5f2   :  { %v5950_v56 = vpop.eup %5949  ;;  %v3586_v3 = vadd.f32 1.0, %v5948_v21  ;;  %8969 = vst [vmem:[#allocation19_spill] sm:$0xff] %v8315_v16 }
 0x5f3   :  { %v8081_v30 = vadd.f32 %v3593_v13, %v3591_v6  ;;  %v3594_v12 = vmul.f32 %v5950_v56, %v5942_v10  ;;  %3774 = vmatpush1.bf16.msra.mxu0 %v7772_v17  ;;  %3817 = vmatpush1.bf16.msra.mxu1 %v7778_v41  ;;  %v5952_v54 = vpop.eup %5951  ;;  %v8968_v41 = vld [vmem:[#allocation32_spill] sm:$0xff] }
 0x5f4   :  { %3775 = vmatprep.subr.bf16.mxu0 %v7784_v19  ;;  %3818 = vmatprep.subr.bf16.mxu1 %v7790_v26  ;;  %v3592_v57 = vmul.f32 %v5952_v54, %v7977_v29  ;;  %v5954_v17 = vpop.eup %5953  ;;  %v8303_v10 = vld [vmem:[%s8715_s3 + $0xe8] ss:$16 sps:$4 sm:$0xff]  }
 0x5f5   :  { %5955 = vtanh.f32 %v8081_v30 }
 0x5f6   :  { %v8089_v4 = vadd.f32 %v3594_v12, %v3592_v57  ;;  %5957 = vrcp.f32 %v3586_v3 }
 0x5f7   :  { %3776 = vmatpush1.bf16.msra.mxu0 %v8939_v31  ;;  %3819 = vmatpush1.bf16.msra.mxu1 %v8940_v38  ;;  %v8112_v38 = vld [vmem:[%s8715_s3 + $0x4] ss:$16 sps:$4 sm:$0xff]  }
 0x5f8   :  { %3777 = vmatprep.subr.bf16.mxu0 %v8941_v35  ;;  %3820 = vmatprep.subr.bf16.mxu1 %v8942_v37  ;;  %5959 = vtanh.f32 %v8089_v4  ;;  %v8133_v35 = vld [vmem:[%s8715_s3 + $0x8] ss:$16 sps:$4 sm:$0xff]   ;;  %v8139_v37 = vld [vmem:[%s8715_s3 + $0x24] ss:$16 sps:$4 sm:$0xff]  }
 0x5fb   :  { %3778 = vmatpush1.bf16.msra.mxu0 %v8943_v63  ;;  %3821 = vmatpush1.bf16.msra.mxu1 %v8944_v51  ;;  %v8145_v63 = vld [vmem:[%s8715_s3 + $0x2c] ss:$16 sps:$4 sm:$0xff]   ;;  %v8153_v51 = vld [vmem:[%s8715_s3 + $0x20] ss:$16 sps:$4 sm:$0xff]  }
 0x5fc   :  { %3779 = vmatprep.subr.bf16.mxu0 %v8945_v11  ;;  %3822 = vmatprep.subr.bf16.mxu1 %v8968_v41  ;;  %v8159_v11 = vld [vmem:[%s8715_s3 + $0x28] ss:$16 sps:$4 sm:$0xff]  }
 0x5ff   :  { %v5956_v19 = vpop.eup %5955  ;;  %3780 = vmatpush1.bf16.msra.mxu0 %v8947_v28  ;;  %3823 = vmatpush1.bf16.msra.mxu1 %v8948_v14  ;;  %v8165_v28 = vld [vmem:[%s8715_s3 + $0x44] ss:$16 sps:$4 sm:$0xff]   ;;  %v8171_v14 = vld [vmem:[%s8715_s3 + $0x4c] ss:$16 sps:$4 sm:$0xff]  }
 0x600   :  { %3781 = vmatprep.subr.bf16.mxu0 %v8949_v47  ;;  %3824 = vmatprep.subr.bf16.mxu1 %v7867_v15  ;;  %v3599_v26 = vmul.f32 %v5956_v19, %v5954_v17  ;;  %v5958_v27 = vpop.eup %5957  ;;  %v8118_v15 = vld [vmem:[%s8715_s3 + $0xc] ss:$16 sps:$4 sm:$0xff]   ;;  %v8177_v47 = vld [vmem:[%s8715_s3 + $0x40] ss:$16 sps:$4 sm:$0xff]  }
 0x602   :  { %4994 = vst [vmem:[%s8718_s6 + $0x30] sm:$0xff] %v3599_v26  ;;  %v5960_v29 = vpop.eup %5959 }
 0x603   :  { %3782 = vmatpush1.bf16.msra.mxu0 %v7876_v5  ;;  %3825 = vmatpush1.bf16.msra.mxu1 %v7882_v8  ;;  %v3600_v31 = vmul.f32 %v5960_v29, %v5958_v27  ;;  %v8127_v8 = vld [vmem:[%s8715_s3] ss:$16 sps:$4 sm:$0xff]  }
 0x604   :  { %3924 = vmatprep.subr.bf16.mxu0 %v8112_v38  ;;  %3967 = vmatprep.subr.bf16.mxu1 %v8118_v15 }
 0x605   :  { %4995 = vst [vmem:[%s8718_s6 + $0x38] sm:$0xff] %v3600_v31  ;;  %v3766_v5 = vpack.c.bf16 %v3600_v31, %v3599_v26 }
 0x607   :  { %3800 = vmatmul.mubr.bf16.vlgmr.msra.gmra.mrb[40].mxu0 %v3766_v5  ;;  %3843 = vmatmul.mubr.bf16.vlgmr.msra.gmra.mrb[40].mxu1 %v3766_v5 }
 0x608   :  { %3925 = vmatpush1.bf16.msra.mxu0 %v8127_v8  ;;  %3968 = vmatpush1.bf16.msra.mxu1 %v8133_v35 }
 0x609   :  { %3926 = vmatprep.subr.bf16.mxu0 %v8139_v37  ;;  %3969 = vmatprep.subr.bf16.mxu1 %v8145_v63 }
 0x60a   :  { %3956 = vmatprep.mubr.bf16.mxu0 %v8861_v1  ;;  %3999 = vmatprep.mubr.bf16.mxu1 %v8861_v1 }
 0x60c   :  { %3927 = vmatpush1.bf16.msra.mxu0 %v8153_v51  ;;  %3970 = vmatpush1.bf16.msra.mxu1 %v8159_v11 }
 0x60d   :  { %3928 = vmatprep.subr.bf16.mxu0 %v8165_v28  ;;  %3971 = vmatprep.subr.bf16.mxu1 %v8171_v14 }
 0x610   :  { %3929 = vmatpush1.bf16.msra.mxu0 %v8177_v47  ;;  %3972 = vmatpush1.bf16.msra.mxu1 %v8183_v34 }
 0x611   :  { %3930 = vmatprep.subr.bf16.mxu0 %v8189_v60  ;;  %3973 = vmatprep.subr.bf16.mxu1 %v8195_v53 }
 0x614   :  { %3931 = vmatpush1.bf16.msra.mxu0 %v8201_v18  ;;  %3974 = vmatpush1.bf16.msra.mxu1 %v8207_v25 }
 0x615   :  { %3932 = vmatprep.subr.bf16.mxu0 %v8213_v9  ;;  %3975 = vmatprep.subr.bf16.mxu1 %v8219_v50 }
 0x618   :  { %3933 = vmatpush1.bf16.msra.mxu0 %v8225_v23  ;;  %3976 = vmatpush1.bf16.msra.mxu1 %v8231_v22 }
 0x619   :  { %3934 = vmatprep.subr.bf16.mxu0 %v8237_v36  ;;  %3977 = vmatprep.subr.bf16.mxu1 %v8243_v45 }
 0x61c   :  { %3935 = vmatpush1.bf16.msra.mxu0 %v8249_v39  ;;  %3978 = vmatpush1.bf16.msra.mxu1 %v8255_v20 }
 0x61d   :  { %3936 = vmatprep.subr.bf16.mxu0 %v8261_v48  ;;  %3979 = vmatprep.subr.bf16.mxu1 %v8267_v46 }
 0x620   :  { %3937 = vmatpush1.bf16.msra.mxu0 %v8273_v7  ;;  %3980 = vmatpush1.bf16.msra.mxu1 %v8279_v49 }
 0x621   :  { %3938 = vmatprep.subr.bf16.mxu0 %v8285_v58  ;;  %3981 = vmatprep.subr.bf16.mxu1 %v8291_v59 }
 0x624   :  { %3939 = vmatpush1.bf16.msra.mxu0 %v8297_v44  ;;  %3982 = vmatpush1.bf16.msra.mxu1 %v8303_v10 }
 0x625   :  { %4075 = vmatprep.subr.bf16.mxu0 %v8309_v61  ;;  %4118 = vmatprep.subr.bf16.mxu1 %v8315_v16 }
 0x6b9   :  { %v3650_v13 = vpop.f32.mrb[20].mxu0  ;;  %v3693_v0 = vpop.f32.mrb[20].mxu1 }
 0x6ba   :  { %v5066_v21 = vadd.f32 %v3650_v13, %v8965_v42  ;;  %v3652_v6 = vpop.f32.mrb[21].mxu0  ;;  %v3695_v56 = vpop.f32.mrb[21].mxu1  ;;  %v5098_v13 = vadd.f32 %v3693_v0, %v8898_v40 }
 0x6bb   :  { %v5067_v12 = vadd.f32 %v3652_v6, %v7245_v55  ;;  %v3654_v54 = vpop.f32.mrb[22].mxu0  ;;  %v3697_v3 = vpop.f32.mrb[22].mxu1  ;;  %v5099_v5 = vadd.f32 %v3695_v56, %v8897_v33 }
 0x6bc   :  { %v4996_v57 = vmul.f32 -1.442695, %v5066_v21  ;;  %v5068_v41 = vadd.f32 %v3654_v54, %v8965_v42  ;;  %v3656_v17 = vpop.f32.mrb[23].mxu0  ;;  %v3699_v19 = vpop.f32.mrb[23].mxu1  ;;  %v5100_v54 = vadd.f32 %v3697_v3, %v8898_v40 }
 0x6bd   :  { %v4998_v26 = vmul.f32 -1.442695, %v5067_v12  ;;  %v5069_v27 = vadd.f32 %v3656_v17, %v7245_v55  ;;  %v5000_v6 = vmul.f32 -1.442695, %v5099_v5  ;;  %v5101_v21 = vadd.f32 %v3699_v19, %v8897_v33 }
 0x6be   :  { %5961 = vpow2.f32 %v4996_v57  ;;  %v4997_v29 = vmul.f32 -1.442695, %v5068_v41 }
 0x6bf   :  { %5963 = vpow2.f32 %v4998_v26  ;;  %v4999_v31 = vmul.f32 -1.442695, %v5069_v27  ;;  %v5001_v57 = vmul.f32 -1.442695, %v5101_v21 }
 0x6c0   :  { %5965 = vpow2.f32 %v4997_v29 }
 0x6c1   :  { %5967 = vpow2.f32 %v4999_v31 }
 0x6c2   :  { %5969 = vtanh.f32 %v5098_v13 }
 0x6c3   :  { %5971 = vpow2.f32 %v5000_v6 }
 0x6c4   :  { %5973 = vtanh.f32 %v5100_v54 }
 0x6c8   :  { %v5962_v42 = vpop.eup %5961 }
 0x6c9   :  { %v5964_v12 = vpop.eup %5963  ;;  %v3716_v16 = vadd.f32 1.0, %v5962_v42 }
 0x6ca   :  { %v3728_v41 = vadd.f32 1.0, %v5964_v12  ;;  %v5966_v17 = vpop.eup %5965 }
 0x6cb   :  { %5975 = vrcp.f32 %v3716_v16  ;;  %v3717_v56 = vadd.f32 1.0, %v5966_v17  ;;  %v5968_v26 = vpop.eup %5967 }
 0x6cc   :  { %5977 = vrcp.f32 %v3728_v41  ;;  %v3729_v0 = vadd.f32 1.0, %v5968_v26  ;;  %v5970_v19 = vpop.eup %5969 }
 0x6cd   :  { %5979 = vpow2.f32 %v5001_v57  ;;  %v5972_v27 = vpop.eup %5971 }
 0x6ce   :  { %5981 = vrcp.f32 %v3717_v56  ;;  %v5974_v3 = vpop.eup %5973  ;;  %v3742_v42 = vadd.f32 1.0, %v5972_v27 }
 0x6cf   :  { %5983 = vrcp.f32 %v3729_v0 }
 0x6d0   :  { %5985 = vrcp.f32 %v3742_v42 }
 0x6d5   :  { %v5976_v29 = vpop.eup %5975 }
 0x6d6   :  { %v5978_v31 = vpop.eup %5977  ;;  %v3750_v5 = vmul.f32 %v5976_v29, %v5970_v19 }
 0x6d7   :  { %v5980_v13 = vpop.eup %5979  ;;  %v3748_v6 = vmul.f32 %v5978_v31, %v8045_v62 }
 0x6d8   :  { %v5982_v21 = vpop.eup %5981  ;;  %v3743_v57 = vadd.f32 1.0, %v5980_v13 }
 0x6d9   :  { %v8327_v54 = vadd.f32 %v3750_v5, %v3748_v6  ;;  %v3751_v16 = vmul.f32 %v5982_v21, %v5974_v3  ;;  %v5984_v12 = vpop.eup %5983 }
 0x6da   :  { %v3749_v41 = vmul.f32 %v5984_v12, %v8050_v2  ;;  %v3801_v17 = vpop.f32.mrb[40].mxu0  ;;  %v3844_v56 = vpop.f32.mrb[40].mxu1 }
 0x6db   :  { %5987 = vtanh.f32 %v8327_v54  ;;  %v5118_v26 = vadd.f32 %v3801_v17, %v8967_v32  ;;  %v3803_v0 = vpop.f32.mrb[41].mxu0  ;;  %v3846_v19 = vpop.f32.mrb[41].mxu1 }
 0x6dc   :  { %v8332_v27 = vadd.f32 %v3751_v16, %v3749_v41  ;;  %v5119_v62 = vadd.f32 %v3803_v0, %v8900_v24  ;;  %v3805_v29 = vpop.f32.mrb[42].mxu0  ;;  %v3848_v31 = vpop.f32.mrb[42].mxu1  ;;  %5989 = vrcp.f32 %v3743_v57  ;;  %v5151_v12 = vadd.f32 %v3846_v19, %v7283_v43 }
 0x6dd   :  { %v5002_v3 = vmul.f32 -1.442695, %v5118_v26  ;;  %v5120_v5 = vadd.f32 %v3805_v29, %v8967_v32  ;;  %v3807_v42 = vpop.f32.mrb[43].mxu0  ;;  %v3850_v13 = vpop.f32.mrb[43].mxu1  ;;  %v5150_v57 = vadd.f32 %v3844_v56, %v7288_v52 }
 0x6de   :  { %5991 = vtanh.f32 %v8332_v27  ;;  %v5004_v2 = vmul.f32 -1.442695, %v5119_v62  ;;  %v5121_v6 = vadd.f32 %v3807_v42, %v8900_v24  ;;  %v5986_v41 = vpop.eup %5985  ;;  %v5006_v0 = vmul.f32 -1.442695, %v5151_v12  ;;  %v8357_v12 = vld [vmem:[%s8715_s3 + $0x108] ss:$16 sps:$4 sm:$0xff]  }
 0x6df   :  { %5993 = vpow2.f32 %v5002_v3  ;;  %v5003_v21 = vmul.f32 -1.442695, %v5120_v5  ;;  %v5153_v29 = vadd.f32 %v3850_v13, %v7283_v43  ;;  %v5152_v62 = vadd.f32 %v3848_v31, %v7288_v52 }
 0x6e0   :  { %5995 = vpow2.f32 %v5004_v2  ;;  %v5005_v16 = vmul.f32 -1.442695, %v5121_v6 }
 0x6e1   :  { %5997 = vpow2.f32 %v5003_v21  ;;  %v5007_v6 = vmul.f32 -1.442695, %v5153_v29 }
 0x6e2   :  { %5999 = vpow2.f32 %v5005_v16 }
 0x6e3   :  { %6001 = vtanh.f32 %v5150_v57  ;;  %v8369_v57 = vld [vmem:[%s8715_s3 + $0x12c] ss:$16 sps:$4 sm:$0xff]  }
 0x6e4   :  { %6003 = vpow2.f32 %v5006_v0  ;;  %v8383_v0 = vld [vmem:[%s8715_s3 + $0x128] ss:$16 sps:$4 sm:$0xff]  }
 0x6e5   :  { %v5988_v17 = vpop.eup %5987  ;;  %6005 = vtanh.f32 %v5152_v62  ;;  %v8389_v62 = vld [vmem:[%s8715_s3 + $0x144] ss:$16 sps:$4 sm:$0xff]  }
 0x6e6   :  { %v3756_v26 = vmul.f32 %v5988_v17, %v5986_v41  ;;  %v5990_v32 = vpop.eup %5989  ;;  %v8363_v17 = vld [vmem:[%s8715_s3 + $0x124] ss:$16 sps:$4 sm:$0xff]  }
 0x6e8   :  { %5008 = vst [vmem:[%s8717_s5 + $0x50] sm:$0xff] %v3756_v26  ;;  %v5992_v3 = vpop.eup %5991 }
 0x6e9   :  { %v5994_v5 = vpop.eup %5993  ;;  %v3757_v19 = vmul.f32 %v5992_v3, %v5990_v32  ;;  %v8351_v32 = vld [vmem:[%s8715_s3 + $0x100] ss:$16 sps:$4 sm:$0xff]   ;;  %v8395_v3 = vld [vmem:[%s8715_s3 + $0x14c] ss:$16 sps:$4 sm:$0xff]  }
 0x6ea   :  { %v5996_v42 = vpop.eup %5995  ;;  %v3867_v2 = vadd.f32 1.0, %v5994_v5 }
 0x6eb   :  { %v3879_v56 = vadd.f32 1.0, %v5996_v42  ;;  %5009 = vst [vmem:[%s8717_s5 + $0x58] sm:$0xff] %v3757_v19  ;;  %v3923_v13 = vpack.c.bf16 %v3757_v19, %v3756_v26  ;;  %v5998_v31 = vpop.eup %5997  ;;  %v8377_v26 = vld [vmem:[%s8715_s3 + $0x120] ss:$16 sps:$4 sm:$0xff]  }
 0x6ec   :  { %6007 = vrcp.f32 %v3867_v2  ;;  %v3868_v21 = vadd.f32 1.0, %v5998_v31  ;;  %v6000_v16 = vpop.eup %5999  ;;  %v8401_v2 = vld [vmem:[%s8715_s3 + $0x140] ss:$16 sps:$4 sm:$0xff]  }
 0x6ed   :  { %6009 = vrcp.f32 %v3879_v56  ;;  %3957 = vmatmul.mubr.bf16.vlgmr.msra.gmra.mrb[24].mxu0 %v3923_v13  ;;  %4000 = vmatmul.mubr.bf16.vlgmr.msra.gmra.mrb[24].mxu1 %v3923_v13  ;;  %v3880_v41 = vadd.f32 1.0, %v6000_v16  ;;  %v6002_v29 = vpop.eup %6001  ;;  %8970 = vst [vmem:[#allocation18_spill] sm:$0xff] %v8401_v2  ;;  %v8419_v16 = vld [vmem:[%s8715_s3 + $0x16c] ss:$16 sps:$4 sm:$0xff]  }
 0x6ee   :  { %6011 = vpow2.f32 %v5007_v6  ;;  %4076 = vmatpush1.bf16.msra.mxu0 %v8351_v32  ;;  %4119 = vmatpush1.bf16.msra.mxu1 %v8357_v12  ;;  %v6004_v5 = vpop.eup %6003  ;;  %v8407_v6 = vld [vmem:[%s8715_s3 + $0x148] ss:$16 sps:$4 sm:$0xff]   ;;  %8973 = vst [vmem:[#allocation23_spill] sm:$0xff] %v8419_v16 }
 0x6ef   :  { %6013 = vrcp.f32 %v3868_v21  ;;  %4077 = vmatprep.subr.bf16.mxu0 %v8363_v17  ;;  %4120 = vmatprep.subr.bf16.mxu1 %v8369_v57  ;;  %v6006_v19 = vpop.eup %6005  ;;  %8971 = vst [vmem:[#allocation21_spill] sm:$0xff] %v8407_v6  ;;  %v3893_v31 = vadd.f32 1.0, %v6004_v5  ;;  %v8413_v21 = vld [vmem:[%s8715_s3 + $0x164] ss:$16 sps:$4 sm:$0xff]  }
 0x6f0   :  { %4107 = vmatprep.mubr.bf16.mxu0 %v8861_v1  ;;  %4150 = vmatprep.mubr.bf16.mxu1 %v8861_v1  ;;  %6015 = vrcp.f32 %v3880_v41  ;;  %8972 = vst [vmem:[#allocation20_spill] sm:$0xff] %v8413_v21 }
 0x6f1   :  { %6017 = vrcp.f32 %v3893_v31  ;;  %v8462_v31 = vld [vmem:[%s8715_s3 + $0x188] ss:$16 sps:$4 sm:$0xff]  }
 0x6f2   :  { %4078 = vmatpush1.bf16.msra.mxu0 %v8377_v26  ;;  %4121 = vmatpush1.bf16.msra.mxu1 %v8383_v0  ;;  %8975 = vst [vmem:[#allocation24_spill] sm:$0xff] %v8462_v31 }
 0x6f3   :  { %4079 = vmatprep.subr.bf16.mxu0 %v8389_v62  ;;  %4122 = vmatprep.subr.bf16.mxu1 %v8395_v3 }
 0x6f6   :  { %v6008_v42 = vpop.eup %6007  ;;  %4080 = vmatpush1.bf16.msra.mxu0 %v8401_v2  ;;  %4123 = vmatpush1.bf16.msra.mxu1 %v8407_v6 }
 0x6f7   :  { %v6010_v56 = vpop.eup %6009  ;;  %v3901_v13 = vmul.f32 %v6008_v42, %v6002_v29  ;;  %4081 = vmatprep.subr.bf16.mxu0 %v8413_v21  ;;  %4124 = vmatprep.subr.bf16.mxu1 %v8419_v16  ;;  %v8428_v42 = vld [vmem:[%s8715_s3 + $0x160] ss:$16 sps:$4 sm:$0xff]   ;;  %v8434_v21 = vld [vmem:[%s8715_s3 + $0x168] ss:$16 sps:$4 sm:$0xff]  }
 0x6f8   :  { %v6012_v41 = vpop.eup %6011  ;;  %v3899_v6 = vmul.f32 %v6010_v56, %v8081_v30 }
 0x6f9   :  { %v6014_v2 = vpop.eup %6013  ;;  %v3894_v30 = vadd.f32 1.0, %v6012_v41  ;;  %v8481_v41 = vld [vmem:[%s8715_s3 + $0x1a0] ss:$16 sps:$4 sm:$0xff]  }
 0x6fa   :  { %v8423_v29 = vadd.f32 %v3901_v13, %v3899_v6  ;;  %v3902_v5 = vmul.f32 %v6014_v2, %v6006_v19  ;;  %4082 = vmatpush1.bf16.msra.mxu0 %v8428_v42  ;;  %4125 = vmatpush1.bf16.msra.mxu1 %v8434_v21  ;;  %v6016_v16 = vpop.eup %6015  ;;  %v8440_v19 = vld [vmem:[%s8715_s3 + $0x184] ss:$16 sps:$4 sm:$0xff]   ;;  %v8446_v2 = vld [vmem:[%s8715_s3 + $0x18c] ss:$16 sps:$4 sm:$0xff]   ;;  %v8456_v13 = vld [vmem:[%s8715_s3 + $0x180] ss:$16 sps:$4 sm:$0xff]  }
 0x6fb   :  { %4083 = vmatprep.subr.bf16.mxu0 %v8440_v19  ;;  %4126 = vmatprep.subr.bf16.mxu1 %v8446_v2  ;;  %v3900_v6 = vmul.f32 %v6016_v16, %v8089_v4  ;;  %8974 = vst [vmem:[#allocation22_spill] sm:$0xff] %v8456_v13  ;;  %v8468_v4 = vld [vmem:[%s8715_s3 + $0x1a4] ss:$16 sps:$4 sm:$0xff]   ;;  %v8474_v16 = vld [vmem:[%s8715_s3 + $0x1ac] ss:$16 sps:$4 sm:$0xff]   ;;  %8978 = vst [vmem:[#allocation27_spill] sm:$0xff] %v8481_v41 }
 0x6fc   :  { %6019 = vtanh.f32 %v8423_v29  ;;  %8976 = vst [vmem:[#allocation25_spill] sm:$0xff] %v8468_v4  ;;  %8977 = vst [vmem:[#allocation26_spill] sm:$0xff] %v8474_v16 }
 0x6fd   :  { %v8451_v56 = vadd.f32 %v3902_v5, %v3900_v6  ;;  %6021 = vrcp.f32 %v3894_v30  ;;  %v8487_v5 = vld [vmem:[%s8715_s3 + $0x1a8] ss:$16 sps:$4 sm:$0xff]   ;;  %v8493_v30 = vld [vmem:[%s8715_s3 + $0x1c4] ss:$16 sps:$4 sm:$0xff]   ;;  %v8499_v6 = vld [vmem:[%s8715_s3 + $0x1cc] ss:$16 sps:$4 sm:$0xff]  }
 0x6fe   :  { %4084 = vmatpush1.bf16.msra.mxu0 %v8456_v13  ;;  %4127 = vmatpush1.bf16.msra.mxu1 %v8462_v31  ;;  %8979 = vst [vmem:[#allocation28_spill] sm:$0xff] %v8487_v5  ;;  %8980 = vst [vmem:[#allocation33_spill] sm:$0xff] %v8493_v30  ;;  %v8532_v13 = vld [vmem:[%s8715_s3 + $0x1e0] ss:$16 sps:$4 sm:$0xff]  }
 0x6ff   :  { %4085 = vmatprep.subr.bf16.mxu0 %v8468_v4  ;;  %4128 = vmatprep.subr.bf16.mxu1 %v8474_v16  ;;  %6023 = vtanh.f32 %v8451_v56  ;;  %8981 = vst [vmem:[#allocation36_spill] sm:$0xff] %v8499_v6  ;;  %v8523_v4 = vld [vmem:[%s8715_s3 + $0x1ec] ss:$16 sps:$4 sm:$0xff]  }
 0x702   :  { %4086 = vmatpush1.bf16.msra.mxu0 %v8481_v41  ;;  %4129 = vmatpush1.bf16.msra.mxu1 %v8487_v5  ;;  %v6018_v41 = vpop.eup %6017  ;;  %v8505_v5 = vld [vmem:[%s8715_s3 + $0x1c0] ss:$16 sps:$4 sm:$0xff]  }
 0x703   :  { %4087 = vmatprep.subr.bf16.mxu0 %v8493_v30  ;;  %4130 = vmatprep.subr.bf16.mxu1 %v8499_v6  ;;  %8982 = vst [vmem:[#allocation35_spill] sm:$0xff] %v8505_v5  ;;  %v8511_v30 = vld [vmem:[%s8715_s3 + $0x1c8] ss:$16 sps:$4 sm:$0xff]   ;;  %v8517_v6 = vld [vmem:[%s8715_s3 + $0x1e4] ss:$16 sps:$4 sm:$0xff]  }
 0x704   :  { %8983 = vst [vmem:[#allocation29_spill] sm:$0xff] %v8511_v30  ;;  %8984 = vst [vmem:[#allocation30_spill] sm:$0xff] %v8517_v6 }
 0x706   :  { %v6020_v16 = vpop.eup %6019  ;;  %4088 = vmatpush1.bf16.msra.mxu0 %v8505_v5  ;;  %4131 = vmatpush1.bf16.msra.mxu1 %v8511_v30 }
 0x707   :  { %4089 = vmatprep.subr.bf16.mxu0 %v8517_v6  ;;  %4132 = vmatprep.subr.bf16.mxu1 %v8523_v4  ;;  %v3907_v5 = vmul.f32 %v6020_v16, %v6018_v41  ;;  %v6022_v31 = vpop.eup %6021  ;;  %v8538_v6 = vld [vmem:[%s8715_s3 + $0x1e8] ss:$16 sps:$4 sm:$0xff]  }
 0x709   :  { %5010 = vst [vmem:[%s8718_s6 + $0x20] sm:$0xff] %v3907_v5  ;;  %v6024_v30 = vpop.eup %6023 }
 0x70a   :  { %4090 = vmatpush1.bf16.msra.mxu0 %v8532_v13  ;;  %4133 = vmatpush1.bf16.msra.mxu1 %v8538_v6  ;;  %v3908_v16 = vmul.f32 %v6024_v30, %v6022_v31 }
 0x70b   :  { %4232 = vmatprep.subr.bf16.mxu0 %v8112_v38  ;;  %4275 = vmatprep.subr.bf16.mxu1 %v8118_v15  ;;  %v8985_v38 = vld [vmem:[#allocation19_spill] sm:$0xff] }
 0x70c   :  { %5011 = vst [vmem:[%s8718_s6 + $0x28] sm:$0xff] %v3908_v16  ;;  %v4074_v41 = vpack.c.bf16 %v3908_v16, %v3907_v5 }
 0x70e   :  { %4108 = vmatmul.mubr.bf16.vlgmr.msra.gmra.mrb[36].mxu0 %v4074_v41  ;;  %4151 = vmatmul.mubr.bf16.vlgmr.msra.gmra.mrb[36].mxu1 %v4074_v41 }
 0x70f   :  { %4233 = vmatpush1.bf16.msra.mxu0 %v8127_v8  ;;  %4276 = vmatpush1.bf16.msra.mxu1 %v8133_v35  ;;  %v8986_v35 = vld [vmem:[#allocation31_spill] sm:$0xff] }
 0x710   :  { %4234 = vmatprep.subr.bf16.mxu0 %v8139_v37  ;;  %4277 = vmatprep.subr.bf16.mxu1 %v8145_v63 }
 0x711   :  { %4264 = vmatprep.mubr.bf16.mxu0 %v8861_v1  ;;  %4307 = vmatprep.mubr.bf16.mxu1 %v8861_v1 }
 0x713   :  { %4235 = vmatpush1.bf16.msra.mxu0 %v8153_v51  ;;  %4278 = vmatpush1.bf16.msra.mxu1 %v8159_v11 }
 0x714   :  { %4236 = vmatprep.subr.bf16.mxu0 %v8165_v28  ;;  %4279 = vmatprep.subr.bf16.mxu1 %v8171_v14 }
 0x717   :  { %4237 = vmatpush1.bf16.msra.mxu0 %v8177_v47  ;;  %4280 = vmatpush1.bf16.msra.mxu1 %v8183_v34 }
 0x718   :  { %4238 = vmatprep.subr.bf16.mxu0 %v8189_v60  ;;  %4281 = vmatprep.subr.bf16.mxu1 %v8195_v53 }
 0x71b   :  { %4239 = vmatpush1.bf16.msra.mxu0 %v8201_v18  ;;  %4282 = vmatpush1.bf16.msra.mxu1 %v8207_v25 }
 0x71c   :  { %4240 = vmatprep.subr.bf16.mxu0 %v8213_v9  ;;  %4283 = vmatprep.subr.bf16.mxu1 %v8219_v50 }
 0x71f   :  { %4241 = vmatpush1.bf16.msra.mxu0 %v8225_v23  ;;  %4284 = vmatpush1.bf16.msra.mxu1 %v8231_v22 }
 0x720   :  { %4242 = vmatprep.subr.bf16.mxu0 %v8237_v36  ;;  %4285 = vmatprep.subr.bf16.mxu1 %v8243_v45 }
 0x723   :  { %4243 = vmatpush1.bf16.msra.mxu0 %v8249_v39  ;;  %4286 = vmatpush1.bf16.msra.mxu1 %v8255_v20 }
 0x724   :  { %4244 = vmatprep.subr.bf16.mxu0 %v8261_v48  ;;  %4287 = vmatprep.subr.bf16.mxu1 %v8267_v46 }
 0x727   :  { %4245 = vmatpush1.bf16.msra.mxu0 %v8273_v7  ;;  %4288 = vmatpush1.bf16.msra.mxu1 %v8279_v49 }
 0x728   :  { %4246 = vmatprep.subr.bf16.mxu0 %v8285_v58  ;;  %4289 = vmatprep.subr.bf16.mxu1 %v8291_v59 }
 0x72b   :  { %4247 = vmatpush1.bf16.msra.mxu0 %v8297_v44  ;;  %4290 = vmatpush1.bf16.msra.mxu1 %v8303_v10 }
 0x72c   :  { %4383 = vmatprep.subr.bf16.mxu0 %v8309_v61  ;;  %4426 = vmatprep.subr.bf16.mxu1 %v8985_v38 }
 0x7c0   :  { %v3958_v15 = vpop.f32.mrb[24].mxu0  ;;  %v4001_v8 = vpop.f32.mrb[24].mxu1 }
 0x7c1   :  { %v5070_v37 = vadd.f32 %v3958_v15, %v8986_v35  ;;  %v3960_v63 = vpop.f32.mrb[25].mxu0  ;;  %v4003_v51 = vpop.f32.mrb[25].mxu1  ;;  %v5102_v22 = vadd.f32 %v4001_v8, %v8898_v40 }
 0x7c2   :  { %v5071_v11 = vadd.f32 %v3960_v63, %v7245_v55  ;;  %v3962_v28 = vpop.f32.mrb[26].mxu0  ;;  %v4005_v14 = vpop.f32.mrb[26].mxu1  ;;  %v5103_v23 = vadd.f32 %v4003_v51, %v8897_v33 }
 0x7c3   :  { %v5012_v47 = vmul.f32 -1.442695, %v5070_v37  ;;  %v5072_v34 = vadd.f32 %v3962_v28, %v8986_v35  ;;  %v3964_v60 = vpop.f32.mrb[27].mxu0  ;;  %v4007_v53 = vpop.f32.mrb[27].mxu1  ;;  %v5104_v39 = vadd.f32 %v4005_v14, %v8898_v40 }
 0x7c4   :  { %v5014_v18 = vmul.f32 -1.442695, %v5071_v11  ;;  %v5073_v25 = vadd.f32 %v3964_v60, %v7245_v55  ;;  %v5016_v36 = vmul.f32 -1.442695, %v5103_v23  ;;  %v5105_v45 = vadd.f32 %v4007_v53, %v8897_v33  ;;  %v8987_v60 = vld [vmem:[#allocation34_spill] sm:$0xff] }
 0x7c5   :  { %6025 = vpow2.f32 %v5012_v47  ;;  %v5013_v9 = vmul.f32 -1.442695, %v5072_v34 }
 0x7c6   :  { %6027 = vpow2.f32 %v5014_v18  ;;  %v5015_v50 = vmul.f32 -1.442695, %v5073_v25  ;;  %v5017_v7 = vmul.f32 -1.442695, %v5105_v45 }
 0x7c7   :  { %6029 = vpow2.f32 %v5013_v9 }
 0x7c8   :  { %6031 = vpow2.f32 %v5015_v50 }
 0x7c9   :  { %6033 = vtanh.f32 %v5102_v22 }
 0x7ca   :  { %6035 = vpow2.f32 %v5016_v36 }
 0x7cb   :  { %6037 = vtanh.f32 %v5104_v39 }
 0x7cf   :  { %v6026_v20 = vpop.eup %6025 }
 0x7d0   :  { %v6028_v48 = vpop.eup %6027  ;;  %v4024_v46 = vadd.f32 1.0, %v6026_v20 }
 0x7d1   :  { %v4036_v49 = vadd.f32 1.0, %v6028_v48  ;;  %v6030_v58 = vpop.eup %6029 }
 0x7d2   :  { %6039 = vrcp.f32 %v4024_v46  ;;  %v4025_v59 = vadd.f32 1.0, %v6030_v58  ;;  %v6032_v44 = vpop.eup %6031 }
 0x7d3   :  { %6041 = vrcp.f32 %v4036_v49  ;;  %v4037_v10 = vadd.f32 1.0, %v6032_v44  ;;  %v6034_v61 = vpop.eup %6033 }
 0x7d4   :  { %6043 = vpow2.f32 %v5017_v7  ;;  %v6036_v31 = vpop.eup %6035 }
 0x7d5   :  { %6045 = vrcp.f32 %v4025_v59  ;;  %v6038_v5 = vpop.eup %6037  ;;  %v4050_v38 = vadd.f32 1.0, %v6036_v31 }
 0x7d6   :  { %6047 = vrcp.f32 %v4037_v10 }
 0x7d7   :  { %6049 = vrcp.f32 %v4050_v38 }
 0x7dc   :  { %v6040_v30 = vpop.eup %6039 }
 0x7dd   :  { %v6042_v16 = vpop.eup %6041  ;;  %v4058_v41 = vmul.f32 %v6040_v30, %v6034_v61 }
 0x7de   :  { %v6044_v15 = vpop.eup %6043  ;;  %v4056_v8 = vmul.f32 %v6042_v16, %v8327_v54 }
 0x7df   :  { %v6046_v37 = vpop.eup %6045  ;;  %v4051_v28 = vadd.f32 1.0, %v6044_v15 }
 0x7e0   :  { %v8589_v63 = vadd.f32 %v4058_v41, %v4056_v8  ;;  %v4059_v51 = vmul.f32 %v6046_v37, %v6038_v5  ;;  %v6048_v11 = vpop.eup %6047 }
 0x7e1   :  { %v4057_v14 = vmul.f32 %v6048_v11, %v8332_v27  ;;  %v4109_v47 = vpop.f32.mrb[36].mxu0  ;;  %v4152_v34 = vpop.f32.mrb[36].mxu1 }
 0x7e2   :  { %6051 = vtanh.f32 %v8589_v63  ;;  %v5114_v53 = vadd.f32 %v4109_v47, %v8987_v60  ;;  %v4111_v18 = vpop.f32.mrb[37].mxu0  ;;  %v4154_v25 = vpop.f32.mrb[37].mxu1  ;;  %v5146_v59 = vadd.f32 %v4152_v34, %v7288_v52 }
 0x7e3   :  { %v8594_v9 = vadd.f32 %v4059_v51, %v4057_v14  ;;  %v5115_v54 = vadd.f32 %v4111_v18, %v8900_v24  ;;  %v4113_v50 = vpop.f32.mrb[38].mxu0  ;;  %v4156_v23 = vpop.f32.mrb[38].mxu1  ;;  %6053 = vrcp.f32 %v4051_v28  ;;  %v5147_v7 = vadd.f32 %v4154_v25, %v7283_v43 }
 0x7e4   :  { %v5018_v22 = vmul.f32 -1.442695, %v5114_v53  ;;  %v5116_v36 = vadd.f32 %v4113_v50, %v8987_v60  ;;  %v4115_v45 = vpop.f32.mrb[39].mxu0  ;;  %v4158_v39 = vpop.f32.mrb[39].mxu1  ;;  %v5148_v5 = vadd.f32 %v4156_v23, %v7288_v52 }
 0x7e5   :  { %6055 = vtanh.f32 %v8594_v9  ;;  %v5020_v27 = vmul.f32 -1.442695, %v5115_v54  ;;  %v5117_v20 = vadd.f32 %v4115_v45, %v8900_v24  ;;  %v6050_v49 = vpop.eup %6049  ;;  %v5022_v10 = vmul.f32 -1.442695, %v5147_v7  ;;  %v8990_v54 = vld [vmem:[#allocation20_spill] sm:$0xff]  ;;  %v9000_v7 = vld [vmem:[#allocation35_spill] sm:$0xff] }
 0x7e6   :  { %6057 = vpow2.f32 %v5018_v22  ;;  %v5019_v48 = vmul.f32 -1.442695, %v5116_v36  ;;  %v5149_v61 = vadd.f32 %v4158_v39, %v7283_v43  ;;  %v8992_v39 = vld [vmem:[#allocation22_spill] sm:$0xff] }
 0x7e7   :  { %6059 = vpow2.f32 %v5020_v27  ;;  %v5021_v46 = vmul.f32 -1.442695, %v5117_v20  ;;  %v8993_v27 = vld [vmem:[#allocation24_spill] sm:$0xff]  ;;  %v8998_v20 = vld [vmem:[#allocation33_spill] sm:$0xff] }
 0x7e8   :  { %6061 = vpow2.f32 %v5019_v48  ;;  %v5023_v8 = vmul.f32 -1.442695, %v5149_v61 }
 0x7e9   :  { %6063 = vpow2.f32 %v5021_v46 }
 0x7ea   :  { %6065 = vtanh.f32 %v5146_v59 }
 0x7eb   :  { %6067 = vpow2.f32 %v5022_v10 }
 0x7ec   :  { %v6052_v58 = vpop.eup %6051  ;;  %6069 = vtanh.f32 %v5148_v5 }
 0x7ed   :  { %v4064_v44 = vmul.f32 %v6052_v58, %v6050_v49  ;;  %v6054_v31 = vpop.eup %6053  ;;  %v9001_v49 = vld [vmem:[#allocation29_spill] sm:$0xff]  ;;  %v9002_v58 = vld [vmem:[#allocation30_spill] sm:$0xff] }
 0x7ef   :  { %5024 = vst [vmem:[%s8717_s5 + $0x60] sm:$0xff] %v4064_v44  ;;  %v6056_v30 = vpop.eup %6055 }
 0x7f0   :  { %v6058_v16 = vpop.eup %6057  ;;  %v4065_v41 = vmul.f32 %v6056_v30, %v6054_v31 }
 0x7f1   :  { %v6060_v38 = vpop.eup %6059  ;;  %v4175_v15 = vadd.f32 1.0, %v6058_v16 }
 0x7f2   :  { %v4187_v37 = vadd.f32 1.0, %v6060_v38  ;;  %5025 = vst [vmem:[%s8717_s5 + $0x68] sm:$0xff] %v4065_v41  ;;  %v4231_v51 = vpack.c.bf16 %v4065_v41, %v4064_v44  ;;  %v6062_v11 = vpop.eup %6061 }
 0x7f3   :  { %6071 = vrcp.f32 %v4175_v15  ;;  %v4176_v28 = vadd.f32 1.0, %v6062_v11  ;;  %v6064_v14 = vpop.eup %6063 }
 0x7f4   :  { %6073 = vrcp.f32 %v4187_v37  ;;  %4265 = vmatmul.mubr.bf16.vlgmr.msra.gmra.mrb[28].mxu0 %v4231_v51  ;;  %4308 = vmatmul.mubr.bf16.vlgmr.msra.gmra.mrb[28].mxu1 %v4231_v51  ;;  %v4188_v47 = vadd.f32 1.0, %v6064_v14  ;;  %v6066_v34 = vpop.eup %6065 }
 0x7f5   :  { %6075 = vpow2.f32 %v5023_v8  ;;  %4384 = vmatpush1.bf16.msra.mxu0 %v8351_v32  ;;  %4427 = vmatpush1.bf16.msra.mxu1 %v8357_v12  ;;  %v6068_v32 = vpop.eup %6067 }
 0x7f6   :  { %6077 = vrcp.f32 %v4176_v28  ;;  %4385 = vmatprep.subr.bf16.mxu0 %v8363_v17  ;;  %4428 = vmatprep.subr.bf16.mxu1 %v8369_v57  ;;  %v6070_v12 = vpop.eup %6069  ;;  %v8988_v17 = vld [vmem:[#allocation18_spill] sm:$0xff]  ;;  %v8989_v57 = vld [vmem:[#allocation21_spill] sm:$0xff] }
 0x7f7   :  { %4415 = vmatprep.mubr.bf16.mxu0 %v8861_v1  ;;  %4458 = vmatprep.mubr.bf16.mxu1 %v8861_v1  ;;  %6079 = vrcp.f32 %v4188_v47  ;;  %v4201_v1 = vadd.f32 1.0, %v6068_v32 }
 0x7f9   :  { %4386 = vmatpush1.bf16.msra.mxu0 %v8377_v26  ;;  %4429 = vmatpush1.bf16.msra.mxu1 %v8383_v0  ;;  %v8991_v26 = vld [vmem:[#allocation23_spill] sm:$0xff]  ;;  %6081 = vrcp.f32 %v4201_v1 }
 0x7fa   :  { %4387 = vmatprep.subr.bf16.mxu0 %v8389_v62  ;;  %4430 = vmatprep.subr.bf16.mxu1 %v8395_v3 }
 0x7fd   :  { %v6072_v53 = vpop.eup %6071  ;;  %4388 = vmatpush1.bf16.msra.mxu0 %v8988_v17  ;;  %4431 = vmatpush1.bf16.msra.mxu1 %v8989_v57 }
 0x7fe   :  { %v6074_v18 = vpop.eup %6073  ;;  %v4209_v25 = vmul.f32 %v6072_v53, %v6066_v34  ;;  %4389 = vmatprep.subr.bf16.mxu0 %v8990_v54  ;;  %4432 = vmatprep.subr.bf16.mxu1 %v8991_v26 }
 0x7ff   :  { %v6076_v0 = vpop.eup %6075  ;;  %v4207_v50 = vmul.f32 %v6074_v18, %v8423_v29 }
 0x800   :  { %v6078_v62 = vpop.eup %6077  ;;  %v4202_v36 = vadd.f32 1.0, %v6076_v0 }
 0x801   :  { %v8625_v23 = vadd.f32 %v4209_v25, %v4207_v50  ;;  %v4210_v3 = vmul.f32 %v6078_v62, %v6070_v12  ;;  %4390 = vmatpush1.bf16.msra.mxu0 %v8428_v42  ;;  %4433 = vmatpush1.bf16.msra.mxu1 %v8434_v21  ;;  %v6080_v22 = vpop.eup %6079  ;;  %v8994_v42 = vld [vmem:[#allocation25_spill] sm:$0xff]  ;;  %v8995_v21 = vld [vmem:[#allocation26_spill] sm:$0xff] }
 0x802   :  { %4391 = vmatprep.subr.bf16.mxu0 %v8440_v19  ;;  %4434 = vmatprep.subr.bf16.mxu1 %v8446_v2  ;;  %v4208_v45 = vmul.f32 %v6080_v22, %v8451_v56  ;;  %v8996_v19 = vld [vmem:[#allocation27_spill] sm:$0xff]  ;;  %v8997_v2 = vld [vmem:[#allocation28_spill] sm:$0xff] }
 0x803   :  { %6083 = vtanh.f32 %v8625_v23  ;;  %v8999_v56 = vld [vmem:[#allocation36_spill] sm:$0xff]  ;;  %v6082_v48 = vpop.eup %6081 }
 0x804   :  { %v8633_v29 = vadd.f32 %v4210_v3, %v4208_v45  ;;  %6085 = vrcp.f32 %v4202_v36 }
 0x805   :  { %4392 = vmatpush1.bf16.msra.mxu0 %v8992_v39  ;;  %4435 = vmatpush1.bf16.msra.mxu1 %v8993_v27 }
 0x806   :  { %4393 = vmatprep.subr.bf16.mxu0 %v8994_v42  ;;  %4436 = vmatprep.subr.bf16.mxu1 %v8995_v21  ;;  %6087 = vtanh.f32 %v8633_v29 }
 0x809   :  { %4394 = vmatpush1.bf16.msra.mxu0 %v8996_v19  ;;  %4437 = vmatpush1.bf16.msra.mxu1 %v8997_v2 }
 0x80a   :  { %4395 = vmatprep.subr.bf16.mxu0 %v8998_v20  ;;  %4438 = vmatprep.subr.bf16.mxu1 %v8999_v56 }
 0x80d   :  { %v6084_v46 = vpop.eup %6083  ;;  %4396 = vmatpush1.bf16.msra.mxu0 %v9000_v7  ;;  %4439 = vmatpush1.bf16.msra.mxu1 %v9001_v49 }
 0x80e   :  { %4397 = vmatprep.subr.bf16.mxu0 %v9002_v58  ;;  %4440 = vmatprep.subr.bf16.mxu1 %v8523_v4  ;;  %v4215_v59 = vmul.f32 %v6084_v46, %v6082_v48  ;;  %v6086_v44 = vpop.eup %6085 }
 0x810   :  { %5026 = vst [vmem:[%s8718_s6 + $0x10] sm:$0xff] %v4215_v59  ;;  %v6088_v10 = vpop.eup %6087 }
 0x811   :  { %4398 = vmatpush1.bf16.msra.mxu0 %v8532_v13  ;;  %4441 = vmatpush1.bf16.msra.mxu1 %v8538_v6  ;;  %v4216_v61 = vmul.f32 %v6088_v10, %v6086_v44 }
 0x813   :  { %5027 = vst [vmem:[%s8718_s6 + $0x18] sm:$0xff] %v4216_v61  ;;  %v4382_v31 = vpack.c.bf16 %v4216_v61, %v4215_v59 }
 0x815   :  { %4416 = vmatmul.mubr.bf16.vlgmr.msra.gmra.mrb[32].mxu0 %v4382_v31  ;;  %4459 = vmatmul.mubr.bf16.vlgmr.msra.gmra.mrb[32].mxu1 %v4382_v31 }
 0x8c7   :  { %v4266_v4 = vpop.f32.mrb[28].mxu0  ;;  %v4309_v5 = vpop.f32.mrb[28].mxu1 }
 0x8c8   :  { %v5074_v30 = vadd.f32 %v4266_v4, %v8986_v35  ;;  %v4268_v16 = vpop.f32.mrb[29].mxu0  ;;  %v4311_v41 = vpop.f32.mrb[29].mxu1  ;;  %v5106_v32 = vadd.f32 %v4309_v5, %v8898_v40 }
 0x8c9   :  { %v5075_v38 = vadd.f32 %v4268_v16, %v7245_v55  ;;  %v4270_v15 = vpop.f32.mrb[30].mxu0  ;;  %v4313_v13 = vpop.f32.mrb[30].mxu1  ;;  %v5107_v34 = vadd.f32 %v4311_v41, %v8897_v33 }
 0x8ca   :  { %v5028_v8 = vmul.f32 -1.442695, %v5074_v30  ;;  %v5076_v6 = vadd.f32 %v4270_v15, %v8986_v35  ;;  %v4272_v37 = vpop.f32.mrb[31].mxu0  ;;  %v4315_v51 = vpop.f32.mrb[31].mxu1  ;;  %v5108_v35 = vadd.f32 %v4313_v13, %v8898_v40 }
 0x8cb   :  { %v5030_v11 = vmul.f32 -1.442695, %v5075_v38  ;;  %v5077_v28 = vadd.f32 %v4272_v37, %v7245_v55  ;;  %v5032_v12 = vmul.f32 -1.442695, %v5107_v34  ;;  %v5109_v53 = vadd.f32 %v4315_v51, %v8897_v33 }
 0x8cc   :  { %6089 = vpow2.f32 %v5028_v8  ;;  %v5029_v14 = vmul.f32 -1.442695, %v5076_v6 }
 0x8cd   :  { %6091 = vpow2.f32 %v5030_v11  ;;  %v5031_v47 = vmul.f32 -1.442695, %v5077_v28  ;;  %v5033_v55 = vmul.f32 -1.442695, %v5109_v53 }
 0x8ce   :  { %6093 = vpow2.f32 %v5029_v14 }
 0x8cf   :  { %6095 = vpow2.f32 %v5031_v47 }
 0x8d0   :  { %6097 = vtanh.f32 %v5106_v32 }
 0x8d1   :  { %6099 = vpow2.f32 %v5032_v12 }
 0x8d2   :  { %6101 = vtanh.f32 %v5108_v35 }
 0x8d6   :  { %v6090_v17 = vpop.eup %6089 }
 0x8d7   :  { %v6092_v57 = vpop.eup %6091  ;;  %v4332_v18 = vadd.f32 1.0, %v6090_v17 }
 0x8d8   :  { %v4344_v25 = vadd.f32 1.0, %v6092_v57  ;;  %v6094_v1 = vpop.eup %6093 }
 0x8d9   :  { %6103 = vrcp.f32 %v4332_v18  ;;  %v4333_v54 = vadd.f32 1.0, %v6094_v1  ;;  %v6096_v26 = vpop.eup %6095 }
 0x8da   :  { %6105 = vrcp.f32 %v4344_v25  ;;  %v4345_v0 = vadd.f32 1.0, %v6096_v26  ;;  %v6098_v33 = vpop.eup %6097 }
 0x8db   :  { %6107 = vpow2.f32 %v5033_v55  ;;  %v6100_v50 = vpop.eup %6099 }
 0x8dc   :  { %6109 = vrcp.f32 %v4333_v54  ;;  %v6102_v40 = vpop.eup %6101  ;;  %v4358_v36 = vadd.f32 1.0, %v6100_v50 }
 0x8dd   :  { %6111 = vrcp.f32 %v4345_v0 }
 0x8de   :  { %6113 = vrcp.f32 %v4358_v36 }
 0x8e3   :  { %v6104_v62 = vpop.eup %6103 }
 0x8e4   :  { %v6106_v3 = vpop.eup %6105  ;;  %v4366_v22 = vmul.f32 %v6104_v62, %v6098_v33 }
 0x8e5   :  { %v6108_v45 = vpop.eup %6107  ;;  %v4364_v39 = vmul.f32 %v6106_v3, %v8589_v63 }
 0x8e6   :  { %v6110_v27 = vpop.eup %6109  ;;  %v4359_v2 = vadd.f32 1.0, %v6108_v45 }
 0x8e7   :  { %v4368_v42 = vadd.f32 %v4366_v22, %v4364_v39  ;;  %v4367_v21 = vmul.f32 %v6110_v27, %v6102_v40  ;;  %v6112_v19 = vpop.eup %6111 }
 0x8e8   :  { %v4365_v20 = vmul.f32 %v6112_v19, %v8594_v9  ;;  %v4417_v56 = vpop.f32.mrb[32].mxu0  ;;  %v4460_v48 = vpop.f32.mrb[32].mxu1 }
 0x8e9   :  { %6115 = vtanh.f32 %v4368_v42  ;;  %4535 = vst [vmem:[%s8719_s8] sm:$0xff] %v4368_v42  ;;  %v5110_v46 = vadd.f32 %v4417_v56, %v8987_v60  ;;  %v4419_v7 = vpop.f32.mrb[33].mxu0  ;;  %v4462_v49 = vpop.f32.mrb[33].mxu1  ;;  %v5142_v13 = vadd.f32 %v4460_v48, %v7288_v52 }
 0x8ea   :  { %v4369_v63 = vadd.f32 %v4367_v21, %v4365_v20  ;;  %v5111_v58 = vadd.f32 %v4419_v7, %v8900_v24  ;;  %v4421_v59 = vpop.f32.mrb[34].mxu0  ;;  %v4464_v44 = vpop.f32.mrb[34].mxu1  ;;  %6117 = vrcp.f32 %v4359_v2  ;;  %v5143_v41 = vadd.f32 %v4462_v49, %v7283_v43 }
 0x8eb   :  { %v5034_v10 = vmul.f32 -1.442695, %v5110_v46  ;;  %v5112_v61 = vadd.f32 %v4421_v59, %v8987_v60  ;;  %v4423_v31 = vpop.f32.mrb[35].mxu0  ;;  %v4466_v4 = vpop.f32.mrb[35].mxu1 }
 0x8ec   :  { %6119 = vtanh.f32 %v4369_v63  ;;  %4536 = vst [vmem:[%s8719_s8 + $0x8] sm:$0xff] %v4369_v63  ;;  %v5036_v9 = vmul.f32 -1.442695, %v5111_v58  ;;  %v5113_v5 = vadd.f32 %v4423_v31, %v8900_v24  ;;  %v6114_v38 = vpop.eup %6113  ;;  %v5038_v8 = vmul.f32 -1.442695, %v5143_v41 }
 0x8ed   :  { %6121 = vpow2.f32 %v5034_v10  ;;  %v5035_v30 = vmul.f32 -1.442695, %v5112_v61  ;;  %v5145_v6 = vadd.f32 %v4466_v4, %v7283_v43  ;;  %v5144_v24 = vadd.f32 %v4464_v44, %v7288_v52 }
 0x8ee   :  { %6123 = vpow2.f32 %v5036_v9  ;;  %v5037_v16 = vmul.f32 -1.442695, %v5113_v5 }
 0x8ef   :  { %6125 = vpow2.f32 %v5035_v30  ;;  %v5039_v34 = vmul.f32 -1.442695, %v5145_v6 }
 0x8f0   :  { %6127 = vpow2.f32 %v5037_v16 }
 0x8f1   :  { %6129 = vtanh.f32 %v5142_v13 }
 0x8f2   :  { %6131 = vpow2.f32 %v5038_v8 }
 0x8f3   :  { %v6116_v15 = vpop.eup %6115  ;;  %6133 = vtanh.f32 %v5144_v24 }
 0x8f4   :  { %v4372_v60 = vmul.f32 %v6116_v15, %v6114_v38  ;;  %v6118_v37 = vpop.eup %6117 }
 0x8f6   :  { %5040 = vst [vmem:[%s8717_s5 + $0x70] sm:$0xff] %v4372_v60  ;;  %4533 = vst [vmem:[%s8720_s7] sm:$0xff] %v4372_v60  ;;  %v6120_v51 = vpop.eup %6119 }
 0x8f7   :  { %v6122_v11 = vpop.eup %6121  ;;  %v4373_v28 = vmul.f32 %v6120_v51, %v6118_v37 }
 0x8f8   :  { %v6124_v14 = vpop.eup %6123  ;;  %v4483_v47 = vadd.f32 1.0, %v6122_v11 }
 0x8f9   :  { %5041 = vst [vmem:[%s8717_s5 + $0x78] sm:$0xff] %v4373_v28  ;;  %4534 = vst [vmem:[%s8720_s7 + $0x8] sm:$0xff] %v4373_v28  ;;  %v4495_v43 = vadd.f32 1.0, %v6124_v14  ;;  %v6126_v32 = vpop.eup %6125 }
 0x8fa   :  { %6135 = vrcp.f32 %v4483_v47  ;;  %v4484_v52 = vadd.f32 1.0, %v6126_v32  ;;  %v6128_v12 = vpop.eup %6127 }
 0x8fb   :  { %6137 = vrcp.f32 %v4495_v43  ;;  %v4496_v53 = vadd.f32 1.0, %v6128_v12  ;;  %v6130_v35 = vpop.eup %6129 }
 0x8fc   :  { %6139 = vpow2.f32 %v5039_v34  ;;  %v6132_v17 = vpop.eup %6131 }
 0x8fd   :  { %6141 = vrcp.f32 %v4484_v52  ;;  %v6134_v57 = vpop.eup %6133  ;;  %v4509_v1 = vadd.f32 1.0, %v6132_v17 }
 0x8fe   :  { %6143 = vrcp.f32 %v4496_v53 }
 0x8ff   :  { %6145 = vrcp.f32 %v4509_v1 }
 0x904   :  { %v6136_v18 = vpop.eup %6135 }
 0x905   :  { %v6138_v55 = vpop.eup %6137  ;;  %v4517_v25 = vmul.f32 %v6136_v18, %v6130_v35 }
 0x906   :  { %v6140_v54 = vpop.eup %6139  ;;  %v4515_v26 = vmul.f32 %v6138_v55, %v8625_v23 }
 0x907   :  { %v6142_v0 = vpop.eup %6141  ;;  %v4510_v62 = vadd.f32 1.0, %v6140_v54 }
 0x908   :  { %v4519_v33 = vadd.f32 %v4517_v25, %v4515_v26  ;;  %v4518_v50 = vmul.f32 %v6142_v0, %v6134_v57  ;;  %v6144_v40 = vpop.eup %6143 }
 0x909   :  { %v4516_v3 = vmul.f32 %v6144_v40, %v8633_v29  ;;  %v6146_v23 = vpop.eup %6145 }
 0x90a   :  { %6147 = vtanh.f32 %v4519_v33  ;;  %5044 = vst [vmem:[%s8719_s8 + $0x10] sm:$0xff] %v4519_v33 }
 0x90b   :  { %v4520_v22 = vadd.f32 %v4518_v50, %v4516_v3  ;;  %6149 = vrcp.f32 %v4510_v62 }
 0x90d   :  { %6151 = vtanh.f32 %v4520_v22  ;;  %5045 = vst [vmem:[%s8719_s8 + $0x18] sm:$0xff] %v4520_v22 }
 0x914   :  { %v6148_v36 = vpop.eup %6147 }
 0x915   :  { %v4523_v45 = vmul.f32 %v6148_v36, %v6146_v23  ;;  %v6150_v39 = vpop.eup %6149 }
 0x917   :  { %4528 = vst [vmem:[%s8718_s6] sm:$0xff] %v4523_v45  ;;  %5042 = vst [vmem:[%s8720_s7 + $0x10] sm:$0xff] %v4523_v45  ;;  %v6152_v29 = vpop.eup %6151 }
 0x918   :  { %v4524_v27 = vmul.f32 %v6152_v29, %v6150_v39 }
 0x91a   :  { %4529 = vst [vmem:[%s8718_s6 + $0x8] sm:$0xff] %v4524_v27  ;;  %5043 = vst [vmem:[%s8720_s7 + $0x18] sm:$0xff] %v4524_v27 }

</bundles_post_ra>
